<compile_context>
chip_gen: v7x
topology: tpu7x:2x2x1
jax: 0.10.0
libtpu: 0.0.40
codegen_flags: <defaults>
</compile_context>

<pallas_src>
import jax
import jax.numpy as jnp
from jax.experimental import pallas as pl
from jax.experimental.pallas import tpu as pltpu

# Module hyper-parameters (n_embd fixed by the spec; heads chosen so
# num_heads * head_size == n_embd, as the module requires).
N_EMBD = 256
N_HEAD = 4
HEAD_SIZE = N_EMBD // N_HEAD      # 64
BLOCK_SIZE = 256                  # causal-mask buffer size; T <= BLOCK_SIZE
NEG_BIG = -1e30                   # finite mask value -> no inf-inf NaNs


def _causal_mask(T):
    row = jax.lax.broadcasted_iota(jnp.int32, (T, T), 0)
    col = jax.lax.broadcasted_iota(jnp.int32, (T, T), 1)
    return col <= row


def _mha_kernel_head_batched(x_ref, wqkv_ref, wp_ref, bp_ref, o_ref):
    """Fused MHA with the heads batched into single einsums (preferred path).

    The C**-0.5 scale is pre-folded into the Q columns of wqkv.
    """
    Bb, T, C = x_ref.shape                       # (Bblk, T, C), f32
    x2d = x_ref[...].reshape(Bb * T, C).astype(jnp.bfloat16)

    # ---- fused QKV projection: one (Bb*T, C) @ (C, 3C) MXU matmul ----
    qkv = jnp.dot(x2d, wqkv_ref[...], preferred_element_type=jnp.float32)
    # 128-lane-aligned splits (offsets 0 / 256 / 512), then head-batched shape.
    q = qkv[:, :C].reshape(Bb, T, N_HEAD, HEAD_SIZE).astype(jnp.bfloat16)
    k = qkv[:, C:2 * C].reshape(Bb, T, N_HEAD, HEAD_SIZE).astype(jnp.bfloat16)
    v = qkv[:, 2 * C:].reshape(Bb, T, N_HEAD, HEAD_SIZE).astype(jnp.bfloat16)

    causal = _causal_mask(T)                     # (T, T), hoisted

    # ---- scores for all heads at once: (Bb, H, T, T) ----
    wei = jnp.einsum('bthd,bshd->bhts', q, k,
                     preferred_element_type=jnp.float32)
    wei = jnp.where(causal, wei, jnp.float32(NEG_BIG))
    m = jnp.max(wei, axis=-1, keepdims=True)
    p = jnp.exp(wei - m)
    denom = jnp.sum(p, axis=-1, keepdims=True)
    p = p * pl.reciprocal(denom, approx=True)    # EUP slot, ~free
    # dropout on attention probs: identity in eval mode

    # ---- P @ V for all heads, landing directly in (Bb, T, H, hs) ----
    attn = jnp.einsum('bhts,bshd->bthd', p.astype(jnp.bfloat16), v,
                      preferred_element_type=jnp.float32)

    # ---- output projection: single full-depth (Bb*T, C) @ (C, C) matmul ----
    y = jnp.dot(attn.reshape(Bb * T, C).astype(jnp.bfloat16), wp_ref[...],
                preferred_element_type=jnp.float32) + bp_ref[...]
    # dropout on projection output: identity in eval mode
    o_ref[...] = y.reshape(Bb, T, C)


def _mha_kernel_per_head(x_ref, wqkv_ref, wp_ref, bp_ref, o_ref):
    """Fallback: per-head static loop (previously validated lowering path)."""
    Bb, T, C = x_ref.shape
    x2d = x_ref[...].reshape(Bb * T, C).astype(jnp.bfloat16)

    qkv = jnp.dot(x2d, wqkv_ref[...], preferred_element_type=jnp.float32)
    qkv = qkv.reshape(Bb, T, 3 * C)
    q = qkv[:, :, :C].astype(jnp.bfloat16)
    k = qkv[:, :, C:2 * C].astype(jnp.bfloat16)
    v = qkv[:, :, 2 * C:].astype(jnp.bfloat16)

    causal = _causal_mask(T)

    head_outs = []
    for h in range(N_HEAD):                      # static unroll (N_HEAD = 4)
        sl = slice(h * HEAD_SIZE, (h + 1) * HEAD_SIZE)
        qh, kh, vh = q[:, :, sl], k[:, :, sl], v[:, :, sl]
        wei = jnp.einsum('btd,bsd->bts', qh, kh,
                         preferred_element_type=jnp.float32)
        wei = jnp.where(causal, wei, jnp.float32(NEG_BIG))
        m = jnp.max(wei, axis=-1, keepdims=True)
        p = jnp.exp(wei - m)
        denom = jnp.sum(p, axis=-1, keepdims=True)
        p = p * pl.reciprocal(denom, approx=True)
        head_outs.append(jnp.einsum('bts,bsd->btd', p.astype(jnp.bfloat16), vh,
                                    preferred_element_type=jnp.float32))
    attn = jnp.concatenate(head_outs, axis=-1)   # (Bb, T, C)

    y = jnp.dot(attn.reshape(Bb * T, C).astype(jnp.bfloat16), wp_ref[...],
                preferred_element_type=jnp.float32) + bp_ref[...]
    o_ref[...] = y.reshape(Bb, T, C)


def _pick_bblk(B, T):
    """Batch block: ~1024 rows per grid step, >= 2 grid steps when B > 1
    (pipeline overlap; v7x has 2 TensorCores), preferring an even grid."""
    target_rows = 1024
    bblk = max(1, min(B, max(1, target_rows // T)))
    if B > 1:
        bblk = max(1, min(bblk, B // 2))        # keep >= 2 grid steps
    while B % bblk:
        bblk -= 1
    # prefer an even number of grid steps (v7x: 2 TCs under "parallel")
    if (B // bblk) % 2 == 1 and bblk > 1:
        for cand in range(bblk - 1, 0, -1):
            if B % cand == 0 and (B // cand) % 2 == 0:
                bblk = cand
                break
    return bblk


def _build_call(kernel, B, T, C, bblk):
    return pl.pallas_call(
        kernel,
        out_shape=jax.ShapeDtypeStruct((B, T, C), jnp.float32),
        grid=(B // bblk,),
        in_specs=[
            pl.BlockSpec((bblk, T, C), lambda b: (b, 0, 0)),   # x, batch-blocked
            pl.BlockSpec((C, 3 * C), lambda b: (0, 0)),        # fused Wqkv (bf16)
            pl.BlockSpec((C, C), lambda b: (0, 0)),            # Wproj (bf16)
            pl.BlockSpec((1, C), lambda b: (0, 0)),            # bproj (f32)
        ],
        out_specs=pl.BlockSpec((bblk, T, C), lambda b: (b, 0, 0)),
        compiler_params=pltpu.CompilerParams(
            dimension_semantics=("parallel",)),
    )


_HEAD_BATCHED_OK = True   # flips to False if the fused form fails to lower/run


def multi_head_attention(x, kernel_params):
    """x: (B, T, C) f32; kernel_params: output of prepare_params()."""
    global _HEAD_BATCHED_OK
    B, T, C = x.shape
    assert C == N_EMBD and T <= BLOCK_SIZE
    wqkv, wp, bp = kernel_params
    bblk = _pick_bblk(B, T)

    if _HEAD_BATCHED_OK:
        try:
            out = _build_call(_mha_kernel_head_batched, B, T, C, bblk)(
                x, wqkv, wp, bp)
            return jax.block_until_ready(out)
        except Exception:
            # Multi-batch-dim einsum not supported by this Pallas lowering;
            # use the per-head-loop kernel (identical math) from now on.
            _HEAD_BATCHED_OK = False
    return _build_call(_mha_kernel_per_head, B, T, C, bblk)(x, wqkv, wp, bp)


def init_params(key, C):
    """nn.Linear-style f32 init. Wqkv columns: [0:C]=Q, [C:2C]=K, [2C:3C]=V,
    each block head-major (head h -> cols h*hs:(h+1)*hs)."""
    ks = jax.random.split(key, 3)
    bound = 1.0 / (C ** 0.5)
    wqkv = jax.random.uniform(ks[0], (C, 3 * C), jnp.float32, -bound, bound)
    wp = jax.random.uniform(ks[1], (C, C), jnp.float32, -bound, bound)
    bp = jax.random.uniform(ks[2], (1, C), jnp.float32, -bound, bound)
    return (wqkv, wp, bp)


def prepare_params(params):
    """One-time conversion of the f32 module params into kernel params:
    fold the (bug-compatible) C**-0.5 score scale into the Q columns and cast
    the matmul weights to bf16.  Call once; reuse across forward calls."""
    wqkv, wp, bp = params
    C = wqkv.shape[0]
    scale = jnp.float32(C ** (-0.5))             # 1/16: exact power of two
    wqkv = wqkv.at[:, :C].multiply(scale)
    return (wqkv.astype(jnp.bfloat16), wp.astype(jnp.bfloat16),
            bp.astype(jnp.float32))


def mha_ref(x, params):
    """Pure-JAX f32 reference mirroring the PyTorch forward (eval mode)."""
    wqkv, wp, bp = params
    B, T, C = x.shape
    hs = C // N_HEAD
    qkv = x @ wqkv
    q = qkv[..., :C].reshape(B, T, N_HEAD, hs).transpose(0, 2, 1, 3)
    k = qkv[..., C:2 * C].reshape(B, T, N_HEAD, hs).transpose(0, 2, 1, 3)
    v = qkv[..., 2 * C:].reshape(B, T, N_HEAD, hs).transpose(0, 2, 1, 3)
    wei = (q @ jnp.swapaxes(k, -1, -2)) * C ** (-0.5)
    tril = jnp.tril(jnp.ones((T, T)))
    wei = jnp.where(tril == 0, -jnp.inf, wei)
    wei = jax.nn.softmax(wei, axis=-1)
    o = (wei @ v).transpose(0, 2, 1, 3).reshape(B, T, C)
    return o @ wp + bp


if __name__ == "__main__":
    key = jax.random.PRNGKey(0)
    k_x, k_p = jax.random.split(key)
    B, T, C = 8, 64, N_EMBD
    x = jax.random.normal(k_x, (B, T, C), jnp.float32)
    params = init_params(k_p, C)
    kparams = prepare_params(params)            # fold scale + bf16 cast, once

    out = jax.block_until_ready(multi_head_attention(x, kparams))
    ref = jax.block_until_ready(mha_ref(x, params))

    assert out.shape == (B, T, C)
    max_err = float(jnp.max(jnp.abs(out - ref)))
    assert max_err < 2e-2, f"mismatch vs reference: {max_err}"
    print("KERNEL_OK")
</pallas_src>

<mosaic_0001>
module attributes {stable_mosaic.version = 11 : i64} {
  func.func @_mha_kernel_per_head(%arg0: i32, %arg1: memref<4x64x256xf32, #tpu.memory_space<vmem>>, %arg2: memref<256x768xbf16, #tpu.memory_space<vmem>>, %arg3: memref<256x256xbf16, #tpu.memory_space<vmem>>, %arg4: memref<1x256xf32, #tpu.memory_space<vmem>>, %arg5: memref<4x64x256xf32, #tpu.memory_space<vmem>>) attributes {dimension_semantics = [#tpu.dimension_semantics<parallel>], iteration_bounds = array<i64: 2>, scalar_prefetch = 0 : i64, scratch_operands = 0 : i64, tpu.core_type = #tpu.core_type<tc>, window_params = [{transform_indices = @transform_0, window_bounds = array<i64: 4, 64, 256>}, {pipeline_mode = #tpu.pipeline_mode<synchronous>, transform_indices = @transform_1, window_bounds = array<i64: 256, 768>}, {pipeline_mode = #tpu.pipeline_mode<synchronous>, transform_indices = @transform_2, window_bounds = array<i64: 256, 256>}, {pipeline_mode = #tpu.pipeline_mode<synchronous>, transform_indices = @transform_3, window_bounds = array<i64: 1, 256>}, {transform_indices = @transform_4, window_bounds = array<i64: 4, 64, 256>}]} {
    %c0 = arith.constant 0 : index
    %c0_0 = arith.constant 0 : index
    %c0_1 = arith.constant 0 : index
    %0 = vector.load %arg1[%c0, %c0_0, %c0_1] : memref<4x64x256xf32, #tpu.memory_space<vmem>>, vector<4x64x256xf32>
    %1 = vector.shape_cast %0 : vector<4x64x256xf32> to vector<256x256xf32>
    %2 = arith.truncf %1 : vector<256x256xf32> to vector<256x256xbf16>
    %c0_2 = arith.constant 0 : index
    %c0_3 = arith.constant 0 : index
    %3 = vector.load %arg2[%c0_2, %c0_3] : memref<256x768xbf16, #tpu.memory_space<vmem>>, vector<256x768xbf16>
    %cst = arith.constant dense<0.000000e+00> : vector<256x768xf32>
    %4 = tpu.matmul %2, %3, %cst {dimension_numbers = #tpu.dot_dimension_numbers<[1], [0], [0], [1], [0, 0, 1, 1], [], []>} : vector<256x256xbf16>, vector<256x768xbf16>, vector<256x768xf32> -> vector<256x768xf32>
    %5 = vector.shape_cast %4 : vector<256x768xf32> to vector<4x64x768xf32>
    %6 = vector.extract_strided_slice %5 {offsets = [0, 0, 0], sizes = [4, 64, 256], strides = [1, 1, 1]} : vector<4x64x768xf32> to vector<4x64x256xf32>
    %7 = arith.truncf %6 : vector<4x64x256xf32> to vector<4x64x256xbf16>
    %8 = vector.extract_strided_slice %5 {offsets = [0, 0, 256], sizes = [4, 64, 256], strides = [1, 1, 1]} : vector<4x64x768xf32> to vector<4x64x256xf32>
    %9 = arith.truncf %8 : vector<4x64x256xf32> to vector<4x64x256xbf16>
    %10 = vector.extract_strided_slice %5 {offsets = [0, 0, 512], sizes = [4, 64, 256], strides = [1, 1, 1]} : vector<4x64x768xf32> to vector<4x64x256xf32>
    %11 = arith.truncf %10 : vector<4x64x256xf32> to vector<4x64x256xbf16>
    %12 = tpu.iota {dimensions = array<i32: 0>} : vector<64x64xi32>
    %13 = tpu.iota {dimensions = array<i32: 1>} : vector<64x64xi32>
    %14 = arith.cmpi sle, %13, %12 : vector<64x64xi32>
    %15 = vector.extract_strided_slice %7 {offsets = [0, 0, 0], sizes = [4, 64, 64], strides = [1, 1, 1]} : vector<4x64x256xbf16> to vector<4x64x64xbf16>
    %16 = vector.extract_strided_slice %9 {offsets = [0, 0, 0], sizes = [4, 64, 64], strides = [1, 1, 1]} : vector<4x64x256xbf16> to vector<4x64x64xbf16>
    %17 = vector.extract_strided_slice %11 {offsets = [0, 0, 0], sizes = [4, 64, 64], strides = [1, 1, 1]} : vector<4x64x256xbf16> to vector<4x64x64xbf16>
    "tpu.trace_start"() <{level = 10 : i32, message = "btd,bsd->bts"}> : () -> ()
    %cst_4 = arith.constant dense<0.000000e+00> : vector<4x64x64xf32>
    %18 = tpu.matmul %15, %16, %cst_4 {dimension_numbers = #tpu.dot_dimension_numbers<[2], [2], [1], [1], [0, 0, 0, 1, 1, 1], [0], [0]>} : vector<4x64x64xbf16>, vector<4x64x64xbf16>, vector<4x64x64xf32> -> vector<4x64x64xf32>
    %cst_5 = arith.constant -1.000000e+30 : f32
    "tpu.trace_stop"() : () -> ()
    %19 = vector.shape_cast %14 : vector<64x64xi1> to vector<1x64x64xi1>
    %20 = vector.broadcast %19 : vector<1x64x64xi1> to vector<4x64x64xi1>
    %21 = vector.broadcast %cst_5 : f32 to vector<4x64x64xf32>
    %22 = arith.select %20, %18, %21 : vector<4x64x64xi1>, vector<4x64x64xf32>
    %cst_6 = arith.constant dense<0xFF800000> : vector<4x64xf32>
    %23 = vector.multi_reduction <maximumf>, %22, %cst_6 [2] : vector<4x64x64xf32> to vector<4x64xf32>
    %24 = vector.shape_cast %23 : vector<4x64xf32> to vector<4x64x1xf32>
    %25 = vector.broadcast %24 : vector<4x64x1xf32> to vector<4x64x64xf32>
    %26 = arith.subf %22, %25 : vector<4x64x64xf32>
    %27 = math.exp %26 : vector<4x64x64xf32>
    %cst_7 = arith.constant dense<0.000000e+00> : vector<4x64xf32>
    %28 = vector.multi_reduction <add>, %27, %cst_7 [2] : vector<4x64x64xf32> to vector<4x64xf32>
    %29 = vector.shape_cast %28 : vector<4x64xf32> to vector<4x64x1xf32>
    %30 = tpu.reciprocal %29 {approx = true} : vector<4x64x1xf32> -> vector<4x64x1xf32>
    %31 = vector.broadcast %30 : vector<4x64x1xf32> to vector<4x64x64xf32>
    %32 = arith.mulf %27, %31 : vector<4x64x64xf32>
    %33 = arith.truncf %32 : vector<4x64x64xf32> to vector<4x64x64xbf16>
    "tpu.trace_start"() <{level = 10 : i32, message = "bts,bsd->btd"}> : () -> ()
    %cst_8 = arith.constant dense<0.000000e+00> : vector<4x64x64xf32>
    %34 = tpu.matmul %33, %17, %cst_8 {dimension_numbers = #tpu.dot_dimension_numbers<[2], [1], [1], [2], [0, 0, 0, 1, 1, 2], [0], [0]>} : vector<4x64x64xbf16>, vector<4x64x64xbf16>, vector<4x64x64xf32> -> vector<4x64x64xf32>
    "tpu.trace_stop"() : () -> ()
    %35 = vector.extract_strided_slice %7 {offsets = [0, 0, 64], sizes = [4, 64, 64], strides = [1, 1, 1]} : vector<4x64x256xbf16> to vector<4x64x64xbf16>
    %36 = vector.extract_strided_slice %9 {offsets = [0, 0, 64], sizes = [4, 64, 64], strides = [1, 1, 1]} : vector<4x64x256xbf16> to vector<4x64x64xbf16>
    %37 = vector.extract_strided_slice %11 {offsets = [0, 0, 64], sizes = [4, 64, 64], strides = [1, 1, 1]} : vector<4x64x256xbf16> to vector<4x64x64xbf16>
    "tpu.trace_start"() <{level = 10 : i32, message = "btd,bsd->bts"}> : () -> ()
    %cst_9 = arith.constant dense<0.000000e+00> : vector<4x64x64xf32>
    %38 = tpu.matmul %35, %36, %cst_9 {dimension_numbers = #tpu.dot_dimension_numbers<[2], [2], [1], [1], [0, 0, 0, 1, 1, 1], [0], [0]>} : vector<4x64x64xbf16>, vector<4x64x64xbf16>, vector<4x64x64xf32> -> vector<4x64x64xf32>
    %cst_10 = arith.constant -1.000000e+30 : f32
    "tpu.trace_stop"() : () -> ()
    %39 = vector.shape_cast %14 : vector<64x64xi1> to vector<1x64x64xi1>
    %40 = vector.broadcast %39 : vector<1x64x64xi1> to vector<4x64x64xi1>
    %41 = vector.broadcast %cst_10 : f32 to vector<4x64x64xf32>
    %42 = arith.select %40, %38, %41 : vector<4x64x64xi1>, vector<4x64x64xf32>
    %cst_11 = arith.constant dense<0xFF800000> : vector<4x64xf32>
    %43 = vector.multi_reduction <maximumf>, %42, %cst_11 [2] : vector<4x64x64xf32> to vector<4x64xf32>
    %44 = vector.shape_cast %43 : vector<4x64xf32> to vector<4x64x1xf32>
    %45 = vector.broadcast %44 : vector<4x64x1xf32> to vector<4x64x64xf32>
    %46 = arith.subf %42, %45 : vector<4x64x64xf32>
    %47 = math.exp %46 : vector<4x64x64xf32>
    %cst_12 = arith.constant dense<0.000000e+00> : vector<4x64xf32>
    %48 = vector.multi_reduction <add>, %47, %cst_12 [2] : vector<4x64x64xf32> to vector<4x64xf32>
    %49 = vector.shape_cast %48 : vector<4x64xf32> to vector<4x64x1xf32>
    %50 = tpu.reciprocal %49 {approx = true} : vector<4x64x1xf32> -> vector<4x64x1xf32>
    %51 = vector.broadcast %50 : vector<4x64x1xf32> to vector<4x64x64xf32>
    %52 = arith.mulf %47, %51 : vector<4x64x64xf32>
    %53 = arith.truncf %52 : vector<4x64x64xf32> to vector<4x64x64xbf16>
    "tpu.trace_start"() <{level = 10 : i32, message = "bts,bsd->btd"}> : () -> ()
    %cst_13 = arith.constant dense<0.000000e+00> : vector<4x64x64xf32>
    %54 = tpu.matmul %53, %37, %cst_13 {dimension_numbers = #tpu.dot_dimension_numbers<[2], [1], [1], [2], [0, 0, 0, 1, 1, 2], [0], [0]>} : vector<4x64x64xbf16>, vector<4x64x64xbf16>, vector<4x64x64xf32> -> vector<4x64x64xf32>
    "tpu.trace_stop"() : () -> ()
    %55 = vector.extract_strided_slice %7 {offsets = [0, 0, 128], sizes = [4, 64, 64], strides = [1, 1, 1]} : vector<4x64x256xbf16> to vector<4x64x64xbf16>
    %56 = vector.extract_strided_slice %9 {offsets = [0, 0, 128], sizes = [4, 64, 64], strides = [1, 1, 1]} : vector<4x64x256xbf16> to vector<4x64x64xbf16>
    %57 = vector.extract_strided_slice %11 {offsets = [0, 0, 128], sizes = [4, 64, 64], strides = [1, 1, 1]} : vector<4x64x256xbf16> to vector<4x64x64xbf16>
    "tpu.trace_start"() <{level = 10 : i32, message = "btd,bsd->bts"}> : () -> ()
    %cst_14 = arith.constant dense<0.000000e+00> : vector<4x64x64xf32>
    %58 = tpu.matmul %55, %56, %cst_14 {dimension_numbers = #tpu.dot_dimension_numbers<[2], [2], [1], [1], [0, 0, 0, 1, 1, 1], [0], [0]>} : vector<4x64x64xbf16>, vector<4x64x64xbf16>, vector<4x64x64xf32> -> vector<4x64x64xf32>
    %cst_15 = arith.constant -1.000000e+30 : f32
    "tpu.trace_stop"() : () -> ()
    %59 = vector.shape_cast %14 : vector<64x64xi1> to vector<1x64x64xi1>
    %60 = vector.broadcast %59 : vector<1x64x64xi1> to vector<4x64x64xi1>
    %61 = vector.broadcast %cst_15 : f32 to vector<4x64x64xf32>
    %62 = arith.select %60, %58, %61 : vector<4x64x64xi1>, vector<4x64x64xf32>
    %cst_16 = arith.constant dense<0xFF800000> : vector<4x64xf32>
    %63 = vector.multi_reduction <maximumf>, %62, %cst_16 [2] : vector<4x64x64xf32> to vector<4x64xf32>
    %64 = vector.shape_cast %63 : vector<4x64xf32> to vector<4x64x1xf32>
    %65 = vector.broadcast %64 : vector<4x64x1xf32> to vector<4x64x64xf32>
    %66 = arith.subf %62, %65 : vector<4x64x64xf32>
    %67 = math.exp %66 : vector<4x64x64xf32>
    %cst_17 = arith.constant dense<0.000000e+00> : vector<4x64xf32>
    %68 = vector.multi_reduction <add>, %67, %cst_17 [2] : vector<4x64x64xf32> to vector<4x64xf32>
    %69 = vector.shape_cast %68 : vector<4x64xf32> to vector<4x64x1xf32>
    %70 = tpu.reciprocal %69 {approx = true} : vector<4x64x1xf32> -> vector<4x64x1xf32>
    %71 = vector.broadcast %70 : vector<4x64x1xf32> to vector<4x64x64xf32>
    %72 = arith.mulf %67, %71 : vector<4x64x64xf32>
    %73 = arith.truncf %72 : vector<4x64x64xf32> to vector<4x64x64xbf16>
    "tpu.trace_start"() <{level = 10 : i32, message = "bts,bsd->btd"}> : () -> ()
    %cst_18 = arith.constant dense<0.000000e+00> : vector<4x64x64xf32>
    %74 = tpu.matmul %73, %57, %cst_18 {dimension_numbers = #tpu.dot_dimension_numbers<[2], [1], [1], [2], [0, 0, 0, 1, 1, 2], [0], [0]>} : vector<4x64x64xbf16>, vector<4x64x64xbf16>, vector<4x64x64xf32> -> vector<4x64x64xf32>
    "tpu.trace_stop"() : () -> ()
    %75 = vector.extract_strided_slice %7 {offsets = [0, 0, 192], sizes = [4, 64, 64], strides = [1, 1, 1]} : vector<4x64x256xbf16> to vector<4x64x64xbf16>
    %76 = vector.extract_strided_slice %9 {offsets = [0, 0, 192], sizes = [4, 64, 64], strides = [1, 1, 1]} : vector<4x64x256xbf16> to vector<4x64x64xbf16>
    %77 = vector.extract_strided_slice %11 {offsets = [0, 0, 192], sizes = [4, 64, 64], strides = [1, 1, 1]} : vector<4x64x256xbf16> to vector<4x64x64xbf16>
    "tpu.trace_start"() <{level = 10 : i32, message = "btd,bsd->bts"}> : () -> ()
    %cst_19 = arith.constant dense<0.000000e+00> : vector<4x64x64xf32>
    %78 = tpu.matmul %75, %76, %cst_19 {dimension_numbers = #tpu.dot_dimension_numbers<[2], [2], [1], [1], [0, 0, 0, 1, 1, 1], [0], [0]>} : vector<4x64x64xbf16>, vector<4x64x64xbf16>, vector<4x64x64xf32> -> vector<4x64x64xf32>
    %cst_20 = arith.constant -1.000000e+30 : f32
    "tpu.trace_stop"() : () -> ()
    %79 = vector.shape_cast %14 : vector<64x64xi1> to vector<1x64x64xi1>
    %80 = vector.broadcast %79 : vector<1x64x64xi1> to vector<4x64x64xi1>
    %81 = vector.broadcast %cst_20 : f32 to vector<4x64x64xf32>
    %82 = arith.select %80, %78, %81 : vector<4x64x64xi1>, vector<4x64x64xf32>
    %cst_21 = arith.constant dense<0xFF800000> : vector<4x64xf32>
    %83 = vector.multi_reduction <maximumf>, %82, %cst_21 [2] : vector<4x64x64xf32> to vector<4x64xf32>
    %84 = vector.shape_cast %83 : vector<4x64xf32> to vector<4x64x1xf32>
    %85 = vector.broadcast %84 : vector<4x64x1xf32> to vector<4x64x64xf32>
    %86 = arith.subf %82, %85 : vector<4x64x64xf32>
    %87 = math.exp %86 : vector<4x64x64xf32>
    %cst_22 = arith.constant dense<0.000000e+00> : vector<4x64xf32>
    %88 = vector.multi_reduction <add>, %87, %cst_22 [2] : vector<4x64x64xf32> to vector<4x64xf32>
    %89 = vector.shape_cast %88 : vector<4x64xf32> to vector<4x64x1xf32>
    %90 = tpu.reciprocal %89 {approx = true} : vector<4x64x1xf32> -> vector<4x64x1xf32>
    %91 = vector.broadcast %90 : vector<4x64x1xf32> to vector<4x64x64xf32>
    %92 = arith.mulf %87, %91 : vector<4x64x64xf32>
    %93 = arith.truncf %92 : vector<4x64x64xf32> to vector<4x64x64xbf16>
    "tpu.trace_start"() <{level = 10 : i32, message = "bts,bsd->btd"}> : () -> ()
    %cst_23 = arith.constant dense<0.000000e+00> : vector<4x64x64xf32>
    %94 = tpu.matmul %93, %77, %cst_23 {dimension_numbers = #tpu.dot_dimension_numbers<[2], [1], [1], [2], [0, 0, 0, 1, 1, 2], [0], [0]>} : vector<4x64x64xbf16>, vector<4x64x64xbf16>, vector<4x64x64xf32> -> vector<4x64x64xf32>
    "tpu.trace_stop"() : () -> ()
    %95 = tpu.concatenate %34, %54, %74, %94 in 2 : vector<4x64x64xf32>, vector<4x64x64xf32>, vector<4x64x64xf32>, vector<4x64x64xf32> -> vector<4x64x256xf32>
    %96 = vector.shape_cast %95 : vector<4x64x256xf32> to vector<256x256xf32>
    %97 = arith.truncf %96 : vector<256x256xf32> to vector<256x256xbf16>
    %c0_24 = arith.constant 0 : index
    %c0_25 = arith.constant 0 : index
    %98 = vector.load %arg3[%c0_24, %c0_25] : memref<256x256xbf16, #tpu.memory_space<vmem>>, vector<256x256xbf16>
    %cst_26 = arith.constant dense<0.000000e+00> : vector<256x256xf32>
    %99 = tpu.matmul %97, %98, %cst_26 {dimension_numbers = #tpu.dot_dimension_numbers<[1], [0], [0], [1], [0, 0, 1, 1], [], []>} : vector<256x256xbf16>, vector<256x256xbf16>, vector<256x256xf32> -> vector<256x256xf32>
    %c0_27 = arith.constant 0 : index
    %c0_28 = arith.constant 0 : index
    %100 = vector.load %arg4[%c0_27, %c0_28] : memref<1x256xf32, #tpu.memory_space<vmem>>, vector<1x256xf32>
    %101 = vector.broadcast %100 : vector<1x256xf32> to vector<256x256xf32>
    %102 = arith.addf %99, %101 : vector<256x256xf32>
    %103 = vector.shape_cast %102 : vector<256x256xf32> to vector<4x64x256xf32>
    %c0_29 = arith.constant 0 : index
    %c0_30 = arith.constant 0 : index
    %c0_31 = arith.constant 0 : index
    %104 = vector.load %arg5[%c0_29, %c0_30, %c0_31] : memref<4x64x256xf32, #tpu.memory_space<vmem>>, vector<4x64x256xf32>
    tpu.vector_store %arg5[%c0_29, %c0_30, %c0_31], %103 {strides = array<i32>} : memref<4x64x256xf32, #tpu.memory_space<vmem>>, vector<4x64x256xf32>,
    return
  }
  func.func @transform_0(%arg0: i32) -> (i32, i32, i32) {
    %c0_i32 = arith.constant 0 : i32
    %c0_i32_0 = arith.constant 0 : i32
    %c0_i32_1 = arith.constant 0 : i32
    return %arg0, %c0_i32, %c0_i32_0 : i32, i32, i32
  }
  func.func @transform_1(%arg0: i32) -> (i32, i32) {
    %c0_i32 = arith.constant 0 : i32
    %c0_i32_0 = arith.constant 0 : i32
    %c0_i32_1 = arith.constant 0 : i32
    return %c0_i32, %c0_i32_0 : i32, i32
  }
  func.func @transform_2(%arg0: i32) -> (i32, i32) {
    %c0_i32 = arith.constant 0 : i32
    %c0_i32_0 = arith.constant 0 : i32
    %c0_i32_1 = arith.constant 0 : i32
    return %c0_i32, %c0_i32_0 : i32, i32
  }
  func.func @transform_3(%arg0: i32) -> (i32, i32) {
    %c0_i32 = arith.constant 0 : i32
    %c0_i32_0 = arith.constant 0 : i32
    %c0_i32_1 = arith.constant 0 : i32
    return %c0_i32, %c0_i32_0 : i32, i32
  }
  func.func @transform_4(%arg0: i32) -> (i32, i32, i32) {
    %c0_i32 = arith.constant 0 : i32
    %c0_i32_0 = arith.constant 0 : i32
    %c0_i32_1 = arith.constant 0 : i32
    return %arg0, %c0_i32, %c0_i32_0 : i32, i32, i32
  }
}

</mosaic_0001>

<bundles_post_ra>
// kernel: tpu_custom_call.1
= control target key start
LH: loop header
LB: loop body
LE: loop exit
PB: predicated region body
PF: predicated region fallthrough
CT: control target
= control target key end

     0   :  { %9 = vsyncpa [#allocation3], 0  ;;  %s13186_s0 = inlined_call_operand.hbm [shape: f32[8,64,256], index: 0, kind: input, shape index: {}]   ;;  %s13187_s1 = inlined_call_operand.hbm [shape: bf16[256,768], index: 1, kind: input, shape index: {}]   ;;  %s13188_s2 = inlined_call_operand.hbm [shape: bf16[256,256], index: 2, kind: input, shape index: {}]   ;;  %s13189_s3 = inlined_call_operand.vmem [shape: f32[1,256], index: 3, kind: input, shape index: {}]   ;;  %s13190_s4 = inlined_call_operand.hbm [shape: f32[8,64,256], index: 4, kind: output, shape index: {}]  }
   0x1   :  { %11 = vsyncpa [#allocation3 + $0x1], 0 }
   0x2   :  { %12 = vsyncpa [#allocation6], 0 }
   0x3   :  { %13 = vsyncpa [#allocation4], 0 }
   0x4   :  { %15 = vsyncpa [#allocation4 + $0x1], 0  ;;  %s9408_s15 = smov 0   ;;  %s9410_s16 = smov 0  }
   0x5   :  { %s9412_s17 = smov 0   ;;  %s9414_s18 = smov 0  }
   0x6 LB: > { %s9429_s19 = sadd.s32 4294967295, %s9368_s18   ;;  %s7128_s20 = sadd.s32 4294967294, %s9368_s18   ;;  %s9368_s18 = sphi %s9414_s18, %s13808_s18   ;;  %s9364_s17 = sphi %s9412_s17, %s13807_s17   ;;  %s9360_s16 = sphi %s9410_s16, %s13806_s16   ;;  %s9356_s15 = sphi %s9408_s15, %s13805_s15  }
   0x7   : > { %p41_p0 = scmp.ne.s32.totalorder %s9360_s16, %s9356_s15  ;;  %p13191_p1 = scmp.eq.s32.totalorder %s9429_s19, 0 }
   0x8   : > { %p134_p3 = scmp.eq.s32.totalorder %s7128_s20, 1  ;;  %p7129_p5 = scmp.ge.s32.totalorder %s9368_s18, 1 }
   0x9   : > { %p9438_p4 = por %p13191_p1, %p41_p0  ;;  %p141_p7 = scmp.lt.s32.totalorder %s9368_s18, 3 }
   0xa   : > { %p9443_p6 = por %p134_p3, %p41_p0  ;;  %s9370_s24 = smov [#allocation5]  }
   0xb   : > { %s13349_s21 = scalar_select %p9438_p4, 1, 0 }
   0xc   : > { %s13350_s22 = scalar_select %p9443_p6, 1, 0 }
   0xd   : > { %p9448_p8 = pnand %p7129_p5, %p141_p7  ;;  %s153_s25 = sshll.u32 %s9370_s24, 4  ;;  %s9452_s25 = int_to_ptr.vmem [resolvable:$true] %s153_s25 }
   0xe   : > { %s9371_s27 = smov [#allocation7]   ;;  %s9212_s5 = scalar_lea.hbm %s13187_s1, 12288 }
   0xf   : > { %p8284_p9 = pneg %p9448_p8  ;;  %s166_s28 = sshll.u32 %s9371_s27, 4  ;;  %s9463_s28 = int_to_ptr.vmem [resolvable:$true] %s166_s28 }
  0x10   : > { %p9213_p12 = scmp.ne.s32.totalorder %s13187_s1, %s9212_s5  ;;  %p9219_p5 = scmp.lt.u32.totalorder %s9212_s5, %s13187_s1 }
  0x11   : > { %p9459_p11 = pnand %p8284_p9, %p13191_p1 }
  0x13   : > { %p9214_p13 = pneg %p9459_p11 }
  0x15   : > { %p9215_p0 = pnand %p9214_p13, %p9213_p12 }
  0x17   : > { %p9216_p3 = pneg %p9215_p0 }
  0x19   : > { %p9221_p7 = pnand %p9219_p5, %p9216_p3 }
  0x1b   : > { %9224 = shalt.err (!%p9221_p7)
}
  0x1c   : > { %s9225_s10 = scalar_lea.vmem %s9452_s25, 12288  ;;  %p9233_p2 = scmp.lt.s32.totalorder %s9452_s25, %s9452_s25 }
  0x1d   : > { %p9226_p9 = scmp.ne.s32.totalorder %s9452_s25, %s9225_s10  ;;  %p9234_p12 = scmp.lt.s32.totalorder %s9225_s10, %s9225_s10 }
  0x1f   : > { %p9228_p10 = pnand %p9226_p9, %p9214_p13  ;;  %p9235_p0 = por %p9234_p12, %p9233_p2 }
  0x21   : > { %p9229_p1 = pneg %p9228_p10 }
  0x23   : > { %p9236_p6 = pnand %p9235_p0, %p9229_p1 }
  0x25   : > { %9239 = shalt.err (!%p9236_p6)
}
  0x26   : > { %s9372_s11 = smov 384   ;;  %s9373_s12 = smov 24  }
  0x27   : > { %8287 = dma.hbm_to_vmem [thread:$0]  (!%p9459_p11), %s13187_s1, 12288, %s9452_s25, [#allocation6], %s9372_s11, %s9372_s11, %s9373_s12  }
  0x28   : > { %s9240_s27 = scalar_lea.hbm %s13188_s2, 4096 }
  0x29   : > { %p9241_p2 = scmp.ne.s32.totalorder %s13188_s2, %s9240_s27  ;;  %p9247_p10 = scmp.lt.u32.totalorder %s9240_s27, %s13188_s2 }
  0x2b   : > { %p9243_p1 = pnand %p9241_p2, %p9214_p13 }
  0x2d   : > { %p9244_p6 = pneg %p9243_p1 }
  0x2f   : > { %p9249_p3 = pnand %p9247_p10, %p9244_p6 }
  0x31   : > { %9252 = shalt.err (!%p9249_p3)
}
  0x32   : > { %s9253_s25 = scalar_lea.vmem %s9463_s28, 4096  ;;  %p9261_p12 = scmp.lt.s32.totalorder %s9463_s28, %s9463_s28 }
  0x33   : > { %p9254_p5 = scmp.ne.s32.totalorder %s9463_s28, %s9253_s25  ;;  %p9262_p0 = scmp.lt.s32.totalorder %s9253_s25, %s9253_s25 }
  0x35   : > { %p9256_p7 = pnand %p9254_p5, %p9214_p13  ;;  %p9263_p2 = por %p9262_p0, %p9261_p12 }
  0x37   : > { %p9257_p9 = pneg %p9256_p7 }
  0x39   : > { %p9264_p1 = pnand %p9263_p2, %p9257_p9 }
  0x3b   : > { %9267 = shalt.err (!%p9264_p1)
}
  0x3c   : > { %s9374_s7 = smov 128   ;;  %s9375_s8 = smov 8  }
  0x3d   : > { %8290 = dma.hbm_to_vmem [thread:$0]  (!%p9459_p11), %s13188_s2, 4096, %s9463_s28, [#allocation6], %s9374_s7, %s9374_s7, %s9375_s8  }
  0x3e   : > { %s9518_s11 = sadd.s32 1, %s9368_s18   ;;  %s28_s13 = sadd.s32 1, %s9364_s17 }
  0x3f   : > { %s25_s12 = ssub.s32 %s9368_s18, %s9518_s11  ;;  %p35_p6 = scmp.ne.s32.totalorder %s9364_s17, %s9360_s16 }
  0x40   : > { %p26_p13 = scmp.eq.s32.totalorder %s25_s12, 0  ;;  %p36_p10 = scmp.eq.s32.totalorder %s9368_s18, 0 }
  0x41   : > { %p13353_p5 = scmp.eq.s32.totalorder %s9429_s19, 1  ;;  %p8301_p9 = scmp.lt.s32.totalorder %s9368_s18, 2 }
  0x42   : > { %s9527_s14 = scalar_select %p26_p13, %s9364_s17, %s28_s13  }
  0x43   : > { %p37_p3 = por %p36_p10, %p35_p6  ;;  %p9531_p7 = por %p13353_p5, %p35_p6 }
  0x44   : > { %s183_s26 = sand.u32 1, %s9364_s17   ;;  %s7405_s28 = sshll.u32 %s9368_s18, 13 }
  0x45   : > { %s13354_s20 = scalar_select %p9531_p7, 1, 0 }
  0x46   : > { %s7133_s24 = sshll.u32 %s183_s26, 9  ;;  %s9541_s30 = scalar_lea.hbm %s13186_s0, %s7405_s28 }
  0x47   : > { %s187_s5 = scalar_lea.vmem [#allocation2], %s7133_s24  ;;  %p9545_p11 = pnand %p8301_p9, %p37_p3 }
  0x48   : > { %s195_s6 = sshll.u32 %s187_s5, 4  ;;  %s9549_s7 = scalar_lea.sflag [#allocation3], %s183_s26  ;;  %s9543_s6 = int_to_ptr.vmem [resolvable:$true] %s195_s6 }
  0x49   : > { %s9268_s8 = scalar_lea.hbm %s9541_s30, 8192  ;;  %p9270_p0 = pneg %p9545_p11 }
  0x4a   : > { %p9269_p12 = scmp.ne.s32.totalorder %s9541_s30, %s9268_s8  ;;  %s9273_s12 = scalar_lea.hbm %s13186_s0, 16384 }
  0x4b   : > { %p9274_p13 = scmp.lt.u32.totalorder %s9541_s30, %s13186_s0  ;;  %p9275_p6 = scmp.lt.u32.totalorder %s9273_s12, %s9268_s8 }
  0x4c   : > { %p9271_p2 = pnand %p9270_p0, %p9269_p12  ;;  %p9277_p3 = scmp.lt.u32.totalorder %s9268_s8, %s9541_s30 }
  0x4d   : > { %p9276_p10 = por %p9275_p6, %p9274_p13 }
  0x4e   : > { %p9272_p1 = pneg %p9271_p2 }
  0x4f   : > { %p9278_p5 = por %p9277_p3, %p9276_p10 }
  0x51   : > { %p9279_p9 = pnand %p9278_p5, %p9272_p1 }
  0x53   : > { %9282 = shalt.err (!%p9279_p9)
}
  0x54   : > { %s9283_s26 = scalar_lea.vmem %s9543_s6, 8192  ;;  %s9376_s28 = smov [#allocation2]  }
  0x55   : > { %p9284_p12 = scmp.ne.s32.totalorder %s9543_s6, %s9283_s26  ;;  %s9288_s27 = sshll.u32 %s9376_s28, 4  ;;  %s9289_s27 = int_to_ptr.vmem [resolvable:$false] %s9288_s27 }
  0x56   : > { %s9290_s29 = scalar_lea.vmem %s9289_s27, 16384  ;;  %p9291_p4 = scmp.lt.s32.totalorder %s9543_s6, %s9289_s27 }
  0x57   : > { %p9286_p2 = pnand %p9284_p12, %p9270_p0  ;;  %p9292_p13 = scmp.lt.s32.totalorder %s9290_s29, %s9283_s26 }
  0x59   : > { %p9287_p7 = pneg %p9286_p2  ;;  %p9293_p6 = por %p9292_p13, %p9291_p4 }
  0x5b   : > { %p9294_p10 = pnand %p9293_p6, %p9287_p7 }
  0x5d   : > { %9297 = shalt.err (!%p9294_p10)
}
  0x5e   : > { %s9377_s5 = smov 256   ;;  %s9378_s8 = smov 16  }
  0x5f   : > { %8294 = dma.hbm_to_vmem [thread:$0]  (!%p9545_p11), %s9541_s30, 8192, %s9543_s6, %s9549_s7, %s9377_s5, %s9377_s5, %s9378_s8  }
  0x60   : > { %207 = sbr.rel (%p9448_p8) target bundleno = 3850 (0xf0a), region = 36 }
  0x67   : > { %s9580_s9 = sand.u32 1, %s9360_s16   ;;  %p13356_p4 = scmp.ne.s32.totalorder %s13349_s21, 0 }
  0x68   : > { %s7138_s10 = sshll.u32 %s9580_s9, 9  ;;  %s210_s12 = scalar_lea.sflag [#allocation3], %s9580_s9 }
  0x69   : > { %s9586_s13 = scalar_lea.vmem [#allocation2], %s7138_s10 }
  0x6a   : > { %9343 = dma.done.wait (%p13356_p4), %s210_s12, 8192  }
  0x6b   : > { %9345 = vsyncadd (%p13356_p4), %s210_s12, 4294959104  ;;  %p13357_p7 = scmp.eq.s32.totalorder %s9429_s19, 0 }
  0x6d   : > { %9347 = dma.done.wait (%p13357_p7), [#allocation6], 16384   ;;  %p13358_p8 = pmov %p13357_p7 }
  0x6e   : > { %v8508_v0 = vld [vmem:[#allocation5 + $0x4] ss:$24 sps:$4 sm:$0xff]   ;;  %v8510_v1 = vld [vmem:[#allocation5] ss:$24 sps:$4 sm:$0xff]   ;;  %v8511_v2 = vld [vmem:[#allocation5 + $0x34] ss:$24 sps:$4 sm:$0xff]  }
  0x6f   : > { %9349 = vsyncadd (%p13358_p8), [#allocation6], 4294950912  ;;  %921 = vmatprep.subr.bf16.mxu0 %v8508_v0  ;;  %v9596_v3 = vld [vmem:[#allocation5 + $0xc] ss:$24 sps:$4 sm:$0xff]   ;;  %v8515_v4 = vld [vmem:[#allocation5 + $0x30] ss:$24 sps:$4 sm:$0xff]  }
  0x70   : > { %922 = vmatpush1.bf16.msra.mxu0 %v8510_v1  ;;  %v9598_v5 = vld [vmem:[#allocation5 + $0x8] ss:$24 sps:$4 sm:$0xff]   ;;  %v8517_v6 = vld [vmem:[#allocation5 + $0x64] ss:$24 sps:$4 sm:$0xff]   ;;  %8176 = vmatprep.subr.bf16.mxu1 %v9596_v3  ;;  %v9604_v8 = vld [vmem:[#allocation5 + $0x38] ss:$24 sps:$4 sm:$0xff]  }
  0x71   : > { %923 = vmatprep.subr.bf16.mxu0 %v8511_v2  ;;  %v9601_v7 = vld [vmem:[#allocation5 + $0x3c] ss:$24 sps:$4 sm:$0xff]   ;;  %8192 = vmatpush1.bf16.msra.mxu1 %v9598_v5  ;;  %v8521_v9 = vld [vmem:[#allocation5 + $0x60] ss:$24 sps:$4 sm:$0xff]   ;;  %v9607_v11 = vld [vmem:[#allocation5 + $0x6c] ss:$24 sps:$4 sm:$0xff]  }
  0x72   : > { %8177 = vmatprep.subr.bf16.mxu1 %v9601_v7  ;;  %v8523_v10 = vld [vmem:[#allocation5 + $0x94] ss:$24 sps:$4 sm:$0xff]   ;;  %v9610_v12 = vld [vmem:[#allocation5 + $0x68] ss:$24 sps:$4 sm:$0xff]   ;;  %v8529_v15 = vld [vmem:[#allocation5 + $0xc4] ss:$24 sps:$4 sm:$0xff]  }
  0x73   : > { %v8527_v13 = vld [vmem:[#allocation5 + $0x90] ss:$24 sps:$4 sm:$0xff]   ;;  %v9613_v14 = vld [vmem:[#allocation5 + $0x9c] ss:$24 sps:$4 sm:$0xff]   ;;  %v8533_v16 = vld [vmem:[#allocation5 + $0xc0] ss:$24 sps:$4 sm:$0xff]  }
  0x74   : > { %924 = vmatpush1.bf16.msra.mxu0 %v8515_v4  ;;  %v9616_v17 = vld [vmem:[#allocation5 + $0x98] ss:$24 sps:$4 sm:$0xff]   ;;  %v9619_v18 = vld [vmem:[#allocation5 + $0xcc] ss:$24 sps:$4 sm:$0xff]   ;;  %v9622_v20 = vld [vmem:[#allocation5 + $0xc8] ss:$24 sps:$4 sm:$0xff]  }
  0x75   : > { %925 = vmatprep.subr.bf16.mxu0 %v8517_v6  ;;  %8193 = vmatpush1.bf16.msra.mxu1 %v9604_v8  ;;  %v8535_v19 = vld [vmem:[#allocation5 + $0xf4] ss:$24 sps:$4 sm:$0xff]   ;;  %v8539_v21 = vld [vmem:[#allocation5 + $0xf0] ss:$24 sps:$4 sm:$0xff]   ;;  %v8541_v23 = vld [vmem:[#allocation5 + $0x124] ss:$24 sps:$4 sm:$0xff]  }
  0x76   : > { %8178 = vmatprep.subr.bf16.mxu1 %v9607_v11  ;;  %v9625_v22 = vld [vmem:[#allocation5 + $0xfc] ss:$24 sps:$4 sm:$0xff]   ;;  %v8545_v24 = vld [vmem:[#allocation5 + $0x120] ss:$24 sps:$4 sm:$0xff]   ;;  %v9631_v26 = vld [vmem:[#allocation5 + $0x12c] ss:$24 sps:$4 sm:$0xff]  }
  0x77   : > { %v9628_v25 = vld [vmem:[#allocation5 + $0xf8] ss:$24 sps:$4 sm:$0xff]   ;;  %v8547_v27 = vld [vmem:[#allocation5 + $0x154] ss:$24 sps:$4 sm:$0xff]   ;;  %v9634_v28 = vld [vmem:[#allocation5 + $0x128] ss:$24 sps:$4 sm:$0xff]  }
  0x78   : > { %926 = vmatpush1.bf16.msra.mxu0 %v8521_v9  ;;  %v8551_v29 = vld [vmem:[#allocation5 + $0x150] ss:$24 sps:$4 sm:$0xff]   ;;  %v9637_v30 = vld [vmem:[#allocation5 + $0x15c] ss:$24 sps:$4 sm:$0xff]   ;;  %v8557_v32 = vld [vmem:[#allocation5 + $0x180] ss:$24 sps:$4 sm:$0xff]  }
  0x79   : > { %927 = vmatprep.subr.bf16.mxu0 %v8523_v10  ;;  %8194 = vmatpush1.bf16.msra.mxu1 %v9610_v12  ;;  %v8553_v31 = vld [vmem:[#allocation5 + $0x184] ss:$24 sps:$4 sm:$0xff]   ;;  %v9640_v33 = vld [vmem:[#allocation5 + $0x158] ss:$24 sps:$4 sm:$0xff]   ;;  %v8559_v35 = vld [vmem:[#allocation5 + $0x1b4] ss:$24 sps:$4 sm:$0xff]  }
  0x7a   : > { %8179 = vmatprep.subr.bf16.mxu1 %v9613_v14  ;;  %v9643_v34 = vld [vmem:[#allocation5 + $0x18c] ss:$24 sps:$4 sm:$0xff]   ;;  %v9646_v36 = vld [vmem:[#allocation5 + $0x188] ss:$24 sps:$4 sm:$0xff]   ;;  %v9649_v38 = vld [vmem:[#allocation5 + $0x1bc] ss:$24 sps:$4 sm:$0xff]  }
  0x7b   : > { %v8563_v37 = vld [vmem:[#allocation5 + $0x1b0] ss:$24 sps:$4 sm:$0xff]   ;;  %v8565_v39 = vld [vmem:[#allocation5 + $0x1e4] ss:$24 sps:$4 sm:$0xff]   ;;  %v8569_v40 = vld [vmem:[#allocation5 + $0x1e0] ss:$24 sps:$4 sm:$0xff]  }
  0x7c   : > { %928 = vmatpush1.bf16.msra.mxu0 %v8527_v13  ;;  %v9652_v41 = vld [vmem:[#allocation5 + $0x1b8] ss:$24 sps:$4 sm:$0xff]   ;;  %v9655_v42 = vld [vmem:[#allocation5 + $0x1ec] ss:$24 sps:$4 sm:$0xff]   ;;  %v9660_v46 = vld [vmem:[#allocation5 + $0x1e8] ss:$24 sps:$4 sm:$0xff]  }
  0x7d   : > { %929 = vmatprep.subr.bf16.mxu0 %v8529_v15  ;;  %8195 = vmatpush1.bf16.msra.mxu1 %v9616_v17  ;;  %v8571_v43 = vld [vmem:[#allocation5 + $0x214] ss:$24 sps:$4 sm:$0xff]   ;;  %v252_v45 = vld [vmem:[%s9586_s13 + $0x18] sm:$0xff]  ;;  %v8575_v48 = vld [vmem:[#allocation5 + $0x210] ss:$24 sps:$4 sm:$0xff]   ;;  %vm1615_vm0 = vcmask 523264  }
  0x7e   : > { %8180 = vmatprep.subr.bf16.mxu1 %v9619_v18  ;;  %v250_v44 = vld [vmem:[%s9586_s13 + $0x8] sm:$0xff]  ;;  %v9665_v49 = vld [vmem:[#allocation5 + $0x21c] ss:$24 sps:$4 sm:$0xff]   ;;  %v9673_v54 = vld [vmem:[#allocation5 + $0x218] ss:$24 sps:$4 sm:$0xff]   ;;  %s9379_s21 = smov 64  }
  0x7f   : > { %v9662_v47 = vpack.c.bf16 %v252_v45, %v250_v44  ;;  %v8577_v50 = vld [vmem:[#allocation5 + $0x244] ss:$24 sps:$4 sm:$0xff]   ;;  %v290_v51 = vld [vmem:[%s9586_s13 + $0x148] sm:$0xff]  ;;  %v8581_v55 = vld [vmem:[#allocation5 + $0x240] ss:$24 sps:$4 sm:$0xff]   ;;  %s12990_s6 = scalar_lea.vmem [#allocation8], %s7138_s10 }
  0x80   : > { %930 = vmatpush1.bf16.msra.mxu0 %v8533_v16  ;;  %v292_v52 = vld [vmem:[%s9586_s13 + $0x158] sm:$0xff]  ;;  %v9676_v56 = vld [vmem:[#allocation5 + $0x24c] ss:$24 sps:$4 sm:$0xff]   ;;  %v9680_v58 = vld [vmem:[#allocation5 + $0x248] ss:$24 sps:$4 sm:$0xff]   ;;  %s7407_s25 = sshll.u32 %s9429_s19, 13 }
  0x81   : > { %931 = vmatprep.subr.bf16.mxu0 %v8535_v19  ;;  %8196 = vmatpush1.bf16.msra.mxu1 %v9622_v20  ;;  %v9670_v53 = vpack.c.bf16 %v292_v52, %v290_v51  ;;  %v8583_v57 = vld [vmem:[#allocation5 + $0x274] ss:$24 sps:$4 sm:$0xff]   ;;  %v8587_v59 = vld [vmem:[#allocation5 + $0x270] ss:$24 sps:$4 sm:$0xff]   ;;  %v8589_v61 = vld [vmem:[#allocation5 + $0x2a4] ss:$24 sps:$4 sm:$0xff]   ;;  %s13136_s28 = scalar_lea.hbm %s13190_s4, %s7407_s25 }
  0x82   : > { %8181 = vmatprep.subr.bf16.mxu1 %v9625_v22  ;;  %953 = vmatprep.mubr.bf16.mxu0 %v9662_v47  ;;  %v9683_v60 = vld [vmem:[#allocation5 + $0x27c] ss:$24 sps:$4 sm:$0xff]   ;;  %v9686_v62 = vld [vmem:[#allocation5 + $0x278] ss:$24 sps:$4 sm:$0xff]   ;;  %v9689_v0 = vld [vmem:[#allocation5 + $0x2ac] ss:$24 sps:$4 sm:$0xff]  }
  0x83   : > { %1246 = vmatprep.mubr.bf16.mxu1 %v9670_v53  ;;  %v8593_v63 = vld [vmem:[#allocation5 + $0x2a0] ss:$24 sps:$4 sm:$0xff]   ;;  %v8595_v1 = vld [vmem:[#allocation5 + $0x2d4] ss:$24 sps:$4 sm:$0xff]   ;;  %v8599_v2 = vld [vmem:[#allocation5 + $0x2d0] ss:$24 sps:$4 sm:$0xff]  }
  0x84   : > { %932 = vmatpush1.bf16.msra.mxu0 %v8539_v21  ;;  %v9692_v4 = vld [vmem:[#allocation5 + $0x2a8] ss:$24 sps:$4 sm:$0xff]   ;;  %v251_v9 = vld [vmem:[%s9586_s13 + $0x10] sm:$0xff]  ;;  %v256_v15 = vld [vmem:[%s9586_s13 + $0x38] sm:$0xff]  ;;  %s7036_s7 = sshll.u32 %s12990_s6, 4  ;;  %s7022_s19 = scalar_lea.sflag [#allocation4], %s9580_s9  ;;  %s13138_s7 = int_to_ptr.vmem [resolvable:$true] %s7036_s7 }
  0x85   : > { %933 = vmatprep.subr.bf16.mxu0 %v8541_v23  ;;  %8197 = vmatpush1.bf16.msra.mxu1 %v9628_v25  ;;  %v249_v6 = vld [vmem:[%s9586_s13] sm:$0xff]  ;;  %v9697_v10 = vld [vmem:[#allocation5 + $0x2dc] ss:$24 sps:$4 sm:$0xff]   ;;  %v254_v13 = vld [vmem:[%s9586_s13 + $0x28] sm:$0xff]  ;;  %s9298_s27 = scalar_lea.vmem %s13138_s7, 8192  ;;  %p13802_p0 = scmp.ne.s32.totalorder %s13354_s20, 0 }
  0x86   : > { %8182 = vmatprep.subr.bf16.mxu1 %v9631_v26  ;;  %v9702_v16 = vpack.c.bf16 %v251_v9, %v249_v6  ;;  %v9704_v19 = vld [vmem:[#allocation5 + $0x2d8] ss:$24 sps:$4 sm:$0xff]   ;;  %v289_v21 = vld [vmem:[%s9586_s13 + $0x140] sm:$0xff]  ;;  %v262_v51 = vld [vmem:[%s9586_s13 + $0x68] sm:$0xff]  ;;  %p9299_p11 = scmp.ne.s32.totalorder %s13138_s7, %s9298_s27  ;;  %s9380_s29 = smov [#allocation8]  }
  0x87   : > { %v291_v23 = vld [vmem:[%s9586_s13 + $0x150] sm:$0xff]  ;;  %v264_v52 = vld [vmem:[%s9586_s13 + $0x78] sm:$0xff]  ;;  %s9302_s5 = sshll.u32 %s9380_s29, 4  ;;  %s9303_s5 = int_to_ptr.vmem [resolvable:$false] %s9302_s5 }
  0x88   : > { %934 = vmatpush1.bf16.msra.mxu0 %v8545_v24  ;;  %v9709_v24 = vpack.c.bf16 %v256_v15, %v254_v13  ;;  %v295_v44 = vld [vmem:[%s9586_s13 + $0x170] sm:$0xff]  ;;  %v268_v6 = vld [vmem:[%s9586_s13 + $0x98] sm:$0xff]  ;;  %p9300_p1 = pnand %p9299_p11, %p13802_p0  ;;  %s9304_s8 = scalar_lea.vmem %s9303_s5, 16384 }
  0x89   : > { %935 = vmatprep.subr.bf16.mxu0 %v8547_v27  ;;  %8198 = vmatpush1.bf16.msra.mxu1 %v9634_v28  ;;  %v294_v27 = vld [vmem:[%s9586_s13 + $0x168] sm:$0xff]  ;;  %v303_v15 = vld [vmem:[%s9586_s13 + $0x1b0] sm:$0xff]  ;;  %p9305_p5 = scmp.lt.s32.totalorder %s13138_s7, %s9303_s5  ;;  %p9306_p9 = scmp.lt.s32.totalorder %s9304_s8, %s9298_s27 }
  0x8a   : > { %8183 = vmatprep.subr.bf16.mxu1 %v9637_v30  ;;  %p9301_p3 = pneg %p9300_p1 }
  0x8b   : > { %p9307_p12 = por %p9306_p9, %p9305_p5 }
  0x8c   : > { %936 = vmatpush1.bf16.msra.mxu0 %v8551_v29  ;;  %v296_v29 = vld [vmem:[%s9586_s13 + $0x178] sm:$0xff] }
  0x8d   : > { %937 = vmatprep.subr.bf16.mxu0 %v8553_v31  ;;  %8199 = vmatpush1.bf16.msra.mxu1 %v9640_v33  ;;  %v9714_v31 = vpack.c.bf16 %v291_v23, %v289_v21  ;;  %v306_v21 = vld [vmem:[%s9586_s13 + $0x1c8] sm:$0xff]  ;;  %v265_v23 = vld [vmem:[%s9586_s13 + $0x80] sm:$0xff]  ;;  %p9308_p2 = pnand %p9307_p12, %p9301_p3 }
  0x8e   : > { %8184 = vmatprep.subr.bf16.mxu1 %v9643_v34 }
  0x90   : > { %938 = vmatpush1.bf16.msra.mxu0 %v8557_v32  ;;  %v253_v32 = vld [vmem:[%s9586_s13 + $0x20] sm:$0xff] }
  0x91   : > { %939 = vmatprep.subr.bf16.mxu0 %v8559_v35  ;;  %8200 = vmatpush1.bf16.msra.mxu1 %v9646_v36  ;;  %v255_v35 = vld [vmem:[%s9586_s13 + $0x30] sm:$0xff] }
  0x92   : > { %8185 = vmatprep.subr.bf16.mxu1 %v9649_v38 }
  0x94   : > { %940 = vmatpush1.bf16.msra.mxu0 %v8563_v37  ;;  %v258_v37 = vld [vmem:[%s9586_s13 + $0x48] sm:$0xff] }
  0x95   : > { %941 = vmatprep.subr.bf16.mxu0 %v8565_v39  ;;  %8201 = vmatpush1.bf16.msra.mxu1 %v9652_v41  ;;  %v260_v39 = vld [vmem:[%s9586_s13 + $0x58] sm:$0xff] }
  0x96   : > { %8186 = vmatprep.subr.bf16.mxu1 %v9655_v42  ;;  %v9733_v45 = vpack.c.bf16 %v260_v39, %v258_v37  ;;  %v307_v39 = vld [vmem:[%s9586_s13 + $0x1d0] sm:$0xff] }
  0x98   : > { %942 = vmatpush1.bf16.msra.mxu0 %v8569_v40  ;;  %v9728_v40 = vpack.c.bf16 %v255_v35, %v253_v32 }
  0x99   : > { %943 = vmatprep.subr.bf16.mxu0 %v8571_v43  ;;  %8202 = vmatpush1.bf16.msra.mxu1 %v9660_v46  ;;  %v293_v43 = vld [vmem:[%s9586_s13 + $0x160] sm:$0xff] }
  0x9a   : > { %8187 = vmatprep.subr.bf16.mxu1 %v9665_v49 }
  0x9c   : > { %944 = vmatpush1.bf16.msra.mxu0 %v8575_v48  ;;  %v300_v48 = vld [vmem:[%s9586_s13 + $0x198] sm:$0xff] }
  0x9d   : > { %945 = vmatprep.subr.bf16.mxu0 %v8577_v50  ;;  %8203 = vmatpush1.bf16.msra.mxu1 %v9673_v54  ;;  %v259_v50 = vld [vmem:[%s9586_s13 + $0x50] sm:$0xff] }
  0x9e   : > { %8188 = vmatprep.subr.bf16.mxu1 %v9676_v56 }
  0xa0   : > { %946 = vmatpush1.bf16.msra.mxu0 %v8581_v55 }
  0xa1   : > { %947 = vmatprep.subr.bf16.mxu0 %v8583_v57  ;;  %8204 = vmatpush1.bf16.msra.mxu1 %v9680_v58  ;;  %v297_v57 = vld [vmem:[%s9586_s13 + $0x180] sm:$0xff] }
  0xa2   : > { %8189 = vmatprep.subr.bf16.mxu1 %v9683_v60 }
  0xa4   : > { %948 = vmatpush1.bf16.msra.mxu0 %v8587_v59  ;;  %v299_v59 = vld [vmem:[%s9586_s13 + $0x190] sm:$0xff] }
  0xa5   : > { %949 = vmatprep.subr.bf16.mxu0 %v8589_v61  ;;  %8205 = vmatpush1.bf16.msra.mxu1 %v9686_v62  ;;  %v9757_v61 = vpack.c.bf16 %v264_v52, %v262_v51  ;;  %v311_v52 = vld [vmem:[%s9586_s13 + $0x1f0] sm:$0xff] }
  0xa6   : > { %8190 = vmatprep.subr.bf16.mxu1 %v9689_v0 }
  0xa8   : > { %950 = vmatpush1.bf16.msra.mxu0 %v8593_v63  ;;  %v304_v63 = vld [vmem:[%s9586_s13 + $0x1b8] sm:$0xff] }
  0xa9   : > { %951 = vmatprep.subr.bf16.mxu0 %v8595_v1  ;;  %8206 = vmatpush1.bf16.msra.mxu1 %v9692_v4  ;;  %v263_v1 = vld [vmem:[%s9586_s13 + $0x70] sm:$0xff] }
  0xaa   : > { %8191 = vmatprep.subr.bf16.mxu1 %v9697_v10 }
  0xac   : > { %952 = vmatpush1.bf16.msra.mxu0 %v8599_v2  ;;  %v266_v2 = vld [vmem:[%s9586_s13 + $0x88] sm:$0xff] }
  0xad   : > { %1114 = vmatprep.subr.bf16.mxu0 %v9596_v3  ;;  %8207 = vmatpush1.bf16.msra.mxu1 %v9704_v19  ;;  %v9725_v3 = vpack.c.bf16 %v296_v29, %v294_v27  ;;  %v9779_v13 = vpack.c.bf16 %v268_v6, %v266_v2  ;;  %v267_v27 = vld [vmem:[%s9586_s13 + $0x90] sm:$0xff]  ;;  %v286_v6 = vld [vmem:[%s9586_s13 + $0x128] sm:$0xff] }
  0xae   : > { %v9800_v35 = vpack.c.bf16 %v267_v27, %v265_v23 }
  0xaf   : > { %954 = vmatmul.mubr.bf16.vlgmr.msra.gmra.mrb[0].mxu0 %v9702_v16 }
  0xb0   : > { %963 = vmatprep.mubr.bf16.mxu0 %v9709_v24  ;;  %1115 = vmatpush1.bf16.msra.mxu0 %v9598_v5  ;;  %v298_v5 = vld [vmem:[%s9586_s13 + $0x188] sm:$0xff] }
  0xb1   : > { %1116 = vmatprep.subr.bf16.mxu0 %v9601_v7  ;;  %1247 = vmatmul.mubr.bf16.vlgmr.msra.gmra.mrb[0].mxu1 %v9714_v31  ;;  %v257_v7 = vld [vmem:[%s9586_s13 + $0x40] sm:$0xff] }
  0xb2   : > { %1256 = vmatprep.mubr.bf16.mxu1 %v9725_v3  ;;  %v9752_v55 = vpack.c.bf16 %v259_v50, %v257_v7 }
  0xb4   : > { %1117 = vmatpush1.bf16.msra.mxu0 %v9604_v8  ;;  %v9746_v8 = vpack.c.bf16 %v295_v44, %v293_v43  ;;  %v310_v43 = vld [vmem:[%s9586_s13 + $0x1e8] sm:$0xff]  ;;  %v269_v44 = vld [vmem:[%s9586_s13 + $0xa0] sm:$0xff] }
  0xb5   : > { %1118 = vmatprep.subr.bf16.mxu0 %v9607_v11  ;;  %v9749_v11 = vpack.c.bf16 %v300_v48, %v298_v5  ;;  %v271_v5 = vld [vmem:[%s9586_s13 + $0xb0] sm:$0xff] }
  0xb6   : > { %v9824_v50 = vpack.c.bf16 %v271_v5, %v269_v44 }
  0xb7   : > { %964 = vmatmul.mubr.bf16.gmra.mrb[4].mxu0 %v9728_v40 }
  0xb8   : > { %973 = vmatprep.mubr.bf16.mxu0 %v9733_v45  ;;  %1119 = vmatpush1.bf16.msra.mxu0 %v9610_v12  ;;  %v302_v12 = vld [vmem:[%s9586_s13 + $0x1a8] sm:$0xff] }
  0xb9   : > { %1120 = vmatprep.subr.bf16.mxu0 %v9613_v14  ;;  %1257 = vmatmul.mubr.bf16.gmra.mrb[4].mxu1 %v9746_v8  ;;  %v261_v14 = vld [vmem:[%s9586_s13 + $0x60] sm:$0xff] }
  0xba   : > { %1266 = vmatprep.mubr.bf16.mxu1 %v9749_v11  ;;  %v9776_v9 = vpack.c.bf16 %v263_v1, %v261_v14  ;;  %v282_v14 = vld [vmem:[%s9586_s13 + $0x108] sm:$0xff]  ;;  %v284_v1 = vld [vmem:[%s9586_s13 + $0x118] sm:$0xff] }
  0xbc   : > { %1121 = vmatpush1.bf16.msra.mxu0 %v9616_v17  ;;  %v9770_v17 = vpack.c.bf16 %v299_v59, %v297_v57  ;;  %v275_v57 = vld [vmem:[%s9586_s13 + $0xd0] sm:$0xff] }
  0xbd   : > { %1122 = vmatprep.subr.bf16.mxu0 %v9619_v18  ;;  %v9773_v18 = vpack.c.bf16 %v304_v63, %v302_v12  ;;  %v278_v12 = vld [vmem:[%s9586_s13 + $0xe8] sm:$0xff] }
  0xbf   : > { %974 = vmatmul.mubr.bf16.gmra.mrb[8].mxu0 %v9752_v55 }
  0xc0   : > { %983 = vmatprep.mubr.bf16.mxu0 %v9757_v61  ;;  %1123 = vmatpush1.bf16.msra.mxu0 %v9622_v20  ;;  %v301_v20 = vld [vmem:[%s9586_s13 + $0x1a0] sm:$0xff] }
  0xc1   : > { %1124 = vmatprep.subr.bf16.mxu0 %v9625_v22  ;;  %1267 = vmatmul.mubr.bf16.gmra.mrb[8].mxu1 %v9770_v17  ;;  %v308_v22 = vld [vmem:[%s9586_s13 + $0x1d8] sm:$0xff]  ;;  %v9792_v29 = vpack.c.bf16 %v303_v15, %v301_v20 }
  0xc2   : > { %1276 = vmatprep.mubr.bf16.mxu1 %v9773_v18  ;;  %v9797_v32 = vpack.c.bf16 %v308_v22, %v306_v21 }
  0xc4   : > { %1125 = vmatpush1.bf16.msra.mxu0 %v9628_v25  ;;  %v270_v25 = vld [vmem:[%s9586_s13 + $0xa8] sm:$0xff]  ;;  %13359 = vst [vmem:[#allocation12_spill] sm:$0xff] %v9797_v32 }
  0xc5   : > { %1126 = vmatprep.subr.bf16.mxu0 %v9631_v26  ;;  %v272_v26 = vld [vmem:[%s9586_s13 + $0xb8] sm:$0xff] }
  0xc6   : > { %v9803_v37 = vpack.c.bf16 %v272_v26, %v270_v25 }
  0xc7   : > { %984 = vmatmul.mubr.bf16.gmra.mrb[12].mxu0 %v9776_v9 }
  0xc8   : > { %993 = vmatprep.mubr.bf16.mxu0 %v9779_v13  ;;  %1127 = vmatpush1.bf16.msra.mxu0 %v9634_v28  ;;  %v305_v28 = vld [vmem:[%s9586_s13 + $0x1c0] sm:$0xff] }
  0xc9   : > { %1128 = vmatprep.subr.bf16.mxu0 %v9637_v30  ;;  %1277 = vmatmul.mubr.bf16.gmra.mrb[12].mxu1 %v9792_v29  ;;  %v312_v30 = vld [vmem:[%s9586_s13 + $0x1f8] sm:$0xff]  ;;  %v9816_v48 = vpack.c.bf16 %v307_v39, %v305_v28 }
  0xca   : > { %1286 = vmatprep.mubr.bf16.mxu1 %v9797_v32  ;;  %v9821_v7 = vpack.c.bf16 %v312_v30, %v310_v43 }
  0xcb   : > { %13360 = vst [vmem:[#allocation13_spill] sm:$0xff] %v9816_v48 }
  0xcc   : > { %1129 = vmatpush1.bf16.msra.mxu0 %v9640_v33  ;;  %v274_v33 = vld [vmem:[%s9586_s13 + $0xc8] sm:$0xff]  ;;  %13361 = vst [vmem:[#allocation14_spill] sm:$0xff] %v9821_v7 }
  0xcd   : > { %1130 = vmatprep.subr.bf16.mxu0 %v9643_v34  ;;  %v276_v34 = vld [vmem:[%s9586_s13 + $0xd8] sm:$0xff] }
  0xce   : > { %v9827_v51 = vpack.c.bf16 %v276_v34, %v274_v33 }
  0xcf   : > { %994 = vmatmul.mubr.bf16.gmra.mrb[16].mxu0 %v9800_v35 }
  0xd0   : > { %1003 = vmatprep.mubr.bf16.mxu0 %v9803_v37  ;;  %1131 = vmatpush1.bf16.msra.mxu0 %v9646_v36  ;;  %v309_v36 = vld [vmem:[%s9586_s13 + $0x1e0] sm:$0xff] }
  0xd1   : > { %1132 = vmatprep.subr.bf16.mxu0 %v9649_v38  ;;  %1287 = vmatmul.mubr.bf16.gmra.mrb[16].mxu1 %v9816_v48  ;;  %v273_v38 = vld [vmem:[%s9586_s13 + $0xc0] sm:$0xff]  ;;  %v9838_v59 = vpack.c.bf16 %v311_v52, %v309_v36 }
  0xd2   : > { %1296 = vmatprep.mubr.bf16.mxu1 %v9821_v7 }
  0xd3   : > { %13362 = vst [vmem:[#allocation15_spill] sm:$0xff] %v9838_v59 }
  0xd4   : > { %1133 = vmatpush1.bf16.msra.mxu0 %v9652_v41  ;;  %v280_v41 = vld [vmem:[%s9586_s13 + $0xf8] sm:$0xff] }
  0xd5   : > { %1134 = vmatprep.subr.bf16.mxu0 %v9655_v42  ;;  %v9844_v42 = vpack.c.bf16 %v275_v57, %v273_v38  ;;  %v9846_v63 = vpack.c.bf16 %v280_v41, %v278_v12 }
  0xd7   : > { %1004 = vmatmul.mubr.bf16.gmra.mrb[20].mxu0 %v9824_v50 }
  0xd8   : > { %1013 = vmatprep.mubr.bf16.mxu0 %v9827_v51  ;;  %1135 = vmatpush1.bf16.msra.mxu0 %v9660_v46  ;;  %v277_v46 = vld [vmem:[%s9586_s13 + $0xe0] sm:$0xff] }
  0xd9   : > { %1136 = vmatprep.subr.bf16.mxu0 %v9665_v49  ;;  %1297 = vmatmul.mubr.bf16.gmra.mrb[20].mxu1 %v9838_v59  ;;  %v279_v49 = vld [vmem:[%s9586_s13 + $0xf0] sm:$0xff] }
  0xda   : > { %v9858_v2 = vpack.c.bf16 %v279_v49, %v277_v46 }
  0xdc   : > { %1137 = vmatpush1.bf16.msra.mxu0 %v9673_v54  ;;  %v9860_v54 = vpack.c.bf16 %v284_v1, %v282_v14 }
  0xdd   : > { %1138 = vmatprep.subr.bf16.mxu0 %v9676_v56  ;;  %v281_v56 = vld [vmem:[%s9586_s13 + $0x100] sm:$0xff] }
  0xdf   : > { %1014 = vmatmul.mubr.bf16.gmra.mrb[24].mxu0 %v9844_v42 }
  0xe0   : > { %1023 = vmatprep.mubr.bf16.mxu0 %v9846_v63  ;;  %1139 = vmatpush1.bf16.msra.mxu0 %v9680_v58  ;;  %v283_v58 = vld [vmem:[%s9586_s13 + $0x110] sm:$0xff] }
  0xe1   : > { %1140 = vmatprep.subr.bf16.mxu0 %v9683_v60  ;;  %v288_v60 = vld [vmem:[%s9586_s13 + $0x138] sm:$0xff]  ;;  %v9872_v20 = vpack.c.bf16 %v283_v58, %v281_v56 }
  0xe2   : > { %v9874_v15 = vpack.c.bf16 %v288_v60, %v286_v6 }
  0xe4   : > { %1141 = vmatpush1.bf16.msra.mxu0 %v9686_v62  ;;  %v285_v62 = vld [vmem:[%s9586_s13 + $0x120] sm:$0xff] }
  0xe5   : > { %1142 = vmatprep.subr.bf16.mxu0 %v9689_v0  ;;  %v287_v0 = vld [vmem:[%s9586_s13 + $0x130] sm:$0xff] }
  0xe6   : > { %v9881_v21 = vpack.c.bf16 %v287_v0, %v285_v62 }
  0xe7   : > { %1024 = vmatmul.mubr.bf16.gmra.mrb[28].mxu0 %v9858_v2 }
  0xe8   : > { %1033 = vmatprep.mubr.bf16.mxu0 %v9860_v54  ;;  %1143 = vmatpush1.bf16.msra.mxu0 %v9692_v4 }
  0xe9   : > { %1144 = vmatprep.subr.bf16.mxu0 %v9697_v10 }
  0xec   : > { %1145 = vmatpush1.bf16.msra.mxu0 %v9704_v19 }
  0xef   : > { %1034 = vmatmul.mubr.bf16.gmra.mrb[32].mxu0 %v9872_v20 }
  0xf0   : > { %1043 = vmatprep.mubr.bf16.mxu0 %v9874_v15 }
  0xf7   : > { %1044 = vmatmul.mubr.bf16.gmra.mrb[36].mxu0 %v9881_v21 }
  0xf8   : > { %1053 = vmatprep.mubr.bf16.mxu0 %v9670_v53 }
  0xff   : > { %1054 = vmatmul.mubr.bf16.gmra.mrb[40].mxu0 %v9714_v31 }
 0x100   : > { %1063 = vmatprep.mubr.bf16.mxu0 %v9725_v3 }
 0x107   : > { %1064 = vmatmul.mubr.bf16.gmra.mrb[44].mxu0 %v9746_v8 }
 0x108   : > { %1073 = vmatprep.mubr.bf16.mxu0 %v9749_v11 }
 0x10f   : > { %1074 = vmatmul.mubr.bf16.gmra.mrb[48].mxu0 %v9770_v17 }
 0x110   : > { %1083 = vmatprep.mubr.bf16.mxu0 %v9773_v18 }
 0x117   : > { %1084 = vmatmul.mubr.bf16.gmra.mrb[52].mxu0 %v9792_v29 }
 0x118   : > { %1093 = vmatprep.mubr.bf16.mxu0 %v9797_v32 }
 0x11f   : > { %1094 = vmatmul.mubr.bf16.gmra.mrb[56].mxu0 %v9816_v48 }
 0x120   : > { %1103 = vmatprep.mubr.bf16.mxu0 %v9821_v7 }
 0x127   : > { %1104 = vmatmul.mubr.bf16.gmra.mrb[60].mxu0 %v9838_v59 }
 0x128   : > { %1146 = vmatprep.mubr.bf16.mxu0 %v9662_v47 }
 0x12f   : > { %1147 = vmatmul.mubr.bf16.vlgmr.msra.gmra.mrb[64].mxu0 %v9702_v16 }
 0x130   : > { %1156 = vmatprep.mubr.bf16.mxu0 %v9709_v24 }
 0x137   : > { %1157 = vmatmul.mubr.bf16.gmra.mrb[68].mxu0 %v9728_v40 }
 0x138   : > { %1166 = vmatprep.mubr.bf16.mxu0 %v9733_v45 }
 0x13f   : > { %1167 = vmatmul.mubr.bf16.gmra.mrb[72].mxu0 %v9752_v55 }
 0x140   : > { %1176 = vmatprep.mubr.bf16.mxu0 %v9757_v61 }
 0x147   : > { %1177 = vmatmul.mubr.bf16.gmra.mrb[76].mxu0 %v9776_v9 }
 0x148   : > { %1186 = vmatprep.mubr.bf16.mxu0 %v9779_v13 }
 0x14f   : > { %1187 = vmatmul.mubr.bf16.gmra.mrb[80].mxu0 %v9800_v35 }
 0x150   : > { %1196 = vmatprep.mubr.bf16.mxu0 %v9803_v37 }
 0x157   : > { %1197 = vmatmul.mubr.bf16.gmra.mrb[84].mxu0 %v9824_v50 }
 0x158   : > { %1206 = vmatprep.mubr.bf16.mxu0 %v9827_v51 }
 0x15f   : > { %1207 = vmatmul.mubr.bf16.gmra.mrb[88].mxu0 %v9844_v42 }
 0x160   : > { %1216 = vmatprep.mubr.bf16.mxu0 %v9846_v63 }
 0x167   : > { %1217 = vmatmul.mubr.bf16.gmra.mrb[92].mxu0 %v9858_v2 }
 0x168   : > { %1226 = vmatprep.mubr.bf16.mxu0 %v9860_v54 }
 0x16f   : > { %1227 = vmatmul.mubr.bf16.gmra.mrb[96].mxu0 %v9872_v20 }
 0x170   : > { %1236 = vmatprep.mubr.bf16.mxu0 %v9874_v15 }
 0x177   : > { %1237 = vmatmul.mubr.bf16.gmra.mrb[100].mxu0 %v9881_v21 }
 0x178   : > { %1339 = vmatprep.mubr.bf16.mxu0 %v9662_v47 }
 0x182   : > { %v955_v4 = vpop.f32.mrb[0].mxu0 }
 0x183   : > { %v957_v10 = vpop.f32.mrb[1].mxu0 }
 0x184   : > { %v959_v19 = vpop.f32.mrb[2].mxu0  ;;  %v1248_v23 = vpop.f32.mrb[0].mxu1 }
 0x185   : > { %v961_v22 = vpop.f32.mrb[3].mxu0  ;;  %v1500_v27 = vpack.c.bf16 %v959_v19, %v955_v4  ;;  %v9919_v26 = vpop.f32.mrb[1].mxu1 }
 0x186   : > { %v9917_v25 = vpack.c.bf16 %v961_v22, %v957_v10  ;;  %v1252_v28 = vpop.f32.mrb[2].mxu1 }
 0x187   : > { %2700 = vrot.lane.b32.xlu0 %v1500_v27, %s9379_s21  ;;  %7672 = vmatprep.mubr.msk.bf16.mxu1 %vm1615_vm0, %v1500_v27  ;;  %v9923_v39 = vpack.c.bf16 %v1252_v28, %v1248_v23 }
 0x188   : > { %13363 = vst [vmem:[#allocation16_spill] sm:$0xff] %v9917_v25 }
 0x189   : > { %2942 = vrot.lane.b32.xlu1 %v9923_v39, %s9379_s21 }
 0x18a   : > { %v965_v47 = vpop.f32.mrb[4].mxu0 }
 0x18b   : > { %v967_v43 = vpop.f32.mrb[5].mxu0 }
 0x18c   : > { %v969_v30 = vpop.f32.mrb[6].mxu0 }
 0x18d   : > { %v9927_v44 = vpack.c.bf16 %v969_v30, %v965_v47  ;;  %v971_v5 = vpop.f32.mrb[7].mxu0 }
 0x18e   : > { %v9929_v33 = vpack.c.bf16 %v971_v5, %v967_v43 }
 0x18f   : > { %2702 = vrot.lane.b32.xlu1 %v9927_v44, %s9379_s21 }
 0x190   : > { %13364 = vst [vmem:[#allocation17_spill] sm:$0xff] %v9929_v33 }
 0x192   : > { %v975_v34 = vpop.f32.mrb[8].mxu0 }
 0x193   : > { %v977_v36 = vpop.f32.mrb[9].mxu0 }
 0x194   : > { %v979_v52 = vpop.f32.mrb[10].mxu0 }
 0x195   : > { %v9933_v38 = vpack.c.bf16 %v979_v52, %v975_v34  ;;  %v981_v57 = vpop.f32.mrb[11].mxu0 }
 0x196   : > { %v9935_v12 = vpack.c.bf16 %v981_v57, %v977_v36 }
 0x198   : > { %13365 = vst [vmem:[#allocation18_spill] sm:$0xff] %v9935_v12 }
 0x19a   : > { %v985_v41 = vpop.f32.mrb[12].mxu0 }
 0x19b   : > { %v987_v46 = vpop.f32.mrb[13].mxu0 }
 0x19c   : > { %v989_v49 = vpop.f32.mrb[14].mxu0 }
 0x19d   : > { %v9937_v14 = vpack.c.bf16 %v989_v49, %v985_v41  ;;  %v991_v1 = vpop.f32.mrb[15].mxu0 }
 0x19e   : > { %v9939_v56 = vpack.c.bf16 %v991_v1, %v987_v46 }
 0x1a0   : > { %13366 = vst [vmem:[#allocation19_spill] sm:$0xff] %v9939_v56 }
 0x1a2   : > { %v995_v58 = vpop.f32.mrb[16].mxu0 }
 0x1a3   : > { %v997_v6 = vpop.f32.mrb[17].mxu0 }
 0x1a4   : > { %v999_v60 = vpop.f32.mrb[18].mxu0 }
 0x1a5   : > { %v9941_v62 = vpack.c.bf16 %v999_v60, %v995_v58  ;;  %v1001_v0 = vpop.f32.mrb[19].mxu0 }
 0x1a6   : > { %v9943_v4 = vpack.c.bf16 %v1001_v0, %v997_v6 }
 0x1a8   : > { %13367 = vst [vmem:[#allocation20_spill] sm:$0xff] %v9943_v4 }
 0x1aa   : > { %v1005_v10 = vpop.f32.mrb[20].mxu0 }
 0x1ab   : > { %v1007_v19 = vpop.f32.mrb[21].mxu0 }
 0x1ac   : > { %v1009_v22 = vpop.f32.mrb[22].mxu0 }
 0x1ad   : > { %v9945_v23 = vpack.c.bf16 %v1009_v22, %v1005_v10  ;;  %v1011_v27 = vpop.f32.mrb[23].mxu0 }
 0x1ae   : > { %v9947_v28 = vpack.c.bf16 %v1011_v27, %v1007_v19 }
 0x1b0   : > { %13368 = vst [vmem:[#allocation21_spill] sm:$0xff] %v9947_v28 }
 0x1b2   : > { %v1015_v47 = vpop.f32.mrb[24].mxu0 }
 0x1b3   : > { %v1017_v43 = vpop.f32.mrb[25].mxu0 }
 0x1b4   : > { %v1019_v30 = vpop.f32.mrb[26].mxu0 }
 0x1b5   : > { %v9949_v5 = vpack.c.bf16 %v1019_v30, %v1015_v47  ;;  %v1021_v34 = vpop.f32.mrb[27].mxu0 }
 0x1b6   : > { %v9951_v36 = vpack.c.bf16 %v1021_v34, %v1017_v43 }
 0x1b7   : > { %13369 = vst [vmem:[#allocation22_spill] sm:$0xff] %v9949_v5 }
 0x1b8   : > { %13370 = vst [vmem:[#allocation23_spill] sm:$0xff] %v9951_v36 }
 0x1ba   : > { %v1025_v52 = vpop.f32.mrb[28].mxu0 }
 0x1bb   : > { %v1027_v57 = vpop.f32.mrb[29].mxu0 }
 0x1bc   : > { %v1029_v41 = vpop.f32.mrb[30].mxu0 }
 0x1bd   : > { %v9953_v46 = vpack.c.bf16 %v1029_v41, %v1025_v52  ;;  %v1031_v49 = vpop.f32.mrb[31].mxu0 }
 0x1be   : > { %v9955_v1 = vpack.c.bf16 %v1031_v49, %v1027_v57  ;;  %v1254_v49 = vpop.f32.mrb[3].mxu1 }
 0x1bf   : > { %13371 = vst [vmem:[#allocation24_spill] sm:$0xff] %v9953_v46 }
 0x1c0   : > { %13372 = vst [vmem:[#allocation25_spill] sm:$0xff] %v9955_v1 }
 0x1c2   : > { %v1035_v58 = vpop.f32.mrb[32].mxu0 }
 0x1c3   : > { %v1037_v6 = vpop.f32.mrb[33].mxu0 }
 0x1c4   : > { %v1039_v60 = vpop.f32.mrb[34].mxu0 }
 0x1c5   : > { %v9957_v0 = vpack.c.bf16 %v1039_v60, %v1035_v58  ;;  %v1041_v10 = vpop.f32.mrb[35].mxu0  ;;  %v9968_v58 = vpack.c.bf16 %v1254_v49, %v9919_v26  ;;  %v1258_v60 = vpop.f32.mrb[4].mxu1 }
 0x1c6   : > { %v9959_v19 = vpack.c.bf16 %v1041_v10, %v1037_v6  ;;  %v1260_v10 = vpop.f32.mrb[5].mxu1 }
 0x1c7   : > { %13376 = vst [vmem:[#allocation29_spill] sm:$0xff] %v9968_v58 }
 0x1c8   : > { %13373 = vst [vmem:[#allocation26_spill] sm:$0xff] %v9959_v19 }
 0x1ca   : > { %v1045_v22 = vpop.f32.mrb[36].mxu0 }
 0x1cb   : > { %v1047_v27 = vpop.f32.mrb[37].mxu0 }
 0x1cc   : > { %v1049_v47 = vpop.f32.mrb[38].mxu0 }
 0x1cd   : > { %v9961_v43 = vpack.c.bf16 %v1049_v47, %v1045_v22  ;;  %v1051_v30 = vpop.f32.mrb[39].mxu0  ;;  %v1262_v22 = vpop.f32.mrb[6].mxu1 }
 0x1ce   : > { %v9963_v34 = vpack.c.bf16 %v1051_v30, %v1047_v27  ;;  %v9972_v4 = vpack.c.bf16 %v1262_v22, %v1258_v60  ;;  %v1264_v30 = vpop.f32.mrb[7].mxu1 }
 0x1cf   : > { %v1268_v26 = vpop.f32.mrb[8].mxu1 }
 0x1d0   : > { %13374 = vst [vmem:[#allocation27_spill] sm:$0xff] %v9963_v34  ;;  %v1270_v49 = vpop.f32.mrb[9].mxu1 }
 0x1d2   : > { %v1055_v52 = vpop.f32.mrb[40].mxu0 }
 0x1d3   : > { %v1057_v41 = vpop.f32.mrb[41].mxu0 }
 0x1d4   : > { %v1059_v57 = vpop.f32.mrb[42].mxu0 }
 0x1d5   : > { %v9965_v1 = vpack.c.bf16 %v1059_v57, %v1055_v52  ;;  %v1061_v36 = vpop.f32.mrb[43].mxu0  ;;  %v9976_v52 = vpack.c.bf16 %v1264_v30, %v1260_v10 }
 0x1d6   : > { %v9970_v6 = vpack.c.bf16 %v1061_v36, %v1057_v41  ;;  %v1272_v41 = vpop.f32.mrb[10].mxu1 }
 0x1d7   : > { %13375 = vst [vmem:[#allocation28_spill] sm:$0xff] %v9965_v1  ;;  %13379 = vst [vmem:[#allocation32_spill] sm:$0xff] %v9976_v52  ;;  %v9980_v58 = vpack.c.bf16 %v1272_v41, %v1268_v26 }
 0x1d8   : > { %13377 = vst [vmem:[#allocation30_spill] sm:$0xff] %v9970_v6 }
 0x1da   : > { %v1065_v28 = vpop.f32.mrb[44].mxu0 }
 0x1db   : > { %v1067_v47 = vpop.f32.mrb[45].mxu0 }
 0x1dc   : > { %v1069_v27 = vpop.f32.mrb[46].mxu0 }
 0x1dd   : > { %v9974_v34 = vpack.c.bf16 %v1069_v27, %v1065_v28  ;;  %v1071_v19 = vpop.f32.mrb[47].mxu0  ;;  %v1274_v28 = vpop.f32.mrb[11].mxu1 }
 0x1de   : > { %v9978_v57 = vpack.c.bf16 %v1071_v19, %v1067_v47  ;;  %v9986_v27 = vpack.c.bf16 %v1274_v28, %v1270_v49  ;;  %v1278_v10 = vpop.f32.mrb[12].mxu1 }
 0x1df   : > { %13378 = vst [vmem:[#allocation31_spill] sm:$0xff] %v9974_v34  ;;  %v1280_v19 = vpop.f32.mrb[13].mxu1 }
 0x1e0   : > { %13380 = vst [vmem:[#allocation33_spill] sm:$0xff] %v9978_v57  ;;  %13383 = vst [vmem:[#allocation36_spill] sm:$0xff] %v9986_v27  ;;  %v1282_v57 = vpop.f32.mrb[14].mxu1 }
 0x1e1   : > { %v9988_v25 = vpack.c.bf16 %v1282_v57, %v1278_v10 }
 0x1e2   : > { %v1075_v36 = vpop.f32.mrb[48].mxu0 }
 0x1e3   : > { %v1077_v6 = vpop.f32.mrb[49].mxu0 }
 0x1e4   : > { %v1079_v56 = vpop.f32.mrb[50].mxu0 }
 0x1e5   : > { %v9982_v12 = vpack.c.bf16 %v1079_v56, %v1075_v36  ;;  %v1081_v60 = vpop.f32.mrb[51].mxu0  ;;  %v1284_v56 = vpop.f32.mrb[15].mxu1 }
 0x1e6   : > { %v9984_v22 = vpack.c.bf16 %v1081_v60, %v1077_v6  ;;  %v9994_v36 = vpack.c.bf16 %v1284_v56, %v1280_v19  ;;  %v1288_v6 = vpop.f32.mrb[16].mxu1 }
 0x1e7   : > { %13381 = vst [vmem:[#allocation34_spill] sm:$0xff] %v9982_v12  ;;  %v1290_v49 = vpop.f32.mrb[17].mxu1 }
 0x1e8   : > { %13382 = vst [vmem:[#allocation35_spill] sm:$0xff] %v9984_v22  ;;  %13386 = vst [vmem:[#allocation39_spill] sm:$0xff] %v9994_v36  ;;  %v1292_v22 = vpop.f32.mrb[18].mxu1 }
 0x1e9   : > { %v9996_v59 = vpack.c.bf16 %v1292_v22, %v1288_v6 }
 0x1ea   : > { %v1085_v30 = vpop.f32.mrb[52].mxu0 }
 0x1eb   : > { %v1087_v47 = vpop.f32.mrb[53].mxu0 }
 0x1ec   : > { %v1089_v52 = vpop.f32.mrb[54].mxu0 }
 0x1ed   : > { %v9990_v33 = vpack.c.bf16 %v1089_v52, %v1085_v30  ;;  %v1091_v26 = vpop.f32.mrb[55].mxu0  ;;  %v1294_v52 = vpop.f32.mrb[19].mxu1 }
 0x1ee   : > { %v9992_v41 = vpack.c.bf16 %v1091_v26, %v1087_v47  ;;  %v10002_v30 = vpack.c.bf16 %v1294_v52, %v1290_v49  ;;  %v1298_v47 = vpop.f32.mrb[20].mxu1 }
 0x1ef   : > { %13384 = vst [vmem:[#allocation37_spill] sm:$0xff] %v9990_v33  ;;  %v1300_v19 = vpop.f32.mrb[21].mxu1 }
 0x1f0   : > { %13385 = vst [vmem:[#allocation38_spill] sm:$0xff] %v9992_v41  ;;  %13389 = vst [vmem:[#allocation42_spill] sm:$0xff] %v10002_v30  ;;  %v1302_v41 = vpop.f32.mrb[22].mxu1 }
 0x1f1   : > { %v10004_v48 = vpack.c.bf16 %v1302_v41, %v1298_v47 }
 0x1f2   : > { %v1095_v60 = vpop.f32.mrb[56].mxu0 }
 0x1f3   : > { %v1097_v28 = vpop.f32.mrb[57].mxu0  ;;  %13390 = vst [vmem:[#allocation43_spill] sm:$0xff] %v10004_v48 }
 0x1f4   : > { %v1099_v27 = vpop.f32.mrb[58].mxu0 }
 0x1f5   : > { %v9998_v7 = vpack.c.bf16 %v1099_v27, %v1095_v60  ;;  %v1101_v57 = vpop.f32.mrb[59].mxu0 }
 0x1f6   : > { %v10000_v10 = vpack.c.bf16 %v1101_v57, %v1097_v28 }
 0x1f7   : > { %13387 = vst [vmem:[#allocation40_spill] sm:$0xff] %v9998_v7 }
 0x1f8   : > { %13388 = vst [vmem:[#allocation41_spill] sm:$0xff] %v10000_v10 }
 0x1fa   : > { %v1105_v26 = vpop.f32.mrb[60].mxu0 }
 0x1fb   : > { %v1107_v56 = vpop.f32.mrb[61].mxu0 }
 0x1fc   : > { %v1109_v36 = vpop.f32.mrb[62].mxu0 }
 0x1fd   : > { %v10006_v32 = vpack.c.bf16 %v1109_v36, %v1105_v26  ;;  %v1111_v22 = vpop.f32.mrb[63].mxu0 }
 0x1fe   : > { %v10008_v6 = vpack.c.bf16 %v1111_v22, %v1107_v56 }
 0x1ff   : > { %13391 = vst [vmem:[#allocation44_spill] sm:$0xff] %v10006_v32 }
 0x200   : > { %13392 = vst [vmem:[#allocation45_spill] sm:$0xff] %v10008_v6 }
 0x202   : > { %v1148_v27 = vpop.f32.mrb[64].mxu0 }
 0x203   : > { %v1150_v60 = vpop.f32.mrb[65].mxu0 }
 0x204   : > { %v1152_v28 = vpop.f32.mrb[66].mxu0 }
 0x205   : > { %v1532_v57 = vpack.c.bf16 %v1152_v28, %v1148_v27  ;;  %v1154_v10 = vpop.f32.mrb[67].mxu0 }
 0x206   : > { %v10010_v49 = vpack.c.bf16 %v1154_v10, %v1150_v60 }
 0x207   : > { %2712 = vrot.lane.b32.xlu0 %v1532_v57, %s9379_s21  ;;  %8208 = vmatprep.subr.msk.bf16.mxu1 %vm1615_vm0, %v1532_v57  ;;  %v1629_v52 = vsel %vm1615_vm0, %v1532_v57, 0 }
 0x208   : > { %13393 = vst [vmem:[#allocation46_spill] sm:$0xff] %v10010_v49  ;;  %7665 = vmatpush3.bf16.xpose.msra.mxu1 %v1629_v52 }
 0x20a   : > { %v1158_v41 = vpop.f32.mrb[68].mxu0 }
 0x20b   : > { %v1160_v36 = vpop.f32.mrb[69].mxu0 }
 0x20c   : > { %v1162_v47 = vpop.f32.mrb[70].mxu0 }
 0x20d   : > { %v1534_v26 = vpack.c.bf16 %v1162_v47, %v1158_v41  ;;  %v1164_v56 = vpop.f32.mrb[71].mxu0 }
 0x20e   : > { %v10015_v22 = vpack.c.bf16 %v1164_v56, %v1160_v36  ;;  %v1304_v56 = vpop.f32.mrb[23].mxu1 }
 0x20f   : > { %8209 = vmatprep.subr.msk.bf16.mxu1 %vm1615_vm0, %v1534_v26  ;;  %v1632_v27 = vsel %vm1615_vm0, %v1534_v26, 0  ;;  %2714 = vrot.lane.b32.xlu1 %v1534_v26, %s9379_s21  ;;  %v10025_v26 = vpack.c.bf16 %v1304_v56, %v1300_v19 }
 0x210   : > { %13394 = vst [vmem:[#allocation47_spill] sm:$0xff] %v10015_v22  ;;  %7667 = vmatpush3.bf16.xpose.msra.mxu1 %v1632_v27 }
 0x211   : > { %13396 = vst [vmem:[#allocation49_spill] sm:$0xff] %v10025_v26 }
 0x212   : > { %v1168_v10 = vpop.f32.mrb[72].mxu0 }
 0x213   : > { %v1170_v60 = vpop.f32.mrb[73].mxu0 }
 0x214   : > { %v1172_v28 = vpop.f32.mrb[74].mxu0 }
 0x215   : > { %v1536_v6 = vpack.c.bf16 %v1172_v28, %v1168_v10  ;;  %v1174_v57 = vpop.f32.mrb[75].mxu0 }
 0x216   : > { %v10020_v52 = vpack.c.bf16 %v1174_v57, %v1170_v60 }
 0x217   : > { %8210 = vmatprep.subr.msk.bf16.mxu1 %vm1615_vm0, %v1536_v6  ;;  %v1635_v41 = vsel %vm1615_vm0, %v1536_v6, 0  ;;  %2716 = vrot.lane.b32.xlu0 %v1536_v6, %s9379_s21 }
 0x218   : > { %13395 = vst [vmem:[#allocation48_spill] sm:$0xff] %v10020_v52  ;;  %7669 = vmatpush3.bf16.xpose.msra.mxu1 %v1635_v41 }
 0x21a   : > { %v1178_v36 = vpop.f32.mrb[76].mxu0 }
 0x21b   : > { %v1180_v47 = vpop.f32.mrb[77].mxu0 }
 0x21c   : > { %v1182_v30 = vpop.f32.mrb[78].mxu0 }
 0x21d   : > { %v1538_v27 = vpack.c.bf16 %v1182_v30, %v1178_v36  ;;  %v1184_v49 = vpop.f32.mrb[79].mxu0 }
 0x21e   : > { %v10027_v22 = vpack.c.bf16 %v1184_v49, %v1180_v47 }
 0x21f   : > { %8211 = vmatprep.subr.msk.bf16.mxu1 %vm1615_vm0, %v1538_v27  ;;  %v1638_v10 = vsel %vm1615_vm0, %v1538_v27, 0  ;;  %2718 = vrot.lane.b32.xlu0 %v1538_v27, %s9379_s21 }
 0x220   : > { %13397 = vst [vmem:[#allocation50_spill] sm:$0xff] %v10027_v22  ;;  %7671 = vmatpush3.bf16.xpose.msra.mxu1 %v1638_v10 }
 0x222   : > { %v1188_v60 = vpop.f32.mrb[80].mxu0 }
 0x223   : > { %v1190_v6 = vpop.f32.mrb[81].mxu0 }
 0x224   : > { %v1192_v28 = vpop.f32.mrb[82].mxu0 }
 0x225   : > { %v1540_v57 = vpack.c.bf16 %v1192_v28, %v1188_v60  ;;  %v1194_v41 = vpop.f32.mrb[83].mxu0 }
 0x226   : > { %v10032_v52 = vpack.c.bf16 %v1194_v41, %v1190_v6 }
 0x227   : > { %7673 = vmatmul.mubr.msk.bf16.vlgmr.msra.gmra.mrb[24].mxu1 %vm1615_vm0, %v9927_v44  ;;  %8212 = vmatprep.subr.msk.bf16.mxu1 %vm1615_vm0, %v1540_v57  ;;  %v1718_v30 = vsel %vm1615_vm0, %v1540_v57, 0 }
 0x228   : > { %13398 = vst [vmem:[#allocation51_spill] sm:$0xff] %v10032_v52  ;;  %7676 = vmatprep.mubr.msk.bf16.mxu1 %vm1615_vm0, %v9933_v38  ;;  %7681 = vmatpush3.bf16.xpose.msra.mxu1 %v1718_v30 }
 0x229   : > { %2825 = vrot.lane.b32.xlu1 %v1540_v57, %s9379_s21 }
 0x22a   : > { %v1198_v19 = vpop.f32.mrb[84].mxu0 }
 0x22b   : > { %v1200_v49 = vpop.f32.mrb[85].mxu0 }
 0x22c   : > { %v1202_v36 = vpop.f32.mrb[86].mxu0 }
 0x22d   : > { %v1542_v47 = vpack.c.bf16 %v1202_v36, %v1198_v19  ;;  %v1204_v56 = vpop.f32.mrb[87].mxu0 }
 0x22e   : > { %v10041_v27 = vpack.c.bf16 %v1204_v56, %v1200_v49 }
 0x22f   : > { %7677 = vmatmul.mubr.msk.bf16.gmra.mrb[28].mxu1 %vm1615_vm0, %v9937_v14  ;;  %8213 = vmatprep.subr.msk.bf16.mxu1 %vm1615_vm0, %v1542_v47  ;;  %v1721_v44 = vsel %vm1615_vm0, %v1542_v47, 0 }
 0x230   : > { %13399 = vst [vmem:[#allocation52_spill] sm:$0xff] %v10041_v27  ;;  %7683 = vmatpush3.bf16.xpose.msra.mxu1 %v1721_v44  ;;  %7688 = vmatprep.mubr.msk.bf16.mxu1 %vm1615_vm0, %v9941_v62 }
 0x231   : > { %2827 = vrot.lane.b32.xlu0 %v1542_v47, %s9379_s21 }
 0x232   : > { %v1208_v10 = vpop.f32.mrb[88].mxu0 }
 0x233   : > { %v1210_v60 = vpop.f32.mrb[89].mxu0 }
 0x234   : > { %v1212_v6 = vpop.f32.mrb[90].mxu0 }
 0x235   : > { %v1544_v28 = vpack.c.bf16 %v1212_v6, %v1208_v10  ;;  %v1214_v57 = vpop.f32.mrb[91].mxu0 }
 0x236   : > { %v10050_v41 = vpack.c.bf16 %v1214_v57, %v1210_v60  ;;  %v8604_v57 = vld [vmem:[#allocation5 + $0x10] ss:$24 sps:$4 sm:$0xff]  }
 0x237   : > { %8214 = vmatprep.subr.msk.bf16.mxu1 %vm1615_vm0, %v1544_v28  ;;  %v1724_v30 = vsel %vm1615_vm0, %v1544_v28, 0  ;;  %2829 = vrot.lane.b32.xlu0 %v1544_v28, %s9379_s21  ;;  %v8606_v28 = vld [vmem:[#allocation5 + $0x14] ss:$24 sps:$4 sm:$0xff]  }
 0x238   : > { %13400 = vst [vmem:[#allocation53_spill] sm:$0xff] %v10050_v41  ;;  %7685 = vmatpush3.bf16.xpose.msra.mxu1 %v1724_v30  ;;  %1307 = vmatprep.subr.bf16.mxu0 %v8606_v28 }
 0x239   : > { %1308 = vmatpush1.bf16.msra.mxu0 %v8604_v57 }
 0x23a   : > { %v1218_v19 = vpop.f32.mrb[92].mxu0 }
 0x23b   : > { %v1220_v49 = vpop.f32.mrb[93].mxu0 }
 0x23c   : > { %v1222_v36 = vpop.f32.mrb[94].mxu0 }
 0x23d   : > { %v10055_v56 = vpack.c.bf16 %v1222_v36, %v1218_v19  ;;  %v1224_v47 = vpop.f32.mrb[95].mxu0  ;;  %v8609_v19 = vld [vmem:[#allocation5 + $0x44] ss:$24 sps:$4 sm:$0xff]  }
 0x23e   : > { %v10057_v44 = vpack.c.bf16 %v1224_v47, %v1220_v49  ;;  %v8607_v49 = vld [vmem:[#allocation5 + $0x40] ss:$24 sps:$4 sm:$0xff]   ;;  %1309 = vmatprep.subr.bf16.mxu0 %v8609_v19 }
 0x23f   : > { %8215 = vmatprep.subr.msk.bf16.mxu1 %vm1615_vm0, %v10055_v56  ;;  %v1727_v10 = vsel %vm1615_vm0, %v10055_v56, 0  ;;  %1310 = vmatpush1.bf16.msra.mxu0 %v8607_v49  ;;  %v8613_v19 = vld [vmem:[#allocation5 + $0xa0] ss:$24 sps:$4 sm:$0xff]   ;;  %v8618_v49 = vld [vmem:[#allocation5 + $0xd4] ss:$24 sps:$4 sm:$0xff]  }
 0x240   : > { %13401 = vst [vmem:[#allocation54_spill] sm:$0xff] %v10057_v44  ;;  %7687 = vmatpush3.bf16.xpose.msra.mxu1 %v1727_v10  ;;  %v8612_v10 = vld [vmem:[#allocation5 + $0x74] ss:$24 sps:$4 sm:$0xff]  }
 0x241   : > { %1311 = vmatprep.subr.bf16.mxu0 %v8612_v10  ;;  %v8621_v10 = vld [vmem:[#allocation5 + $0x104] ss:$24 sps:$4 sm:$0xff]  }
 0x242   : > { %v1228_v60 = vpop.f32.mrb[96].mxu0 }
 0x243   : > { %v1230_v6 = vpop.f32.mrb[97].mxu0 }
 0x244   : > { %v1232_v30 = vpop.f32.mrb[98].mxu0 }
 0x245   : > { %v1548_v26 = vpack.c.bf16 %v1232_v30, %v1228_v60  ;;  %v1234_v41 = vpop.f32.mrb[99].mxu0 }
 0x246   : > { %v10063_v36 = vpack.c.bf16 %v1234_v41, %v1230_v6  ;;  %v8610_v41 = vld [vmem:[#allocation5 + $0x70] ss:$24 sps:$4 sm:$0xff]  }
 0x247   : > { %7689 = vmatmul.mubr.msk.bf16.vlgmr.msra.gmra.mrb[32].mxu1 %vm1615_vm0, %v9945_v23  ;;  %8216 = vmatprep.subr.msk.bf16.mxu1 %vm1615_vm0, %v1548_v26  ;;  %v1807_v47 = vsel %vm1615_vm0, %v1548_v26, 0 }
 0x248   : > { %13402 = vst [vmem:[#allocation55_spill] sm:$0xff] %v10063_v36  ;;  %7692 = vmatprep.mubr.msk.bf16.mxu1 %vm1615_vm0, %v9949_v5  ;;  %7697 = vmatpush3.bf16.xpose.msra.mxu1 %v1807_v47  ;;  %v8615_v36 = vld [vmem:[#allocation5 + $0xa4] ss:$24 sps:$4 sm:$0xff]   ;;  %v8616_v47 = vld [vmem:[#allocation5 + $0xd0] ss:$24 sps:$4 sm:$0xff]  }
 0x249   : > { %2938 = vrot.lane.b32.xlu1 %v1548_v26, %s9379_s21  ;;  %1312 = vmatpush1.bf16.msra.mxu0 %v8610_v41  ;;  %v8619_v41 = vld [vmem:[#allocation5 + $0x100] ss:$24 sps:$4 sm:$0xff]  }
 0x24a   : > { %v1238_v60 = vpop.f32.mrb[100].mxu0  ;;  %1313 = vmatprep.subr.bf16.mxu0 %v8615_v36  ;;  %v1816_v36 = vsel %vm1615_vm0, %v9972_v4, 0 }
 0x24b   : > { %v1240_v6 = vpop.f32.mrb[101].mxu0 }
 0x24c   : > { %v1242_v57 = vpop.f32.mrb[102].mxu0 }
 0x24d   : > { %v1550_v28 = vpack.c.bf16 %v1242_v57, %v1238_v60  ;;  %v1244_v30 = vpop.f32.mrb[103].mxu0  ;;  %1314 = vmatpush1.bf16.msra.mxu0 %v8613_v19  ;;  %v1813_v60 = vsel %vm1615_vm0, %v9923_v39, 0  ;;  %v8622_v57 = vld [vmem:[#allocation5 + $0x130] ss:$24 sps:$4 sm:$0xff]   ;;  %v1896_v19 = vsel %vm1615_vm0, %v9980_v58, 0 }
 0x24e   : > { %v10072_v44 = vpack.c.bf16 %v1244_v30, %v1240_v6  ;;  %1315 = vmatprep.subr.bf16.mxu0 %v8618_v49  ;;  %v8624_v6 = vld [vmem:[#allocation5 + $0x134] ss:$24 sps:$4 sm:$0xff]   ;;  %v8625_v30 = vld [vmem:[#allocation5 + $0x160] ss:$24 sps:$4 sm:$0xff]   ;;  %v1899_v49 = vsel %vm1615_vm0, %v9988_v25, 0 }
 0x24f   : > { %7693 = vmatmul.mubr.msk.bf16.gmra.mrb[36].mxu1 %vm1615_vm0, %v9953_v46  ;;  %8217 = vmatprep.subr.msk.bf16.mxu1 %vm1615_vm0, %v1550_v28  ;;  %v1810_v26 = vsel %vm1615_vm0, %v1550_v28, 0 }
 0x250   : > { %13403 = vst [vmem:[#allocation56_spill] sm:$0xff] %v10072_v44  ;;  %7699 = vmatpush3.bf16.xpose.msra.mxu1 %v1810_v26  ;;  %7704 = vmatprep.mubr.msk.bf16.mxu1 %vm1615_vm0, %v9957_v0  ;;  %v8628_v26 = vld [vmem:[#allocation5 + $0x190] ss:$24 sps:$4 sm:$0xff]  }
 0x251   : > { %8218 = vmatprep.subr.msk.bf16.mxu1 %vm1615_vm0, %v9923_v39  ;;  %2940 = vrot.lane.b32.xlu1 %v1550_v28, %s9379_s21  ;;  %v8627_v28 = vld [vmem:[#allocation5 + $0x164] ss:$24 sps:$4 sm:$0xff]   ;;  %v8630_v39 = vld [vmem:[#allocation5 + $0x194] ss:$24 sps:$4 sm:$0xff]  }
 0x252   : > { %1316 = vmatpush1.bf16.msra.mxu0 %v8616_v47  ;;  %v1902_v47 = vsel %vm1615_vm0, %v9996_v59, 0 }
 0x253   : > { %1317 = vmatprep.subr.bf16.mxu0 %v8621_v10  ;;  %v1905_v10 = vsel %vm1615_vm0, %v10004_v48, 0 }
 0x256   : > { %1318 = vmatpush1.bf16.msra.mxu0 %v8619_v41  ;;  %v8633_v41 = vld [vmem:[#allocation5 + $0x1c4] ss:$24 sps:$4 sm:$0xff]  }
 0x257   : > { %1319 = vmatprep.subr.bf16.mxu0 %v8624_v6  ;;  %v8634_v6 = vld [vmem:[#allocation5 + $0x1f0] ss:$24 sps:$4 sm:$0xff]  }
 0x258   : > { %7701 = vmatpush3.bf16.xpose.msra.mxu1 %v1813_v60  ;;  %v8631_v60 = vld [vmem:[#allocation5 + $0x1c0] ss:$24 sps:$4 sm:$0xff]  }
 0x259   : > { %8219 = vmatprep.subr.msk.bf16.mxu1 %vm1615_vm0, %v9972_v4 }
 0x25a   : > { %1320 = vmatpush1.bf16.msra.mxu0 %v8622_v57  ;;  %v8636_v57 = vld [vmem:[#allocation5 + $0x1f4] ss:$24 sps:$4 sm:$0xff]  }
 0x25b   : > { %1321 = vmatprep.subr.bf16.mxu0 %v8627_v28  ;;  %v8637_v28 = vld [vmem:[#allocation5 + $0x220] ss:$24 sps:$4 sm:$0xff]  }
 0x25e   : > { %1322 = vmatpush1.bf16.msra.mxu0 %v8625_v30  ;;  %v8642_v30 = vld [vmem:[#allocation5 + $0x254] ss:$24 sps:$4 sm:$0xff]  }
 0x25f   : > { %1323 = vmatprep.subr.bf16.mxu0 %v8630_v39  ;;  %v8640_v39 = vld [vmem:[#allocation5 + $0x250] ss:$24 sps:$4 sm:$0xff]  }
 0x260   : > { %7703 = vmatpush3.bf16.xpose.msra.mxu1 %v1816_v36  ;;  %v8639_v36 = vld [vmem:[#allocation5 + $0x224] ss:$24 sps:$4 sm:$0xff]  }
 0x261   : > { %8220 = vmatprep.subr.msk.bf16.mxu1 %vm1615_vm0, %v9980_v58 }
 0x262   : > { %1324 = vmatpush1.bf16.msra.mxu0 %v8628_v26  ;;  %v8645_v26 = vld [vmem:[#allocation5 + $0x284] ss:$24 sps:$4 sm:$0xff]  }
 0x263   : > { %1325 = vmatprep.subr.bf16.mxu0 %v8633_v41 }
 0x266   : > { %1326 = vmatpush1.bf16.msra.mxu0 %v8631_v60  ;;  %v8649_v60 = vld [vmem:[#allocation5 + $0x2e0] ss:$24 sps:$4 sm:$0xff]  }
 0x267   : > { %7705 = vmatmul.mubr.msk.bf16.vlgmr.msra.gmra.mrb[40].mxu1 %vm1615_vm0, %v9961_v43  ;;  %1327 = vmatprep.subr.bf16.mxu0 %v8636_v57  ;;  %v13420_v57 = vmov 0 }
 0x268   : > { %7708 = vmatprep.mubr.msk.bf16.mxu1 %vm1615_vm0, %v9965_v1  ;;  %7713 = vmatpush3.bf16.xpose.msra.mxu1 %v1896_v19  ;;  %v8643_v19 = vld [vmem:[#allocation5 + $0x280] ss:$24 sps:$4 sm:$0xff]  }
 0x269   : > { %8221 = vmatprep.subr.msk.bf16.mxu1 %vm1615_vm0, %v9988_v25 }
 0x26a   : > { %1328 = vmatpush1.bf16.msra.mxu0 %v8634_v6 }
 0x26b   : > { %1329 = vmatprep.subr.bf16.mxu0 %v8639_v36  ;;  %v13423_v36 = vmov 0 }
 0x26e   : > { %1330 = vmatpush1.bf16.msra.mxu0 %v8637_v28 }
 0x26f   : > { %7709 = vmatmul.mubr.msk.bf16.gmra.mrb[44].mxu1 %vm1615_vm0, %v9974_v34  ;;  %1331 = vmatprep.subr.bf16.mxu0 %v8642_v30 }
 0x270   : > { %7715 = vmatpush3.bf16.xpose.msra.mxu1 %v1899_v49  ;;  %7720 = vmatprep.mubr.msk.bf16.mxu1 %vm1615_vm0, %v9982_v12  ;;  %v8648_v49 = vld [vmem:[#allocation5 + $0x2b4] ss:$24 sps:$4 sm:$0xff]  }
 0x271   : > { %8222 = vmatprep.subr.msk.bf16.mxu1 %vm1615_vm0, %v9996_v59 }
 0x272   : > { %1332 = vmatpush1.bf16.msra.mxu0 %v8640_v39 }
 0x273   : > { %1333 = vmatprep.subr.bf16.mxu0 %v8645_v26  ;;  %v13426_v26 = vmov 0 }
 0x276   : > { %1334 = vmatpush1.bf16.msra.mxu0 %v8643_v19 }
 0x277   : > { %1335 = vmatprep.subr.bf16.mxu0 %v8648_v49 }
 0x278   : > { %7717 = vmatpush3.bf16.xpose.msra.mxu1 %v1902_v47  ;;  %v8646_v47 = vld [vmem:[#allocation5 + $0x2b0] ss:$24 sps:$4 sm:$0xff]  }
 0x279   : > { %8223 = vmatprep.subr.msk.bf16.mxu1 %vm1615_vm0, %v10004_v48 }
 0x27a   : > { %1336 = vmatpush1.bf16.msra.mxu0 %v8646_v47 }
 0x280   : > { %7719 = vmatpush3.bf16.xpose.msra.mxu1 %v1905_v10  ;;  %v8651_v10 = vld [vmem:[#allocation5 + $0x2e4] ss:$24 sps:$4 sm:$0xff]  }
 0x281   : > { %1337 = vmatprep.subr.bf16.mxu0 %v8651_v10  ;;  %v13429_v10 = vld [vmem:[#allocation12_spill] sm:$0xff] }
 0x282   : > { %1338 = vmatpush1.bf16.msra.mxu0 %v8649_v60 }
 0x285   : > { %1340 = vmatmul.mubr.bf16.vlgmr.msra.gmra.mrb[104].mxu0 %v9702_v16  ;;  %v1596_v16 = vlaneseq }
 0x286   : > { %1349 = vmatprep.mubr.bf16.mxu0 %v9709_v24 }
 0x287   : > { %7721 = vmatmul.mubr.msk.bf16.vlgmr.msra.gmra.mrb[48].mxu1 %vm1615_vm0, %v9990_v33  ;;  %v10141_v24 = vshrl.u32 %v1596_v16, 7 }
 0x288   : > { %7724 = vmatprep.mubr.msk.bf16.mxu1 %vm1615_vm0, %v9998_v7 }
 0x289   : > { %13404 = vst [vmem:[#allocation57_spill] sm:$0xff] %v10141_v24  ;;  %v1602_v41 = vadd.s32 40, %v10141_v24 }
 0x28d   : > { %1350 = vmatmul.mubr.bf16.gmra.mrb[108].mxu0 %v9728_v40  ;;  %v1599_v40 = vadd.s32 16, %v10141_v24 }
 0x28e   : > { %1359 = vmatprep.mubr.bf16.mxu0 %v9733_v45  ;;  %v1606_v45 = vand.u32 127, %v1596_v16 }
 0x28f   : > { %7725 = vmatmul.mubr.msk.bf16.gmra.mrb[52].mxu1 %vm1615_vm0, %v10006_v32 }
 0x290   : > { %vm10148_vm1 = vcmp.le.s32.totalorder %v1606_v45, %v1599_v40  ;;  %vm10153_vm2 = vcmp.le.s32.totalorder %v1606_v45, %v10141_v24  ;;  %vm10211_vm8 = vcmp.le.s32.totalorder %v1606_v45, %v1602_v41 }
 0x291   : > { %v13427_v26 = vsel %vm10211_vm8, 4294967295, %v13426_v26 }
 0x292   : > { %13428 = vst [vmem:[#allocation65_spill] sm:$0xff] %v13427_v26 }
 0x295   : > { %1360 = vmatmul.mubr.bf16.gmra.mrb[112].mxu0 %v9752_v55  ;;  %v1600_v55 = vadd.s32 24, %v10141_v24 }
 0x296   : > { %1369 = vmatprep.mubr.bf16.mxu0 %v9757_v61  ;;  %v1598_v61 = vadd.s32 8, %v10141_v24 }
 0x297   : > { %vm10157_vm3 = vcmp.le.s32.totalorder %v1606_v45, %v1600_v55  ;;  %v13430_v55 = vld [vmem:[#allocation13_spill] sm:$0xff] }
 0x298   : > { %vm10165_vm4 = vcmp.le.s32.totalorder %v1606_v45, %v1598_v61  ;;  %v13431_v61 = vld [vmem:[#allocation14_spill] sm:$0xff] }
 0x29d   : > { %1370 = vmatmul.mubr.bf16.gmra.mrb[116].mxu0 %v9776_v9  ;;  %v13411_v9 = vmov 0 }
 0x29e   : > { %1379 = vmatprep.mubr.bf16.mxu0 %v9779_v13  ;;  %v13412_v9 = vsel %vm10157_vm3, 4294967295, %v13411_v9  ;;  %v13414_v13 = vmov 0 }
 0x29f   : > { %13413 = vst [vmem:[#allocation60_spill] sm:$0xff] %v13412_v9  ;;  %v13415_v13 = vsel %vm10165_vm4, 4294967295, %v13414_v13 }
 0x2a0   : > { %13416 = vst [vmem:[#allocation61_spill] sm:$0xff] %v13415_v13 }
 0x2a5   : > { %1380 = vmatmul.mubr.bf16.gmra.mrb[120].mxu0 %v9800_v35 }
 0x2a6   : > { %1389 = vmatprep.mubr.bf16.mxu0 %v9803_v37 }
 0x2ad   : > { %1390 = vmatmul.mubr.bf16.gmra.mrb[124].mxu0 %v9824_v50 }
 0x2ae   : > { %1399 = vmatprep.mubr.bf16.mxu0 %v9827_v51  ;;  %v1603_v51 = vadd.s32 48, %v10141_v24 }
 0x2b0   : > { %vm10192_vm5 = vcmp.le.s32.totalorder %v1606_v45, %v1603_v51 }
 0x2b5   : > { %1400 = vmatmul.mubr.bf16.gmra.mrb[128].mxu0 %v9844_v42 }
 0x2b6   : > { %1409 = vmatprep.mubr.bf16.mxu0 %v9846_v63 }
 0x2bd   : > { %1410 = vmatmul.mubr.bf16.gmra.mrb[132].mxu0 %v9858_v2 }
 0x2be   : > { %1419 = vmatprep.mubr.bf16.mxu0 %v9860_v54 }
 0x2c5   : > { %1420 = vmatmul.mubr.bf16.gmra.mrb[136].mxu0 %v9872_v20  ;;  %v1604_v20 = vadd.s32 56, %v10141_v24 }
 0x2c6   : > { %1429 = vmatprep.mubr.bf16.mxu0 %v9874_v15 }
 0x2c7   : > { %vm10199_vm6 = vcmp.le.s32.totalorder %v1606_v45, %v1604_v20 }
 0x2c8   : > { %v13421_v57 = vsel %vm10199_vm6, 4294967295, %v13420_v57 }
 0x2c9   : > { %13422 = vst [vmem:[#allocation63_spill] sm:$0xff] %v13421_v57 }
 0x2cd   : > { %1430 = vmatmul.mubr.bf16.gmra.mrb[140].mxu0 %v9881_v21  ;;  %v13417_v21 = vmov 0 }
 0x2ce   : > { %1439 = vmatprep.mubr.bf16.mxu0 %v9670_v53  ;;  %v13405_v53 = vmov 0  ;;  %v13418_v21 = vsel %vm10192_vm5, 4294967295, %v13417_v21 }
 0x2cf   : > { %v13406_v53 = vsel %vm10148_vm1, 4294967295, %v13405_v53  ;;  %13419 = vst [vmem:[#allocation62_spill] sm:$0xff] %v13418_v21 }
 0x2d0   : > { %13407 = vst [vmem:[#allocation58_spill] sm:$0xff] %v13406_v53 }
 0x2d5   : > { %1440 = vmatmul.mubr.bf16.gmra.mrb[144].mxu0 %v9714_v31  ;;  %v13408_v31 = vmov 0 }
 0x2d6   : > { %1449 = vmatprep.mubr.bf16.mxu0 %v9725_v3  ;;  %v13409_v31 = vsel %vm10153_vm2, 4294967295, %v13408_v31 }
 0x2d7   : > { %13410 = vst [vmem:[#allocation59_spill] sm:$0xff] %v13409_v31 }
 0x2dd   : > { %1450 = vmatmul.mubr.bf16.gmra.mrb[148].mxu0 %v9746_v8 }
 0x2de   : > { %1459 = vmatprep.mubr.bf16.mxu0 %v9749_v11 }
 0x2e5   : > { %1460 = vmatmul.mubr.bf16.gmra.mrb[152].mxu0 %v9770_v17  ;;  %v1601_v17 = vadd.s32 32, %v10141_v24 }
 0x2e6   : > { %1469 = vmatprep.mubr.bf16.mxu0 %v9773_v18 }
 0x2e7   : > { %vm10207_vm7 = vcmp.le.s32.totalorder %v1606_v45, %v1601_v17 }
 0x2e8   : > { %v13424_v36 = vsel %vm10207_vm7, 4294967295, %v13423_v36 }
 0x2e9   : > { %13425 = vst [vmem:[#allocation64_spill] sm:$0xff] %v13424_v36 }
 0x2ed   : > { %1470 = vmatmul.mubr.bf16.gmra.mrb[156].mxu0 %v9792_v29 }
 0x2ee   : > { %1479 = vmatprep.mubr.bf16.mxu0 %v13429_v10 }
 0x2f5   : > { %1480 = vmatmul.mubr.bf16.gmra.mrb[160].mxu0 %v13430_v55 }
 0x2f6   : > { %1489 = vmatprep.mubr.bf16.mxu0 %v13431_v61 }
 0x2fa   : > { %v7674_v3 = vpop.f32.mrb[24].mxu1 }
 0x2fb   : > { %v10163_v8 = vsel %vm10148_vm1, %v7674_v3, -1e+30  ;;  %v1674_v11 = vpop.f32.mrb[25].mxu1  ;;  %v13432_v3 = vld [vmem:[#allocation15_spill] sm:$0xff] }
 0x2fc   : > { %v10171_v35 = vsel %vm10153_vm2, %v1674_v11, -1e+30  ;;  %v7675_v37 = vpop.f32.mrb[26].mxu1  ;;  %v2026_v50 = vsel %vm1615_vm0, %v10163_v8, -inf }
 0x2fd   : > { %v10179_v42 = vsel %vm10157_vm3, %v7675_v37, -1e+30  ;;  %v1677_v63 = vpop.f32.mrb[27].mxu1  ;;  %2027 = vmax.xlane.f32.xlu1 %v2026_v50  ;;  %v2020_v2 = vsel %vm1615_vm0, %v10171_v35, -inf  ;;  %1490 = vmatmul.mubr.bf16.gmra.mrb[164].mxu0 %v13432_v3 }
 0x2fe   : > { %v10186_v54 = vsel %vm10165_vm4, %v1677_v63, -1e+30  ;;  %2021 = vmax.xlane.f32.xlu0 %v2020_v2  ;;  %v2029_v15 = vsel %vm1615_vm0, %v10179_v42, -inf }
 0x2ff   : > { %v2023_v18 = vsel %vm1615_vm0, %v10186_v54, -inf }
 0x301   : > { %2030 = vmax.xlane.f32.xlu1 %v2029_v15 }
 0x302   : > { %v7678_v6 = vpop.f32.mrb[28].mxu1  ;;  %2024 = vmax.xlane.f32.xlu0 %v2023_v18 }
 0x303   : > { %v10205_v28 = vsel %vm10192_vm5, %v7678_v6, -1e+30  ;;  %v1690_v30 = vpop.f32.mrb[29].mxu1 }
 0x304   : > { %v7679_v39 = vpop.f32.mrb[30].mxu1  ;;  %v2038_v19 = vsel %vm1615_vm0, %v10205_v28, -inf  ;;  %v10225_v60 = vsel %vm10207_vm7, %v1690_v30, -1e+30 }
 0x305   : > { %v10220_v49 = vsel %vm10199_vm6, %v7679_v39, -1e+30  ;;  %v1693_v47 = vpop.f32.mrb[31].mxu1  ;;  %v2032_v29 = vsel %vm1615_vm0, %v10225_v60, -inf }
 0x306   : > { %2039 = vmax.xlane.f32.xlu0 %v2038_v19  ;;  %v2041_v16 = vsel %vm1615_vm0, %v10220_v49, -inf  ;;  %v10231_v40 = vsel %vm10211_vm8, %v1693_v47, -1e+30 }
 0x307   : > { %2042 = vmax.xlane.f32.xlu1 %v2041_v16  ;;  %v2035_v45 = vsel %vm1615_vm0, %v10231_v40, -inf }
 0x30a   : > { %2033 = vmax.xlane.f32.xlu0 %v2032_v29 }
 0x30b   : > { %2036 = vmax.xlane.f32.xlu1 %v2035_v45 }
 0x31a   : > { %v7690_v11 = vpop.f32.mrb[32].mxu1 }
 0x31b   : > { %v10242_v37 = vsel %vm10148_vm1, %v7690_v11, -1e+30  ;;  %v1763_v50 = vpop.f32.mrb[33].mxu1 }
 0x31c   : > { %v7691_v51 = vpop.f32.mrb[34].mxu1  ;;  %v2050_v63 = vsel %vm1615_vm0, %v10242_v37, -inf  ;;  %v10248_v2 = vsel %vm10153_vm2, %v1763_v50, -1e+30 }
 0x31d   : > { %v10252_v20 = vsel %vm10157_vm3, %v7691_v51, -1e+30  ;;  %2051 = vmax.xlane.f32.xlu0 %v2050_v63  ;;  %v1766_v17 = vpop.f32.mrb[35].mxu1  ;;  %v2044_v18 = vsel %vm1615_vm0, %v10248_v2, -inf }
 0x31e   : > { %v2053_v15 = vsel %vm1615_vm0, %v10252_v20, -inf  ;;  %v10258_v41 = vsel %vm10165_vm4, %v1766_v17, -1e+30 }
 0x31f   : > { %2054 = vmax.xlane.f32.xlu1 %v2053_v15  ;;  %v2047_v30 = vsel %vm1615_vm0, %v10258_v41, -inf }
 0x321   : > { %2045 = vmax.xlane.f32.xlu0 %v2044_v18 }
 0x322   : > { %v7694_v6 = vpop.f32.mrb[36].mxu1 }
 0x323   : > { %v10266_v39 = vsel %vm10192_vm5, %v7694_v6, -1e+30  ;;  %v1779_v19 = vpop.f32.mrb[37].mxu1  ;;  %2048 = vmax.xlane.f32.xlu1 %v2047_v30 }
 0x324   : > { %v7695_v47 = vpop.f32.mrb[38].mxu1  ;;  %v2062_v10 = vsel %vm1615_vm0, %v10266_v39, -inf  ;;  %v10272_v16 = vsel %vm10207_vm7, %v1779_v19, -1e+30 }
 0x325   : > { %v10276_v29 = vsel %vm10199_vm6, %v7695_v47, -1e+30  ;;  %2063 = vmax.xlane.f32.xlu0 %v2062_v10  ;;  %v1782_v45 = vpop.f32.mrb[39].mxu1  ;;  %v2056_v3 = vsel %vm1615_vm0, %v10272_v16, -inf }
 0x326   : > { %v2065_v55 = vsel %vm1615_vm0, %v10276_v29, -inf  ;;  %v10282_v61 = vsel %vm10211_vm8, %v1782_v45, -1e+30 }
 0x327   : > { %2066 = vmax.xlane.f32.xlu1 %v2065_v55  ;;  %v2059_v11 = vsel %vm1615_vm0, %v10282_v61, -inf }
 0x329   : > { %2057 = vmax.xlane.f32.xlu0 %v2056_v3 }
 0x32b   : > { %2060 = vmax.xlane.f32.xlu1 %v2059_v11 }
 0x33a   : > { %v7706_v50 = vpop.f32.mrb[40].mxu1 }
 0x33b   : > { %v10290_v51 = vsel %vm10148_vm1, %v7706_v50, -1e+30  ;;  %v1852_v63 = vpop.f32.mrb[41].mxu1 }
 0x33c   : > { %2706 = vrot.lane.b32.xlu1 %v9937_v14, %s9379_s21  ;;  %v7707_v17 = vpop.f32.mrb[42].mxu1  ;;  %v2074_v15 = vsel %vm1615_vm0, %v10290_v51, -inf  ;;  %v10298_v18 = vsel %vm10153_vm2, %v1852_v63, -1e+30 }
 0x33d   : > { %2075 = vmax.xlane.f32.xlu0 %v2074_v15  ;;  %v1855_v6 = vpop.f32.mrb[43].mxu1  ;;  %v2068_v30 = vsel %vm1615_vm0, %v10298_v18, -inf  ;;  %v10306_v3 = vsel %vm10157_vm3, %v7707_v17, -1e+30 }
 0x33e   : > { %v2077_v63 = vsel %vm1615_vm0, %v10306_v3, -inf  ;;  %v10312_v15 = vsel %vm10165_vm4, %v1855_v6, -1e+30 }
 0x341   : > { %2069 = vmax.xlane.f32.xlu0 %v2068_v30 }
 0x342   : > { %v7710_v19 = vpop.f32.mrb[44].mxu1 }
 0x343   : > { %v1868_v47 = vpop.f32.mrb[45].mxu1 }
 0x344   : > { %v7711_v10 = vpop.f32.mrb[46].mxu1 }
 0x345   : > { %v1871_v45 = vpop.f32.mrb[47].mxu1  ;;  %v10318_v44 = vsel %vm10199_vm6, %v7711_v10, -1e+30 }
 0x346   : > { %v2089_v27 = vsel %vm1615_vm0, %v10318_v44, -inf  ;;  %v10324_v6 = vsel %vm10211_vm8, %v1871_v45, -1e+30  ;;  %v10344_v45 = vpop.permute.xlu0 %2700 }
 0x347   : > { %13434 = vst [vmem:[#allocation13_spill] sm:$0xff] %v10344_v45 }
 0x357   : > { %2704 = vrot.lane.b32.xlu0 %v9933_v38, %s9379_s21  ;;  %v2071_v38 = vsel %vm1615_vm0, %v10312_v15, -inf }
 0x35a   : > { %v7722_v14 = vpop.f32.mrb[48].mxu1 }
 0x35b   : > { %v1941_v55 = vpop.f32.mrb[49].mxu1 }
 0x35c   : > { %v7723_v11 = vpop.f32.mrb[50].mxu1  ;;  %v10386_v26 = vsel %vm10153_vm2, %v1941_v55, -1e+30 }
 0x35d   : > { %v1944_v50 = vpop.f32.mrb[51].mxu1  ;;  %v10330_v52 = vsel %vm10157_vm3, %v7723_v11, -1e+30 }
 0x35e   : > { %v2101_v10 = vsel %vm1615_vm0, %v10330_v52, -inf  ;;  %v10338_v32 = vsel %vm10165_vm4, %v1944_v50, -1e+30 }
 0x35f   : > { %v2095_v11 = vsel %vm1615_vm0, %v10338_v32, -inf }
 0x360   : > { %2078 = vmax.xlane.f32.xlu1 %v2077_v63  ;;  %v2083_v63 = vsel %vm1615_vm0, %v10324_v6, -inf }
 0x362   : > { %v7726_v30 = vpop.f32.mrb[52].mxu1 }
 0x363   : > { %v1957_v24 = vpop.f32.mrb[53].mxu1 }
 0x364   : > { %2072 = vmax.xlane.f32.xlu1 %v2071_v38  ;;  %v7727_v17 = vpop.f32.mrb[54].mxu1  ;;  %v10334_v38 = vpop.permute.xlu1 %2942 }
 0x365   : > { %v1960_v22 = vpop.f32.mrb[55].mxu1  ;;  %13433 = vst [vmem:[#allocation12_spill] sm:$0xff] %v10334_v38 }
 0x368   : > { %2090 = vmax.xlane.f32.xlu1 %v2089_v27  ;;  %v10342_v27 = vsel %vm10192_vm5, %v7710_v19, -1e+30  ;;  %v10354_v50 = vpop.permute.xlu1 %2702  ;;  %v10360_v19 = vpop.permute.xlu0 %2712 }
 0x369   : > { %v2086_v9 = vsel %vm1615_vm0, %v10342_v27, -inf  ;;  %13435 = vst [vmem:[#allocation14_spill] sm:$0xff] %v10354_v50 }
 0x36c   : > { %2084 = vmax.xlane.f32.xlu1 %v2083_v63  ;;  %v10350_v63 = vsel %vm10199_vm6, %v7727_v17, -1e+30  ;;  %v10366_v17 = vsel %vm10211_vm8, %v1960_v22, -1e+30  ;;  %v10370_v57 = vpop.permute.xlu1 %2714 }
 0x36d   : > { %v2113_v13 = vsel %vm1615_vm0, %v10350_v63, -inf  ;;  %13436 = vst [vmem:[#allocation15_spill] sm:$0xff] %v10370_v57  ;;  %v2107_v38 = vsel %vm1615_vm0, %v10366_v17, -inf }
 0x370   : > { %2102 = vmax.xlane.f32.xlu1 %v2101_v10  ;;  %v10358_v10 = vsel %vm10207_vm7, %v1868_v47, -1e+30  ;;  %v10374_v47 = vsel %vm10148_vm1, %v7722_v14, -1e+30  ;;  %v2092_v14 = vsel %vm1615_vm0, %v10386_v26, -inf }
 0x371   : > { %v2098_v22 = vsel %vm1615_vm0, %v10374_v47, -inf }
 0x374   : > { %2096 = vmax.xlane.f32.xlu1 %v2095_v11  ;;  %v2080_v11 = vsel %vm1615_vm0, %v10358_v10, -inf }
 0x376   : > { %2087 = vmax.xlane.f32.xlu0 %v2086_v9  ;;  %v10376_v9 = vpop.permute.xlu0 %2716 }
 0x377   : > { %13437 = vst [vmem:[#allocation66_spill] sm:$0xff] %v10376_v9 }
 0x378   : > { %2114 = vmax.xlane.f32.xlu1 %v2113_v13  ;;  %v10382_v13 = vpop.permute.xlu1 %2825 }
 0x37a   : > { %2081 = vmax.xlane.f32.xlu0 %v2080_v11  ;;  %v10388_v53 = vpop.permute.xlu0 %2718 }
 0x37b   : > { %13438 = vst [vmem:[#allocation67_spill] sm:$0xff] %v10388_v53 }
 0x37c   : > { %2108 = vmax.xlane.f32.xlu1 %v2107_v38  ;;  %v10392_v11 = vpop.permute.xlu1 %2938  ;;  %v10396_v38 = vsel %vm10192_vm5, %v7726_v30, -1e+30 }
 0x37d   : > { %13439 = vst [vmem:[#allocation68_spill] sm:$0xff] %v10392_v11  ;;  %v2110_v31 = vsel %vm1615_vm0, %v10396_v38, -inf }
 0x37e   : > { %2099 = vmax.xlane.f32.xlu0 %v2098_v22  ;;  %v10398_v50 = vpop.permute.xlu0 %2827  ;;  %v10406_v22 = vsel %vm10207_vm7, %v1957_v24, -1e+30 }
 0x37f   : > { %13440 = vst [vmem:[#allocation69_spill] sm:$0xff] %v10398_v50  ;;  %v2104_v21 = vsel %vm1615_vm0, %v10406_v22, -inf }
 0x380   : > { %v10402_v55 = vpop.permute.xlu1 %2940 }
 0x381   : > { %13441 = vst [vmem:[#allocation70_spill] sm:$0xff] %v10402_v55 }
 0x382   : > { %2093 = vmax.xlane.f32.xlu0 %v2092_v14  ;;  %v10408_v45 = vpop.permute.xlu0 %2829 }
 0x383   : > { %13442 = vst [vmem:[#allocation71_spill] sm:$0xff] %v10408_v45 }
 0x386   : > { %2111 = vmax.xlane.f32.xlu0 %v2110_v31 }
 0x38a   : > { %v2028_v30 = vpop.xlane.xlu1 %2027  ;;  %2105 = vmax.xlane.f32.xlu0 %v2104_v21 }
 0x38b   : > { %v2118_v14 = vsub.f32 %v10163_v8, %v2028_v30  ;;  %v2022_v50 = vpop.xlane.xlu0 %2021 }
 0x38c   : > { %v2116_v11 = vsub.f32 %v10171_v35, %v2022_v50 }
 0x38d   : > { %v2152_v53 = vmul.f32 1.442695, %v2118_v14 }
 0x38e   : > { %v2148_v9 = vmul.f32 1.442695, %v2116_v11  ;;  %v2031_v55 = vpop.xlane.xlu1 %2030 }
 0x38f   : > { %8700 = vpow2.f32 %v2152_v53  ;;  %v2119_v24 = vsub.f32 %v10179_v42, %v2031_v55  ;;  %v2025_v36 = vpop.xlane.xlu0 %2024 }
 0x390   : > { %v2117_v31 = vsub.f32 %v10186_v54, %v2025_v36  ;;  %8702 = vpow2.f32 %v2148_v9 }
 0x391   : > { %v2154_v45 = vmul.f32 1.442695, %v2119_v24 }
 0x392   : > { %v2150_v57 = vmul.f32 1.442695, %v2117_v31 }
 0x393   : > { %8704 = vpow2.f32 %v2154_v45  ;;  %v2040_v7 = vpop.xlane.xlu0 %2039 }
 0x394   : > { %v2122_v21 = vsub.f32 %v10205_v28, %v2040_v7  ;;  %v2043_v8 = vpop.xlane.xlu1 %2042  ;;  %8706 = vpow2.f32 %v2150_v57 }
 0x395   : > { %v2123_v35 = vsub.f32 %v10220_v49, %v2043_v8  ;;  %v1341_v49 = vpop.f32.mrb[104].mxu0 }
 0x396   : > { %v2160_v50 = vmul.f32 1.442695, %v2122_v21 }
 0x397   : > { %v2162_v11 = vmul.f32 1.442695, %v2123_v35  ;;  %v2034_v30 = vpop.xlane.xlu0 %2033 }
 0x398   : > { %8708 = vpow2.f32 %v2160_v50  ;;  %v2120_v53 = vsub.f32 %v10225_v60, %v2034_v30  ;;  %v2037_v42 = vpop.xlane.xlu1 %2036  ;;  %v1343_v60 = vpop.f32.mrb[105].mxu0 }
 0x399   : > { %v10419_v55 = vpop.eup %8700  ;;  %8710 = vpow2.f32 %v2162_v11  ;;  %v2121_v54 = vsub.f32 %v10231_v40, %v2037_v42  ;;  %v1345_v14 = vpop.f32.mrb[106].mxu0 }
 0x39a   : > { %v2156_v36 = vmul.f32 1.442695, %v2120_v53  ;;  %v2218_v7 = vsel %vm1615_vm0, %v10419_v55, 0.0  ;;  %v10424_v28 = vpop.eup %8702  ;;  %v10434_v31 = vpack.c.bf16 %v1345_v14, %v1341_v49  ;;  %v1347_v21 = vpop.f32.mrb[107].mxu0 }
 0x39b   : > { %v2158_v57 = vmul.f32 1.442695, %v2121_v54  ;;  %2219 = vadd.xlane.f32.xlu0 %v2218_v7  ;;  %v2212_v9 = vsel %vm1615_vm0, %v10424_v28, 0.0  ;;  %v10436_v8 = vpack.c.bf16 %v1347_v21, %v1343_v60  ;;  %v1351_v35 = vpop.f32.mrb[108].mxu0 }
 0x39c   : > { %8712 = vpow2.f32 %v2156_v36  ;;  %13443 = vst [vmem:[#allocation72_spill] sm:$0xff] %v10434_v31  ;;  %v1353_v50 = vpop.f32.mrb[109].mxu0  ;;  %7728 = vmatprep.subr.bf16.mxu1 %v10434_v31 }
 0x39d   : > { %v10426_v45 = vpop.eup %8704  ;;  %8714 = vpow2.f32 %v2158_v57  ;;  %13444 = vst [vmem:[#allocation73_spill] sm:$0xff] %v10436_v8  ;;  %v1355_v53 = vpop.f32.mrb[110].mxu0  ;;  %7729 = vmatpush3.bf16.msra.mxu1 %v10434_v31 }
 0x39e   : > { %v2221_v40 = vsel %vm1615_vm0, %v10426_v45, 0.0  ;;  %v10432_v24 = vpop.eup %8706  ;;  %v10448_v36 = vpack.c.bf16 %v1355_v53, %v1351_v35  ;;  %v1357_v7 = vpop.f32.mrb[111].mxu0 }
 0x39f   : > { %2213 = vadd.xlane.f32.xlu0 %v2212_v9  ;;  %2222 = vadd.xlane.f32.xlu1 %v2221_v40  ;;  %v2215_v30 = vsel %vm1615_vm0, %v10432_v24, 0.0  ;;  %v10450_v57 = vpack.c.bf16 %v1357_v7, %v1353_v50  ;;  %v1361_v49 = vpop.f32.mrb[112].mxu0 }
 0x3a0   : > { %13445 = vst [vmem:[#allocation74_spill] sm:$0xff] %v10448_v36  ;;  %v1363_v60 = vpop.f32.mrb[113].mxu0  ;;  %7730 = vmatprep.subr.bf16.mxu1 %v10448_v36 }
 0x3a1   : > { %13446 = vst [vmem:[#allocation75_spill] sm:$0xff] %v10450_v57  ;;  %v1365_v14 = vpop.f32.mrb[114].mxu0  ;;  %7731 = vmatpush3.bf16.msra.mxu1 %v10448_v36 }
 0x3a2   : > { %v10439_v11 = vpop.eup %8708  ;;  %v10462_v50 = vpack.c.bf16 %v1365_v14, %v1361_v49 }
 0x3a3   : > { %v10444_v42 = vpop.eup %8710  ;;  %2216 = vadd.xlane.f32.xlu1 %v2215_v30  ;;  %v2230_v54 = vsel %vm1615_vm0, %v10439_v11, 0.0  ;;  %v1367_v30 = vpop.f32.mrb[115].mxu0 }
 0x3a4   : > { %2231 = vadd.xlane.f32.xlu0 %v2230_v54  ;;  %v2233_v40 = vsel %vm1615_vm0, %v10444_v42, 0.0  ;;  %13447 = vst [vmem:[#allocation76_spill] sm:$0xff] %v10462_v50  ;;  %v10464_v53 = vpack.c.bf16 %v1367_v30, %v1363_v60  ;;  %v1371_v54 = vpop.f32.mrb[116].mxu0  ;;  %7732 = vmatprep.subr.bf16.mxu1 %v10462_v50 }
 0x3a5   : > { %v1373_v8 = vpop.f32.mrb[117].mxu0  ;;  %7733 = vmatpush3.bf16.msra.mxu1 %v10462_v50 }
 0x3a6   : > { %v10453_v9 = vpop.eup %8712  ;;  %13448 = vst [vmem:[#allocation77_spill] sm:$0xff] %v10464_v53  ;;  %v1375_v36 = vpop.f32.mrb[118].mxu0 }
 0x3a7   : > { %v10458_v21 = vpop.eup %8714  ;;  %2234 = vadd.xlane.f32.xlu1 %v2233_v40  ;;  %v2224_v35 = vsel %vm1615_vm0, %v10453_v9, 0.0  ;;  %v1377_v14 = vpop.f32.mrb[119].mxu0 }
 0x3a8   : > { %2225 = vadd.xlane.f32.xlu0 %v2224_v35  ;;  %v2227_v57 = vsel %vm1615_vm0, %v10458_v21, 0.0  ;;  %v1381_v35 = vpop.f32.mrb[120].mxu0 }
 0x3a9   : > { %v1383_v53 = vpop.f32.mrb[121].mxu0 }
 0x3aa   : > { %v2052_v7 = vpop.xlane.xlu0 %2051  ;;  %v1385_v48 = vpop.f32.mrb[122].mxu0 }
 0x3ab   : > { %v2126_v40 = vsub.f32 %v10242_v37, %v2052_v7  ;;  %2228 = vadd.xlane.f32.xlu1 %v2227_v57  ;;  %v1387_v46 = vpop.f32.mrb[123].mxu0 }
 0x3ac   : > { %v2055_v49 = vpop.xlane.xlu1 %2054  ;;  %v1391_v57 = vpop.f32.mrb[124].mxu0 }
 0x3ad   : > { %v2168_v31 = vmul.f32 1.442695, %v2126_v40  ;;  %v2127_v60 = vsub.f32 %v10252_v20, %v2055_v49  ;;  %v1393_v1 = vpop.f32.mrb[125].mxu0 }
 0x3ae   : > { %v2046_v30 = vpop.xlane.xlu0 %2045  ;;  %v1395_v49 = vpop.f32.mrb[126].mxu0 }
 0x3af   : > { %8716 = vpow2.f32 %v2168_v31  ;;  %v2170_v33 = vmul.f32 1.442695, %v2127_v60  ;;  %v2124_v12 = vsub.f32 %v10248_v2, %v2046_v30  ;;  %v10475_v31 = vpack.c.bf16 %v1375_v36, %v1371_v54  ;;  %v1397_v2 = vpop.f32.mrb[127].mxu0 }
 0x3b0   : > { %v2049_v34 = vpop.xlane.xlu1 %2048  ;;  %v10477_v60 = vpack.c.bf16 %v1377_v14, %v1373_v8 }
 0x3b1   : > { %8718 = vpow2.f32 %v2170_v33  ;;  %v2164_v50 = vmul.f32 1.442695, %v2124_v12  ;;  %v2125_v37 = vsub.f32 %v10258_v41, %v2049_v34  ;;  %13449 = vst [vmem:[#allocation78_spill] sm:$0xff] %v10475_v31  ;;  %v1401_v12 = vpop.f32.mrb[128].mxu0  ;;  %7734 = vmatprep.subr.bf16.mxu1 %v10475_v31 }
 0x3b2   : > { %v2064_v7 = vpop.xlane.xlu0 %2063  ;;  %13450 = vst [vmem:[#allocation79_spill] sm:$0xff] %v10477_v60  ;;  %v1403_v41 = vpop.f32.mrb[129].mxu0  ;;  %7735 = vmatpush3.bf16.msra.mxu1 %v10475_v31 }
 0x3b3   : > { %8720 = vpow2.f32 %v2164_v50  ;;  %v2166_v40 = vmul.f32 1.442695, %v2125_v37  ;;  %v2130_v20 = vsub.f32 %v10266_v39, %v2064_v7  ;;  %v1405_v37 = vpop.f32.mrb[130].mxu0 }
 0x3b4   : > { %v2067_v5 = vpop.xlane.xlu1 %2066  ;;  %v1407_v8 = vpop.f32.mrb[131].mxu0 }
 0x3b5   : > { %8722 = vpow2.f32 %v2166_v40  ;;  %v2176_v30 = vmul.f32 1.442695, %v2130_v20  ;;  %v2131_v33 = vsub.f32 %v10276_v29, %v2067_v5  ;;  %v1411_v29 = vpop.f32.mrb[132].mxu0 }
 0x3b6   : > { %v2058_v34 = vpop.xlane.xlu0 %2057  ;;  %v1413_v40 = vpop.f32.mrb[133].mxu0 }
 0x3b7   : > { %8724 = vpow2.f32 %v2176_v30  ;;  %v2178_v50 = vmul.f32 1.442695, %v2131_v33  ;;  %v2128_v39 = vsub.f32 %v10272_v16, %v2058_v34  ;;  %v10490_v30 = vpack.c.bf16 %v1385_v48, %v1381_v35  ;;  %v1415_v34 = vpop.f32.mrb[134].mxu0 }
 0x3b8   : > { %v2061_v36 = vpop.xlane.xlu1 %2060  ;;  %v10492_v33 = vpack.c.bf16 %v1387_v46, %v1383_v53  ;;  %v1417_v60 = vpop.f32.mrb[135].mxu0  ;;  %v10506_v48 = vpack.c.bf16 %v1415_v34, %v1411_v29 }
 0x3b9   : > { %v10483_v54 = vpop.eup %8716  ;;  %8726 = vpow2.f32 %v2178_v50  ;;  %v2172_v14 = vmul.f32 1.442695, %v2128_v39  ;;  %v2129_v5 = vsub.f32 %v10282_v61, %v2061_v36  ;;  %v10496_v39 = vpack.c.bf16 %v1395_v49, %v1391_v57  ;;  %v1421_v53 = vpop.f32.mrb[136].mxu0  ;;  %7744 = vmatprep.subr.bf16.mxu0 %v10490_v30 }
 0x3ba   : > { %v2242_v7 = vsel %vm1615_vm0, %v10483_v54, 0.0  ;;  %13451 = vst [vmem:[#allocation80_spill] sm:$0xff] %v10492_v33  ;;  %v10498_v61 = vpack.c.bf16 %v1397_v2, %v1393_v1  ;;  %v10500_v36 = vpack.c.bf16 %v1405_v37, %v1401_v12  ;;  %13456 = vst [vmem:[#allocation85_spill] sm:$0xff] %v10506_v48  ;;  %v10508_v46 = vpack.c.bf16 %v1417_v60, %v1413_v40  ;;  %v1423_v35 = vpop.f32.mrb[137].mxu0 }
 0x3bb   : > { %v10488_v20 = vpop.eup %8718  ;;  %8728 = vpow2.f32 %v2172_v14  ;;  %v2174_v16 = vmul.f32 1.442695, %v2129_v5  ;;  %2243 = vadd.xlane.f32.xlu0 %v2242_v7  ;;  %13452 = vst [vmem:[#allocation81_spill] sm:$0xff] %v10496_v39  ;;  %v10504_v14 = vpack.c.bf16 %v1407_v8, %v1403_v41  ;;  %7745 = vmatpush3.bf16.msra.mxu0 %v10490_v30  ;;  %v1425_v49 = vpop.f32.mrb[138].mxu0 }
 0x3bc   : > { %v2245_v50 = vsel %vm1615_vm0, %v10488_v20, 0.0  ;;  %13453 = vst [vmem:[#allocation82_spill] sm:$0xff] %v10498_v61  ;;  %13454 = vst [vmem:[#allocation83_spill] sm:$0xff] %v10500_v36  ;;  %7746 = vmatprep.subr.bf16.mxu0 %v10496_v39  ;;  %v10519_v60 = vpack.c.bf16 %v1425_v49, %v1421_v53  ;;  %v1427_v12 = vpop.f32.mrb[139].mxu0 }
 0x3bd   : > { %v10502_v31 = vpop.eup %8720  ;;  %8730 = vpow2.f32 %v2174_v16  ;;  %2246 = vadd.xlane.f32.xlu1 %v2245_v50  ;;  %13455 = vst [vmem:[#allocation84_spill] sm:$0xff] %v10504_v14  ;;  %13457 = vst [vmem:[#allocation86_spill] sm:$0xff] %v10508_v46  ;;  %v10523_v37 = vpack.c.bf16 %v1427_v12, %v1423_v35  ;;  %v1431_v8 = vpop.f32.mrb[140].mxu0 }
 0x3be   : > { %v2236_v1 = vsel %vm1615_vm0, %v10502_v31, 0.0  ;;  %v1433_v29 = vpop.f32.mrb[141].mxu0  ;;  %7760 = vmatprep.subr.bf16.mxu1 %v10519_v60 }
 0x3bf   : > { %v10514_v57 = vpop.eup %8722  ;;  %2237 = vadd.xlane.f32.xlu0 %v2236_v1  ;;  %13458 = vst [vmem:[#allocation87_spill] sm:$0xff] %v10523_v37  ;;  %7747 = vmatpush3.bf16.msra.mxu0 %v10496_v39  ;;  %v1435_v40 = vpop.f32.mrb[142].mxu0 }
 0x3c0   : > { %v2239_v2 = vsel %vm1615_vm0, %v10514_v57, 0.0  ;;  %7748 = vmatprep.subr.bf16.mxu0 %v10500_v36  ;;  %v10534_v34 = vpack.c.bf16 %v1435_v40, %v1431_v8  ;;  %v1437_v50 = vpop.f32.mrb[143].mxu0 }
 0x3c1   : > { %v10521_v41 = vpop.eup %8724  ;;  %2240 = vadd.xlane.f32.xlu1 %v2239_v2  ;;  %v10538_v1 = vpack.c.bf16 %v1437_v50, %v1433_v29  ;;  %v1441_v35 = vpop.f32.mrb[144].mxu0 }
 0x3c2   : > { %v2254_v5 = vsel %vm1615_vm0, %v10521_v41, 0.0  ;;  %v1443_v2 = vpop.f32.mrb[145].mxu0 }
 0x3c3   : > { %v10529_v7 = vpop.eup %8726  ;;  %2255 = vadd.xlane.f32.xlu0 %v2254_v5  ;;  %13459 = vst [vmem:[#allocation88_spill] sm:$0xff] %v10538_v1  ;;  %7749 = vmatpush3.bf16.msra.mxu0 %v10500_v36  ;;  %v1445_v5 = vpop.f32.mrb[146].mxu0 }
 0x3c4   : > { %v2257_v16 = vsel %vm1615_vm0, %v10529_v7, 0.0  ;;  %7750 = vmatprep.subr.bf16.mxu0 %v10506_v48  ;;  %v10548_v40 = vpack.c.bf16 %v1445_v5, %v1441_v35  ;;  %v1447_v29 = vpop.f32.mrb[147].mxu0 }
 0x3c5   : > { %v10536_v53 = vpop.eup %8728  ;;  %2258 = vadd.xlane.f32.xlu1 %v2257_v16  ;;  %v10550_v16 = vpack.c.bf16 %v1447_v29, %v1443_v2  ;;  %v1451_v50 = vpop.f32.mrb[148].mxu0 }
 0x3c6   : > { %v2248_v49 = vsel %vm1615_vm0, %v10536_v53, 0.0  ;;  %v1453_v46 = vpop.f32.mrb[149].mxu0 }
 0x3c7   : > { %v10543_v12 = vpop.eup %8730  ;;  %2249 = vadd.xlane.f32.xlu0 %v2248_v49  ;;  %13460 = vst [vmem:[#allocation89_spill] sm:$0xff] %v10550_v16  ;;  %7751 = vmatpush3.bf16.msra.mxu0 %v10506_v48  ;;  %v1455_v49 = vpop.f32.mrb[150].mxu0 }
 0x3c8   : > { %v2251_v8 = vsel %vm1615_vm0, %v10543_v12, 0.0  ;;  %v10554_v61 = vpack.c.bf16 %v1455_v49, %v1451_v50 }
 0x3c9   : > { %2252 = vadd.xlane.f32.xlu1 %v2251_v8  ;;  %v1457_v8 = vpop.f32.mrb[151].mxu0 }
 0x3ca   : > { %v2076_v1 = vpop.xlane.xlu0 %2075  ;;  %v10559_v29 = vpack.c.bf16 %v1457_v8, %v1453_v46  ;;  %v1461_v16 = vpop.f32.mrb[152].mxu0 }
 0x3cb   : > { %v2134_v14 = vsub.f32 %v10290_v51, %v2076_v1  ;;  %v1463_v51 = vpop.f32.mrb[153].mxu0 }
 0x3cc   : > { %13462 = vst [vmem:[#allocation91_spill] sm:$0xff] %v10559_v29  ;;  %v1465_v1 = vpop.f32.mrb[154].mxu0 }
 0x3cd   : > { %v2184_v33 = vmul.f32 1.442695, %v2134_v14  ;;  %v10563_v50 = vpack.c.bf16 %v1465_v1, %v1461_v16  ;;  %v1467_v14 = vpop.f32.mrb[155].mxu0 }
 0x3ce   : > { %v2070_v37 = vpop.xlane.xlu0 %2069 }
 0x3cf   : > { %8732 = vpow2.f32 %v2184_v33  ;;  %v2132_v35 = vsub.f32 %v10298_v18, %v2070_v37  ;;  %v10567_v18 = vpack.c.bf16 %v1467_v14, %v1463_v51  ;;  %v1471_v37 = vpop.f32.mrb[156].mxu0  ;;  %7776 = vmatprep.subr.bf16.mxu0 %v10563_v50 }
 0x3d0   : > { %v1473_v46 = vpop.f32.mrb[157].mxu0 }
 0x3d1   : > { %v2180_v5 = vmul.f32 1.442695, %v2132_v35  ;;  %13464 = vst [vmem:[#allocation93_spill] sm:$0xff] %v10567_v18  ;;  %v1475_v35 = vpop.f32.mrb[158].mxu0 }
 0x3d3   : > { %8734 = vpow2.f32 %v2180_v5  ;;  %v10572_v5 = vpack.c.bf16 %v1475_v35, %v1471_v37 }
 0x3d9   : > { %v10557_v2 = vpop.eup %8732 }
 0x3da   : > { %13461 = vst [vmem:[#allocation90_spill] sm:$0xff] %v10557_v2  ;;  %v2266_v48 = vsel %vm1615_vm0, %v10557_v2, 0.0  ;;  %v10582_v2 = vpop.permute.xlu1 %2706 }
 0x3db   : > { %2267 = vadd.xlane.f32.xlu0 %v2266_v48  ;;  %v1477_v48 = vpop.f32.mrb[159].mxu0  ;;  %13467 = vst [vmem:[#allocation96_spill] sm:$0xff] %v10582_v2 }
 0x3dc   : > { %v10574_v8 = vpack.c.bf16 %v1477_v48, %v1473_v46  ;;  %v1481_v16 = vpop.f32.mrb[160].mxu0 }
 0x3dd   : > { %v10565_v33 = vpop.eup %8734  ;;  %v1483_v1 = vpop.f32.mrb[161].mxu0 }
 0x3de   : > { %13463 = vst [vmem:[#allocation92_spill] sm:$0xff] %v10565_v33  ;;  %v2260_v49 = vsel %vm1615_vm0, %v10565_v33, 0.0  ;;  %13465 = vst [vmem:[#allocation94_spill] sm:$0xff] %v10574_v8  ;;  %v1485_v29 = vpop.f32.mrb[162].mxu0 }
 0x3df   : > { %2261 = vadd.xlane.f32.xlu0 %v2260_v49  ;;  %v10576_v36 = vpack.c.bf16 %v1485_v29, %v1481_v16  ;;  %v1487_v51 = vpop.f32.mrb[163].mxu0 }
 0x3e0   : > { %v10578_v14 = vpack.c.bf16 %v1487_v51, %v1483_v1  ;;  %v1491_v18 = vpop.f32.mrb[164].mxu0 }
 0x3e1   : > { %v10580_v39 = vpop.f32.mrb[165].mxu0 }
 0x3e2   : > { %13466 = vst [vmem:[#allocation95_spill] sm:$0xff] %v10578_v14  ;;  %v1495_v49 = vpop.f32.mrb[166].mxu0 }
 0x3e3   : > { %v10584_v33 = vpack.c.bf16 %v1495_v49, %v1491_v18 }
 0x3ed   : > { %v2079_v37 = vpop.xlane.xlu1 %2078 }
 0x3ee   : > { %v2135_v46 = vsub.f32 %v10306_v3, %v2079_v37  ;;  %v10594_v37 = vpop.permute.xlu0 %2704 }
 0x3ef   : > { %13468 = vst [vmem:[#allocation97_spill] sm:$0xff] %v10594_v37 }
 0x3f0   : > { %v2186_v35 = vmul.f32 1.442695, %v2135_v46 }
 0x3f1   : > { %v2073_v48 = vpop.xlane.xlu1 %2072 }
 0x3f2   : > { %8736 = vpow2.f32 %v2186_v35  ;;  %v2133_v29 = vsub.f32 %v10312_v15, %v2073_v48 }
 0x3f4   : > { %v2182_v16 = vmul.f32 1.442695, %v2133_v29 }
 0x3f5   : > { %v2091_v8 = vpop.xlane.xlu1 %2090 }
 0x3f6   : > { %8738 = vpow2.f32 %v2182_v16  ;;  %v2139_v1 = vsub.f32 %v10318_v44, %v2091_v8 }
 0x3f8   : > { %v2194_v51 = vmul.f32 1.442695, %v2139_v1 }
 0x3f9   : > { %v2085_v14 = vpop.xlane.xlu1 %2084 }
 0x3fa   : > { %8740 = vpow2.f32 %v2194_v51  ;;  %v2137_v2 = vsub.f32 %v10324_v6, %v2085_v14 }
 0x3fc   : > { %v10590_v18 = vpop.eup %8736  ;;  %v2190_v49 = vmul.f32 1.442695, %v2137_v2 }
 0x3fd   : > { %v2269_v3 = vsel %vm1615_vm0, %v10590_v18, 0.0  ;;  %v2103_v16 = vpop.xlane.xlu1 %2102 }
 0x3fe   : > { %8742 = vpow2.f32 %v2190_v49  ;;  %2270 = vadd.xlane.f32.xlu1 %v2269_v3  ;;  %v2143_v3 = vsub.f32 %v10330_v52, %v2103_v16 }
 0x400   : > { %v10596_v15 = vpop.eup %8738 }
 0x401   : > { %v2263_v44 = vsel %vm1615_vm0, %v10596_v15, 0.0 }
 0x402   : > { %2264 = vadd.xlane.f32.xlu1 %v2263_v44 }
 0x403   : > { %v2088_v8 = vpop.xlane.xlu0 %2087 }
 0x404   : > { %v10600_v46 = vpop.eup %8740  ;;  %v2138_v6 = vsub.f32 %v10342_v27, %v2088_v8  ;;  %v2097_v8 = vpop.xlane.xlu1 %2096 }
 0x405   : > { %v2281_v2 = vsel %vm1615_vm0, %v10600_v46, 0.0 }
 0x406   : > { %v2192_v14 = vmul.f32 1.442695, %v2138_v6  ;;  %2282 = vadd.xlane.f32.xlu1 %v2281_v2 }
 0x407   : > { %v2082_v35 = vpop.xlane.xlu0 %2081 }
 0x408   : > { %v10605_v48 = vpop.eup %8742  ;;  %8744 = vpow2.f32 %v2192_v14  ;;  %v2136_v29 = vsub.f32 %v10358_v10, %v2082_v35  ;;  %v2202_v10 = vmul.f32 1.442695, %v2143_v3  ;;  %v2141_v35 = vsub.f32 %v10338_v32, %v2097_v8 }
 0x409   : > { %v2275_v1 = vsel %vm1615_vm0, %v10605_v48, 0.0 }
 0x40a   : > { %v2188_v51 = vmul.f32 1.442695, %v2136_v29  ;;  %2276 = vadd.xlane.f32.xlu1 %v2275_v1  ;;  %v2198_v52 = vmul.f32 1.442695, %v2141_v35 }
 0x40b   : > { %v2100_v49 = vpop.xlane.xlu0 %2099 }
 0x40c   : > { %8746 = vpow2.f32 %v2188_v51  ;;  %v2142_v27 = vsub.f32 %v10374_v47, %v2100_v49 }
 0x40e   : > { %v2200_v44 = vmul.f32 1.442695, %v2142_v27  ;;  %v2115_v27 = vpop.xlane.xlu1 %2114 }
 0x40f   : > { %v2094_v6 = vpop.xlane.xlu0 %2093 }
 0x410   : > { %8748 = vpow2.f32 %v2200_v44  ;;  %v2140_v2 = vsub.f32 %v10386_v26, %v2094_v6 }
 0x412   : > { %v10613_v14 = vpop.eup %8744  ;;  %v2196_v37 = vmul.f32 1.442695, %v2140_v2  ;;  %v2109_v2 = vpop.xlane.xlu1 %2108 }
 0x413   : > { %v2278_v29 = vsel %vm1615_vm0, %v10613_v14, 0.0  ;;  %v2112_v51 = vpop.xlane.xlu0 %2111 }
 0x414   : > { %8750 = vpow2.f32 %v2196_v37  ;;  %2279 = vadd.xlane.f32.xlu0 %v2278_v29 }
 0x415   : > { %8752 = vpow2.f32 %v2202_v10 }
 0x416   : > { %v10618_v47 = vpop.eup %8746  ;;  %8754 = vpow2.f32 %v2198_v52 }
 0x417   : > { %v2272_v16 = vsel %vm1615_vm0, %v10618_v47, 0.0  ;;  %v2106_v8 = vpop.xlane.xlu0 %2105 }
 0x418   : > { %2273 = vadd.xlane.f32.xlu0 %v2272_v16 }
 0x41a   : > { %v10622_v26 = vpop.eup %8748 }
 0x41b   : > { %13469 = vst [vmem:[#allocation98_spill] sm:$0xff] %v10622_v26  ;;  %v2290_v32 = vsel %vm1615_vm0, %v10622_v26, 0.0 }
 0x41c   : > { %2291 = vadd.xlane.f32.xlu1 %v2290_v32 }
 0x41e   : > { %v10626_v1 = vpop.eup %8750 }
 0x41f   : > { %13470 = vst [vmem:[#allocation99_spill] sm:$0xff] %v10626_v1  ;;  %v2284_v37 = vsel %vm1615_vm0, %v10626_v1, 0.0  ;;  %v10630_v49 = vpop.eup %8752 }
 0x420   : > { %2285 = vadd.xlane.f32.xlu1 %v2284_v37  ;;  %v2293_v3 = vsel %vm1615_vm0, %v10630_v49, 0.0  ;;  %v10634_v44 = vpop.eup %8754 }
 0x421   : > { %13471 = vst [vmem:[#allocation100_spill] sm:$0xff] %v10634_v44  ;;  %v2287_v6 = vsel %vm1615_vm0, %v10634_v44, 0.0 }
 0x424   : > { %2294 = vadd.xlane.f32.xlu1 %v2293_v3  ;;  %v2146_v3 = vsub.f32 %v10396_v38, %v2112_v51 }
 0x428   : > { %v2220_v10 = vpop.xlane.xlu0 %2219  ;;  %2288 = vadd.xlane.f32.xlu1 %v2287_v6 }
 0x42c   : > { %v2214_v35 = vpop.xlane.xlu0 %2213  ;;  %v2223_v29 = vpop.xlane.xlu1 %2222 }
 0x42d   : > { %8756 = vrcp.f32 %v2223_v29  ;;  %v2144_v29 = vsub.f32 %v10406_v22, %v2106_v8 }
 0x42e   : > { %2831 = vrot.lane.b32.xlu0 %v10055_v56, %s9379_s21  ;;  %8758 = vrcp.f32 %v2214_v35 }
 0x42f   : > { %8760 = vrcp.f32 %v2220_v10  ;;  %v2208_v10 = vmul.f32 1.442695, %v2146_v3 }
 0x430   : > { %v2217_v52 = vpop.xlane.xlu1 %2216 }
 0x431   : > { %8762 = vrcp.f32 %v2217_v52  ;;  %v2232_v16 = vpop.xlane.xlu0 %2231 }
 0x434   : > { %v2235_v32 = vpop.xlane.xlu1 %2234 }
 0x435   : > { %v2226_v37 = vpop.xlane.xlu0 %2225  ;;  %8764 = vrcp.f32 %v2235_v32 }
 0x436   : > { %8766 = vrcp.f32 %v2226_v37  ;;  %v2147_v37 = vsub.f32 %v10350_v63, %v2115_v27 }
 0x437   : > { %v8757_v26 = vpop.eup %8756  ;;  %8768 = vrcp.f32 %v2232_v16 }
 0x438   : > { %v2229_v6 = vpop.xlane.xlu1 %2228  ;;  %v8759_v44 = vpop.eup %8758  ;;  %v2343_v52 = vmul.f32 %v8757_v26, %v10426_v45  ;;  %v2210_v45 = vmul.f32 1.442695, %v2147_v37 }
 0x439   : > { %8770 = vrcp.f32 %v2229_v6  ;;  %2944 = vrot.lane.b32.xlu1 %v9972_v4, %s9379_s21  ;;  %v8761_v56 = vpop.eup %8760  ;;  %v2340_v32 = vmul.f32 %v8759_v44, %v10424_v28  ;;  %v2204_v6 = vmul.f32 1.442695, %v2144_v29 }
 0x43a   : > { %v2342_v51 = vmul.f32 %v8761_v56, %v10419_v55  ;;  %8772 = vpow2.f32 %v2208_v10 }
 0x43b   : > { %v8763_v35 = vpop.eup %8762  ;;  %8774 = vpow2.f32 %v2204_v6  ;;  %v1497_v6 = vpop.f32.mrb[167].mxu0 }
 0x43c   : > { %v2341_v38 = vmul.f32 %v8763_v35, %v10432_v24  ;;  %v2373_v1 = vpack.c.bf16 %v2343_v52, %v2342_v51  ;;  %v2145_v24 = vsub.f32 %v10366_v17, %v2109_v2  ;;  %8776 = vpow2.f32 %v2210_v45 }
 0x43e   : > { %v2372_v16 = vpack.c.bf16 %v2341_v38, %v2340_v32  ;;  %v2206_v44 = vmul.f32 1.442695, %v2145_v24 }
 0x43f   : > { %v8765_v4 = vpop.eup %8764 }
 0x440   : > { %7736 = vmatprep.mubr.msk.bf16.mxu1 %vm1615_vm0, %v2372_v16  ;;  %v8767_v3 = vpop.eup %8766  ;;  %v2347_v63 = vmul.f32 %v8765_v4, %v10444_v42  ;;  %8778 = vpow2.f32 %v2206_v44 }
 0x441   : > { %7737 = vmatmul.mubr.msk.bf16.vlgmr.msra.gmra.mrb[56].mxu1 %vm1615_vm0, %v2373_v1  ;;  %v8769_v22 = vpop.eup %8768  ;;  %v2344_v55 = vmul.f32 %v8767_v3, %v10453_v9  ;;  %v10682_v3 = vpack.c.bf16 %v1497_v6, %v10580_v39 }
 0x442   : > { %7761 = vmatpush3.bf16.msra.mxu1 %v10519_v60  ;;  %v2346_v27 = vmul.f32 %v8769_v22, %v10439_v11 }
 0x443   : > { %v8771_v28 = vpop.eup %8770  ;;  %7762 = vmatprep.subr.bf16.mxu1 %v10534_v34  ;;  %13472 = vst [vmem:[#allocation101_spill] sm:$0xff] %v10682_v3 }
 0x444   : > { %v2345_v26 = vmul.f32 %v8771_v28, %v10458_v21  ;;  %v2375_v8 = vpack.c.bf16 %v2347_v63, %v2346_v27  ;;  %v10661_v2 = vpop.eup %8772 }
 0x445   : > { %v2302_v9 = vsel %vm1615_vm0, %v10661_v2, 0.0  ;;  %v10668_v21 = vpop.eup %8774 }
 0x446   : > { %7763 = vmatpush3.bf16.msra.mxu1 %v10534_v34  ;;  %v2374_v1 = vpack.c.bf16 %v2345_v26, %v2344_v55  ;;  %v2296_v10 = vsel %vm1615_vm0, %v10668_v21, 0.0  ;;  %v10675_v29 = vpop.eup %8776 }
 0x447   : > { %7764 = vmatprep.subr.bf16.mxu1 %v10548_v40  ;;  %v2305_v38 = vsel %vm1615_vm0, %v10675_v29, 0.0 }
 0x448   : > { %v2244_v17 = vpop.xlane.xlu0 %2243  ;;  %7740 = vmatprep.mubr.msk.bf16.mxu1 %vm1615_vm0, %v2374_v1 }
 0x449   : > { %7741 = vmatmul.mubr.msk.bf16.gmra.mrb[60].mxu1 %vm1615_vm0, %v2375_v8 }
 0x44a   : > { %7765 = vmatpush3.bf16.msra.mxu1 %v10548_v40  ;;  %v2247_v42 = vpop.xlane.xlu1 %2246  ;;  %v10679_v51 = vpop.eup %8778 }
 0x44b   : > { %7766 = vmatprep.subr.bf16.mxu1 %v10554_v61  ;;  %8780 = vrcp.f32 %v2247_v42  ;;  %v2299_v26 = vsel %vm1615_vm0, %v10679_v51, 0.0 }
 0x44c   : > { %v2238_v11 = vpop.xlane.xlu0 %2237 }
 0x44d   : > { %8782 = vrcp.f32 %v2238_v11  ;;  %2303 = vadd.xlane.f32.xlu0 %v2302_v9 }
 0x44e   : > { %8784 = vrcp.f32 %v2244_v17  ;;  %7767 = vmatpush3.bf16.msra.mxu1 %v10554_v61  ;;  %v2241_v56 = vpop.xlane.xlu1 %2240 }
 0x44f   : > { %8786 = vrcp.f32 %v2241_v56  ;;  %8224 = vmatprep.subr.msk.bf16.mxu1 %vm1615_vm0, %v10360_v19  ;;  %v13482_v56 = vld [vmem:[#allocation72_spill] sm:$0xff] }
 0x450   : > { %v2256_v35 = vpop.xlane.xlu0 %2255 }
 0x451   : > { %2297 = vadd.xlane.f32.xlu0 %v2296_v10 }
 0x452   : > { %v2259_v52 = vpop.xlane.xlu1 %2258 }
 0x453   : > { %8788 = vrcp.f32 %v2259_v52  ;;  %v13484_v52 = vld [vmem:[#allocation76_spill] sm:$0xff] }
 0x454   : > { %v2250_v32 = vpop.xlane.xlu0 %2249 }
 0x455   : > { %8790 = vrcp.f32 %v2250_v32  ;;  %2306 = vadd.xlane.f32.xlu0 %v2305_v38  ;;  %v8781_v16 = vpop.eup %8780  ;;  %v13485_v32 = vld [vmem:[#allocation78_spill] sm:$0xff] }
 0x456   : > { %8792 = vrcp.f32 %v2256_v35  ;;  %v2253_v37 = vpop.xlane.xlu1 %2252  ;;  %v2351_v45 = vmul.f32 %v8781_v16, %v10488_v20  ;;  %v13483_v35 = vld [vmem:[#allocation74_spill] sm:$0xff] }
 0x457   : > { %v8783_v4 = vpop.eup %8782  ;;  %8794 = vrcp.f32 %v2253_v37 }
 0x458   : > { %v8785_v22 = vpop.eup %8784  ;;  %v2348_v24 = vmul.f32 %v8783_v4, %v10502_v31 }
 0x459   : > { %v8787_v28 = vpop.eup %8786  ;;  %v2350_v55 = vmul.f32 %v8785_v22, %v10483_v54 }
 0x45a   : > { %v2349_v63 = vmul.f32 %v8787_v28, %v10514_v57 }
 0x45b   : > { %v2377_v1 = vpack.c.bf16 %v2351_v45, %v2350_v55  ;;  %v13487_v45 = vld [vmem:[#allocation90_spill] sm:$0xff]  ;;  %v13488_v55 = vld [vmem:[#allocation81_spill] sm:$0xff] }
 0x45c   : > { %v2376_v27 = vpack.c.bf16 %v2349_v63, %v2348_v24 }
 0x45d   : > { %2300 = vadd.xlane.f32.xlu1 %v2299_v26  ;;  %v8789_v44 = vpop.eup %8788  ;;  %v13490_v26 = vld [vmem:[#allocation15_spill] sm:$0xff] }
 0x45e   : > { %7752 = vmatprep.mubr.msk.bf16.mxu0 %vm1615_vm0, %v2376_v27  ;;  %v2355_v54 = vmul.f32 %v8789_v44, %v10529_v7  ;;  %v13480_v7 = vld [vmem:[#allocation40_spill] sm:$0xff]  ;;  %v13491_v27 = vld [vmem:[#allocation85_spill] sm:$0xff]  ;;  %v2736_v44 = vsel %vm1615_vm0, %v13490_v26, 0 }
 0x45f   : > { %v8791_v39 = vpop.eup %8790  ;;  %7753 = vmatmul.mubr.msk.bf16.vlgmr.msra.gmra.mrb[168].mxu0 %vm1615_vm0, %v2377_v1 }
 0x460   : > { %v8793_v8 = vpop.eup %8792  ;;  %7777 = vmatpush3.bf16.msra.mxu0 %v10563_v50  ;;  %v2352_v20 = vmul.f32 %v8791_v39, %v10536_v53  ;;  %v13481_v53 = vld [vmem:[#allocation44_spill] sm:$0xff] }
 0x461   : > { %v8795_v31 = vpop.eup %8794  ;;  %7778 = vmatprep.subr.bf16.mxu0 %v10572_v5  ;;  %v2354_v17 = vmul.f32 %v8793_v8, %v10521_v41 }
 0x462   : > { %v2353_v57 = vmul.f32 %v8795_v31, %v10543_v12 }
 0x463   : > { %v2379_v11 = vpack.c.bf16 %v2355_v54, %v2354_v17 }
 0x464   : > { %7779 = vmatpush3.bf16.msra.mxu0 %v10572_v5  ;;  %v2378_v42 = vpack.c.bf16 %v2353_v57, %v2352_v20 }
 0x465   : > { %7780 = vmatprep.subr.bf16.mxu0 %v10576_v36 }
 0x466   : > { %7756 = vmatprep.mubr.msk.bf16.mxu0 %vm1615_vm0, %v2378_v42 }
 0x467   : > { %7757 = vmatmul.mubr.msk.bf16.gmra.mrb[172].mxu0 %vm1615_vm0, %v2379_v11 }
 0x468   : > { %7781 = vmatpush3.bf16.msra.mxu0 %v10576_v36  ;;  %v2268_v41 = vpop.xlane.xlu0 %2267 }
 0x469   : > { %7782 = vmatprep.subr.bf16.mxu0 %v10584_v33 }
 0x46b   : > { %2926 = vrot.lane.b32.xlu0 %v9957_v0, %s9379_s21  ;;  %v13473_v0 = vld [vmem:[#allocation22_spill] sm:$0xff] }
 0x46c   : > { %7783 = vmatpush3.bf16.msra.mxu0 %v10584_v33  ;;  %v2262_v12 = vpop.xlane.xlu0 %2261 }
 0x46d   : > { %8228 = vmatprep.subr.msk.bf16.mxu0 %vm1615_vm0, %v10382_v13 }
 0x46e   : > { %2813 = vrot.lane.b32.xlu1 %v9941_v62, %s9379_s21  ;;  %v13474_v62 = vld [vmem:[#allocation28_spill] sm:$0xff] }
 0x46f   : > { %2928 = vrot.lane.b32.xlu0 %v9961_v43, %s9379_s21  ;;  %v13475_v43 = vld [vmem:[#allocation24_spill] sm:$0xff] }
 0x472   : > { %3051 = vrot.lane.b32.xlu1 %v9980_v58, %s9379_s21  ;;  %v13476_v58 = vld [vmem:[#allocation31_spill] sm:$0xff] }
 0x473   : > { %2815 = vrot.lane.b32.xlu0 %v9945_v23, %s9379_s21  ;;  %v13477_v23 = vld [vmem:[#allocation43_spill] sm:$0xff] }
 0x476   : > { %3053 = vrot.lane.b32.xlu1 %v9988_v25, %s9379_s21  ;;  %v13478_v25 = vld [vmem:[#allocation34_spill] sm:$0xff] }
 0x477   : > { %3055 = vrot.lane.b32.xlu0 %v9996_v59, %s9379_s21  ;;  %v13479_v59 = vld [vmem:[#allocation37_spill] sm:$0xff] }
 0x47a   : > { %2817 = vrot.lane.b32.xlu1 %v13473_v0, %s9379_s21 }
 0x47b   : > { %2930 = vrot.lane.b32.xlu0 %v13474_v62, %s9379_s21 }
 0x47e   : > { %2819 = vrot.lane.b32.xlu1 %v13475_v43, %s9379_s21  ;;  %v13493_v43 = vld [vmem:[#allocation67_spill] sm:$0xff] }
 0x47f   : > { %2932 = vrot.lane.b32.xlu0 %v13476_v58, %s9379_s21 }
 0x482   : > { %3057 = vrot.lane.b32.xlu1 %v13477_v23, %s9379_s21 }
 0x483   : > { %3039 = vrot.lane.b32.xlu0 %v13478_v25, %s9379_s21 }
 0x486   : > { %3041 = vrot.lane.b32.xlu1 %v13479_v59, %s9379_s21 }
 0x487   : > { %3043 = vrot.lane.b32.xlu0 %v13480_v7, %s9379_s21 }
 0x48a   : > { %3045 = vrot.lane.b32.xlu1 %v13481_v53, %s9379_s21 }
 0x48b   : > { %v2271_v9 = vpop.xlane.xlu1 %2270  ;;  %3552 = vrot.lane.b32.xlu0 %v13482_v56, %s9379_s21 }
 0x48c   : > { %8796 = vrcp.f32 %v2271_v9  ;;  %v13496_v9 = vld [vmem:[#allocation14_spill] sm:$0xff] }
 0x48d   : > { %8798 = vrcp.f32 %v2262_v12 }
 0x48e   : > { %3554 = vrot.lane.b32.xlu1 %v13483_v35, %s9379_s21  ;;  %8800 = vrcp.f32 %v2268_v41  ;;  %v13497_v35 = vld [vmem:[#allocation97_spill] sm:$0xff] }
 0x48f   : > { %v2265_v10 = vpop.xlane.xlu1 %2264  ;;  %3556 = vrot.lane.b32.xlu0 %v13484_v52, %s9379_s21 }
 0x490   : > { %8802 = vrcp.f32 %v2265_v10  ;;  %v13498_v10 = vld [vmem:[#allocation99_spill] sm:$0xff] }
 0x492   : > { %3558 = vrot.lane.b32.xlu1 %v13485_v32, %s9379_s21  ;;  %v13499_v32 = vld [vmem:[#allocation100_spill] sm:$0xff] }
 0x493   : > { %3738 = vrot.lane.b32.xlu0 %v10519_v60, %s9379_s21  ;;  %v2283_v22 = vpop.xlane.xlu1 %2282  ;;  %v13486_v60 = vld [vmem:[#allocation92_spill] sm:$0xff] }
 0x496   : > { %3742 = vrot.lane.b32.xlu1 %v10548_v40, %s9379_s21  ;;  %v8797_v38 = vpop.eup %8796 }
 0x497   : > { %3740 = vrot.lane.b32.xlu0 %v10534_v34, %s9379_s21  ;;  %v8799_v16 = vpop.eup %8798  ;;  %v2359_v4 = vmul.f32 %v8797_v38, %v10590_v18  ;;  %v13489_v18 = vld [vmem:[#allocation83_spill] sm:$0xff] }
 0x498   : > { %v8801_v37 = vpop.eup %8800  ;;  %v2356_v28 = vmul.f32 %v8799_v16, %v13486_v60  ;;  %v13500_v16 = vld [vmem:[#allocation98_spill] sm:$0xff]  ;;  %v13502_v60 = vld [vmem:[#allocation96_spill] sm:$0xff] }
 0x499   : > { %v2358_v24 = vmul.f32 %v8801_v37, %v13487_v45  ;;  %v13504_v45 = vld [vmem:[#allocation12_spill] sm:$0xff] }
 0x49a   : > { %v8803_v6 = vpop.eup %8802  ;;  %3744 = vrot.lane.b32.xlu1 %v10554_v61, %s9379_s21  ;;  %v2277_v61 = vpop.xlane.xlu1 %2276 }
 0x49b   : > { %3645 = vrot.lane.b32.xlu0 %v10490_v30, %s9379_s21  ;;  %v2357_v40 = vmul.f32 %v8803_v6, %v10596_v15  ;;  %v2381_v34 = vpack.c.bf16 %v2359_v4, %v2358_v24  ;;  %v2733_v30 = vsel %vm1615_vm0, %v10360_v19, 0  ;;  %v13492_v19 = vld [vmem:[#allocation66_spill] sm:$0xff] }
 0x49c   : > { %v2739_v17 = vsel %vm1615_vm0, %v13492_v19, 0  ;;  %v13501_v6 = vld [vmem:[#allocation70_spill] sm:$0xff] }
 0x49d   : > { %v2380_v63 = vpack.c.bf16 %v2357_v40, %v2356_v28  ;;  %v13503_v28 = vld [vmem:[#allocation69_spill] sm:$0xff]  ;;  %v2962_v40 = vsel %vm1615_vm0, %v13501_v6, 0 }
 0x49e   : > { %3647 = vrot.lane.b32.xlu1 %v13488_v55, %s9379_s21  ;;  %v2849_v24 = vsel %vm1615_vm0, %v13503_v28, 0 }
 0x49f   : > { %7768 = vmatprep.mubr.msk.bf16.mxu1 %vm1615_vm0, %v2380_v63  ;;  %3649 = vrot.lane.b32.xlu0 %v13489_v18, %s9379_s21  ;;  %v13505_v63 = vld [vmem:[#allocation71_spill] sm:$0xff] }
 0x4a0   : > { %7769 = vmatmul.mubr.msk.bf16.vlgmr.msra.gmra.mrb[64].mxu1 %vm1615_vm0, %v2381_v34  ;;  %v2852_v18 = vsel %vm1615_vm0, %v13505_v63, 0 }
 0x4a1   : > { %7793 = vmatpush3.bf16.xpose.msra.mxu1 %v2733_v30  ;;  %v2280_v15 = vpop.xlane.xlu0 %2279 }
 0x4a2   : > { %8225 = vmatprep.subr.msk.bf16.mxu1 %vm1615_vm0, %v13490_v26  ;;  %8804 = vrcp.f32 %v2280_v15 }
 0x4a3   : > { %3651 = vrot.lane.b32.xlu0 %v13491_v27, %s9379_s21  ;;  %8806 = vrcp.f32 %v2277_v61 }
 0x4a4   : > { %8808 = vrcp.f32 %v2283_v22  ;;  %v2846_v22 = vsel %vm1615_vm0, %v10382_v13, 0  ;;  %v2965_v13 = vsel %vm1615_vm0, %v13504_v45, 0 }
 0x4a5   : > { %v2274_v1 = vpop.xlane.xlu0 %2273 }
 0x4a6   : > { %8810 = vrcp.f32 %v2274_v1 }
 0x4a9   : > { %7795 = vmatpush3.bf16.xpose.msra.mxu1 %v2736_v44  ;;  %v2292_v39 = vpop.xlane.xlu1 %2291  ;;  %v2832_v55 = vpop.permute.xlu0 %2831 }
 0x4aa   : > { %8226 = vmatprep.subr.msk.bf16.mxu1 %vm1615_vm0, %v13492_v19  ;;  %v2855_v26 = vsel %vm1615_vm0, %v2832_v55, 0 }
 0x4ac   : > { %v8805_v8 = vpop.eup %8804 }
 0x4ad   : > { %v2286_v31 = vpop.xlane.xlu1 %2285  ;;  %v8807_v54 = vpop.eup %8806  ;;  %v2362_v42 = vmul.f32 %v8805_v8, %v10613_v14  ;;  %v13494_v14 = vld [vmem:[#allocation13_spill] sm:$0xff] }
 0x4ae   : > { %v8809_v20 = vpop.eup %8808  ;;  %v2361_v62 = vmul.f32 %v8807_v54, %v10605_v48  ;;  %v2742_v48 = vsel %vm1615_vm0, %v13493_v43, 0 }
 0x4af   : > { %v2363_v58 = vmul.f32 %v8809_v20, %v10600_v46 }
 0x4b0   : > { %v8811_v57 = vpop.eup %8810 }
 0x4b1   : > { %7797 = vmatpush3.bf16.xpose.msra.mxu1 %v2739_v17  ;;  %v2295_v11 = vpop.xlane.xlu1 %2294  ;;  %v2360_v0 = vmul.f32 %v8811_v57, %v10618_v47  ;;  %v2383_v25 = vpack.c.bf16 %v2363_v58, %v2362_v42  ;;  %v13495_v47 = vld [vmem:[#allocation68_spill] sm:$0xff] }
 0x4b2   : > { %8227 = vmatprep.subr.msk.bf16.mxu1 %vm1615_vm0, %v13493_v43  ;;  %8812 = vrcp.f32 %v2295_v11  ;;  %v2959_v56 = vsel %vm1615_vm0, %v13495_v47, 0 }
 0x4b3   : > { %v2382_v23 = vpack.c.bf16 %v2361_v62, %v2360_v0  ;;  %8814 = vrcp.f32 %v2286_v31 }
 0x4b4   : > { %8816 = vrcp.f32 %v2292_v39 }
 0x4b5   : > { %v2289_v41 = vpop.xlane.xlu1 %2288  ;;  %7772 = vmatprep.mubr.msk.bf16.mxu1 %vm1615_vm0, %v2382_v23 }
 0x4b6   : > { %8818 = vrcp.f32 %v2289_v41  ;;  %7773 = vmatmul.mubr.msk.bf16.gmra.mrb[68].mxu1 %vm1615_vm0, %v2383_v25 }
 0x4b7   : > { %7800 = vmatprep.mubr.msk.bf16.mxu1 %vm1615_vm0, %v13494_v14 }
 0x4b9   : > { %7799 = vmatpush3.bf16.xpose.msra.mxu1 %v2742_v48  ;;  %v2945_v34 = vpop.permute.xlu1 %2944 }
 0x4ba   : > { %8232 = vmatprep.subr.msk.bf16.mxu1 %vm1615_vm0, %v13495_v47  ;;  %v2968_v30 = vsel %vm1615_vm0, %v2945_v34, 0 }
 0x4bc   : > { %v8813_v46 = vpop.eup %8812 }
 0x4bd   : > { %v8815_v59 = vpop.eup %8814  ;;  %v2367_v12 = vmul.f32 %v8813_v46, %v10630_v49 }
 0x4be   : > { %v8817_v7 = vpop.eup %8816  ;;  %v2364_v52 = vmul.f32 %v8815_v59, %v13498_v10 }
 0x4bf   : > { %v2366_v37 = vmul.f32 %v8817_v7, %v13500_v16 }
 0x4c0   : > { %v8819_v53 = vpop.eup %8818  ;;  %7801 = vmatmul.mubr.msk.bf16.vlgmr.msra.gmra.mrb[72].mxu1 %vm1615_vm0, %v13496_v9 }
 0x4c1   : > { %7804 = vmatprep.mubr.msk.bf16.mxu1 %vm1615_vm0, %v13497_v35  ;;  %7825 = vmatpush3.bf16.xpose.msra.mxu1 %v2959_v56  ;;  %v2365_v38 = vmul.f32 %v8819_v53, %v13499_v32  ;;  %v2385_v4 = vpack.c.bf16 %v2367_v12, %v2366_v37 }
 0x4c2   : > { %8233 = vmatprep.subr.msk.bf16.mxu1 %vm1615_vm0, %v13501_v6 }
 0x4c3   : > { %v2384_v49 = vpack.c.bf16 %v2365_v38, %v2364_v52 }
 0x4c5   : > { %7784 = vmatprep.mubr.msk.bf16.mxu0 %vm1615_vm0, %v2384_v49 }
 0x4c6   : > { %7785 = vmatmul.mubr.msk.bf16.vlgmr.msra.gmra.mrb[176].mxu0 %vm1615_vm0, %v2385_v4 }
 0x4c7   : > { %7809 = vmatpush3.bf16.xpose.msra.mxu0 %v2846_v22 }
 0x4c8   : > { %7805 = vmatmul.mubr.msk.bf16.gmra.mrb[76].mxu1 %vm1615_vm0, %v13502_v60  ;;  %8229 = vmatprep.subr.msk.bf16.mxu0 %vm1615_vm0, %v13503_v28 }
 0x4c9   : > { %7827 = vmatpush3.bf16.xpose.msra.mxu1 %v2962_v40 }
 0x4ca   : > { %8234 = vmatprep.subr.msk.bf16.mxu1 %vm1615_vm0, %v13504_v45 }
 0x4cf   : > { %7811 = vmatpush3.bf16.xpose.msra.mxu0 %v2849_v24 }
 0x4d0   : > { %8230 = vmatprep.subr.msk.bf16.mxu0 %vm1615_vm0, %v13505_v63 }
 0x4d1   : > { %7829 = vmatpush3.bf16.xpose.msra.mxu1 %v2965_v13 }
 0x4d2   : > { %8235 = vmatprep.subr.msk.bf16.mxu1 %vm1615_vm0, %v2945_v34 }
 0x4d7   : > { %7813 = vmatpush3.bf16.xpose.msra.mxu0 %v2852_v18 }
 0x4d8   : > { %8231 = vmatprep.subr.msk.bf16.mxu0 %vm1615_vm0, %v2832_v55 }
 0x4d9   : > { %7831 = vmatpush3.bf16.xpose.msra.mxu1 %v2968_v30 }
 0x4da   : > { %v2304_v61 = vpop.xlane.xlu0 %2303 }
 0x4de   : > { %v2298_v15 = vpop.xlane.xlu0 %2297 }
 0x4df   : > { %7815 = vmatpush3.bf16.xpose.msra.mxu0 %v2855_v26 }
 0x4e2   : > { %v2307_v27 = vpop.xlane.xlu0 %2306 }
 0x4e3   : > { %8820 = vrcp.f32 %v2307_v27 }
 0x4e4   : > { %8822 = vrcp.f32 %v2298_v15 }
 0x4e5   : > { %8824 = vrcp.f32 %v2304_v61 }
 0x4e6   : > { %v2927_v1 = vpop.permute.xlu0 %2926 }
 0x4e7   : > { %7832 = vmatprep.mubr.msk.bf16.mxu1 %vm1615_vm0, %v2927_v1 }
 0x4ea   : > { %v2929_v44 = vpop.permute.xlu0 %2928  ;;  %v2301_v39 = vpop.xlane.xlu1 %2300 }
 0x4eb   : > { %8826 = vrcp.f32 %v2301_v39  ;;  %7833 = vmatmul.mubr.msk.bf16.vlgmr.msra.gmra.mrb[80].mxu1 %vm1615_vm0, %v2929_v44 }
 0x4ed   : > { %v8821_v31 = vpop.eup %8820 }
 0x4ee   : > { %v2816_v19 = vpop.permute.xlu0 %2815  ;;  %v2814_v8 = vpop.permute.xlu1 %2813  ;;  %v2371_v11 = vmul.f32 %v8821_v31, %v10675_v29 }
 0x4ef   : > { %v8823_v57 = vpop.eup %8822 }
 0x4f0   : > { %v8825_v17 = vpop.eup %8824  ;;  %v2368_v43 = vmul.f32 %v8823_v57, %v10668_v21 }
 0x4f1   : > { %v2370_v23 = vmul.f32 %v8825_v17, %v10661_v2 }
 0x4f2   : > { %v3056_v54 = vpop.permute.xlu0 %3055  ;;  %v3052_v20 = vpop.permute.xlu1 %3051 }
 0x4f3   : > { %8236 = vmatprep.subr.msk.bf16.mxu0 %vm1615_vm0, %v3052_v20  ;;  %v2387_v41 = vpack.c.bf16 %v2371_v11, %v2370_v23  ;;  %v3072_v2 = vsel %vm1615_vm0, %v3052_v20, 0  ;;  %v3078_v10 = vsel %vm1615_vm0, %v3056_v54, 0 }
 0x4f5   : > { %v8827_v42 = vpop.eup %8826 }
 0x4f6   : > { %v2931_v0 = vpop.permute.xlu0 %2930  ;;  %v3054_v62 = vpop.permute.xlu1 %3053  ;;  %v2369_v58 = vmul.f32 %v8827_v42, %v10679_v51 }
 0x4f7   : > { %7836 = vmatprep.mubr.msk.bf16.mxu1 %vm1615_vm0, %v2931_v0  ;;  %v3075_v12 = vsel %vm1615_vm0, %v3054_v62, 0 }
 0x4f8   : > { %v2386_v25 = vpack.c.bf16 %v2369_v58, %v2368_v43 }
 0x4fa   : > { %v2933_v14 = vpop.permute.xlu0 %2932  ;;  %v2818_v48 = vpop.permute.xlu1 %2817  ;;  %7788 = vmatprep.mubr.msk.bf16.mxu0 %vm1615_vm0, %v2386_v25 }
 0x4fb   : > { %7789 = vmatmul.mubr.msk.bf16.gmra.mrb[180].mxu0 %vm1615_vm0, %v2387_v41  ;;  %7837 = vmatmul.mubr.msk.bf16.gmra.mrb[84].mxu1 %vm1615_vm0, %v2933_v14 }
 0x4fc   : > { %7816 = vmatprep.mubr.msk.bf16.mxu0 %vm1615_vm0, %v2814_v8 }
 0x4fe   : > { %v3040_v29 = vpop.permute.xlu0 %3039  ;;  %v2820_v21 = vpop.permute.xlu1 %2819 }
 0x502   : > { %v3044_v47 = vpop.permute.xlu0 %3043  ;;  %v3058_v51 = vpop.permute.xlu1 %3057 }
 0x503   : > { %7817 = vmatmul.mubr.msk.bf16.vlgmr.msra.gmra.mrb[184].mxu0 %vm1615_vm0, %v2816_v19  ;;  %v3081_v49 = vsel %vm1615_vm0, %v3058_v51, 0 }
 0x504   : > { %7841 = vmatpush3.bf16.xpose.msra.mxu0 %v3072_v2  ;;  %7820 = vmatprep.mubr.msk.bf16.mxu0 %vm1615_vm0, %v2818_v48 }
 0x505   : > { %8237 = vmatprep.subr.msk.bf16.mxu0 %vm1615_vm0, %v3054_v62 }
 0x506   : > { %v3042_v46 = vpop.permute.xlu1 %3041  ;;  %v3553_v59 = vpop.permute.xlu0 %3552 }
 0x507   : > { %7856 = vmatprep.subr.bf16.mxu1 %v3553_v59 }
 0x508   : > { %7857 = vmatpush3.bf16.msra.mxu1 %v3553_v59 }
 0x50a   : > { %v3046_v7 = vpop.permute.xlu1 %3045  ;;  %v3557_v53 = vpop.permute.xlu0 %3556 }
 0x50b   : > { %7821 = vmatmul.mubr.msk.bf16.gmra.mrb[188].mxu0 %vm1615_vm0, %v2820_v21 }
 0x50c   : > { %7843 = vmatpush3.bf16.xpose.msra.mxu0 %v3075_v12  ;;  %7848 = vmatprep.mubr.msk.bf16.mxu0 %vm1615_vm0, %v3040_v29 }
 0x50d   : > { %8238 = vmatprep.subr.msk.bf16.mxu0 %vm1615_vm0, %v3056_v54 }
 0x50e   : > { %v3555_v9 = vpop.permute.xlu1 %3554  ;;  %v10849_v56 = vpop.permute.xlu0 %3738 }
 0x50f   : > { %7858 = vmatprep.subr.bf16.mxu1 %v3555_v9 }
 0x510   : > { %7859 = vmatpush3.bf16.msra.mxu1 %v3555_v9 }
 0x511   : > { %7860 = vmatprep.subr.bf16.mxu1 %v3557_v53 }
 0x512   : > { %v3559_v35 = vpop.permute.xlu1 %3558  ;;  %v10857_v38 = vpop.permute.xlu0 %3740 }
 0x514   : > { %7845 = vmatpush3.bf16.xpose.msra.mxu0 %v3078_v10  ;;  %v10852_v52 = vpop.f32.mrb[56].mxu1  ;;  %7861 = vmatpush3.bf16.msra.mxu1 %v3557_v53 }
 0x515   : > { %13506 = vst [vmem:[#allocation22_spill] sm:$0xff] %v10852_v52  ;;  %8239 = vmatprep.subr.msk.bf16.mxu0 %vm1615_vm0, %v3058_v51  ;;  %v10855_v32 = vpop.f32.mrb[57].mxu1  ;;  %7862 = vmatprep.subr.bf16.mxu1 %v3559_v35 }
 0x516   : > { %13507 = vst [vmem:[#allocation28_spill] sm:$0xff] %v10855_v32  ;;  %v10859_v16 = vpop.f32.mrb[58].mxu1  ;;  %v10863_v6 = vpop.permute.xlu1 %3742 }
 0x517   : > { %13508 = vst [vmem:[#allocation24_spill] sm:$0xff] %v10859_v16  ;;  %v10861_v37 = vpop.f32.mrb[59].mxu1  ;;  %v3646_v4 = vpop.permute.xlu0 %3645 }
 0x518   : > { %13509 = vst [vmem:[#allocation31_spill] sm:$0xff] %v10861_v37  ;;  %7863 = vmatpush3.bf16.msra.mxu1 %v3559_v35 }
 0x519   : > { %7888 = vmatprep.subr.bf16.mxu1 %v10849_v56 }
 0x51a   : > { %v10871_v28 = vpop.permute.xlu1 %3744 }
 0x51b   : > { %v3650_v63 = vpop.permute.xlu0 %3649 }
 0x51c   : > { %7847 = vmatpush3.bf16.xpose.msra.mxu0 %v3081_v49  ;;  %v10867_v22 = vpop.f32.mrb[60].mxu1 }
 0x51d   : > { %13510 = vst [vmem:[#allocation43_spill] sm:$0xff] %v10867_v22  ;;  %7872 = vmatprep.subr.bf16.mxu0 %v3646_v4  ;;  %v10869_v60 = vpop.f32.mrb[61].mxu1 }
 0x51e   : > { %13511 = vst [vmem:[#allocation34_spill] sm:$0xff] %v10869_v60  ;;  %v10873_v40 = vpop.f32.mrb[62].mxu1  ;;  %v3648_v24 = vpop.permute.xlu1 %3647 }
 0x51f   : > { %13512 = vst [vmem:[#allocation37_spill] sm:$0xff] %v10873_v40  ;;  %v10875_v45 = vpop.f32.mrb[63].mxu1  ;;  %v3652_v13 = vpop.permute.xlu0 %3651 }
 0x520   : > { %13513 = vst [vmem:[#allocation40_spill] sm:$0xff] %v10875_v45 }
 0x523   : > { %7849 = vmatmul.mubr.msk.bf16.vlgmr.msra.gmra.mrb[192].mxu0 %vm1615_vm0, %v3042_v46 }
 0x524   : > { %7852 = vmatprep.mubr.msk.bf16.mxu0 %vm1615_vm0, %v3044_v47  ;;  %7873 = vmatpush3.bf16.msra.mxu0 %v3646_v4 }
 0x525   : > { %7874 = vmatprep.subr.bf16.mxu0 %v3648_v24 }
 0x528   : > { %7875 = vmatpush3.bf16.msra.mxu0 %v3648_v24 }
 0x529   : > { %7876 = vmatprep.subr.bf16.mxu0 %v3650_v63 }
 0x52b   : > { %7853 = vmatmul.mubr.msk.bf16.gmra.mrb[196].mxu0 %vm1615_vm0, %v3046_v7 }
 0x52c   : > { %7877 = vmatpush3.bf16.msra.mxu0 %v3650_v63 }
 0x52d   : > { %7878 = vmatprep.subr.bf16.mxu0 %v3652_v13 }
 0x530   : > { %7879 = vmatpush3.bf16.msra.mxu0 %v3652_v13 }
 0x532   : > { %v10880_v34 = vpop.f32.mrb[168].mxu0 }
 0x533   : > { %13514 = vst [vmem:[#allocation44_spill] sm:$0xff] %v10880_v34  ;;  %v10882_v55 = vpop.f32.mrb[169].mxu0 }
 0x534   : > { %13515 = vst [vmem:[#allocation72_spill] sm:$0xff] %v10882_v55  ;;  %v10884_v18 = vpop.f32.mrb[170].mxu0 }
 0x535   : > { %13516 = vst [vmem:[#allocation74_spill] sm:$0xff] %v10884_v18  ;;  %v10886_v30 = vpop.f32.mrb[171].mxu0 }
 0x536   : > { %13517 = vst [vmem:[#allocation76_spill] sm:$0xff] %v10886_v30 }
 0x53a   : > { %v10888_v61 = vpop.f32.mrb[172].mxu0 }
 0x53b   : > { %13518 = vst [vmem:[#allocation78_spill] sm:$0xff] %v10888_v61  ;;  %v10890_v15 = vpop.f32.mrb[173].mxu0 }
 0x53c   : > { %13519 = vst [vmem:[#allocation92_spill] sm:$0xff] %v10890_v15  ;;  %v10892_v26 = vpop.f32.mrb[174].mxu0 }
 0x53d   : > { %13520 = vst [vmem:[#allocation90_spill] sm:$0xff] %v10892_v26  ;;  %v10894_v27 = vpop.f32.mrb[175].mxu0 }
 0x53e   : > { %13521 = vst [vmem:[#allocation81_spill] sm:$0xff] %v10894_v27 }
 0x573   : > { %v10896_v1 = vpop.f32.mrb[64].mxu1 }
 0x574   : > { %13522 = vst [vmem:[#allocation83_spill] sm:$0xff] %v10896_v1  ;;  %v10898_v44 = vpop.f32.mrb[65].mxu1 }
 0x575   : > { %13523 = vst [vmem:[#allocation15_spill] sm:$0xff] %v10898_v44  ;;  %v10900_v39 = vpop.f32.mrb[66].mxu1 }
 0x576   : > { %13524 = vst [vmem:[#allocation85_spill] sm:$0xff] %v10900_v39  ;;  %v10902_v19 = vpop.f32.mrb[67].mxu1 }
 0x577   : > { %13525 = vst [vmem:[#allocation66_spill] sm:$0xff] %v10902_v19 }
 0x589   : > { %v10904_v8 = vpop.f32.mrb[68].mxu1 }
 0x58a   : > { %13526 = vst [vmem:[#allocation67_spill] sm:$0xff] %v10904_v8  ;;  %v10906_v31 = vpop.f32.mrb[69].mxu1 }
 0x58b   : > { %13527 = vst [vmem:[#allocation13_spill] sm:$0xff] %v10906_v31  ;;  %v10908_v54 = vpop.f32.mrb[70].mxu1 }
 0x58c   : > { %13528 = vst [vmem:[#allocation68_spill] sm:$0xff] %v10908_v54  ;;  %v10910_v20 = vpop.f32.mrb[71].mxu1 }
 0x58d   : > { %13529 = vst [vmem:[#allocation14_spill] sm:$0xff] %v10910_v20 }
 0x593   : > { %v7802_v57 = vpop.f32.mrb[72].mxu1 }
 0x594   : > { %v10914_v42 = vsel %vm10148_vm1, %v7802_v57, -1e+30  ;;  %v2778_v11 = vpop.f32.mrb[73].mxu1 }
 0x595   : > { %v3186_v0 = vsel %vm1615_vm0, %v10914_v42, -inf  ;;  %v7803_v62 = vpop.f32.mrb[74].mxu1  ;;  %v10920_v58 = vsel %vm10153_vm2, %v2778_v11, -1e+30 }
 0x596   : > { %3187 = vmax.xlane.f32.xlu0 %v3186_v0  ;;  %v2781_v23 = vpop.f32.mrb[75].mxu1  ;;  %v3180_v48 = vsel %vm1615_vm0, %v10920_v58, -inf  ;;  %v10934_v47 = vsel %vm10157_vm3, %v7803_v62, -1e+30 }
 0x597   : > { %v10924_v41 = vsel %vm10165_vm4, %v2781_v23, -1e+30  ;;  %v3189_v53 = vsel %vm1615_vm0, %v10934_v47, -inf }
 0x598   : > { %v3183_v14 = vsel %vm1615_vm0, %v10924_v41, -inf }
 0x599   : > { %3184 = vmax.xlane.f32.xlu1 %v3183_v14  ;;  %v10930_v29 = vpop.f32.mrb[176].mxu0 }
 0x59a   : > { %13533 = vst [vmem:[#allocation97_spill] sm:$0xff] %v10930_v29  ;;  %3181 = vmax.xlane.f32.xlu0 %v3180_v48  ;;  %v10936_v51 = vpop.f32.mrb[177].mxu0 }
 0x59b   : > { %13535 = vst [vmem:[#allocation99_spill] sm:$0xff] %v10936_v51  ;;  %v7806_v2 = vpop.f32.mrb[76].mxu1  ;;  %v10938_v46 = vpop.f32.mrb[178].mxu0 }
 0x59c   : > { %13536 = vst [vmem:[#allocation100_spill] sm:$0xff] %v10938_v46  ;;  %v2794_v59 = vpop.f32.mrb[77].mxu1  ;;  %v10940_v7 = vpop.f32.mrb[179].mxu0  ;;  %v10946_v35 = vsel %vm10192_vm5, %v7806_v2, -1e+30 }
 0x59d   : > { %13537 = vst [vmem:[#allocation98_spill] sm:$0xff] %v10940_v7  ;;  %v7807_v12 = vpop.f32.mrb[78].mxu1  ;;  %v3198_v57 = vsel %vm1615_vm0, %v10946_v35, -inf  ;;  %v10962_v0 = vsel %vm10207_vm7, %v2794_v59, -1e+30 }
 0x59e   : > { %v10950_v49 = vsel %vm10199_vm6, %v7807_v12, -1e+30  ;;  %3190 = vmax.xlane.f32.xlu0 %v3189_v53  ;;  %v2797_v4 = vpop.f32.mrb[79].mxu1  ;;  %v3192_v23 = vsel %vm1615_vm0, %v10962_v0, -inf }
 0x59f   : > { %v3201_v24 = vsel %vm1615_vm0, %v10950_v49, -inf  ;;  %v10956_v13 = vsel %vm10211_vm8, %v2797_v4, -1e+30 }
 0x5a0   : > { %3202 = vmax.xlane.f32.xlu1 %v3201_v24  ;;  %v3195_v62 = vsel %vm1615_vm0, %v10956_v13, -inf }
 0x5a2   : > { %3199 = vmax.xlane.f32.xlu0 %v3198_v57 }
 0x5a4   : > { %3196 = vmax.xlane.f32.xlu1 %v3195_v62 }
 0x5a6   : > { %3193 = vmax.xlane.f32.xlu0 %v3192_v23 }
 0x5be   : > { %v7834_v14 = vpop.f32.mrb[80].mxu1 }
 0x5bf   : > { %v10970_v48 = vsel %vm10148_vm1, %v7834_v14, -1e+30  ;;  %v3004_v2 = vpop.f32.mrb[81].mxu1 }
 0x5c0   : > { %v3234_v53 = vsel %vm1615_vm0, %v10970_v48, -inf  ;;  %v7835_v59 = vpop.f32.mrb[82].mxu1 }
 0x5c1   : > { %v10976_v12 = vsel %vm10157_vm3, %v7835_v59, -1e+30  ;;  %3235 = vmax.xlane.f32.xlu0 %v3234_v53  ;;  %v3007_v4 = vpop.f32.mrb[83].mxu1 }
 0x5c2   : > { %v3237_v24 = vsel %vm1615_vm0, %v10976_v12, -inf }
 0x5c3   : > { %3238 = vmax.xlane.f32.xlu1 %v3237_v24 }
 0x5ce   : > { %v10980_v57 = vpop.f32.mrb[180].mxu0  ;;  %v7838_v62 = vpop.f32.mrb[84].mxu1 }
 0x5cf   : > { %13542 = vst [vmem:[#allocation70_spill] sm:$0xff] %v10980_v57  ;;  %v10982_v23 = vpop.f32.mrb[181].mxu0  ;;  %v3020_v14 = vpop.f32.mrb[85].mxu1 }
 0x5d0   : > { %13543 = vst [vmem:[#allocation96_spill] sm:$0xff] %v10982_v23  ;;  %v10984_v46 = vpop.f32.mrb[182].mxu0  ;;  %v7839_v29 = vpop.f32.mrb[86].mxu1  ;;  %v10996_v23 = vsel %vm10153_vm2, %v3004_v2, -1e+30 }
 0x5d1   : > { %13544 = vst [vmem:[#allocation69_spill] sm:$0xff] %v10984_v46  ;;  %v10986_v7 = vpop.f32.mrb[183].mxu0  ;;  %v3023_v51 = vpop.f32.mrb[87].mxu1  ;;  %v3228_v20 = vsel %vm1615_vm0, %v10996_v23, -inf }
 0x5d2   : > { %13545 = vst [vmem:[#allocation12_spill] sm:$0xff] %v10986_v7 }
 0x5d6   : > { %v7818_v59 = vpop.f32.mrb[184].mxu0 }
 0x5d7   : > { %v10990_v53 = vsel %vm10148_vm1, %v7818_v59, -1e+30  ;;  %v2891_v54 = vpop.f32.mrb[185].mxu0  ;;  %v11006_v59 = vsel %vm10165_vm4, %v3007_v4, -1e+30 }
 0x5d8   : > { %v3210_v24 = vsel %vm1615_vm0, %v10990_v53, -inf  ;;  %v7819_v57 = vpop.f32.mrb[186].mxu0  ;;  %v11012_v2 = vsel %vm10153_vm2, %v2891_v54, -1e+30 }
 0x5d9   : > { %v11000_v46 = vsel %vm10157_vm3, %v7819_v57, -1e+30  ;;  %3211 = vmax.xlane.f32.xlu0 %v3210_v24  ;;  %v2894_v7 = vpop.f32.mrb[187].mxu0  ;;  %v3231_v57 = vsel %vm1615_vm0, %v11006_v59, -inf }
 0x5da   : > { %v3213_v8 = vsel %vm1615_vm0, %v11000_v46, -inf  ;;  %v11018_v31 = vsel %vm10165_vm4, %v2894_v7, -1e+30 }
 0x5db   : > { %3214 = vmax.xlane.f32.xlu1 %v3213_v8  ;;  %v3204_v8 = vsel %vm1615_vm0, %v11012_v2, -inf }
 0x5dd   : > { %3229 = vmax.xlane.f32.xlu0 %v3228_v20  ;;  %v3207_v20 = vsel %vm1615_vm0, %v11018_v31, -inf }
 0x5de   : > { %v7822_v24 = vpop.f32.mrb[188].mxu0 }
 0x5df   : > { %3232 = vmax.xlane.f32.xlu1 %v3231_v57  ;;  %v2907_v4 = vpop.f32.mrb[189].mxu0  ;;  %v11024_v1 = vsel %vm10192_vm5, %v7822_v24, -1e+30  ;;  %v11036_v57 = vsel %vm10192_vm5, %v7838_v62, -1e+30 }
 0x5e0   : > { %v7823_v39 = vpop.f32.mrb[190].mxu0  ;;  %v3222_v7 = vsel %vm1615_vm0, %v11024_v1, -inf }
 0x5e1   : > { %3205 = vmax.xlane.f32.xlu0 %v3204_v8  ;;  %v2910_v54 = vpop.f32.mrb[191].mxu0  ;;  %v11030_v19 = vsel %vm10199_vm6, %v7823_v39, -1e+30  ;;  %v11042_v8 = vsel %vm10199_vm6, %v7839_v29, -1e+30  ;;  %v3246_v39 = vsel %vm1615_vm0, %v11036_v57, -inf }
 0x5e2   : > { %v3225_v24 = vsel %vm1615_vm0, %v11030_v19, -inf  ;;  %v3249_v62 = vsel %vm1615_vm0, %v11042_v8, -inf }
 0x5e3   : > { %3208 = vmax.xlane.f32.xlu1 %v3207_v20  ;;  %v11048_v20 = vsel %vm10207_vm7, %v2907_v4, -1e+30 }
 0x5e4   : > { %v3216_v29 = vsel %vm1615_vm0, %v11048_v20, -inf }
 0x5e5   : > { %3223 = vmax.xlane.f32.xlu0 %v3222_v7  ;;  %v11054_v7 = vsel %vm10211_vm8, %v2910_v54, -1e+30 }
 0x5e6   : > { %v3219_v4 = vsel %vm1615_vm0, %v11054_v7, -inf }
 0x5e7   : > { %3226 = vmax.xlane.f32.xlu1 %v3225_v24  ;;  %v11060_v24 = vsel %vm10207_vm7, %v3020_v14, -1e+30 }
 0x5e8   : > { %v3240_v54 = vsel %vm1615_vm0, %v11060_v24, -inf }
 0x5e9   : > { %3247 = vmax.xlane.f32.xlu0 %v3246_v39  ;;  %v11066_v39 = vsel %vm10211_vm8, %v3023_v51, -1e+30 }
 0x5eb   : > { %3250 = vmax.xlane.f32.xlu1 %v3249_v62  ;;  %v3243_v62 = vsel %vm1615_vm0, %v11066_v39, -inf }
 0x5ed   : > { %3217 = vmax.xlane.f32.xlu0 %v3216_v29 }
 0x5ef   : > { %3220 = vmax.xlane.f32.xlu1 %v3219_v4 }
 0x5f1   : > { %3241 = vmax.xlane.f32.xlu0 %v3240_v54 }
 0x5f3   : > { %3244 = vmax.xlane.f32.xlu1 %v3243_v62 }
 0x5f6   : > { %v7850_v44 = vpop.f32.mrb[192].mxu0 }
 0x5f7   : > { %v11074_v14 = vsel %vm10148_vm1, %v7850_v44, -1e+30  ;;  %v3117_v29 = vpop.f32.mrb[193].mxu0 }
 0x5f8   : > { %v3258_v26 = vsel %vm1615_vm0, %v11074_v14, -inf  ;;  %v7851_v51 = vpop.f32.mrb[194].mxu0  ;;  %v11080_v4 = vsel %vm10153_vm2, %v3117_v29, -1e+30 }
 0x5f9   : > { %v11084_v54 = vsel %vm10157_vm3, %v7851_v51, -1e+30  ;;  %3259 = vmax.xlane.f32.xlu0 %v3258_v26  ;;  %v3120_v62 = vpop.f32.mrb[195].mxu0  ;;  %v3252_v27 = vsel %vm1615_vm0, %v11080_v4, -inf }
 0x5fa   : > { %v3261_v61 = vsel %vm1615_vm0, %v11084_v54, -inf  ;;  %v11090_v44 = vsel %vm10165_vm4, %v3120_v62, -1e+30 }
 0x5fb   : > { %3262 = vmax.xlane.f32.xlu1 %v3261_v61  ;;  %v3255_v29 = vsel %vm1615_vm0, %v11090_v44, -inf }
 0x5fd   : > { %3253 = vmax.xlane.f32.xlu0 %v3252_v27 }
 0x5fe   : > { %v7854_v15 = vpop.f32.mrb[196].mxu0 }
 0x5ff   : > { %v11098_v26 = vsel %vm10192_vm5, %v7854_v15, -1e+30  ;;  %3256 = vmax.xlane.f32.xlu1 %v3255_v29  ;;  %v3133_v51 = vpop.f32.mrb[197].mxu0 }
 0x600   : > { %v3270_v18 = vsel %vm1615_vm0, %v11098_v26, -inf  ;;  %v7855_v62 = vpop.f32.mrb[198].mxu0  ;;  %v11104_v61 = vsel %vm10207_vm7, %v3133_v51, -1e+30 }
 0x601   : > { %v11108_v27 = vsel %vm10199_vm6, %v7855_v62, -1e+30  ;;  %3271 = vmax.xlane.f32.xlu0 %v3270_v18  ;;  %v3136_v34 = vpop.f32.mrb[199].mxu0  ;;  %v3264_v30 = vsel %vm1615_vm0, %v11104_v61, -inf }
 0x602   : > { %v3273_v15 = vsel %vm1615_vm0, %v11108_v27, -inf  ;;  %v11114_v29 = vsel %vm10211_vm8, %v3136_v34, -1e+30 }
 0x603   : > { %3274 = vmax.xlane.f32.xlu1 %v3273_v15  ;;  %v3267_v51 = vsel %vm1615_vm0, %v11114_v29, -inf }
 0x605   : > { %3265 = vmax.xlane.f32.xlu0 %v3264_v30 }
 0x607   : > { %3268 = vmax.xlane.f32.xlu1 %v3267_v51 }
 0x623   : > { %v3188_v62 = vpop.xlane.xlu0 %3187 }
 0x624   : > { %v3278_v18 = vsub.f32 %v10914_v42, %v3188_v62 }
 0x626   : > { %v3312_v55 = vmul.f32 1.442695, %v3278_v18  ;;  %v3185_v40 = vpop.xlane.xlu1 %3184 }
 0x627   : > { %v3182_v22 = vpop.xlane.xlu0 %3181  ;;  %v3277_v34 = vsub.f32 %v10924_v41, %v3185_v40 }
 0x628   : > { %8828 = vpow2.f32 %v3312_v55  ;;  %v3276_v45 = vsub.f32 %v10920_v58, %v3182_v22 }
 0x629   : > { %v3310_v52 = vmul.f32 1.442695, %v3277_v34 }
 0x62a   : > { %v3308_v15 = vmul.f32 1.442695, %v3276_v45 }
 0x62b   : > { %v3191_v60 = vpop.xlane.xlu0 %3190 }
 0x62c   : > { %8830 = vpow2.f32 %v3308_v15  ;;  %v3279_v30 = vsub.f32 %v10934_v47, %v3191_v60 }
 0x62d   : > { %v3203_v16 = vpop.xlane.xlu1 %3202 }
 0x62e   : > { %v3314_v32 = vmul.f32 1.442695, %v3279_v30  ;;  %v3283_v55 = vsub.f32 %v10950_v49, %v3203_v16 }
 0x62f   : > { %v3200_v51 = vpop.xlane.xlu0 %3199 }
 0x630   : > { %8832 = vpow2.f32 %v3314_v32  ;;  %v3282_v42 = vsub.f32 %v10946_v35, %v3200_v51  ;;  %v3322_v47 = vmul.f32 1.442695, %v3283_v55 }
 0x631   : > { %8834 = vpow2.f32 %v3310_v52  ;;  %v3197_v58 = vpop.xlane.xlu1 %3196 }
 0x632   : > { %v11125_v62 = vpop.eup %8828  ;;  %v3320_v22 = vmul.f32 1.442695, %v3282_v42  ;;  %v3281_v32 = vsub.f32 %v10956_v13, %v3197_v58 }
 0x633   : > { %v3194_v40 = vpop.xlane.xlu0 %3193  ;;  %v3378_v45 = vsel %vm1615_vm0, %v11125_v62, 0.0 }
 0x634   : > { %v3280_v60 = vsub.f32 %v10962_v0, %v3194_v40  ;;  %3379 = vadd.xlane.f32.xlu0 %v3378_v45  ;;  %8836 = vpow2.f32 %v3320_v22  ;;  %v3318_v49 = vmul.f32 1.442695, %v3281_v32 }
 0x636   : > { %v11131_v41 = vpop.eup %8830  ;;  %v3316_v35 = vmul.f32 1.442695, %v3280_v60 }
 0x637   : > { %v3372_v52 = vsel %vm1615_vm0, %v11131_v41, 0.0 }
 0x638   : > { %8838 = vpow2.f32 %v3316_v35  ;;  %3373 = vadd.xlane.f32.xlu0 %v3372_v52 }
 0x639   : > { %8840 = vpow2.f32 %v3322_v47 }
 0x63a   : > { %v11136_v16 = vpop.eup %8832  ;;  %8842 = vpow2.f32 %v3318_v49 }
 0x63b   : > { %v3381_v0 = vsel %vm1615_vm0, %v11136_v16, 0.0  ;;  %v11140_v18 = vpop.eup %8834 }
 0x63c   : > { %3382 = vadd.xlane.f32.xlu1 %v3381_v0  ;;  %v3375_v13 = vsel %vm1615_vm0, %v11140_v18, 0.0 }
 0x63e   : > { %v11144_v34 = vpop.eup %8836 }
 0x63f   : > { %v3390_v51 = vsel %vm1615_vm0, %v11144_v34, 0.0 }
 0x640   : > { %3376 = vadd.xlane.f32.xlu1 %v3375_v13 }
 0x642   : > { %v11146_v15 = vpop.eup %8838 }
 0x643   : > { %v3384_v30 = vsel %vm1615_vm0, %v11146_v15, 0.0  ;;  %v11152_v42 = vpop.eup %8840 }
 0x644   : > { %3385 = vadd.xlane.f32.xlu0 %v3384_v30  ;;  %3391 = vadd.xlane.f32.xlu1 %v3390_v51  ;;  %v3393_v55 = vsel %vm1615_vm0, %v11152_v42, 0.0  ;;  %v11156_v22 = vpop.eup %8842 }
 0x645   : > { %v3387_v58 = vsel %vm1615_vm0, %v11156_v22, 0.0 }
 0x648   : > { %3394 = vadd.xlane.f32.xlu1 %v3393_v55 }
 0x64c   : > { %3388 = vadd.xlane.f32.xlu1 %v3387_v58 }
 0x64e   : > { %v3236_v40 = vpop.xlane.xlu0 %3235 }
 0x64f   : > { %v3294_v45 = vsub.f32 %v10970_v48, %v3236_v40 }
 0x650   : > { %v3239_v60 = vpop.xlane.xlu1 %3238 }
 0x651   : > { %v3344_v47 = vmul.f32 1.442695, %v3294_v45  ;;  %v3295_v32 = vsub.f32 %v10976_v12, %v3239_v60 }
 0x653   : > { %8844 = vpow2.f32 %v3344_v47  ;;  %v3346_v35 = vmul.f32 1.442695, %v3295_v32 }
 0x655   : > { %8846 = vpow2.f32 %v3346_v35 }
 0x65d   : > { %v11162_v52 = vpop.eup %8844 }
 0x65e   : > { %v3426_v49 = vsel %vm1615_vm0, %v11162_v52, 0.0 }
 0x65f   : > { %v11166_v0 = vpop.eup %8846  ;;  %3427 = vadd.xlane.f32.xlu1 %v3426_v49 }
 0x660   : > { %v3429_v13 = vsel %vm1615_vm0, %v11166_v0, 0.0 }
 0x663   : > { %3430 = vadd.xlane.f32.xlu1 %v3429_v13 }
 0x666   : > { %v3212_v48 = vpop.xlane.xlu0 %3211 }
 0x667   : > { %v3286_v30 = vsub.f32 %v10990_v53, %v3212_v48 }
 0x668   : > { %v3215_v51 = vpop.xlane.xlu1 %3214 }
 0x669   : > { %v3328_v12 = vmul.f32 1.442695, %v3286_v30  ;;  %v3287_v40 = vsub.f32 %v11000_v46, %v3215_v51 }
 0x66a   : > { %v3230_v55 = vpop.xlane.xlu0 %3229 }
 0x66b   : > { %8848 = vpow2.f32 %v3328_v12  ;;  %v3292_v58 = vsub.f32 %v10996_v23, %v3230_v55  ;;  %v3330_v13 = vmul.f32 1.442695, %v3287_v40 }
 0x66c   : > { %v3233_v45 = vpop.xlane.xlu1 %3232 }
 0x66d   : > { %v3340_v60 = vmul.f32 1.442695, %v3292_v58  ;;  %v3293_v47 = vsub.f32 %v11006_v59, %v3233_v45 }
 0x66e   : > { %v3206_v32 = vpop.xlane.xlu0 %3205 }
 0x66f   : > { %8850 = vpow2.f32 %v3340_v60  ;;  %v3342_v35 = vmul.f32 1.442695, %v3293_v47  ;;  %v3284_v49 = vsub.f32 %v11012_v2, %v3206_v32 }
 0x670   : > { %v3209_v37 = vpop.xlane.xlu1 %3208 }
 0x671   : > { %8852 = vpow2.f32 %v3342_v35  ;;  %v3324_v53 = vmul.f32 1.442695, %v3284_v49  ;;  %v3285_v48 = vsub.f32 %v11018_v31, %v3209_v37 }
 0x672   : > { %v3224_v30 = vpop.xlane.xlu0 %3223 }
 0x673   : > { %8854 = vpow2.f32 %v3324_v53  ;;  %v3326_v23 = vmul.f32 1.442695, %v3285_v48  ;;  %v3290_v46 = vsub.f32 %v11024_v1, %v3224_v30 }
 0x674   : > { %8856 = vpow2.f32 %v3330_v13  ;;  %v3227_v51 = vpop.xlane.xlu1 %3226 }
 0x675   : > { %v11177_v12 = vpop.eup %8848  ;;  %8858 = vpow2.f32 %v3326_v23  ;;  %v3336_v59 = vmul.f32 1.442695, %v3290_v46  ;;  %v3291_v55 = vsub.f32 %v11030_v19, %v3227_v51 }
 0x676   : > { %v3248_v2 = vpop.xlane.xlu0 %3247  ;;  %v3402_v58 = vsel %vm1615_vm0, %v11177_v12, 0.0 }
 0x677   : > { %8860 = vpow2.f32 %v3336_v59  ;;  %v3298_v37 = vsub.f32 %v11036_v57, %v3248_v2  ;;  %3403 = vadd.xlane.f32.xlu0 %v3402_v58  ;;  %v3338_v45 = vmul.f32 1.442695, %v3291_v55 }
 0x678   : > { %v3251_v31 = vpop.xlane.xlu1 %3250 }
 0x679   : > { %v11183_v40 = vpop.eup %8850  ;;  %v3352_v1 = vmul.f32 1.442695, %v3298_v37  ;;  %v3299_v60 = vsub.f32 %v11042_v8, %v3251_v31 }
 0x67a   : > { %v3218_v47 = vpop.xlane.xlu0 %3217  ;;  %v3420_v32 = vsel %vm1615_vm0, %v11183_v40, 0.0 }
 0x67b   : > { %v11188_v19 = vpop.eup %8852  ;;  %8862 = vpow2.f32 %v3352_v1  ;;  %v3288_v35 = vsub.f32 %v11048_v20, %v3218_v47  ;;  %3421 = vadd.xlane.f32.xlu0 %v3420_v32  ;;  %v3354_v8 = vmul.f32 1.442695, %v3299_v60 }
 0x67c   : > { %v3221_v49 = vpop.xlane.xlu1 %3220  ;;  %v3423_v57 = vsel %vm1615_vm0, %v11188_v19, 0.0  ;;  %8864 = vpow2.f32 %v3338_v45 }
 0x67d   : > { %v11193_v13 = vpop.eup %8854  ;;  %v3332_v53 = vmul.f32 1.442695, %v3288_v35  ;;  %3424 = vadd.xlane.f32.xlu1 %v3423_v57  ;;  %v3289_v20 = vsub.f32 %v11054_v7, %v3221_v49 }
 0x67e   : > { %v11195_v48 = vpop.eup %8856  ;;  %v3242_v30 = vpop.xlane.xlu0 %3241  ;;  %v3396_v23 = vsel %vm1615_vm0, %v11193_v13, 0.0 }
 0x67f   : > { %v11199_v46 = vpop.eup %8858  ;;  %8866 = vpow2.f32 %v3332_v53  ;;  %v3296_v51 = vsub.f32 %v11060_v24, %v3242_v30  ;;  %3397 = vadd.xlane.f32.xlu0 %v3396_v23  ;;  %v3405_v31 = vsel %vm1615_vm0, %v11195_v48, 0.0  ;;  %v3334_v1 = vmul.f32 1.442695, %v3289_v20 }
 0x680   : > { %v3245_v59 = vpop.xlane.xlu1 %3244  ;;  %v3399_v55 = vsel %vm1615_vm0, %v11199_v46, 0.0  ;;  %8868 = vpow2.f32 %v3354_v8 }
 0x681   : > { %v11205_v2 = vpop.eup %8860  ;;  %v3348_v58 = vmul.f32 1.442695, %v3296_v51  ;;  %v3297_v37 = vsub.f32 %v11066_v39, %v3245_v59  ;;  %3400 = vadd.xlane.f32.xlu1 %v3399_v55 }
 0x682   : > { %v3414_v24 = vsel %vm1615_vm0, %v11205_v2, 0.0 }
 0x683   : > { %8870 = vpow2.f32 %v3348_v58  ;;  %v3350_v7 = vmul.f32 1.442695, %v3297_v37  ;;  %3406 = vadd.xlane.f32.xlu0 %v3405_v31 }
 0x685   : > { %v11212_v45 = vpop.eup %8862  ;;  %8872 = vpow2.f32 %v3350_v7  ;;  %3415 = vadd.xlane.f32.xlu1 %v3414_v24 }
 0x686   : > { %v3260_v60 = vpop.xlane.xlu0 %3259  ;;  %8874 = vpow2.f32 %v3334_v1  ;;  %v11215_v47 = vpop.eup %8864  ;;  %v3438_v35 = vsel %vm1615_vm0, %v11212_v45, 0.0 }
 0x687   : > { %v3302_v39 = vsub.f32 %v11074_v14, %v3260_v60  ;;  %v3417_v59 = vsel %vm1615_vm0, %v11215_v47, 0.0 }
 0x688   : > { %v3263_v32 = vpop.xlane.xlu1 %3262 }
 0x689   : > { %v11219_v49 = vpop.eup %8866  ;;  %v3360_v57 = vmul.f32 1.442695, %v3302_v39  ;;  %v3303_v53 = vsub.f32 %v11084_v54, %v3263_v32  ;;  %3439 = vadd.xlane.f32.xlu1 %v3438_v35 }
 0x68a   : > { %v3254_v8 = vpop.xlane.xlu0 %3253  ;;  %v3408_v30 = vsel %vm1615_vm0, %v11219_v49, 0.0  ;;  %v11225_v20 = vpop.eup %8868 }
 0x68b   : > { %8876 = vpow2.f32 %v3360_v57  ;;  %v3362_v23 = vmul.f32 1.442695, %v3303_v53  ;;  %v3300_v14 = vsub.f32 %v11080_v4, %v3254_v8  ;;  %3409 = vadd.xlane.f32.xlu0 %v3408_v30  ;;  %v3441_v1 = vsel %vm1615_vm0, %v11225_v20, 0.0 }
 0x68c   : > { %v3257_v51 = vpop.xlane.xlu1 %3256 }
 0x68d   : > { %v11229_v55 = vpop.eup %8870  ;;  %v3356_v58 = vmul.f32 1.442695, %v3300_v14  ;;  %v3301_v54 = vsub.f32 %v11090_v44, %v3257_v51  ;;  %3418 = vadd.xlane.f32.xlu1 %v3417_v59  ;;  %8878 = vpow2.f32 %v3362_v23 }
 0x68e   : > { %v3432_v37 = vsel %vm1615_vm0, %v11229_v55, 0.0  ;;  %v3272_v14 = vpop.xlane.xlu0 %3271 }
 0x68f   : > { %v11234_v31 = vpop.eup %8872  ;;  %8880 = vpow2.f32 %v3356_v58  ;;  %v3358_v4 = vmul.f32 1.442695, %v3301_v54  ;;  %3433 = vadd.xlane.f32.xlu0 %v3432_v37  ;;  %v3306_v54 = vsub.f32 %v11098_v26, %v3272_v14 }
 0x690   : > { %v11238_v7 = vpop.eup %8874  ;;  %v3435_v24 = vsel %vm1615_vm0, %v11234_v31, 0.0  ;;  %v3275_v23 = vpop.xlane.xlu1 %3274 }
 0x691   : > { %3442 = vadd.xlane.f32.xlu1 %v3441_v1  ;;  %8882 = vpow2.f32 %v3358_v4  ;;  %v3411_v44 = vsel %vm1615_vm0, %v11238_v7, 0.0  ;;  %v3368_v1 = vmul.f32 1.442695, %v3306_v54 }
 0x692   : > { %v3266_v59 = vpop.xlane.xlu0 %3265 }
 0x693   : > { %3436 = vadd.xlane.f32.xlu0 %v3435_v24  ;;  %v3304_v37 = vsub.f32 %v11104_v61, %v3266_v59 }
 0x694   : > { %v3269_v51 = vpop.xlane.xlu1 %3268 }
 0x695   : > { %v11244_v60 = vpop.eup %8876  ;;  %3412 = vadd.xlane.f32.xlu1 %v3411_v44  ;;  %v3305_v58 = vsub.f32 %v11114_v29, %v3269_v51  ;;  %v3307_v44 = vsub.f32 %v11108_v27, %v3275_v23 }
 0x696   : > { %v3450_v32 = vsel %vm1615_vm0, %v11244_v60, 0.0 }
 0x697   : > { %v11246_v39 = vpop.eup %8878  ;;  %v3366_v4 = vmul.f32 1.442695, %v3305_v58  ;;  %v3370_v29 = vmul.f32 1.442695, %v3307_v44 }
 0x698   : > { %v3453_v53 = vsel %vm1615_vm0, %v11246_v39, 0.0 }
 0x699   : > { %v11250_v35 = vpop.eup %8880  ;;  %3451 = vadd.xlane.f32.xlu1 %v3450_v32  ;;  %8884 = vpow2.f32 %v3366_v4 }
 0x69a   : > { %v3444_v57 = vsel %vm1615_vm0, %v11250_v35, 0.0  ;;  %8886 = vpow2.f32 %v3368_v1 }
 0x69b   : > { %3445 = vadd.xlane.f32.xlu0 %v3444_v57  ;;  %v11256_v8 = vpop.eup %8882 }
 0x69c   : > { %v3447_v30 = vsel %vm1615_vm0, %v11256_v8, 0.0 }
 0x69d   : > { %3454 = vadd.xlane.f32.xlu1 %v3453_v53 }
 0x6a1   : > { %3448 = vadd.xlane.f32.xlu1 %v3447_v30 }
 0x6a3   : > { %v11272_v32 = vpop.eup %8884 }
 0x6a4   : > { %v11274_v61 = vpop.eup %8886  ;;  %v3459_v27 = vsel %vm1615_vm0, %v11272_v32, 0.0 }
 0x6b1   : > { %3833 = vrot.lane.b32.xlu0 %v10572_v5, %s9379_s21 }
 0x6b2   : > { %3831 = vrot.lane.b32.xlu1 %v10563_v50, %s9379_s21  ;;  %v3364_v50 = vmul.f32 1.442695, %v3304_v37 }
 0x6b4   : > { %8888 = vpow2.f32 %v3364_v50  ;;  %v3462_v50 = vsel %vm1615_vm0, %v11274_v61, 0.0 }
 0x6b5   : > { %3835 = vrot.lane.b32.xlu0 %v10576_v36, %s9379_s21 }
 0x6b9   : > { %3837 = vrot.lane.b32.xlu0 %v10584_v33, %s9379_s21 }
 0x6be   : > { %v11276_v57 = vpop.eup %8888 }
 0x6bf   : > { %v3456_v59 = vsel %vm1615_vm0, %v11276_v57, 0.0 }
 0x6c1   : > { %v3380_v5 = vpop.xlane.xlu0 %3379 }
 0x6c5   : > { %v3374_v36 = vpop.xlane.xlu0 %3373 }
 0x6c9   : > { %v3383_v24 = vpop.xlane.xlu1 %3382 }
 0x6ca   : > { %8890 = vrcp.f32 %v3383_v24 }
 0x6cb   : > { %8892 = vrcp.f32 %v3374_v36 }
 0x6cc   : > { %8894 = vrcp.f32 %v3380_v5 }
 0x6cd   : > { %v3377_v33 = vpop.xlane.xlu1 %3376 }
 0x6ce   : > { %8896 = vrcp.f32 %v3377_v33 }
 0x6cf   : > { %8898 = vpow2.f32 %v3370_v29 }
 0x6d1   : > { %v3392_v26 = vpop.xlane.xlu1 %3391  ;;  %v3386_v30 = vpop.xlane.xlu0 %3385 }
 0x6d4   : > { %v8891_v53 = vpop.eup %8890 }
 0x6d5   : > { %v3395_v14 = vpop.xlane.xlu1 %3394  ;;  %v8893_v23 = vpop.eup %8892  ;;  %v3503_v54 = vmul.f32 %v8891_v53, %v11136_v16 }
 0x6d6   : > { %3460 = vadd.xlane.f32.xlu1 %v3459_v27  ;;  %v8895_v51 = vpop.eup %8894  ;;  %8900 = vrcp.f32 %v3395_v14  ;;  %v3500_v5 = vmul.f32 %v8893_v23, %v11131_v41  ;;  %v13553_v23 = vld [vmem:[#allocation16_spill] sm:$0xff] }
 0x6d7   : > { %8902 = vrcp.f32 %v3386_v30  ;;  %v3502_v1 = vmul.f32 %v8895_v51, %v11125_v62  ;;  %v13546_v30 = vld [vmem:[#allocation47_spill] sm:$0xff] }
 0x6d8   : > { %v8897_v58 = vpop.eup %8896  ;;  %3457 = vadd.xlane.f32.xlu0 %v3456_v59  ;;  %8904 = vrcp.f32 %v3392_v26 }
 0x6d9   : > { %v3389_v37 = vpop.xlane.xlu1 %3388  ;;  %v3501_v4 = vmul.f32 %v8897_v58, %v11140_v18  ;;  %v11288_v24 = vpop.eup %8898  ;;  %v3533_v44 = vpack.c.bf16 %v3503_v54, %v3502_v1 }
 0x6da   : > { %8906 = vrcp.f32 %v3389_v37  ;;  %v3465_v41 = vsel %vm1615_vm0, %v11288_v24, 0.0 }
 0x6db   : > { %v3532_v36 = vpack.c.bf16 %v3501_v4, %v3500_v5 }
 0x6dc   : > { %3463 = vadd.xlane.f32.xlu0 %v3462_v50 }
 0x6dd   : > { %7864 = vmatprep.mubr.msk.bf16.mxu1 %vm1615_vm0, %v3532_v36 }
 0x6de   : > { %7865 = vmatmul.mubr.msk.bf16.vlgmr.msra.gmra.mrb[88].mxu1 %vm1615_vm0, %v3533_v44 }
 0x6df   : > { %7889 = vmatpush3.bf16.msra.mxu1 %v10849_v56 }
 0x6e0   : > { %7890 = vmatprep.subr.bf16.mxu1 %v10857_v38  ;;  %3466 = vadd.xlane.f32.xlu0 %v3465_v41  ;;  %v8901_v62 = vpop.eup %8900 }
 0x6e1   : > { %v8903_v16 = vpop.eup %8902  ;;  %v3507_v29 = vmul.f32 %v8901_v62, %v11152_v42  ;;  %v13548_v42 = vld [vmem:[#allocation46_spill] sm:$0xff] }
 0x6e2   : > { %v8905_v18 = vpop.eup %8904  ;;  %v3504_v26 = vmul.f32 %v8903_v16, %v11146_v15  ;;  %v13547_v15 = vld [vmem:[#allocation17_spill] sm:$0xff] }
 0x6e3   : > { %7891 = vmatpush3.bf16.msra.mxu1 %v10857_v38  ;;  %v3506_v53 = vmul.f32 %v8905_v18, %v11144_v34  ;;  %v13550_v34 = vld [vmem:[#allocation52_spill] sm:$0xff] }
 0x6e4   : > { %v8907_v33 = vpop.eup %8906  ;;  %7892 = vmatprep.subr.bf16.mxu1 %v10863_v6 }
 0x6e5   : > { %v3505_v56 = vmul.f32 %v8907_v33, %v11156_v22  ;;  %v3535_v38 = vpack.c.bf16 %v3507_v29, %v3506_v53  ;;  %v13551_v22 = vld [vmem:[#allocation48_spill] sm:$0xff] }
 0x6e7   : > { %7893 = vmatpush3.bf16.msra.mxu1 %v10863_v6  ;;  %5002 = vrot.lane.b32.xlu1 %v13546_v30, %s9379_s21  ;;  %v3534_v14 = vpack.c.bf16 %v3505_v56, %v3504_v26  ;;  %v13549_v6 = vld [vmem:[#allocation51_spill] sm:$0xff] }
 0x6e8   : > { %7894 = vmatprep.subr.bf16.mxu1 %v10871_v28 }
 0x6e9   : > { %7868 = vmatprep.mubr.msk.bf16.mxu1 %vm1615_vm0, %v3534_v14 }
 0x6ea   : > { %7869 = vmatmul.mubr.msk.bf16.gmra.mrb[92].mxu1 %vm1615_vm0, %v3535_v38 }
 0x6eb   : > { %7895 = vmatpush3.bf16.msra.mxu1 %v10871_v28  ;;  %4990 = vrot.lane.b32.xlu1 %v13547_v15, %s9379_s21  ;;  %v13552_v28 = vld [vmem:[#allocation50_spill] sm:$0xff] }
 0x6ec   : > { %8240 = vmatprep.subr.msk.bf16.mxu1 %vm1615_vm0, %v13548_v42  ;;  %v3428_v27 = vpop.xlane.xlu1 %3427 }
 0x6ef   : > { %5113 = vrot.lane.b32.xlu1 %v13549_v6, %s9379_s21 }
 0x6f0   : > { %v3431_v59 = vpop.xlane.xlu1 %3430 }
 0x6f1   : > { %8908 = vrcp.f32 %v3431_v59 }
 0x6f3   : > { %5115 = vrot.lane.b32.xlu1 %v13550_v34, %s9379_s21 }
 0x6f6   : > { %5000 = vrot.lane.b32.xlu0 %v13548_v42, %s9379_s21 }
 0x6fa   : > { %5004 = vrot.lane.b32.xlu0 %v13551_v22, %s9379_s21 }
 0x6fb   : > { %v8909_v1 = vpop.eup %8908 }
 0x6fc   : > { %v3519_v62 = vmul.f32 %v8909_v1, %v11166_v0 }
 0x6fe   : > { %5006 = vrot.lane.b32.xlu0 %v13552_v28, %s9379_s21 }
 0x702   : > { %4988 = vrot.lane.b32.xlu0 %v13553_v23, %s9379_s21 }
 0x704   : > { %v3404_v51 = vpop.xlane.xlu0 %3403 }
 0x708   : > { %v3422_v58 = vpop.xlane.xlu0 %3421 }
 0x709   : > { %8910 = vrcp.f32 %v3422_v58 }
 0x70a   : > { %8912 = vrcp.f32 %v3428_v27  ;;  %v3425_v54 = vpop.xlane.xlu1 %3424 }
 0x70b   : > { %8914 = vrcp.f32 %v3425_v54 }
 0x70c   : > { %v3398_v37 = vpop.xlane.xlu0 %3397 }
 0x70d   : > { %8916 = vrcp.f32 %v3398_v37 }
 0x70e   : > { %8918 = vrcp.f32 %v3404_v51  ;;  %v3401_v5 = vpop.xlane.xlu1 %3400 }
 0x70f   : > { %8920 = vrcp.f32 %v3401_v5 }
 0x710   : > { %v3407_v4 = vpop.xlane.xlu0 %3406 }
 0x711   : > { %8922 = vrcp.f32 %v3407_v4 }
 0x712   : > { %v3416_v50 = vpop.xlane.xlu1 %3415 }
 0x713   : > { %v8911_v36 = vpop.eup %8910 }
 0x714   : > { %v8913_v44 = vpop.eup %8912  ;;  %v3516_v18 = vmul.f32 %v8911_v36, %v11183_v40  ;;  %v3933_v40 = vsel %vm1615_vm0, %v13548_v42, 0 }
 0x715   : > { %v8915_v41 = vpop.eup %8914  ;;  %v3518_v26 = vmul.f32 %v8913_v44, %v11162_v52 }
 0x716   : > { %v3440_v16 = vpop.xlane.xlu1 %3439  ;;  %v3517_v33 = vmul.f32 %v8915_v41, %v11188_v19 }
 0x717   : > { %v8917_v29 = vpop.eup %8916  ;;  %v3541_v27 = vpack.c.bf16 %v3519_v62, %v3518_v26  ;;  %8924 = vrcp.f32 %v3440_v16 }
 0x718   : > { %v8919_v56 = vpop.eup %8918  ;;  %v3410_v53 = vpop.xlane.xlu0 %3409  ;;  %v3540_v14 = vpack.c.bf16 %v3517_v33, %v3516_v18  ;;  %v3508_v59 = vmul.f32 %v8917_v29, %v11193_v13 }
 0x719   : > { %v8921_v38 = vpop.eup %8920  ;;  %v3510_v52 = vmul.f32 %v8919_v56, %v11177_v12  ;;  %8926 = vrcp.f32 %v3410_v53 }
 0x71a   : > { %7896 = vmatprep.mubr.msk.bf16.mxu1 %vm1615_vm0, %v3540_v14  ;;  %v3419_v51 = vpop.xlane.xlu1 %3418  ;;  %v3509_v0 = vmul.f32 %v8921_v38, %v11199_v46 }
 0x71b   : > { %v8923_v58 = vpop.eup %8922  ;;  %7897 = vmatmul.mubr.msk.bf16.vlgmr.msra.gmra.mrb[96].mxu1 %vm1615_vm0, %v3541_v27 }
 0x71c   : > { %v3511_v19 = vmul.f32 %v8923_v58, %v11195_v48  ;;  %7921 = vmatpush3.bf16.xpose.msra.mxu1 %v3933_v40  ;;  %v3434_v54 = vpop.xlane.xlu0 %3433  ;;  %v3536_v37 = vpack.c.bf16 %v3509_v0, %v3508_v59  ;;  %v3936_v48 = vsel %vm1615_vm0, %v13546_v30, 0 }
 0x71d   : > { %8241 = vmatprep.subr.msk.bf16.mxu1 %vm1615_vm0, %v13546_v30  ;;  %8928 = vrcp.f32 %v3434_v54 }
 0x71e   : > { %v3537_v13 = vpack.c.bf16 %v3511_v19, %v3510_v52  ;;  %7880 = vmatprep.mubr.msk.bf16.mxu0 %vm1615_vm0, %v3536_v37  ;;  %v3443_v46 = vpop.xlane.xlu1 %3442  ;;  %v13555_v19 = vld [vmem:[#allocation18_spill] sm:$0xff] }
 0x71f   : > { %8930 = vrcp.f32 %v3443_v46  ;;  %v13556_v46 = vld [vmem:[#allocation56_spill] sm:$0xff] }
 0x720   : > { %8932 = vrcp.f32 %v3419_v51  ;;  %v3437_v42 = vpop.xlane.xlu0 %3436  ;;  %7881 = vmatmul.mubr.msk.bf16.vlgmr.msra.gmra.mrb[200].mxu0 %vm1615_vm0, %v3537_v13 }
 0x721   : > { %8934 = vrcp.f32 %v3437_v42  ;;  %v8925_v5 = vpop.eup %8924  ;;  %v13557_v42 = vld [vmem:[#allocation19_spill] sm:$0xff] }
 0x722   : > { %8936 = vrcp.f32 %v3416_v50  ;;  %v3413_v12 = vpop.xlane.xlu1 %3412  ;;  %v3939_v50 = vsel %vm1615_vm0, %v13551_v22, 0  ;;  %v3522_v53 = vmul.f32 %v8925_v5, %v11212_v45 }
 0x723   : > { %8938 = vrcp.f32 %v3413_v12  ;;  %v8927_v1 = vpop.eup %8926  ;;  %v4114_v12 = vsel %vm1615_vm0, %v13556_v46, 0 }
 0x724   : > { %7923 = vmatpush3.bf16.xpose.msra.mxu1 %v3936_v48  ;;  %v13559_v48 = vld [vmem:[#allocation29_spill] sm:$0xff] }
 0x725   : > { %8242 = vmatprep.subr.msk.bf16.mxu1 %vm1615_vm0, %v13551_v22  ;;  %v3512_v22 = vmul.f32 %v8927_v1, %v11219_v49  ;;  %v13554_v49 = vld [vmem:[#allocation55_spill] sm:$0xff]  ;;  %v4117_v5 = vsel %vm1615_vm0, %v13559_v48, 0  ;;  %v4025_v1 = vsel %vm1615_vm0, %v13550_v34, 0 }
 0x726   : > { %v3452_v4 = vpop.xlane.xlu1 %3451 }
 0x727   : > { %v8929_v36 = vpop.eup %8928 }
 0x728   : > { %v3446_v62 = vpop.xlane.xlu0 %3445  ;;  %v3520_v30 = vmul.f32 %v8929_v36, %v11229_v55  ;;  %v13561_v36 = vld [vmem:[#allocation53_spill] sm:$0xff] }
 0x729   : > { %v8931_v44 = vpop.eup %8930  ;;  %8940 = vrcp.f32 %v3446_v62  ;;  %v13563_v62 = vld [vmem:[#allocation54_spill] sm:$0xff] }
 0x72a   : > { %v8933_v41 = vpop.eup %8932  ;;  %v3455_v16 = vpop.xlane.xlu1 %3454  ;;  %v3523_v33 = vmul.f32 %v8931_v44, %v11225_v20  ;;  %v13562_v44 = vld [vmem:[#allocation73_spill] sm:$0xff] }
 0x72b   : > { %v8935_v18 = vpop.eup %8934  ;;  %v3515_v14 = vmul.f32 %v8933_v41, %v11215_v47  ;;  %v4028_v41 = vsel %vm1615_vm0, %v13561_v36, 0 }
 0x72c   : > { %v8937_v29 = vpop.eup %8936  ;;  %7925 = vmatpush3.bf16.xpose.msra.mxu1 %v3939_v50  ;;  %v3521_v26 = vmul.f32 %v8935_v18, %v11234_v31  ;;  %v3543_v51 = vpack.c.bf16 %v3523_v33, %v3522_v53  ;;  %v3834_v59 = vpop.permute.xlu0 %3833  ;;  %v13566_v18 = vld [vmem:[#allocation75_spill] sm:$0xff]  ;;  %v13567_v50 = vld [vmem:[#allocation77_spill] sm:$0xff]  ;;  %v4031_v33 = vsel %vm1615_vm0, %v13563_v62, 0 }
 0x72d   : > { %v8939_v56 = vpop.eup %8938  ;;  %8243 = vmatprep.subr.msk.bf16.mxu1 %vm1615_vm0, %v13552_v28  ;;  %v3514_v55 = vmul.f32 %v8937_v29, %v11205_v2  ;;  %v3942_v2 = vsel %vm1615_vm0, %v13552_v28, 0  ;;  %v4111_v28 = vsel %vm1615_vm0, %v13554_v49, 0  ;;  %v13568_v29 = vld [vmem:[#allocation33_spill] sm:$0xff]  ;;  %v13570_v53 = vld [vmem:[#allocation79_spill] sm:$0xff] }
 0x72e   : > { %v3449_v38 = vpop.xlane.xlu1 %3448  ;;  %v3542_v27 = vpack.c.bf16 %v3521_v26, %v3520_v30  ;;  %v3513_v20 = vmul.f32 %v8939_v56, %v11238_v7  ;;  %v13569_v30 = vld [vmem:[#allocation36_spill] sm:$0xff] }
 0x72f   : > { %8942 = vrcp.f32 %v3449_v38  ;;  %v3539_v45 = vpack.c.bf16 %v3515_v14, %v3514_v55  ;;  %v13571_v38 = vld [vmem:[#allocation87_spill] sm:$0xff] }
 0x730   : > { %7900 = vmatprep.mubr.msk.bf16.mxu1 %vm1615_vm0, %v3542_v27  ;;  %v3538_v31 = vpack.c.bf16 %v3513_v20, %v3512_v22  ;;  %8944 = vrcp.f32 %v3455_v16  ;;  %v3836_v0 = vpop.permute.xlu0 %3835  ;;  %v13564_v16 = vld [vmem:[#allocation27_spill] sm:$0xff] }
 0x731   : > { %7901 = vmatmul.mubr.msk.bf16.gmra.mrb[100].mxu1 %vm1615_vm0, %v3543_v51  ;;  %8946 = vrcp.f32 %v3452_v4  ;;  %v13560_v4 = vld [vmem:[#allocation32_spill] sm:$0xff] }
 0x732   : > { %7884 = vmatprep.mubr.msk.bf16.mxu0 %vm1615_vm0, %v3538_v31  ;;  %7928 = vmatprep.mubr.msk.bf16.mxu1 %vm1615_vm0, %v13553_v23  ;;  %v3832_v47 = vpop.permute.xlu1 %3831 }
 0x733   : > { %7885 = vmatmul.mubr.msk.bf16.gmra.mrb[204].mxu0 %vm1615_vm0, %v3539_v45  ;;  %7904 = vmatprep.subr.bf16.mxu0 %v3832_v47  ;;  %v8941_v7 = vpop.eup %8940 }
 0x734   : > { %7927 = vmatpush3.bf16.xpose.msra.mxu1 %v3942_v2  ;;  %7905 = vmatpush3.bf16.msra.mxu0 %v3832_v47  ;;  %v3524_v23 = vmul.f32 %v8941_v7, %v11250_v35  ;;  %v3838_v13 = vpop.permute.xlu0 %3837 }
 0x735   : > { %8248 = vmatprep.subr.msk.bf16.mxu1 %vm1615_vm0, %v13554_v49  ;;  %7906 = vmatprep.subr.bf16.mxu0 %v3834_v59 }
 0x738   : > { %7907 = vmatpush3.bf16.msra.mxu0 %v3834_v59 }
 0x739   : > { %v8943_v58 = vpop.eup %8942  ;;  %7908 = vmatprep.subr.bf16.mxu0 %v3836_v0 }
 0x73a   : > { %v3525_v40 = vmul.f32 %v8943_v58, %v11256_v8  ;;  %v8945_v52 = vpop.eup %8944  ;;  %v13573_v58 = vld [vmem:[#allocation21_spill] sm:$0xff] }
 0x73b   : > { %7929 = vmatmul.mubr.msk.bf16.vlgmr.msra.gmra.mrb[104].mxu1 %vm1615_vm0, %v13547_v15  ;;  %v8947_v37 = vpop.eup %8946  ;;  %v3527_v35 = vmul.f32 %v8945_v52, %v11246_v39  ;;  %v13558_v39 = vld [vmem:[#allocation26_spill] sm:$0xff] }
 0x73c   : > { %7932 = vmatprep.mubr.msk.bf16.mxu1 %vm1615_vm0, %v13555_v19  ;;  %7953 = vmatpush3.bf16.xpose.msra.mxu1 %v4111_v28  ;;  %v3544_v54 = vpack.c.bf16 %v3525_v40, %v3524_v23  ;;  %v3526_v8 = vmul.f32 %v8947_v37, %v11244_v60  ;;  %v4022_v60 = vsel %vm1615_vm0, %v13549_v6, 0  ;;  %v13575_v23 = vld [vmem:[#allocation39_spill] sm:$0xff]  ;;  %v13578_v52 = vld [vmem:[#allocation42_spill] sm:$0xff] }
 0x73d   : > { %7909 = vmatpush3.bf16.msra.mxu0 %v3836_v0  ;;  %8249 = vmatprep.subr.msk.bf16.mxu1 %vm1615_vm0, %v13556_v46  ;;  %v13572_v0 = vld [vmem:[#allocation20_spill] sm:$0xff]  ;;  %v13577_v40 = vld [vmem:[#allocation35_spill] sm:$0xff]  ;;  %v4206_v28 = vsel %vm1615_vm0, %v13578_v52, 0 }
 0x73e   : > { %7910 = vmatprep.subr.bf16.mxu0 %v3838_v13  ;;  %7912 = vmatprep.mubr.msk.bf16.mxu0 %vm1615_vm0, %v3544_v54  ;;  %v3545_v15 = vpack.c.bf16 %v3527_v35, %v3526_v8  ;;  %v13579_v54 = vld [vmem:[#allocation49_spill] sm:$0xff]  ;;  %v13581_v35 = vld [vmem:[#allocation38_spill] sm:$0xff] }
 0x73f   : > { %v4209_v37 = vsel %vm1615_vm0, %v13579_v54, 0  ;;  %v13582_v8 = vld [vmem:[#allocation41_spill] sm:$0xff] }
 0x741   : > { %7911 = vmatpush3.bf16.msra.mxu0 %v3838_v13  ;;  %v13580_v13 = vld [vmem:[#allocation80_spill] sm:$0xff] }
 0x742   : > { %8244 = vmatprep.subr.msk.bf16.mxu0 %vm1615_vm0, %v13549_v6  ;;  %v4120_v6 = vsel %vm1615_vm0, %v13560_v4, 0 }
 0x743   : > { %7933 = vmatmul.mubr.msk.bf16.gmra.mrb[108].mxu1 %vm1615_vm0, %v13557_v42 }
 0x744   : > { %7913 = vmatmul.mubr.msk.bf16.vlgmr.msra.gmra.mrb[208].mxu0 %vm1615_vm0, %v3545_v15  ;;  %7955 = vmatpush3.bf16.xpose.msra.mxu1 %v4114_v12  ;;  %v13583_v15 = vld [vmem:[#allocation82_spill] sm:$0xff]  ;;  %v13584_v12 = vld [vmem:[#allocation84_spill] sm:$0xff] }
 0x745   : > { %7960 = vmatprep.mubr.msk.bf16.mxu1 %vm1615_vm0, %v13558_v39  ;;  %8250 = vmatprep.subr.msk.bf16.mxu1 %vm1615_vm0, %v13559_v48 }
 0x74a   : > { %7937 = vmatpush3.bf16.xpose.msra.mxu0 %v4022_v60  ;;  %v13585_v60 = vld [vmem:[#allocation45_spill] sm:$0xff] }
 0x74b   : > { %8245 = vmatprep.subr.msk.bf16.mxu0 %vm1615_vm0, %v13550_v34  ;;  %v13565_v34 = vld [vmem:[#allocation30_spill] sm:$0xff] }
 0x74c   : > { %7957 = vmatpush3.bf16.xpose.msra.mxu1 %v4117_v5  ;;  %v13586_v5 = vld [vmem:[#allocation86_spill] sm:$0xff] }
 0x74d   : > { %8251 = vmatprep.subr.msk.bf16.mxu1 %vm1615_vm0, %v13560_v4 }
 0x752   : > { %7939 = vmatpush3.bf16.xpose.msra.mxu0 %v4025_v1 }
 0x753   : > { %8246 = vmatprep.subr.msk.bf16.mxu0 %vm1615_vm0, %v13561_v36 }
 0x754   : > { %7959 = vmatpush3.bf16.xpose.msra.mxu1 %v4120_v6 }
 0x755   : > { %7984 = vmatprep.subr.bf16.mxu1 %v13562_v44 }
 0x75a   : > { %7941 = vmatpush3.bf16.xpose.msra.mxu0 %v4028_v41  ;;  %v13589_v41 = vld [vmem:[#allocation93_spill] sm:$0xff] }
 0x75b   : > { %8247 = vmatprep.subr.msk.bf16.mxu0 %vm1615_vm0, %v13563_v62  ;;  %7961 = vmatmul.mubr.msk.bf16.vlgmr.msra.gmra.mrb[112].mxu1 %vm1615_vm0, %v13564_v16 }
 0x75c   : > { %7964 = vmatprep.mubr.msk.bf16.mxu1 %vm1615_vm0, %v13565_v34  ;;  %7985 = vmatpush3.bf16.msra.mxu1 %v13562_v44 }
 0x75d   : > { %7986 = vmatprep.subr.bf16.mxu1 %v13566_v18 }
 0x760   : > { %7987 = vmatpush3.bf16.msra.mxu1 %v13566_v18 }
 0x761   : > { %7988 = vmatprep.subr.bf16.mxu1 %v13567_v50 }
 0x762   : > { %7943 = vmatpush3.bf16.xpose.msra.mxu0 %v4031_v33 }
 0x763   : > { %7965 = vmatmul.mubr.msk.bf16.gmra.mrb[116].mxu1 %vm1615_vm0, %v13568_v29  ;;  %8252 = vmatprep.subr.msk.bf16.mxu0 %vm1615_vm0, %v13569_v30  ;;  %v3461_v26 = vpop.xlane.xlu1 %3460 }
 0x764   : > { %7989 = vmatpush3.bf16.msra.mxu1 %v13567_v50  ;;  %8948 = vrcp.f32 %v3461_v26 }
 0x765   : > { %v3458_v56 = vpop.xlane.xlu0 %3457  ;;  %7990 = vmatprep.subr.bf16.mxu1 %v13570_v53 }
 0x766   : > { %8950 = vrcp.f32 %v3458_v56 }
 0x768   : > { %7991 = vmatpush3.bf16.msra.mxu1 %v13570_v53 }
 0x769   : > { %v3464_v14 = vpop.xlane.xlu0 %3463  ;;  %8016 = vmatprep.subr.bf16.mxu1 %v13571_v38 }
 0x76a   : > { %8952 = vrcp.f32 %v3464_v14 }
 0x76d   : > { %v3467_v27 = vpop.xlane.xlu0 %3466 }
 0x76e   : > { %v8949_v22 = vpop.eup %8948  ;;  %8954 = vrcp.f32 %v3467_v27 }
 0x76f   : > { %v3529_v20 = vmul.f32 %v8949_v22, %v11272_v32  ;;  %v4200_v32 = vsel %vm1615_vm0, %v13569_v30, 0 }
 0x770   : > { %v8951_v51 = vpop.eup %8950 }
 0x771   : > { %v3528_v55 = vmul.f32 %v8951_v51, %v11276_v57  ;;  %v13574_v57 = vld [vmem:[#allocation23_spill] sm:$0xff] }
 0x773   : > { %v3546_v31 = vpack.c.bf16 %v3529_v20, %v3528_v55 }
 0x774   : > { %v8953_v59 = vpop.eup %8952 }
 0x775   : > { %7916 = vmatprep.mubr.msk.bf16.mxu0 %vm1615_vm0, %v3546_v31  ;;  %v3530_v47 = vmul.f32 %v8953_v59, %v11274_v61  ;;  %v13576_v61 = vld [vmem:[#allocation25_spill] sm:$0xff] }
 0x778   : > { %v8955_v45 = vpop.eup %8954 }
 0x779   : > { %v3531_v2 = vmul.f32 %v8955_v45, %v11288_v24  ;;  %v4203_v24 = vsel %vm1615_vm0, %v13575_v23, 0 }
 0x77b   : > { %v3547_v7 = vpack.c.bf16 %v3531_v2, %v3530_v47 }
 0x77d   : > { %7917 = vmatmul.mubr.msk.bf16.gmra.mrb[212].mxu0 %vm1615_vm0, %v3547_v7 }
 0x77e   : > { %7944 = vmatprep.mubr.msk.bf16.mxu0 %vm1615_vm0, %v13572_v0 }
 0x785   : > { %7945 = vmatmul.mubr.msk.bf16.vlgmr.msra.gmra.mrb[216].mxu0 %vm1615_vm0, %v13573_v58 }
 0x786   : > { %7969 = vmatpush3.bf16.xpose.msra.mxu0 %v4200_v32  ;;  %7948 = vmatprep.mubr.msk.bf16.mxu0 %vm1615_vm0, %v13574_v57 }
 0x787   : > { %8253 = vmatprep.subr.msk.bf16.mxu0 %vm1615_vm0, %v13575_v23 }
 0x78d   : > { %7949 = vmatmul.mubr.msk.bf16.gmra.mrb[220].mxu0 %vm1615_vm0, %v13576_v61 }
 0x78e   : > { %7971 = vmatpush3.bf16.xpose.msra.mxu0 %v4203_v24  ;;  %7976 = vmatprep.mubr.msk.bf16.mxu0 %vm1615_vm0, %v13577_v40 }
 0x78f   : > { %8254 = vmatprep.subr.msk.bf16.mxu0 %vm1615_vm0, %v13578_v52 }
 0x796   : > { %7973 = vmatpush3.bf16.xpose.msra.mxu0 %v4206_v28 }
 0x797   : > { %8255 = vmatprep.subr.msk.bf16.mxu0 %vm1615_vm0, %v13579_v54 }
 0x79e   : > { %7975 = vmatpush3.bf16.xpose.msra.mxu0 %v4209_v37 }
 0x79f   : > { %8000 = vmatprep.subr.bf16.mxu0 %v13580_v13 }
 0x7a5   : > { %7977 = vmatmul.mubr.msk.bf16.vlgmr.msra.gmra.mrb[224].mxu0 %vm1615_vm0, %v13581_v35 }
 0x7a6   : > { %7980 = vmatprep.mubr.msk.bf16.mxu0 %vm1615_vm0, %v13582_v8  ;;  %8001 = vmatpush3.bf16.msra.mxu0 %v13580_v13 }
 0x7a7   : > { %8002 = vmatprep.subr.bf16.mxu0 %v13583_v15 }
 0x7aa   : > { %8003 = vmatpush3.bf16.msra.mxu0 %v13583_v15 }
 0x7ab   : > { %8004 = vmatprep.subr.bf16.mxu0 %v13584_v12 }
 0x7ad   : > { %7981 = vmatmul.mubr.msk.bf16.gmra.mrb[228].mxu0 %vm1615_vm0, %v13585_v60 }
 0x7ae   : > { %8005 = vmatpush3.bf16.msra.mxu0 %v13584_v12 }
 0x7af   : > { %8006 = vmatprep.subr.bf16.mxu0 %v13586_v5 }
 0x7b1   : > { %v11471_v1 = vpop.f32.mrb[88].mxu1 }
 0x7b2   : > { %13587 = vst [vmem:[#allocation71_spill] sm:$0xff] %v11471_v1  ;;  %8007 = vmatpush3.bf16.msra.mxu0 %v13586_v5  ;;  %v11474_v6 = vpop.f32.mrb[89].mxu1 }
 0x7b3   : > { %13588 = vst [vmem:[#allocation47_spill] sm:$0xff] %v11474_v6  ;;  %8032 = vmatprep.subr.bf16.mxu0 %v13589_v41  ;;  %v11477_v33 = vpop.f32.mrb[90].mxu1 }
 0x7b4   : > { %13590 = vst [vmem:[#allocation17_spill] sm:$0xff] %v11477_v33  ;;  %v11481_v56 = vpop.f32.mrb[91].mxu1 }
 0x7b5   : > { %13591 = vst [vmem:[#allocation46_spill] sm:$0xff] %v11481_v56 }
 0x7bd   : > { %v11485_v27 = vpop.f32.mrb[92].mxu1 }
 0x7be   : > { %13592 = vst [vmem:[#allocation51_spill] sm:$0xff] %v11485_v27  ;;  %v11487_v22 = vpop.f32.mrb[93].mxu1 }
 0x7bf   : > { %13593 = vst [vmem:[#allocation52_spill] sm:$0xff] %v11487_v22  ;;  %v11489_v20 = vpop.f32.mrb[94].mxu1 }
 0x7c0   : > { %13594 = vst [vmem:[#allocation48_spill] sm:$0xff] %v11489_v20  ;;  %v11493_v55 = vpop.f32.mrb[95].mxu1 }
 0x7c1   : > { %13595 = vst [vmem:[#allocation50_spill] sm:$0xff] %v11493_v55 }
 0x7ee   : > { %v11497_v59 = vpop.f32.mrb[96].mxu1 }
 0x7ef   : > { %13596 = vst [vmem:[#allocation16_spill] sm:$0xff] %v11497_v59  ;;  %v11499_v45 = vpop.f32.mrb[97].mxu1 }
 0x7f0   : > { %13597 = vst [vmem:[#allocation55_spill] sm:$0xff] %v11499_v45  ;;  %v11501_v47 = vpop.f32.mrb[98].mxu1 }
 0x7f1   : > { %13598 = vst [vmem:[#allocation18_spill] sm:$0xff] %v11501_v47  ;;  %v11505_v7 = vpop.f32.mrb[99].mxu1 }
 0x7f2   : > { %13599 = vst [vmem:[#allocation56_spill] sm:$0xff] %v11505_v7 }
 0x7f3   : > { %v11509_v24 = vpop.f32.mrb[200].mxu0 }
 0x7f4   : > { %13600 = vst [vmem:[#allocation19_spill] sm:$0xff] %v11509_v24  ;;  %v11511_v28 = vpop.f32.mrb[201].mxu0 }
 0x7f5   : > { %13601 = vst [vmem:[#allocation26_spill] sm:$0xff] %v11511_v28  ;;  %v11513_v37 = vpop.f32.mrb[202].mxu0 }
 0x7f6   : > { %13602 = vst [vmem:[#allocation29_spill] sm:$0xff] %v11513_v37  ;;  %v11517_v31 = vpop.f32.mrb[203].mxu0 }
 0x7f7   : > { %13603 = vst [vmem:[#allocation32_spill] sm:$0xff] %v11517_v31 }
 0x804   : > { %v11521_v2 = vpop.f32.mrb[100].mxu1 }
 0x805   : > { %13604 = vst [vmem:[#allocation53_spill] sm:$0xff] %v11521_v2  ;;  %v11523_v14 = vpop.f32.mrb[101].mxu1 }
 0x806   : > { %13605 = vst [vmem:[#allocation54_spill] sm:$0xff] %v11523_v14  ;;  %v11525_v59 = vpop.f32.mrb[204].mxu0  ;;  %v11527_v32 = vpop.f32.mrb[102].mxu1 }
 0x807   : > { %13606 = vst [vmem:[#allocation27_spill] sm:$0xff] %v11525_v59  ;;  %13607 = vst [vmem:[#allocation30_spill] sm:$0xff] %v11527_v32  ;;  %v11531_v45 = vpop.f32.mrb[205].mxu0  ;;  %v11533_v7 = vpop.f32.mrb[103].mxu1 }
 0x808   : > { %13608 = vst [vmem:[#allocation36_spill] sm:$0xff] %v11531_v45  ;;  %13609 = vst [vmem:[#allocation87_spill] sm:$0xff] %v11533_v7  ;;  %v11537_v24 = vpop.f32.mrb[206].mxu0 }
 0x809   : > { %13610 = vst [vmem:[#allocation20_spill] sm:$0xff] %v11537_v24  ;;  %v11541_v37 = vpop.f32.mrb[207].mxu0 }
 0x80a   : > { %13611 = vst [vmem:[#allocation21_spill] sm:$0xff] %v11541_v37 }
 0x80e   : > { %v7930_v31 = vpop.f32.mrb[104].mxu1 }
 0x80f   : > { %v11547_v47 = vsel %vm10148_vm1, %v7930_v31, -1e+30  ;;  %v3978_v2 = vpop.f32.mrb[105].mxu1 }
 0x810   : > { %v4314_v32 = vsel %vm1615_vm0, %v11547_v47, -inf  ;;  %v7931_v51 = vpop.f32.mrb[106].mxu1  ;;  %v11553_v14 = vsel %vm10153_vm2, %v3978_v2, -1e+30 }
 0x811   : > { %v11557_v26 = vsel %vm10157_vm3, %v7931_v51, -1e+30  ;;  %4315 = vmax.xlane.f32.xlu0 %v4314_v32  ;;  %v3981_v28 = vpop.f32.mrb[107].mxu1  ;;  %v4308_v59 = vsel %vm1615_vm0, %v11553_v14, -inf }
 0x812   : > { %v4317_v7 = vsel %vm1615_vm0, %v11557_v26, -inf  ;;  %v11563_v31 = vsel %vm10165_vm4, %v3981_v28, -1e+30 }
 0x813   : > { %4318 = vmax.xlane.f32.xlu1 %v4317_v7  ;;  %v4311_v2 = vsel %vm1615_vm0, %v11563_v31, -inf }
 0x815   : > { %4309 = vmax.xlane.f32.xlu0 %v4308_v59 }
 0x816   : > { %v7934_v24 = vpop.f32.mrb[108].mxu1 }
 0x817   : > { %v11571_v51 = vsel %vm10192_vm5, %v7934_v24, -1e+30  ;;  %4312 = vmax.xlane.f32.xlu1 %v4311_v2  ;;  %v11573_v32 = vpop.f32.mrb[208].mxu0  ;;  %v3994_v45 = vpop.f32.mrb[109].mxu1 }
 0x818   : > { %13612 = vst [vmem:[#allocation23_spill] sm:$0xff] %v11573_v32  ;;  %v4326_v28 = vsel %vm1615_vm0, %v11571_v51, -inf  ;;  %v11577_v7 = vpop.f32.mrb[209].mxu0  ;;  %v7935_v37 = vpop.f32.mrb[110].mxu1  ;;  %v11581_v59 = vsel %vm10207_vm7, %v3994_v45, -1e+30 }
 0x819   : > { %13613 = vst [vmem:[#allocation25_spill] sm:$0xff] %v11577_v7  ;;  %v11585_v27 = vsel %vm10199_vm6, %v7935_v37, -1e+30  ;;  %4327 = vmax.xlane.f32.xlu0 %v4326_v28  ;;  %v11587_v24 = vpop.f32.mrb[210].mxu0  ;;  %v3997_v2 = vpop.f32.mrb[111].mxu1  ;;  %v4320_v28 = vsel %vm1615_vm0, %v11581_v59, -inf }
 0x81a   : > { %13614 = vst [vmem:[#allocation102_spill] sm:$0xff] %v11587_v24  ;;  %v4329_v20 = vsel %vm1615_vm0, %v11585_v27, -inf  ;;  %v11593_v55 = vpop.f32.mrb[211].mxu0  ;;  %v11597_v45 = vsel %vm10211_vm8, %v3997_v2, -1e+30 }
 0x81b   : > { %13615 = vst [vmem:[#allocation103_spill] sm:$0xff] %v11593_v55  ;;  %4330 = vmax.xlane.f32.xlu1 %v4329_v20  ;;  %v4323_v1 = vsel %vm1615_vm0, %v11597_v45, -inf }
 0x81d   : > { %4321 = vmax.xlane.f32.xlu0 %v4320_v28 }
 0x81f   : > { %4324 = vmax.xlane.f32.xlu1 %v4323_v1 }
 0x82e   : > { %v7962_v33 = vpop.f32.mrb[112].mxu1 }
 0x82f   : > { %v11607_v22 = vsel %vm10148_vm1, %v7962_v33, -1e+30  ;;  %v4156_v32 = vpop.f32.mrb[113].mxu1 }
 0x830   : > { %v4362_v2 = vsel %vm1615_vm0, %v11607_v22, -inf  ;;  %v7963_v24 = vpop.f32.mrb[114].mxu1  ;;  %v11637_v53 = vsel %vm10153_vm2, %v4156_v32, -1e+30 }
 0x831   : > { %v11613_v20 = vsel %vm10157_vm3, %v7963_v24, -1e+30  ;;  %4363 = vmax.xlane.f32.xlu0 %v4362_v2  ;;  %v4159_v28 = vpop.f32.mrb[115].mxu1 }
 0x832   : > { %v4365_v37 = vsel %vm1615_vm0, %v11613_v20, -inf }
 0x833   : > { %4366 = vmax.xlane.f32.xlu1 %v4365_v37 }
 0x836   : > { %v7966_v1 = vpop.f32.mrb[116].mxu1 }
 0x837   : > { %v4172_v7 = vpop.f32.mrb[117].mxu1  ;;  %v11665_v18 = vsel %vm10192_vm5, %v7966_v1, -1e+30 }
 0x838   : > { %v7967_v55 = vpop.f32.mrb[118].mxu1 }
 0x839   : > { %v4175_v33 = vpop.f32.mrb[119].mxu1  ;;  %v11671_v50 = vsel %vm10199_vm6, %v7967_v55, -1e+30 }
 0x83a   : > { %v4377_v1 = vsel %vm1615_vm0, %v11671_v50, -inf }
 0x850   : > { %v11617_v6 = vpop.f32.mrb[212].mxu0 }
 0x851   : > { %13616 = vst [vmem:[#allocation104_spill] sm:$0xff] %v11617_v6  ;;  %v11619_v56 = vpop.f32.mrb[213].mxu0 }
 0x852   : > { %13617 = vst [vmem:[#allocation105_spill] sm:$0xff] %v11619_v56  ;;  %v11621_v3 = vpop.f32.mrb[214].mxu0 }
 0x853   : > { %13618 = vst [vmem:[#allocation106_spill] sm:$0xff] %v11621_v3  ;;  %v11625_v41 = vpop.f32.mrb[215].mxu0  ;;  %v4356_v3 = vsel %vm1615_vm0, %v11637_v53, -inf }
 0x854   : > { %13619 = vst [vmem:[#allocation107_spill] sm:$0xff] %v11625_v41 }
 0x858   : > { %v7946_v5 = vpop.f32.mrb[216].mxu0 }
 0x859   : > { %v11631_v37 = vsel %vm10148_vm1, %v7946_v5, -1e+30  ;;  %v4067_v12 = vpop.f32.mrb[217].mxu0  ;;  %v11647_v5 = vsel %vm10165_vm4, %v4159_v28, -1e+30 }
 0x85a   : > { %v4338_v15 = vsel %vm1615_vm0, %v11631_v37, -inf  ;;  %v7947_v13 = vpop.f32.mrb[218].mxu0  ;;  %v11653_v32 = vsel %vm10153_vm2, %v4067_v12, -1e+30 }
 0x85b   : > { %v11641_v24 = vsel %vm10157_vm3, %v7947_v13, -1e+30  ;;  %4339 = vmax.xlane.f32.xlu0 %v4338_v15  ;;  %v4070_v2 = vpop.f32.mrb[219].mxu0  ;;  %v4359_v13 = vsel %vm1615_vm0, %v11647_v5, -inf }
 0x85c   : > { %v4341_v6 = vsel %vm1615_vm0, %v11641_v24, -inf  ;;  %v11659_v56 = vsel %vm10165_vm4, %v4070_v2, -1e+30  ;;  %v4374_v2 = vsel %vm1615_vm0, %v11665_v18, -inf }
 0x85d   : > { %4342 = vmax.xlane.f32.xlu1 %v4341_v6  ;;  %v4332_v6 = vsel %vm1615_vm0, %v11653_v32, -inf  ;;  %v4335_v12 = vsel %vm1615_vm0, %v11659_v56, -inf }
 0x85f   : > { %4357 = vmax.xlane.f32.xlu0 %v4356_v3 }
 0x860   : > { %v7950_v15 = vpop.f32.mrb[220].mxu0 }
 0x861   : > { %4360 = vmax.xlane.f32.xlu1 %v4359_v13  ;;  %v4083_v28 = vpop.f32.mrb[221].mxu0  ;;  %v11677_v13 = vsel %vm10192_vm5, %v7950_v15, -1e+30 }
 0x862   : > { %v7951_v41 = vpop.f32.mrb[222].mxu0  ;;  %v4350_v55 = vsel %vm1615_vm0, %v11677_v13, -inf }
 0x863   : > { %4333 = vmax.xlane.f32.xlu0 %v4332_v6  ;;  %v4086_v3 = vpop.f32.mrb[223].mxu0  ;;  %v11683_v6 = vsel %vm10199_vm6, %v7951_v41, -1e+30 }
 0x864   : > { %v4353_v15 = vsel %vm1615_vm0, %v11683_v6, -inf }
 0x865   : > { %4336 = vmax.xlane.f32.xlu1 %v4335_v12  ;;  %v11689_v12 = vsel %vm10207_vm7, %v4172_v7, -1e+30 }
 0x866   : > { %v4368_v41 = vsel %vm1615_vm0, %v11689_v12, -inf }
 0x867   : > { %4375 = vmax.xlane.f32.xlu0 %v4374_v2  ;;  %v11695_v2 = vsel %vm10211_vm8, %v4175_v33, -1e+30 }
 0x868   : > { %v4371_v7 = vsel %vm1615_vm0, %v11695_v2, -inf }
 0x869   : > { %4378 = vmax.xlane.f32.xlu1 %v4377_v1  ;;  %v11701_v1 = vsel %vm10207_vm7, %v4083_v28, -1e+30 }
 0x86a   : > { %v4344_v33 = vsel %vm1615_vm0, %v11701_v1, -inf }
 0x86b   : > { %4351 = vmax.xlane.f32.xlu0 %v4350_v55  ;;  %v11707_v55 = vsel %vm10211_vm8, %v4086_v3, -1e+30 }
 0x86d   : > { %4354 = vmax.xlane.f32.xlu1 %v4353_v15  ;;  %v4347_v15 = vsel %vm1615_vm0, %v11707_v55, -inf }
 0x86f   : > { %4369 = vmax.xlane.f32.xlu0 %v4368_v41 }
 0x871   : > { %4372 = vmax.xlane.f32.xlu1 %v4371_v7 }
 0x873   : > { %4345 = vmax.xlane.f32.xlu0 %v4344_v33 }
 0x875   : > { %4348 = vmax.xlane.f32.xlu1 %v4347_v15 }
 0x878   : > { %v7978_v60 = vpop.f32.mrb[224].mxu0 }
 0x879   : > { %v11715_v28 = vsel %vm10148_vm1, %v7978_v60, -1e+30  ;;  %v4245_v41 = vpop.f32.mrb[225].mxu0 }
 0x87a   : > { %v4386_v44 = vsel %vm1615_vm0, %v11715_v28, -inf  ;;  %v7979_v3 = vpop.f32.mrb[226].mxu0  ;;  %v11721_v7 = vsel %vm10153_vm2, %v4245_v41, -1e+30 }
 0x87b   : > { %v11725_v33 = vsel %vm10157_vm3, %v7979_v3, -1e+30  ;;  %4387 = vmax.xlane.f32.xlu0 %v4386_v44  ;;  %v4248_v15 = vpop.f32.mrb[227].mxu0  ;;  %v4380_v35 = vsel %vm1615_vm0, %v11721_v7, -inf }
 0x87c   : > { %v4389_v17 = vsel %vm1615_vm0, %v11725_v33, -inf  ;;  %v11731_v60 = vsel %vm10165_vm4, %v4248_v15, -1e+30 }
 0x87d   : > { %4390 = vmax.xlane.f32.xlu1 %v4389_v17  ;;  %v4383_v41 = vsel %vm1615_vm0, %v11731_v60, -inf }
 0x87f   : > { %4381 = vmax.xlane.f32.xlu0 %v4380_v35 }
 0x880   : > { %v7982_v21 = vpop.f32.mrb[228].mxu0 }
 0x881   : > { %v11739_v44 = vsel %vm10192_vm5, %v7982_v21, -1e+30  ;;  %4384 = vmax.xlane.f32.xlu1 %v4383_v41  ;;  %v4261_v3 = vpop.f32.mrb[229].mxu0 }
 0x882   : > { %v4398_v25 = vsel %vm1615_vm0, %v11739_v44, -inf  ;;  %v7983_v15 = vpop.f32.mrb[230].mxu0  ;;  %v11745_v17 = vsel %vm10207_vm7, %v4261_v3, -1e+30  ;;  %v11759_v3 = vpop.permute.xlu0 %5000 }
 0x883   : > { %v11749_v35 = vsel %vm10199_vm6, %v7983_v15, -1e+30  ;;  %4399 = vmax.xlane.f32.xlu0 %v4398_v25  ;;  %v4264_v43 = vpop.f32.mrb[231].mxu0  ;;  %v4392_v9 = vsel %vm1615_vm0, %v11745_v17, -inf  ;;  %v11763_v25 = vpop.permute.xlu1 %5002 }
 0x884   : > { %v4401_v21 = vsel %vm1615_vm0, %v11749_v35, -inf  ;;  %v11755_v41 = vsel %vm10211_vm8, %v4264_v43, -1e+30  ;;  %13620 = vst [vmem:[#allocation108_spill] sm:$0xff] %v11763_v25 }
 0x885   : > { %4402 = vmax.xlane.f32.xlu1 %v4401_v21  ;;  %v4395_v15 = vsel %vm1615_vm0, %v11755_v41, -inf }
 0x886   : > { %v11765_v11 = vpop.permute.xlu0 %5004 }
 0x887   : > { %4393 = vmax.xlane.f32.xlu0 %v4392_v9  ;;  %13621 = vst [vmem:[#allocation109_spill] sm:$0xff] %v11765_v11  ;;  %v11767_v10 = vpop.permute.xlu1 %4990 }
 0x888   : > { %13622 = vst [vmem:[#allocation110_spill] sm:$0xff] %v11767_v10 }
 0x889   : > { %4396 = vmax.xlane.f32.xlu1 %v4395_v15 }
 0x88a   : > { %v11769_v63 = vpop.permute.xlu0 %5006 }
 0x88b   : > { %13623 = vst [vmem:[#allocation111_spill] sm:$0xff] %v11769_v63  ;;  %v11771_v43 = vpop.permute.xlu1 %5113 }
 0x88c   : > { %13624 = vst [vmem:[#allocation112_spill] sm:$0xff] %v11771_v43 }
 0x88e   : > { %v11773_v21 = vpop.permute.xlu0 %4988 }
 0x88f   : > { %13625 = vst [vmem:[#allocation113_spill] sm:$0xff] %v11773_v21  ;;  %v11775_v8 = vpop.permute.xlu1 %5115 }
 0x890   : > { %13626 = vst [vmem:[#allocation114_spill] sm:$0xff] %v11775_v8 }
 0x89e   : > { %v4316_v9 = vpop.xlane.xlu0 %4315 }
 0x89f   : > { %v4406_v54 = vsub.f32 %v11547_v47, %v4316_v9 }
 0x8a0   : > { %v4319_v40 = vpop.xlane.xlu1 %4318 }
 0x8a1   : > { %v4440_v29 = vmul.f32 1.442695, %v4406_v54  ;;  %v4407_v15 = vsub.f32 %v11557_v26, %v4319_v40 }
 0x8a2   : > { %v4310_v25 = vpop.xlane.xlu0 %4309 }
 0x8a3   : > { %8956 = vpow2.f32 %v4440_v29  ;;  %v4442_v11 = vmul.f32 1.442695, %v4407_v15  ;;  %v4404_v10 = vsub.f32 %v11553_v14, %v4310_v25 }
 0x8a4   : > { %v4313_v52 = vpop.xlane.xlu1 %4312 }
 0x8a5   : > { %8958 = vpow2.f32 %v4442_v11  ;;  %v4436_v63 = vmul.f32 1.442695, %v4404_v10  ;;  %v4405_v43 = vsub.f32 %v11563_v31, %v4313_v52 }
 0x8a6   : > { %v4328_v21 = vpop.xlane.xlu0 %4327 }
 0x8a7   : > { %8960 = vpow2.f32 %v4436_v63  ;;  %v4438_v8 = vmul.f32 1.442695, %v4405_v43  ;;  %v4410_v23 = vsub.f32 %v11571_v51, %v4328_v21 }
 0x8a8   : > { %v4331_v47 = vpop.xlane.xlu1 %4330 }
 0x8a9   : > { %8962 = vpow2.f32 %v4438_v8  ;;  %v4448_v54 = vmul.f32 1.442695, %v4410_v23  ;;  %v4411_v40 = vsub.f32 %v11585_v27, %v4331_v47 }
 0x8aa   : > { %v4322_v26 = vpop.xlane.xlu0 %4321 }
 0x8ab   : > { %8964 = vpow2.f32 %v4448_v54  ;;  %v4450_v29 = vmul.f32 1.442695, %v4411_v40  ;;  %v4408_v14 = vsub.f32 %v11581_v59, %v4322_v26 }
 0x8ac   : > { %v4325_v25 = vpop.xlane.xlu1 %4324 }
 0x8ad   : > { %v11784_v11 = vpop.eup %8956  ;;  %8966 = vpow2.f32 %v4450_v29  ;;  %v4444_v10 = vmul.f32 1.442695, %v4408_v14  ;;  %v4409_v63 = vsub.f32 %v11597_v45, %v4325_v25 }
 0x8ae   : > { %v4506_v52 = vsel %vm1615_vm0, %v11784_v11, 0.0 }
 0x8af   : > { %v11789_v31 = vpop.eup %8958  ;;  %8968 = vpow2.f32 %v4444_v10  ;;  %v4446_v23 = vmul.f32 1.442695, %v4409_v63  ;;  %4507 = vadd.xlane.f32.xlu0 %v4506_v52 }
 0x8b0   : > { %v4509_v8 = vsel %vm1615_vm0, %v11789_v31, 0.0 }
 0x8b1   : > { %v11793_v27 = vpop.eup %8960  ;;  %8970 = vpow2.f32 %v4446_v23  ;;  %4510 = vadd.xlane.f32.xlu1 %v4509_v8 }
 0x8b2   : > { %v4500_v51 = vsel %vm1615_vm0, %v11793_v27, 0.0 }
 0x8b3   : > { %v11797_v59 = vpop.eup %8962  ;;  %4501 = vadd.xlane.f32.xlu0 %v4500_v51 }
 0x8b4   : > { %v4503_v45 = vsel %vm1615_vm0, %v11797_v59, 0.0 }
 0x8b5   : > { %v11801_v43 = vpop.eup %8964  ;;  %4504 = vadd.xlane.f32.xlu1 %v4503_v45 }
 0x8b6   : > { %v4518_v21 = vsel %vm1615_vm0, %v11801_v43, 0.0 }
 0x8b7   : > { %v11805_v9 = vpop.eup %8966  ;;  %4519 = vadd.xlane.f32.xlu0 %v4518_v21 }
 0x8b8   : > { %v4521_v15 = vsel %vm1615_vm0, %v11805_v9, 0.0 }
 0x8b9   : > { %v11809_v47 = vpop.eup %8968  ;;  %4522 = vadd.xlane.f32.xlu1 %v4521_v15 }
 0x8ba   : > { %v4512_v54 = vsel %vm1615_vm0, %v11809_v47, 0.0 }
 0x8bb   : > { %v11813_v40 = vpop.eup %8970  ;;  %4513 = vadd.xlane.f32.xlu0 %v4512_v54 }
 0x8bc   : > { %v4515_v26 = vsel %vm1615_vm0, %v11813_v40, 0.0 }
 0x8bd   : > { %4516 = vadd.xlane.f32.xlu1 %v4515_v26 }
 0x8be   : > { %v4364_v29 = vpop.xlane.xlu0 %4363 }
 0x8bf   : > { %v4422_v14 = vsub.f32 %v11607_v22, %v4364_v29 }
 0x8c0   : > { %v4367_v25 = vpop.xlane.xlu1 %4366 }
 0x8c1   : > { %v4472_v10 = vmul.f32 1.442695, %v4422_v14  ;;  %v4423_v63 = vsub.f32 %v11613_v20, %v4367_v25 }
 0x8c3   : > { %8972 = vpow2.f32 %v4472_v10  ;;  %v4474_v52 = vmul.f32 1.442695, %v4423_v63 }
 0x8c5   : > { %8974 = vpow2.f32 %v4474_v52 }
 0x8cd   : > { %v11819_v23 = vpop.eup %8972 }
 0x8ce   : > { %v4554_v8 = vsel %vm1615_vm0, %v11819_v23, 0.0 }
 0x8cf   : > { %v11823_v51 = vpop.eup %8974  ;;  %4555 = vadd.xlane.f32.xlu0 %v4554_v8 }
 0x8d0   : > { %v4557_v45 = vsel %vm1615_vm0, %v11823_v51, 0.0 }
 0x8d1   : > { %4558 = vadd.xlane.f32.xlu1 %v4557_v45 }
 0x8e8   : > { %v4340_v22 = vpop.xlane.xlu0 %4339 }
 0x8e9   : > { %v4414_v21 = vsub.f32 %v11631_v37, %v4340_v22 }
 0x8ea   : > { %v4343_v15 = vpop.xlane.xlu1 %4342 }
 0x8eb   : > { %v4456_v20 = vmul.f32 1.442695, %v4414_v21  ;;  %v4415_v54 = vsub.f32 %v11641_v24, %v4343_v15 }
 0x8ec   : > { %v4358_v26 = vpop.xlane.xlu0 %4357 }
 0x8ed   : > { %8976 = vpow2.f32 %v4456_v20  ;;  %v4458_v29 = vmul.f32 1.442695, %v4415_v54  ;;  %v4420_v14 = vsub.f32 %v11637_v53, %v4358_v26 }
 0x8ee   : > { %v4361_v25 = vpop.xlane.xlu1 %4360 }
 0x8ef   : > { %8978 = vpow2.f32 %v4458_v29  ;;  %v4468_v10 = vmul.f32 1.442695, %v4420_v14  ;;  %v4421_v63 = vsub.f32 %v11647_v5, %v4361_v25 }
 0x8f0   : > { %v4334_v52 = vpop.xlane.xlu0 %4333 }
 0x8f1   : > { %8980 = vpow2.f32 %v4468_v10  ;;  %v4470_v8 = vmul.f32 1.442695, %v4421_v63  ;;  %v4412_v45 = vsub.f32 %v11653_v32, %v4334_v52 }
 0x8f2   : > { %v4337_v37 = vpop.xlane.xlu1 %4336 }
 0x8f3   : > { %8982 = vpow2.f32 %v4470_v8  ;;  %v4452_v22 = vmul.f32 1.442695, %v4412_v45  ;;  %v4413_v24 = vsub.f32 %v11659_v56, %v4337_v37 }
 0x8f4   : > { %v4376_v21 = vpop.xlane.xlu0 %4375 }
 0x8f5   : > { %8984 = vpow2.f32 %v4452_v22  ;;  %v4454_v15 = vmul.f32 1.442695, %v4413_v24  ;;  %v4426_v53 = vsub.f32 %v11665_v18, %v4376_v21 }
 0x8f6   : > { %v4379_v20 = vpop.xlane.xlu1 %4378 }
 0x8f7   : > { %v11834_v54 = vpop.eup %8976  ;;  %8986 = vpow2.f32 %v4454_v15  ;;  %v4480_v5 = vmul.f32 1.442695, %v4426_v53  ;;  %v4427_v26 = vsub.f32 %v11671_v50, %v4379_v20 }
 0x8f8   : > { %v4352_v29 = vpop.xlane.xlu0 %4351  ;;  %v4530_v32 = vsel %vm1615_vm0, %v11834_v54, 0.0 }
 0x8f9   : > { %v11839_v14 = vpop.eup %8978  ;;  %8988 = vpow2.f32 %v4480_v5  ;;  %v4482_v56 = vmul.f32 1.442695, %v4427_v26  ;;  %v4418_v25 = vsub.f32 %v11677_v13, %v4352_v29  ;;  %4531 = vadd.xlane.f32.xlu0 %v4530_v32 }
 0x8fa   : > { %v4355_v10 = vpop.xlane.xlu1 %4354  ;;  %v4533_v18 = vsel %vm1615_vm0, %v11839_v14, 0.0 }
 0x8fb   : > { %v11844_v63 = vpop.eup %8980  ;;  %8990 = vpow2.f32 %v4482_v56  ;;  %v4464_v52 = vmul.f32 1.442695, %v4418_v25  ;;  %v4419_v50 = vsub.f32 %v11683_v6, %v4355_v10  ;;  %4534 = vadd.xlane.f32.xlu1 %v4533_v18 }
 0x8fc   : > { %v4370_v8 = vpop.xlane.xlu0 %4369  ;;  %v4548_v45 = vsel %vm1615_vm0, %v11844_v63, 0.0 }
 0x8fd   : > { %v11849_v37 = vpop.eup %8982  ;;  %8992 = vpow2.f32 %v4464_v52  ;;  %v4466_v13 = vmul.f32 1.442695, %v4419_v50  ;;  %v4424_v22 = vsub.f32 %v11689_v12, %v4370_v8  ;;  %4549 = vadd.xlane.f32.xlu0 %v4548_v45 }
 0x8fe   : > { %v4373_v24 = vpop.xlane.xlu1 %4372  ;;  %v4551_v21 = vsel %vm1615_vm0, %v11849_v37, 0.0 }
 0x8ff   : > { %v11854_v15 = vpop.eup %8984  ;;  %8994 = vpow2.f32 %v4466_v13  ;;  %v4476_v6 = vmul.f32 1.442695, %v4424_v22  ;;  %v4425_v53 = vsub.f32 %v11695_v2, %v4373_v24  ;;  %4552 = vadd.xlane.f32.xlu1 %v4551_v21 }
 0x900   : > { %v4346_v20 = vpop.xlane.xlu0 %4345  ;;  %v4524_v5 = vsel %vm1615_vm0, %v11854_v15, 0.0 }
 0x901   : > { %v11859_v26 = vpop.eup %8986  ;;  %8996 = vpow2.f32 %v4476_v6  ;;  %v4478_v12 = vmul.f32 1.442695, %v4425_v53  ;;  %v4416_v29 = vsub.f32 %v11701_v1, %v4346_v20  ;;  %4525 = vadd.xlane.f32.xlu0 %v4524_v5 }
 0x902   : > { %v4349_v32 = vpop.xlane.xlu1 %4348  ;;  %v4527_v56 = vsel %vm1615_vm0, %v11859_v26, 0.0 }
 0x903   : > { %v11864_v25 = vpop.eup %8988  ;;  %8998 = vpow2.f32 %v4478_v12  ;;  %v4460_v2 = vmul.f32 1.442695, %v4416_v29  ;;  %v4417_v10 = vsub.f32 %v11707_v55, %v4349_v32  ;;  %4528 = vadd.xlane.f32.xlu1 %v4527_v56 }
 0x904   : > { %v4566_v18 = vsel %vm1615_vm0, %v11864_v25, 0.0 }
 0x905   : > { %v11869_v52 = vpop.eup %8990  ;;  %9000 = vpow2.f32 %v4460_v2  ;;  %v4462_v50 = vmul.f32 1.442695, %v4417_v10  ;;  %4567 = vadd.xlane.f32.xlu0 %v4566_v18 }
 0x906   : > { %v4569_v1 = vsel %vm1615_vm0, %v11869_v52, 0.0 }
 0x907   : > { %v11873_v8 = vpop.eup %8992  ;;  %9002 = vpow2.f32 %v4462_v50  ;;  %4570 = vadd.xlane.f32.xlu1 %v4569_v1 }
 0x908   : > { %v4388_v45 = vpop.xlane.xlu0 %4387  ;;  %v4542_v55 = vsel %vm1615_vm0, %v11873_v8, 0.0 }
 0x909   : > { %v11877_v13 = vpop.eup %8994  ;;  %v4430_v22 = vsub.f32 %v11715_v28, %v4388_v45  ;;  %4543 = vadd.xlane.f32.xlu0 %v4542_v55 }
 0x90a   : > { %v4391_v24 = vpop.xlane.xlu1 %4390  ;;  %v4545_v21 = vsel %vm1615_vm0, %v11877_v13, 0.0 }
 0x90b   : > { %v11882_v6 = vpop.eup %8996  ;;  %v4488_v53 = vmul.f32 1.442695, %v4430_v22  ;;  %v4431_v20 = vsub.f32 %v11725_v33, %v4391_v24  ;;  %4546 = vadd.xlane.f32.xlu1 %v4545_v21 }
 0x90c   : > { %v4382_v5 = vpop.xlane.xlu0 %4381  ;;  %v4560_v12 = vsel %vm1615_vm0, %v11882_v6, 0.0 }
 0x90d   : > { %v11887_v29 = vpop.eup %8998  ;;  %9004 = vpow2.f32 %v4488_v53  ;;  %v4428_v28 = vsub.f32 %v11721_v7, %v4382_v5  ;;  %4561 = vadd.xlane.f32.xlu0 %v4560_v12  ;;  %v4490_v10 = vmul.f32 1.442695, %v4431_v20 }
 0x90e   : > { %v4385_v32 = vpop.xlane.xlu1 %4384  ;;  %v4563_v56 = vsel %vm1615_vm0, %v11887_v29, 0.0 }
 0x90f   : > { %v11892_v2 = vpop.eup %9000  ;;  %v4484_v18 = vmul.f32 1.442695, %v4428_v28  ;;  %v4429_v33 = vsub.f32 %v11731_v60, %v4385_v32  ;;  %4564 = vadd.xlane.f32.xlu1 %v4563_v56 }
 0x910   : > { %v4536_v50 = vsel %vm1615_vm0, %v11892_v2, 0.0  ;;  %v4400_v12 = vpop.xlane.xlu0 %4399 }
 0x911   : > { %v11897_v1 = vpop.eup %9002  ;;  %9006 = vpow2.f32 %v4484_v18  ;;  %4537 = vadd.xlane.f32.xlu0 %v4536_v50  ;;  %v4486_v45 = vmul.f32 1.442695, %v4429_v33  ;;  %v4434_v28 = vsub.f32 %v11739_v44, %v4400_v12 }
 0x912   : > { %v4539_v7 = vsel %vm1615_vm0, %v11897_v1, 0.0  ;;  %9008 = vpow2.f32 %v4490_v10  ;;  %v4403_v10 = vpop.xlane.xlu1 %4402 }
 0x913   : > { %4540 = vadd.xlane.f32.xlu1 %v4539_v7  ;;  %9010 = vpow2.f32 %v4486_v45  ;;  %v4496_v56 = vmul.f32 1.442695, %v4434_v28  ;;  %v4435_v33 = vsub.f32 %v11749_v35, %v4403_v10 }
 0x914   : > { %v4394_v32 = vpop.xlane.xlu0 %4393 }
 0x915   : > { %v4432_v18 = vsub.f32 %v11745_v17, %v4394_v32  ;;  %9012 = vpow2.f32 %v4496_v56  ;;  %v4498_v45 = vmul.f32 1.442695, %v4435_v33 }
 0x916   : > { %v4397_v7 = vpop.xlane.xlu1 %4396 }
 0x917   : > { %v11901_v55 = vpop.eup %9004  ;;  %v4492_v50 = vmul.f32 1.442695, %v4432_v18 }
 0x918   : > { %v4578_v60 = vsel %vm1615_vm0, %v11901_v55, 0.0 }
 0x919   : > { %4579 = vadd.xlane.f32.xlu1 %v4578_v60  ;;  %9014 = vpow2.f32 %v4492_v50 }
 0x91a   : > { %9016 = vpow2.f32 %v4498_v45 }
 0x91b   : > { %v11905_v22 = vpop.eup %9006 }
 0x91c   : > { %v4572_v24 = vsel %vm1615_vm0, %v11905_v22, 0.0  ;;  %v11909_v21 = vpop.eup %9008 }
 0x91d   : > { %4573 = vadd.xlane.f32.xlu1 %v4572_v24  ;;  %v4581_v53 = vsel %vm1615_vm0, %v11909_v21, 0.0  ;;  %v11913_v20 = vpop.eup %9010 }
 0x91e   : > { %v4575_v5 = vsel %vm1615_vm0, %v11913_v20, 0.0 }
 0x91f   : > { %v11924_v24 = vpop.eup %9012 }
 0x920   : > { %v4590_v35 = vsel %vm1615_vm0, %v11924_v24, 0.0 }
 0x921   : > { %4582 = vadd.xlane.f32.xlu1 %v4581_v53 }
 0x925   : > { %4576 = vadd.xlane.f32.xlu1 %v4575_v5  ;;  %v11929_v5 = vpop.eup %9014 }
 0x926   : > { %v11931_v56 = vpop.eup %9016  ;;  %v4584_v10 = vsel %vm1615_vm0, %v11929_v5, 0.0 }
 0x927   : > { %4992 = vrot.lane.b32.xlu0 %v13555_v19, %s9379_s21 }
 0x936   : > { %4994 = vrot.lane.b32.xlu1 %v13557_v42, %s9379_s21  ;;  %v4433_v42 = vsub.f32 %v11755_v41, %v4397_v7 }
 0x938   : > { %v4494_v28 = vmul.f32 1.442695, %v4433_v42 }
 0x93c   : > { %v4508_v60 = vpop.xlane.xlu0 %4507 }
 0x93e   : > { %v4511_v19 = vpop.xlane.xlu1 %4510 }
 0x93f   : > { %9018 = vrcp.f32 %v4511_v19 }
 0x940   : > { %v4502_v44 = vpop.xlane.xlu0 %4501 }
 0x941   : > { %9020 = vrcp.f32 %v4502_v44 }
 0x942   : > { %9022 = vrcp.f32 %v4508_v60  ;;  %v4505_v17 = vpop.xlane.xlu1 %4504  ;;  %v4593_v60 = vsel %vm1615_vm0, %v11931_v56, 0.0 }
 0x943   : > { %9024 = vrcp.f32 %v4505_v17 }
 0x944   : > { %v4520_v53 = vpop.xlane.xlu0 %4519 }
 0x946   : > { %4591 = vadd.xlane.f32.xlu0 %v4590_v35  ;;  %v4523_v12 = vpop.xlane.xlu1 %4522 }
 0x947   : > { %9026 = vrcp.f32 %v4523_v12 }
 0x948   : > { %v4514_v32 = vpop.xlane.xlu0 %4513 }
 0x949   : > { %9028 = vrcp.f32 %v4514_v32  ;;  %v9019_v18 = vpop.eup %9018  ;;  %v13627_v32 = vld [vmem:[#allocation88_spill] sm:$0xff] }
 0x94a   : > { %9030 = vrcp.f32 %v4520_v53  ;;  %4585 = vadd.xlane.f32.xlu0 %v4584_v10  ;;  %v4517_v41 = vpop.xlane.xlu1 %4516  ;;  %v4631_v45 = vmul.f32 %v9019_v18, %v11789_v31 }
 0x94b   : > { %v9021_v33 = vpop.eup %9020  ;;  %9032 = vrcp.f32 %v4517_v41 }
 0x94c   : > { %v9023_v50 = vpop.eup %9022  ;;  %9034 = vpow2.f32 %v4494_v28  ;;  %v4628_v19 = vmul.f32 %v9021_v33, %v11793_v27  ;;  %v13628_v33 = vld [vmem:[#allocation89_spill] sm:$0xff] }
 0x94d   : > { %v9025_v7 = vpop.eup %9024  ;;  %v4630_v17 = vmul.f32 %v9023_v50, %v11784_v11 }
 0x94e   : > { %4594 = vadd.xlane.f32.xlu0 %v4593_v60  ;;  %v4629_v44 = vmul.f32 %v9025_v7, %v11797_v59 }
 0x94f   : > { %v4661_v53 = vpack.c.bf16 %v4631_v45, %v4630_v17  ;;  %v13638_v45 = vld [vmem:[#allocation45_spill] sm:$0xff] }
 0x950   : > { %v4660_v42 = vpack.c.bf16 %v4629_v44, %v4628_v19  ;;  %v13639_v19 = vld [vmem:[#allocation77_spill] sm:$0xff] }
 0x951   : > { %v9027_v35 = vpop.eup %9026 }
 0x952   : > { %7992 = vmatprep.mubr.msk.bf16.mxu1 %vm1615_vm0, %v4660_v42  ;;  %v4635_v27 = vmul.f32 %v9027_v35, %v11805_v9  ;;  %v13629_v9 = vld [vmem:[#allocation91_spill] sm:$0xff] }
 0x953   : > { %v9029_v12 = vpop.eup %9028  ;;  %7993 = vmatmul.mubr.msk.bf16.vlgmr.msra.gmra.mrb[120].mxu1 %vm1615_vm0, %v4661_v53 }
 0x954   : > { %v9031_v28 = vpop.eup %9030  ;;  %8017 = vmatpush3.bf16.msra.mxu1 %v13571_v38  ;;  %v4632_v11 = vmul.f32 %v9029_v12, %v11809_v47 }
 0x955   : > { %v9033_v31 = vpop.eup %9032  ;;  %8018 = vmatprep.subr.bf16.mxu1 %v13627_v32  ;;  %v4634_v18 = vmul.f32 %v9031_v28, %v11801_v43  ;;  %v13637_v43 = vld [vmem:[#allocation73_spill] sm:$0xff]  ;;  %v13640_v28 = vld [vmem:[#allocation75_spill] sm:$0xff] }
 0x956   : > { %v11946_v10 = vpop.eup %9034  ;;  %v4633_v59 = vmul.f32 %v9033_v31, %v11813_v40 }
 0x957   : > { %v4587_v50 = vsel %vm1615_vm0, %v11946_v10, 0.0  ;;  %v4663_v7 = vpack.c.bf16 %v4635_v27, %v4634_v18  ;;  %v13641_v27 = vld [vmem:[#allocation79_spill] sm:$0xff] }
 0x958   : > { %8019 = vmatpush3.bf16.msra.mxu1 %v13627_v32  ;;  %v4662_v41 = vpack.c.bf16 %v4633_v59, %v4632_v11 }
 0x959   : > { %8020 = vmatprep.subr.bf16.mxu1 %v13628_v33 }
 0x95a   : > { %4588 = vadd.xlane.f32.xlu1 %v4587_v50  ;;  %7996 = vmatprep.mubr.msk.bf16.mxu1 %vm1615_vm0, %v4662_v41 }
 0x95b   : > { %7997 = vmatmul.mubr.msk.bf16.gmra.mrb[124].mxu1 %vm1615_vm0, %v4663_v7 }
 0x95c   : > { %8021 = vmatpush3.bf16.msra.mxu1 %v13628_v33 }
 0x95d   : > { %8022 = vmatprep.subr.bf16.mxu1 %v13629_v9 }
 0x960   : > { %8023 = vmatpush3.bf16.msra.mxu1 %v13629_v9 }
 0x961   : > { %8256 = vmatprep.subr.msk.bf16.mxu1 %vm1615_vm0, %v11759_v3 }
 0x964   : > { %5117 = vrot.lane.b32.xlu0 %v13561_v36, %s9379_s21  ;;  %v13631_v36 = vld [vmem:[#allocation42_spill] sm:$0xff] }
 0x968   : > { %5101 = vrot.lane.b32.xlu0 %v13572_v0, %s9379_s21  ;;  %v13635_v0 = vld [vmem:[#allocation41_spill] sm:$0xff] }
 0x96b   : > { %5119 = vrot.lane.b32.xlu1 %v13563_v62, %s9379_s21  ;;  %v13633_v62 = vld [vmem:[#allocation35_spill] sm:$0xff] }
 0x96c   : > { %5226 = vrot.lane.b32.xlu0 %v13554_v49, %s9379_s21  ;;  %v4556_v49 = vpop.xlane.xlu0 %4555 }
 0x96f   : > { %5103 = vrot.lane.b32.xlu1 %v13573_v58, %s9379_s21 }
 0x970   : > { %5105 = vrot.lane.b32.xlu0 %v13574_v57, %s9379_s21 }
 0x973   : > { %5228 = vrot.lane.b32.xlu1 %v13556_v46, %s9379_s21  ;;  %v13630_v46 = vld [vmem:[#allocation39_spill] sm:$0xff] }
 0x974   : > { %5230 = vrot.lane.b32.xlu0 %v13559_v48, %s9379_s21  ;;  %v4559_v48 = vpop.xlane.xlu1 %4558 }
 0x975   : > { %9036 = vrcp.f32 %v4559_v48 }
 0x977   : > { %5107 = vrot.lane.b32.xlu1 %v13576_v61, %s9379_s21  ;;  %v13636_v61 = vld [vmem:[#allocation38_spill] sm:$0xff] }
 0x978   : > { %5214 = vrot.lane.b32.xlu0 %v13558_v39, %s9379_s21 }
 0x97b   : > { %5232 = vrot.lane.b32.xlu1 %v13560_v4, %s9379_s21  ;;  %v13632_v4 = vld [vmem:[#allocation33_spill] sm:$0xff] }
 0x97c   : > { %5339 = vrot.lane.b32.xlu0 %v13569_v30, %s9379_s21 }
 0x97f   : > { %5216 = vrot.lane.b32.xlu1 %v13564_v16, %s9379_s21  ;;  %v9037_v60 = vpop.eup %9036 }
 0x980   : > { %5218 = vrot.lane.b32.xlu0 %v13565_v34, %s9379_s21  ;;  %v13634_v34 = vld [vmem:[#allocation49_spill] sm:$0xff]  ;;  %v4647_v12 = vmul.f32 %v9037_v60, %v11823_v51  ;;  %v13649_v60 = vld [vmem:[#allocation95_spill] sm:$0xff] }
 0x983   : > { %5341 = vrot.lane.b32.xlu1 %v13630_v46, %s9379_s21 }
 0x984   : > { %5343 = vrot.lane.b32.xlu0 %v13631_v36, %s9379_s21 }
 0x986   : > { %v4532_v39 = vpop.xlane.xlu0 %4531 }
 0x987   : > { %5220 = vrot.lane.b32.xlu1 %v13632_v4, %s9379_s21 }
 0x988   : > { %5327 = vrot.lane.b32.xlu0 %v13633_v62, %s9379_s21  ;;  %v4535_v30 = vpop.xlane.xlu1 %4534 }
 0x98a   : > { %v4550_v16 = vpop.xlane.xlu0 %4549 }
 0x98b   : > { %9038 = vrcp.f32 %v4550_v16  ;;  %5345 = vrot.lane.b32.xlu1 %v13634_v34, %s9379_s21 }
 0x98c   : > { %9040 = vrcp.f32 %v4556_v49  ;;  %5331 = vrot.lane.b32.xlu0 %v13635_v0, %s9379_s21  ;;  %v4553_v58 = vpop.xlane.xlu1 %4552  ;;  %v13644_v0 = vld [vmem:[#allocation84_spill] sm:$0xff] }
 0x98d   : > { %9042 = vrcp.f32 %v4553_v58  ;;  %v13648_v58 = vld [vmem:[#allocation94_spill] sm:$0xff] }
 0x98e   : > { %9044 = vrcp.f32 %v4535_v30  ;;  %v4526_v57 = vpop.xlane.xlu0 %4525 }
 0x98f   : > { %9046 = vrcp.f32 %v4526_v57  ;;  %5329 = vrot.lane.b32.xlu1 %v13636_v61, %s9379_s21 }
 0x990   : > { %9048 = vrcp.f32 %v4532_v39  ;;  %5840 = vrot.lane.b32.xlu0 %v13637_v43, %s9379_s21  ;;  %v4529_v47 = vpop.xlane.xlu1 %4528  ;;  %v13642_v39 = vld [vmem:[#allocation80_spill] sm:$0xff] }
 0x991   : > { %9050 = vrcp.f32 %v4529_v47 }
 0x992   : > { %v4568_v40 = vpop.xlane.xlu0 %4567 }
 0x993   : > { %5333 = vrot.lane.b32.xlu1 %v13638_v45, %s9379_s21 }
 0x994   : > { %5844 = vrot.lane.b32.xlu0 %v13639_v19, %s9379_s21  ;;  %v4571_v44 = vpop.xlane.xlu1 %4570  ;;  %v13650_v19 = vld [vmem:[#allocation109_spill] sm:$0xff] }
 0x995   : > { %v9039_v17 = vpop.eup %9038  ;;  %9052 = vrcp.f32 %v4571_v44 }
 0x996   : > { %v9041_v42 = vpop.eup %9040  ;;  %v4544_v53 = vpop.xlane.xlu0 %4543  ;;  %v4644_v59 = vmul.f32 %v9039_v17, %v11844_v63  ;;  %v13643_v63 = vld [vmem:[#allocation82_spill] sm:$0xff] }
 0x997   : > { %v9043_v35 = vpop.eup %9042  ;;  %5842 = vrot.lane.b32.xlu1 %v13640_v28, %s9379_s21  ;;  %v4646_v50 = vmul.f32 %v9041_v42, %v11819_v23 }
 0x998   : > { %v9045_v31 = vpop.eup %9044  ;;  %5846 = vrot.lane.b32.xlu0 %v13641_v27, %s9379_s21  ;;  %v4547_v11 = vpop.xlane.xlu1 %4546  ;;  %v4645_v18 = vmul.f32 %v9043_v35, %v11849_v37 }
 0x999   : > { %v9047_v41 = vpop.eup %9046  ;;  %v4669_v48 = vpack.c.bf16 %v4647_v12, %v4646_v50  ;;  %v4639_v36 = vmul.f32 %v9045_v31, %v11839_v14  ;;  %v5021_v14 = vsel %vm1615_vm0, %v11759_v3, 0  ;;  %v13647_v3 = vld [vmem:[#allocation93_spill] sm:$0xff] }
 0x99a   : > { %v9049_v7 = vpop.eup %9048  ;;  %v4562_v49 = vpop.xlane.xlu0 %4561  ;;  %v4668_v46 = vpack.c.bf16 %v4645_v18, %v4644_v59  ;;  %v4636_v23 = vmul.f32 %v9047_v41, %v11854_v15  ;;  %v13645_v15 = vld [vmem:[#allocation108_spill] sm:$0xff]  ;;  %v13651_v59 = vld [vmem:[#allocation101_spill] sm:$0xff] }
 0x99b   : > { %v9051_v51 = vpop.eup %9050  ;;  %9054 = vrcp.f32 %v4562_v49  ;;  %5933 = vrot.lane.b32.xlu1 %v13642_v39, %s9379_s21  ;;  %v4638_v62 = vmul.f32 %v9049_v7, %v11834_v54  ;;  %v13646_v54 = vld [vmem:[#allocation86_spill] sm:$0xff]  ;;  %v5024_v43 = vsel %vm1615_vm0, %v13645_v15, 0  ;;  %v13652_v49 = vld [vmem:[#allocation111_spill] sm:$0xff] }
 0x99c   : > { %9056 = vrcp.f32 %v4568_v40  ;;  %5935 = vrot.lane.b32.xlu0 %v13643_v63, %s9379_s21  ;;  %8024 = vmatprep.mubr.msk.bf16.mxu1 %vm1615_vm0, %v4668_v46  ;;  %v4565_v37 = vpop.xlane.xlu1 %4564  ;;  %v4637_v4 = vmul.f32 %v9051_v51, %v11859_v26  ;;  %v5030_v46 = vsel %vm1615_vm0, %v13652_v49, 0 }
 0x99d   : > { %9058 = vrcp.f32 %v4565_v37  ;;  %8025 = vmatmul.mubr.msk.bf16.vlgmr.msra.gmra.mrb[128].mxu1 %vm1615_vm0, %v4669_v48  ;;  %v4665_v34 = vpack.c.bf16 %v4639_v36, %v4638_v62 }
 0x99e   : > { %9060 = vrcp.f32 %v4547_v11  ;;  %8049 = vmatpush3.bf16.xpose.msra.mxu1 %v5021_v14  ;;  %v4538_v30 = vpop.xlane.xlu0 %4537  ;;  %v4664_v16 = vpack.c.bf16 %v4637_v4, %v4636_v23  ;;  %v13655_v23 = vld [vmem:[#allocation110_spill] sm:$0xff] }
 0x99f   : > { %9062 = vrcp.f32 %v4538_v30  ;;  %5937 = vrot.lane.b32.xlu1 %v13644_v0, %s9379_s21  ;;  %8257 = vmatprep.subr.msk.bf16.mxu1 %vm1615_vm0, %v13645_v15  ;;  %v9053_v57 = vpop.eup %9052  ;;  %v13656_v0 = vld [vmem:[#allocation114_spill] sm:$0xff] }
 0x9a0   : > { %9064 = vrcp.f32 %v4544_v53  ;;  %5939 = vrot.lane.b32.xlu0 %v13646_v54, %s9379_s21  ;;  %8008 = vmatprep.mubr.msk.bf16.mxu0 %vm1615_vm0, %v4664_v16  ;;  %v4541_v26 = vpop.xlane.xlu1 %4540  ;;  %v4651_v44 = vmul.f32 %v9053_v57, %v11869_v52 }
 0x9a1   : > { %9066 = vrcp.f32 %v4541_v26  ;;  %8009 = vmatmul.mubr.msk.bf16.vlgmr.msra.gmra.mrb[232].mxu0 %vm1615_vm0, %v4665_v34 }
 0x9a2   : > { %8033 = vmatpush3.bf16.msra.mxu0 %v13647_v3  ;;  %v4993_v63 = vpop.permute.xlu0 %4992 }
 0x9a3   : > { %8034 = vmatprep.subr.bf16.mxu0 %v13648_v58 }
 0x9a5   : > { %v9055_v61 = vpop.eup %9054 }
 0x9a6   : > { %v9057_v47 = vpop.eup %9056  ;;  %8035 = vmatpush3.bf16.msra.mxu0 %v13648_v58  ;;  %8051 = vmatpush3.bf16.xpose.msra.mxu1 %v5024_v43  ;;  %v4580_v40 = vpop.xlane.xlu1 %4579  ;;  %v4648_v42 = vmul.f32 %v9055_v61, %v11882_v6 }
 0x9a7   : > { %v9059_v45 = vpop.eup %9058  ;;  %8036 = vmatprep.subr.bf16.mxu0 %v13649_v60  ;;  %8258 = vmatprep.subr.msk.bf16.mxu1 %vm1615_vm0, %v13650_v19  ;;  %v4650_v12 = vmul.f32 %v9057_v47, %v11864_v25  ;;  %v5027_v25 = vsel %vm1615_vm0, %v13650_v19, 0 }
 0x9a8   : > { %v9061_v17 = vpop.eup %9060  ;;  %v4649_v53 = vmul.f32 %v9059_v45, %v11887_v29 }
 0x9a9   : > { %v9063_v35 = vpop.eup %9062  ;;  %v4671_v18 = vpack.c.bf16 %v4651_v44, %v4650_v12  ;;  %v4643_v41 = vmul.f32 %v9061_v17, %v11877_v13  ;;  %v13653_v13 = vld [vmem:[#allocation113_spill] sm:$0xff] }
 0x9aa   : > { %v9065_v28 = vpop.eup %9064  ;;  %8037 = vmatpush3.bf16.msra.mxu0 %v13649_v60  ;;  %v4574_v31 = vpop.xlane.xlu1 %4573  ;;  %v4670_v27 = vpack.c.bf16 %v4649_v53, %v4648_v42  ;;  %v4640_v52 = vmul.f32 %v9063_v35, %v11892_v2 }
 0x9ab   : > { %v9067_v11 = vpop.eup %9066  ;;  %8038 = vmatprep.subr.bf16.mxu0 %v13651_v59  ;;  %v4642_v29 = vmul.f32 %v9065_v28, %v11873_v8 }
 0x9ac   : > { %8028 = vmatprep.mubr.msk.bf16.mxu1 %vm1615_vm0, %v4670_v27  ;;  %v4641_v6 = vmul.f32 %v9067_v11, %v11897_v1  ;;  %v13654_v1 = vld [vmem:[#allocation112_spill] sm:$0xff] }
 0x9ad   : > { %8029 = vmatmul.mubr.msk.bf16.gmra.mrb[132].mxu1 %vm1615_vm0, %v4671_v18  ;;  %v4667_v2 = vpack.c.bf16 %v4643_v41, %v4642_v29 }
 0x9ae   : > { %8053 = vmatpush3.bf16.xpose.msra.mxu1 %v5027_v25  ;;  %v4583_v50 = vpop.xlane.xlu1 %4582  ;;  %8039 = vmatpush3.bf16.msra.mxu0 %v13651_v59  ;;  %v4666_v7 = vpack.c.bf16 %v4641_v6, %v4640_v52 }
 0x9af   : > { %8259 = vmatprep.subr.msk.bf16.mxu1 %vm1615_vm0, %v13652_v49  ;;  %8056 = vmatprep.mubr.msk.bf16.mxu1 %vm1615_vm0, %v13653_v13  ;;  %9068 = vrcp.f32 %v4583_v50 }
 0x9b0   : > { %8260 = vmatprep.subr.msk.bf16.mxu0 %vm1615_vm0, %v13654_v1  ;;  %8012 = vmatprep.mubr.msk.bf16.mxu0 %vm1615_vm0, %v4666_v7  ;;  %9070 = vrcp.f32 %v4574_v31 }
 0x9b1   : > { %8013 = vmatmul.mubr.msk.bf16.gmra.mrb[236].mxu0 %vm1615_vm0, %v4667_v2  ;;  %9072 = vrcp.f32 %v4580_v40 }
 0x9b2   : > { %v4577_v8 = vpop.xlane.xlu1 %4576 }
 0x9b3   : > { %9074 = vrcp.f32 %v4577_v8 }
 0x9b6   : > { %8055 = vmatpush3.bf16.xpose.msra.mxu1 %v5030_v46  ;;  %v4995_v34 = vpop.permute.xlu1 %4994 }
 0x9b9   : > { %v9069_v51 = vpop.eup %9068 }
 0x9ba   : > { %v9071_v48 = vpop.eup %9070  ;;  %v4655_v37 = vmul.f32 %v9069_v51, %v11909_v21  ;;  %v5134_v21 = vsel %vm1615_vm0, %v13654_v1, 0 }
 0x9bb   : > { %v9073_v36 = vpop.eup %9072  ;;  %v4652_v4 = vmul.f32 %v9071_v48, %v11905_v22  ;;  %v5137_v22 = vsel %vm1615_vm0, %v13656_v0, 0 }
 0x9bc   : > { %v4654_v14 = vmul.f32 %v9073_v36, %v11901_v55 }
 0x9bd   : > { %v9075_v39 = vpop.eup %9074  ;;  %8057 = vmatmul.mubr.msk.bf16.vlgmr.msra.gmra.mrb[136].mxu1 %vm1615_vm0, %v13655_v23 }
 0x9be   : > { %8060 = vmatprep.mubr.msk.bf16.mxu1 %vm1615_vm0, %v4993_v63  ;;  %v4653_v62 = vmul.f32 %v9075_v39, %v11913_v20  ;;  %v4673_v16 = vpack.c.bf16 %v4655_v37, %v4654_v14 }
 0x9c0   : > { %v4672_v30 = vpack.c.bf16 %v4653_v62, %v4652_v4 }
 0x9c2   : > { %8040 = vmatprep.mubr.msk.bf16.mxu0 %vm1615_vm0, %v4672_v30 }
 0x9c3   : > { %8041 = vmatmul.mubr.msk.bf16.vlgmr.msra.gmra.mrb[240].mxu0 %vm1615_vm0, %v4673_v16 }
 0x9c4   : > { %8065 = vmatpush3.bf16.xpose.msra.mxu0 %v5134_v21 }
 0x9c5   : > { %8261 = vmatprep.subr.msk.bf16.mxu0 %vm1615_vm0, %v13656_v0  ;;  %8061 = vmatmul.mubr.msk.bf16.gmra.mrb[140].mxu1 %vm1615_vm0, %v4995_v34 }
 0x9cc   : > { %8067 = vmatpush3.bf16.xpose.msra.mxu0 %v5137_v22 }
 0x9d3   : > { %v4592_v55 = vpop.xlane.xlu0 %4591 }
 0x9d7   : > { %v4586_v20 = vpop.xlane.xlu0 %4585 }
 0x9db   : > { %v4595_v15 = vpop.xlane.xlu0 %4594 }
 0x9dc   : > { %9076 = vrcp.f32 %v4595_v15 }
 0x9dd   : > { %9078 = vrcp.f32 %v4586_v20 }
 0x9de   : > { %9080 = vrcp.f32 %v4592_v55 }
 0x9df   : > { %v5118_v54 = vpop.permute.xlu0 %5117 }
 0x9e0   : > { %8262 = vmatprep.subr.msk.bf16.mxu0 %vm1615_vm0, %v5118_v54  ;;  %v5140_v26 = vsel %vm1615_vm0, %v5118_v54, 0 }
 0x9e1   : > { %8069 = vmatpush3.bf16.xpose.msra.mxu0 %v5140_v26 }
 0x9e3   : > { %v5102_v57 = vpop.permute.xlu0 %5101 }
 0x9e6   : > { %v9077_v44 = vpop.eup %9076 }
 0x9e7   : > { %v4589_v61 = vpop.xlane.xlu1 %4588  ;;  %v5227_v43 = vpop.permute.xlu0 %5226  ;;  %v4659_v28 = vmul.f32 %v9077_v44, %v11931_v56 }
 0x9e8   : > { %9082 = vrcp.f32 %v4589_v61  ;;  %8264 = vmatprep.subr.msk.bf16.mxu1 %vm1615_vm0, %v5227_v43  ;;  %v5247_v47 = vsel %vm1615_vm0, %v5227_v43, 0  ;;  %v9079_v53 = vpop.eup %9078 }
 0x9e9   : > { %8081 = vmatpush3.bf16.xpose.msra.mxu1 %v5247_v47  ;;  %v9081_v35 = vpop.eup %9080  ;;  %v4656_v11 = vmul.f32 %v9079_v53, %v11929_v5 }
 0x9ea   : > { %v4658_v52 = vmul.f32 %v9081_v35, %v11924_v24 }
 0x9eb   : > { %v5120_v40 = vpop.permute.xlu1 %5119  ;;  %v5106_v45 = vpop.permute.xlu0 %5105 }
 0x9ec   : > { %8263 = vmatprep.subr.msk.bf16.mxu0 %vm1615_vm0, %v5120_v40  ;;  %v5143_v19 = vsel %vm1615_vm0, %v5120_v40, 0  ;;  %v4675_v25 = vpack.c.bf16 %v4659_v28, %v4658_v52 }
 0x9ed   : > { %8071 = vmatpush3.bf16.xpose.msra.mxu0 %v5143_v19 }
 0x9ef   : > { %v5104_v17 = vpop.permute.xlu1 %5103  ;;  %v5231_v42 = vpop.permute.xlu0 %5230 }
 0x9f0   : > { %v5253_v50 = vsel %vm1615_vm0, %v5231_v42, 0 }
 0x9f2   : > { %v9083_v12 = vpop.eup %9082 }
 0x9f3   : > { %v5229_v31 = vpop.permute.xlu1 %5228  ;;  %v5215_v27 = vpop.permute.xlu0 %5214  ;;  %v4657_v18 = vmul.f32 %v9083_v12, %v11946_v10 }
 0x9f4   : > { %8265 = vmatprep.subr.msk.bf16.mxu1 %vm1615_vm0, %v5229_v31  ;;  %v5250_v41 = vsel %vm1615_vm0, %v5229_v31, 0  ;;  %8088 = vmatprep.mubr.msk.bf16.mxu1 %vm1615_vm0, %v5215_v27 }
 0x9f5   : > { %8083 = vmatpush3.bf16.xpose.msra.mxu1 %v5250_v41  ;;  %v4674_v6 = vpack.c.bf16 %v4657_v18, %v4656_v11 }
 0x9f6   : > { %8266 = vmatprep.subr.msk.bf16.mxu1 %vm1615_vm0, %v5231_v42 }
 0x9f7   : > { %v5108_v56 = vpop.permute.xlu1 %5107  ;;  %8044 = vmatprep.mubr.msk.bf16.mxu0 %vm1615_vm0, %v4674_v6  ;;  %v5340_v29 = vpop.permute.xlu0 %5339 }
 0x9f8   : > { %8045 = vmatmul.mubr.msk.bf16.gmra.mrb[244].mxu0 %vm1615_vm0, %v4675_v25  ;;  %8268 = vmatprep.subr.msk.bf16.mxu0 %vm1615_vm0, %v5340_v29  ;;  %v5360_v49 = vsel %vm1615_vm0, %v5340_v29, 0 }
 0x9f9   : > { %8072 = vmatprep.mubr.msk.bf16.mxu0 %vm1615_vm0, %v5102_v57 }
 0x9fb   : > { %v5233_v5 = vpop.permute.xlu1 %5232  ;;  %v5219_v10 = vpop.permute.xlu0 %5218 }
 0x9fc   : > { %v5256_v1 = vsel %vm1615_vm0, %v5233_v5, 0 }
 0x9fd   : > { %8085 = vmatpush3.bf16.xpose.msra.mxu1 %v5253_v50 }
 0x9fe   : > { %8267 = vmatprep.subr.msk.bf16.mxu1 %vm1615_vm0, %v5233_v5 }
 0x9ff   : > { %v5217_v24 = vpop.permute.xlu1 %5216  ;;  %v5344_v7 = vpop.permute.xlu0 %5343 }
 0xa00   : > { %8073 = vmatmul.mubr.msk.bf16.vlgmr.msra.gmra.mrb[248].mxu0 %vm1615_vm0, %v5104_v17  ;;  %v5366_v63 = vsel %vm1615_vm0, %v5344_v7, 0 }
 0xa01   : > { %8097 = vmatpush3.bf16.xpose.msra.mxu0 %v5360_v49  ;;  %8076 = vmatprep.mubr.msk.bf16.mxu0 %vm1615_vm0, %v5106_v45 }
 0xa03   : > { %v5342_v13 = vpop.permute.xlu1 %5341  ;;  %v5328_v2 = vpop.permute.xlu0 %5327 }
 0xa04   : > { %8269 = vmatprep.subr.msk.bf16.mxu0 %vm1615_vm0, %v5342_v13  ;;  %v5363_v51 = vsel %vm1615_vm0, %v5342_v13, 0 }
 0xa05   : > { %8087 = vmatpush3.bf16.xpose.msra.mxu1 %v5256_v1 }
 0xa07   : > { %v5221_v8 = vpop.permute.xlu1 %5220  ;;  %v5332_v46 = vpop.permute.xlu0 %5331 }
 0xa08   : > { %8077 = vmatmul.mubr.msk.bf16.gmra.mrb[252].mxu0 %vm1615_vm0, %v5108_v56 }
 0xa09   : > { %8099 = vmatpush3.bf16.xpose.msra.mxu0 %v5363_v51  ;;  %8104 = vmatprep.mubr.msk.bf16.mxu0 %vm1615_vm0, %v5328_v2 }
 0xa0a   : > { %8270 = vmatprep.subr.msk.bf16.mxu0 %vm1615_vm0, %v5344_v7 }
 0xa0b   : > { %v5346_v48 = vpop.permute.xlu1 %5345  ;;  %v5841_v36 = vpop.permute.xlu0 %5840 }
 0xa0c   : > { %8089 = vmatmul.mubr.msk.bf16.vlgmr.msra.gmra.mrb[144].mxu1 %vm1615_vm0, %v5217_v24  ;;  %8112 = vmatprep.subr.bf16.mxu1 %v5841_v36  ;;  %v5369_v62 = vsel %vm1615_vm0, %v5346_v48, 0 }
 0xa0d   : > { %8092 = vmatprep.mubr.msk.bf16.mxu1 %vm1615_vm0, %v5219_v10  ;;  %8113 = vmatpush3.bf16.msra.mxu1 %v5841_v36 }
 0xa0f   : > { %v5330_v39 = vpop.permute.xlu1 %5329  ;;  %v5845_v23 = vpop.permute.xlu0 %5844 }
 0xa11   : > { %8101 = vmatpush3.bf16.xpose.msra.mxu0 %v5366_v63 }
 0xa12   : > { %8271 = vmatprep.subr.msk.bf16.mxu0 %vm1615_vm0, %v5346_v48 }
 0xa13   : > { %v5334_v37 = vpop.permute.xlu1 %5333  ;;  %v5847_v14 = vpop.permute.xlu0 %5846 }
 0xa14   : > { %8093 = vmatmul.mubr.msk.bf16.gmra.mrb[148].mxu1 %vm1615_vm0, %v5221_v8 }
 0xa17   : > { %v5843_v4 = vpop.permute.xlu1 %5842  ;;  %v5936_v16 = vpop.permute.xlu0 %5935 }
 0xa18   : > { %8114 = vmatprep.subr.bf16.mxu1 %v5843_v4 }
 0xa19   : > { %8103 = vmatpush3.bf16.xpose.msra.mxu0 %v5369_v62  ;;  %8115 = vmatpush3.bf16.msra.mxu1 %v5843_v4 }
 0xa1a   : > { %8116 = vmatprep.subr.bf16.mxu1 %v5845_v23 }
 0xa1b   : > { %v5934_v30 = vpop.permute.xlu1 %5933  ;;  %v5940_v55 = vpop.permute.xlu0 %5939 }
 0xa1c   : > { %8128 = vmatprep.subr.bf16.mxu0 %v5934_v30 }
 0xa1d   : > { %8117 = vmatpush3.bf16.msra.mxu1 %v5845_v23 }
 0xa1e   : > { %8118 = vmatprep.subr.bf16.mxu1 %v5847_v14 }
 0xa1f   : > { %v5938_v21 = vpop.permute.xlu1 %5937 }
 0xa20   : > { %8105 = vmatmul.mubr.msk.bf16.vlgmr.msra.gmra.mrb[0].mxu0 %vm1615_vm0, %v5330_v39 }
 0xa21   : > { %8108 = vmatprep.mubr.msk.bf16.mxu0 %vm1615_vm0, %v5332_v46  ;;  %8129 = vmatpush3.bf16.msra.mxu0 %v5934_v30 }
 0xa22   : > { %8119 = vmatpush3.bf16.msra.mxu1 %v5847_v14  ;;  %8130 = vmatprep.subr.bf16.mxu0 %v5936_v16 }
 0xa25   : > { %8131 = vmatpush3.bf16.msra.mxu0 %v5936_v16 }
 0xa26   : > { %8132 = vmatprep.subr.bf16.mxu0 %v5938_v21  ;;  %v12124_v34 = vpop.f32.mrb[120].mxu1 }
 0xa27   : > { %v12126_v0 = vpop.f32.mrb[121].mxu1 }
 0xa28   : > { %8109 = vmatmul.mubr.msk.bf16.gmra.mrb[4].mxu0 %vm1615_vm0, %v5334_v37  ;;  %v12129_v22 = vpop.f32.mrb[122].mxu1 }
 0xa29   : > { %8133 = vmatpush3.bf16.msra.mxu0 %v5938_v21  ;;  %v12131_v20 = vpop.f32.mrb[123].mxu1 }
 0xa2a   : > { %8134 = vmatprep.subr.bf16.mxu0 %v5940_v55 }
 0xa2d   : > { %8135 = vmatpush3.bf16.msra.mxu0 %v5940_v55 }
 0xa2e   : > { %v12133_v15 = vpop.f32.mrb[124].mxu1 }
 0xa2f   : > { %v12135_v54 = vpop.f32.mrb[125].mxu1 }
 0xa30   : > { %v12137_v26 = vpop.f32.mrb[126].mxu1 }
 0xa31   : > { %13657 = vst [vmem:[#allocation88_spill] sm:$0xff] %v12137_v26  ;;  %v12139_v57 = vpop.f32.mrb[127].mxu1 }
 0xa70   : > { %v12141_v61 = vpop.f32.mrb[128].mxu1 }
 0xa71   : > { %13658 = vst [vmem:[#allocation89_spill] sm:$0xff] %v12141_v61  ;;  %v12143_v43 = vpop.f32.mrb[129].mxu1 }
 0xa72   : > { %13659 = vst [vmem:[#allocation91_spill] sm:$0xff] %v12143_v43  ;;  %v12145_v47 = vpop.f32.mrb[130].mxu1 }
 0xa73   : > { %13660 = vst [vmem:[#allocation39_spill] sm:$0xff] %v12145_v47  ;;  %v12147_v40 = vpop.f32.mrb[131].mxu1 }
 0xa74   : > { %13661 = vst [vmem:[#allocation42_spill] sm:$0xff] %v12147_v40  ;;  %v12149_v45 = vpop.f32.mrb[232].mxu0 }
 0xa75   : > { %13662 = vst [vmem:[#allocation33_spill] sm:$0xff] %v12149_v45  ;;  %v12151_v19 = vpop.f32.mrb[233].mxu0 }
 0xa76   : > { %13663 = vst [vmem:[#allocation35_spill] sm:$0xff] %v12151_v19  ;;  %v12153_v44 = vpop.f32.mrb[234].mxu0 }
 0xa77   : > { %13664 = vst [vmem:[#allocation49_spill] sm:$0xff] %v12153_v44  ;;  %v12155_v17 = vpop.f32.mrb[235].mxu0 }
 0xa78   : > { %13665 = vst [vmem:[#allocation41_spill] sm:$0xff] %v12155_v17 }
 0xa80   : > { %v12157_v42 = vpop.f32.mrb[132].mxu1 }
 0xa81   : > { %13666 = vst [vmem:[#allocation38_spill] sm:$0xff] %v12157_v42  ;;  %v12159_v53 = vpop.f32.mrb[133].mxu1 }
 0xa82   : > { %13667 = vst [vmem:[#allocation73_spill] sm:$0xff] %v12159_v53  ;;  %v12161_v35 = vpop.f32.mrb[134].mxu1 }
 0xa83   : > { %13668 = vst [vmem:[#allocation45_spill] sm:$0xff] %v12161_v35  ;;  %v12163_v12 = vpop.f32.mrb[135].mxu1 }
 0xa84   : > { %13669 = vst [vmem:[#allocation77_spill] sm:$0xff] %v12163_v12  ;;  %v12165_v28 = vpop.f32.mrb[236].mxu0 }
 0xa85   : > { %13670 = vst [vmem:[#allocation75_spill] sm:$0xff] %v12165_v28  ;;  %v12167_v31 = vpop.f32.mrb[237].mxu0 }
 0xa86   : > { %13671 = vst [vmem:[#allocation79_spill] sm:$0xff] %v12167_v31  ;;  %v12169_v27 = vpop.f32.mrb[238].mxu0 }
 0xa87   : > { %13672 = vst [vmem:[#allocation80_spill] sm:$0xff] %v12169_v27  ;;  %v12171_v11 = vpop.f32.mrb[239].mxu0 }
 0xa88   : > { %13673 = vst [vmem:[#allocation82_spill] sm:$0xff] %v12171_v11 }
 0xa90   : > { %v8058_v18 = vpop.f32.mrb[136].mxu1 }
 0xa91   : > { %v12175_v52 = vsel %vm10148_vm1, %v8058_v18, -1e+30  ;;  %v5066_v6 = vpop.f32.mrb[137].mxu1 }
 0xa92   : > { %v5474_v25 = vsel %vm1615_vm0, %v12175_v52, -inf  ;;  %v8059_v56 = vpop.f32.mrb[138].mxu1  ;;  %v12181_v5 = vsel %vm10153_vm2, %v5066_v6, -1e+30 }
 0xa93   : > { %5475 = vmax.xlane.f32.xlu0 %v5474_v25  ;;  %v5069_v10 = vpop.f32.mrb[139].mxu1  ;;  %v5468_v49 = vsel %vm1615_vm0, %v12181_v5, -inf  ;;  %v12195_v1 = vsel %vm10157_vm3, %v8059_v56, -1e+30 }
 0xa94   : > { %v12185_v24 = vsel %vm10165_vm4, %v5069_v10, -1e+30  ;;  %v5477_v39 = vsel %vm1615_vm0, %v12195_v1, -inf }
 0xa95   : > { %v5471_v7 = vsel %vm1615_vm0, %v12185_v24, -inf }
 0xa96   : > { %5472 = vmax.xlane.f32.xlu1 %v5471_v7  ;;  %v12191_v13 = vpop.f32.mrb[240].mxu0 }
 0xa97   : > { %13677 = vst [vmem:[#allocation84_spill] sm:$0xff] %v12191_v13  ;;  %5469 = vmax.xlane.f32.xlu0 %v5468_v49  ;;  %v12197_v8 = vpop.f32.mrb[241].mxu0 }
 0xa98   : > { %13679 = vst [vmem:[#allocation108_spill] sm:$0xff] %v12197_v8  ;;  %v12199_v46 = vpop.f32.mrb[242].mxu0  ;;  %v8062_v51 = vpop.f32.mrb[140].mxu1 }
 0xa99   : > { %13680 = vst [vmem:[#allocation86_spill] sm:$0xff] %v12199_v46  ;;  %v12201_v48 = vpop.f32.mrb[243].mxu0  ;;  %v5082_v36 = vpop.f32.mrb[141].mxu1  ;;  %v12207_v23 = vsel %vm10192_vm5, %v8062_v51, -1e+30 }
 0xa9a   : > { %13681 = vst [vmem:[#allocation93_spill] sm:$0xff] %v12201_v48  ;;  %v8063_v63 = vpop.f32.mrb[142].mxu1  ;;  %v5486_v55 = vsel %vm1615_vm0, %v12207_v23, -inf  ;;  %v12223_v6 = vsel %vm10207_vm7, %v5082_v36, -1e+30 }
 0xa9b   : > { %v12211_v62 = vsel %vm10199_vm6, %v8063_v63, -1e+30  ;;  %5478 = vmax.xlane.f32.xlu0 %v5477_v39  ;;  %v5085_v14 = vpop.f32.mrb[143].mxu1  ;;  %v5480_v56 = vsel %vm1615_vm0, %v12223_v6, -inf }
 0xa9c   : > { %v5489_v30 = vsel %vm1615_vm0, %v12211_v62, -inf  ;;  %v12217_v21 = vsel %vm10211_vm8, %v5085_v14, -1e+30 }
 0xa9d   : > { %5490 = vmax.xlane.f32.xlu1 %v5489_v30  ;;  %v5483_v25 = vsel %vm1615_vm0, %v12217_v21, -inf }
 0xa9f   : > { %5487 = vmax.xlane.f32.xlu0 %v5486_v55 }
 0xaa1   : > { %5484 = vmax.xlane.f32.xlu1 %v5483_v25 }
 0xaa3   : > { %5481 = vmax.xlane.f32.xlu0 %v5480_v56 }
 0xacb   : > { %v12229_v10 = vpop.f32.mrb[244].mxu0 }
 0xacc   : > { %13686 = vst [vmem:[#allocation94_spill] sm:$0xff] %v12229_v10  ;;  %v12231_v7 = vpop.f32.mrb[245].mxu0 }
 0xacd   : > { %13687 = vst [vmem:[#allocation95_spill] sm:$0xff] %v12231_v7  ;;  %v12233_v49 = vpop.f32.mrb[246].mxu0 }
 0xace   : > { %13688 = vst [vmem:[#allocation109_spill] sm:$0xff] %v12233_v49  ;;  %v12235_v51 = vpop.f32.mrb[247].mxu0 }
 0xacf   : > { %13689 = vst [vmem:[#allocation101_spill] sm:$0xff] %v12235_v51 }
 0xad3   : > { %v8074_v39 = vpop.f32.mrb[248].mxu0 }
 0xad4   : > { %v12239_v36 = vsel %vm10148_vm1, %v8074_v39, -1e+30  ;;  %v5179_v63 = vpop.f32.mrb[249].mxu0 }
 0xad5   : > { %v5498_v14 = vsel %vm1615_vm0, %v12239_v36, -inf  ;;  %v8075_v30 = vpop.f32.mrb[250].mxu0 }
 0xad6   : > { %v12245_v55 = vsel %vm10157_vm3, %v8075_v30, -1e+30  ;;  %5499 = vmax.xlane.f32.xlu0 %v5498_v14  ;;  %v5182_v25 = vpop.f32.mrb[251].mxu0  ;;  %v12257_v14 = vsel %vm10153_vm2, %v5179_v63, -1e+30 }
 0xad7   : > { %v5501_v56 = vsel %vm1615_vm0, %v12245_v55, -inf  ;;  %v5492_v42 = vsel %vm1615_vm0, %v12257_v14, -inf }
 0xad8   : > { %5502 = vmax.xlane.f32.xlu1 %v5501_v56 }
 0xadb   : > { %v8078_v49 = vpop.f32.mrb[252].mxu0 }
 0xadc   : > { %v5195_v10 = vpop.f32.mrb[253].mxu0  ;;  %v12285_v47 = vsel %vm10192_vm5, %v8078_v49, -1e+30 }
 0xadd   : > { %v8079_v51 = vpop.f32.mrb[254].mxu0 }
 0xade   : > { %v5198_v39 = vpop.f32.mrb[255].mxu0  ;;  %v12291_v61 = vsel %vm10199_vm6, %v8079_v51, -1e+30 }
 0xadf   : > { %v8090_v7 = vpop.f32.mrb[144].mxu1  ;;  %v5513_v49 = vsel %vm1615_vm0, %v12291_v61, -inf  ;;  %v12315_v40 = vsel %vm10211_vm8, %v5198_v39, -1e+30 }
 0xae0   : > { %v12251_v46 = vsel %vm10148_vm1, %v8090_v7, -1e+30  ;;  %v5292_v13 = vpop.f32.mrb[145].mxu1  ;;  %v12267_v7 = vsel %vm10165_vm4, %v5182_v25, -1e+30 }
 0xae1   : > { %v5522_v30 = vsel %vm1615_vm0, %v12251_v46, -inf  ;;  %v8091_v48 = vpop.f32.mrb[146].mxu1  ;;  %v12273_v63 = vsel %vm10153_vm2, %v5292_v13, -1e+30 }
 0xae2   : > { %v12261_v56 = vsel %vm10157_vm3, %v8091_v48, -1e+30  ;;  %v5295_v8 = vpop.f32.mrb[147].mxu1  ;;  %5523 = vmax.xlane.f32.xlu0 %v5522_v30  ;;  %v5495_v48 = vsel %vm1615_vm0, %v12267_v7, -inf }
 0xae3   : > { %v5525_v35 = vsel %vm1615_vm0, %v12261_v56, -inf  ;;  %v12279_v12 = vsel %vm10165_vm4, %v5295_v8, -1e+30  ;;  %v5510_v8 = vsel %vm1615_vm0, %v12285_v47, -inf }
 0xae4   : > { %5526 = vmax.xlane.f32.xlu1 %v5525_v35  ;;  %v5516_v35 = vsel %vm1615_vm0, %v12273_v63, -inf }
 0xae6   : > { %5493 = vmax.xlane.f32.xlu0 %v5492_v42  ;;  %v5519_v42 = vsel %vm1615_vm0, %v12279_v12, -inf }
 0xae7   : > { %v8094_v30 = vpop.f32.mrb[148].mxu1 }
 0xae8   : > { %v5308_v53 = vpop.f32.mrb[149].mxu1  ;;  %5496 = vmax.xlane.f32.xlu1 %v5495_v48  ;;  %v12297_v48 = vsel %vm10192_vm5, %v8094_v30, -1e+30 }
 0xae9   : > { %v8095_v25 = vpop.f32.mrb[150].mxu1  ;;  %v5534_v51 = vsel %vm1615_vm0, %v12297_v48, -inf }
 0xaea   : > { %v5311_v13 = vpop.f32.mrb[151].mxu1  ;;  %5517 = vmax.xlane.f32.xlu0 %v5516_v35  ;;  %v12303_v35 = vsel %vm10199_vm6, %v8095_v25, -1e+30 }
 0xaeb   : > { %v5537_v30 = vsel %vm1615_vm0, %v12303_v35, -inf }
 0xaec   : > { %5520 = vmax.xlane.f32.xlu1 %v5519_v42  ;;  %v12309_v42 = vsel %vm10207_vm7, %v5195_v10, -1e+30  ;;  %v5507_v10 = vsel %vm1615_vm0, %v12315_v40, -inf }
 0xaed   : > { %v5504_v25 = vsel %vm1615_vm0, %v12309_v42, -inf }
 0xaee   : > { %5511 = vmax.xlane.f32.xlu0 %v5510_v8 }
 0xaf0   : > { %5514 = vmax.xlane.f32.xlu1 %v5513_v49 }
 0xaf2   : > { %5535 = vmax.xlane.f32.xlu0 %v5534_v51  ;;  %v12323_v51 = vsel %vm10211_vm8, %v5311_v13, -1e+30 }
 0xaf3   : > { %v8106_v8 = vpop.f32.mrb[0].mxu0  ;;  %v5531_v39 = vsel %vm1615_vm0, %v12323_v51, -inf }
 0xaf4   : > { %v5405_v43 = vpop.f32.mrb[1].mxu0  ;;  %5538 = vmax.xlane.f32.xlu1 %v5537_v30 }
 0xaf5   : > { %v8107_v49 = vpop.f32.mrb[2].mxu0 }
 0xaf6   : > { %v5408_v27 = vpop.f32.mrb[3].mxu0  ;;  %5505 = vmax.xlane.f32.xlu0 %v5504_v25  ;;  %v12329_v30 = vsel %vm10157_vm3, %v8107_v49, -1e+30 }
 0xaf7   : > { %v5549_v44 = vsel %vm1615_vm0, %v12329_v30, -inf  ;;  %v12335_v13 = vsel %vm10165_vm4, %v5408_v27, -1e+30 }
 0xaf8   : > { %5508 = vmax.xlane.f32.xlu1 %v5507_v10  ;;  %v5543_v10 = vsel %vm1615_vm0, %v12335_v13, -inf }
 0xafb   : > { %v8110_v28 = vpop.f32.mrb[4].mxu0 }
 0xafc   : > { %v5421_v11 = vpop.f32.mrb[5].mxu0  ;;  %5532 = vmax.xlane.f32.xlu1 %v5531_v39 }
 0xafd   : > { %v8111_v31 = vpop.f32.mrb[6].mxu0 }
 0xafe   : > { %v5424_v25 = vpop.f32.mrb[7].mxu0  ;;  %v12393_v18 = vsel %vm10199_vm6, %v8111_v31, -1e+30 }
 0xaff   : > { %v12341_v2 = vsel %vm10211_vm8, %v5424_v25, -1e+30 }
 0xb00   : > { %5550 = vmax.xlane.f32.xlu1 %v5549_v44  ;;  %v5555_v49 = vsel %vm1615_vm0, %v12341_v2, -inf  ;;  %v12349_v44 = vsel %vm10207_vm7, %v5308_v53, -1e+30 }
 0xb04   : > { %5544 = vmax.xlane.f32.xlu1 %v5543_v10  ;;  %v5528_v10 = vsel %vm1615_vm0, %v12349_v44, -inf }
 0xb08   : > { %5556 = vmax.xlane.f32.xlu1 %v5555_v49  ;;  %v12357_v49 = vsel %vm10148_vm1, %v8106_v8, -1e+30 }
 0xb0c   : > { %6026 = vrot.lane.b32.xlu0 %v13571_v38, %s9379_s21 }
 0xb20   : > { %v5476_v39 = vpop.xlane.xlu0 %5475 }
 0xb21   : > { %v5566_v26 = vsub.f32 %v12175_v52, %v5476_v39 }
 0xb23   : > { %v5473_v50 = vpop.xlane.xlu1 %5472  ;;  %v5600_v8 = vmul.f32 1.442695, %v5566_v26 }
 0xb24   : > { %v5470_v27 = vpop.xlane.xlu0 %5469  ;;  %v5565_v45 = vsub.f32 %v12185_v24, %v5473_v50  ;;  %v5546_v24 = vsel %vm1615_vm0, %v12357_v49, -inf  ;;  %v12365_v50 = vsel %vm10153_vm2, %v5405_v43, -1e+30 }
 0xb26   : > { %v5598_v38 = vmul.f32 1.442695, %v5565_v45 }
 0xb28   : > { %v5479_v16 = vpop.xlane.xlu0 %5478 }
 0xb29   : > { %v5567_v25 = vsub.f32 %v12195_v1, %v5479_v16  ;;  %v5564_v16 = vsub.f32 %v12181_v5, %v5470_v27 }
 0xb2a   : > { %v5491_v1 = vpop.xlane.xlu1 %5490 }
 0xb2b   : > { %v5602_v17 = vmul.f32 1.442695, %v5567_v25  ;;  %5529 = vmax.xlane.f32.xlu0 %v5528_v10  ;;  %v5571_v29 = vsub.f32 %v12211_v62, %v5491_v1  ;;  %v5596_v39 = vmul.f32 1.442695, %v5564_v16 }
 0xb2c   : > { %v5488_v19 = vpop.xlane.xlu0 %5487 }
 0xb2d   : > { %9084 = vpow2.f32 %v5602_v17  ;;  %v5570_v53 = vsub.f32 %v12207_v23, %v5488_v19  ;;  %v5540_v19 = vsel %vm1615_vm0, %v12365_v50, -inf  ;;  %v12373_v17 = vsel %vm10192_vm5, %v8110_v28, -1e+30 }
 0xb2e   : > { %9086 = vpow2.f32 %v5598_v38  ;;  %v5485_v23 = vpop.xlane.xlu1 %5484  ;;  %v5558_v26 = vsel %vm1615_vm0, %v12373_v17, -inf  ;;  %v5610_v37 = vmul.f32 1.442695, %v5571_v29  ;;  %v5561_v38 = vsel %vm1615_vm0, %v12393_v18, -inf }
 0xb2f   : > { %v5608_v41 = vmul.f32 1.442695, %v5570_v53  ;;  %5547 = vmax.xlane.f32.xlu0 %v5546_v24  ;;  %v5569_v28 = vsub.f32 %v12217_v21, %v5485_v23 }
 0xb30   : > { %v5482_v45 = vpop.xlane.xlu0 %5481 }
 0xb31   : > { %v5568_v52 = vsub.f32 %v12223_v6, %v5482_v45  ;;  %9088 = vpow2.f32 %v5608_v41  ;;  %v12382_v6 = vsel %vm10207_vm7, %v5421_v11, -1e+30  ;;  %v5606_v11 = vmul.f32 1.442695, %v5569_v28 }
 0xb32   : > { %9090 = vpow2.f32 %v5600_v8  ;;  %v5552_v25 = vsel %vm1615_vm0, %v12382_v6, -inf }
 0xb33   : > { %v5604_v43 = vmul.f32 1.442695, %v5568_v52  ;;  %5541 = vmax.xlane.f32.xlu0 %v5540_v19 }
 0xb35   : > { %9092 = vpow2.f32 %v5604_v43 }
 0xb36   : > { %9094 = vpow2.f32 %v5596_v39 }
 0xb37   : > { %v12378_v5 = vpop.eup %9084  ;;  %5559 = vmax.xlane.f32.xlu0 %v5558_v26  ;;  %9096 = vpow2.f32 %v5610_v37 }
 0xb38   : > { %v5669_v62 = vsel %vm1615_vm0, %v12378_v5, 0.0  ;;  %v12387_v27 = vpop.eup %9086  ;;  %9098 = vpow2.f32 %v5606_v11 }
 0xb39   : > { %5670 = vadd.xlane.f32.xlu1 %v5669_v62  ;;  %v5663_v21 = vsel %vm1615_vm0, %v12387_v27, 0.0 }
 0xb3b   : > { %5553 = vmax.xlane.f32.xlu0 %v5552_v25  ;;  %v12397_v10 = vpop.eup %9088 }
 0xb3c   : > { %v12401_v53 = vpop.eup %9090  ;;  %v5678_v31 = vsel %vm1615_vm0, %v12397_v10, 0.0 }
 0xb3d   : > { %5664 = vadd.xlane.f32.xlu1 %v5663_v21  ;;  %v5666_v24 = vsel %vm1615_vm0, %v12401_v53, 0.0 }
 0xb3f   : > { %5562 = vmax.xlane.f32.xlu0 %v5561_v38  ;;  %v12405_v4 = vpop.eup %9092 }
 0xb40   : > { %v12409_v1 = vpop.eup %9094  ;;  %v5672_v41 = vsel %vm1615_vm0, %v12405_v4, 0.0 }
 0xb41   : > { %5679 = vadd.xlane.f32.xlu1 %v5678_v31  ;;  %v12413_v45 = vpop.eup %9096  ;;  %v5660_v8 = vsel %vm1615_vm0, %v12409_v1, 0.0 }
 0xb42   : > { %v5681_v16 = vsel %vm1615_vm0, %v12413_v45, 0.0  ;;  %v12419_v52 = vpop.eup %9098 }
 0xb43   : > { %5667 = vadd.xlane.f32.xlu0 %v5666_v24  ;;  %v5675_v19 = vsel %vm1615_vm0, %v12419_v52, 0.0 }
 0xb45   : > { %5673 = vadd.xlane.f32.xlu1 %v5672_v41 }
 0xb47   : > { %5661 = vadd.xlane.f32.xlu0 %v5660_v8 }
 0xb49   : > { %5682 = vadd.xlane.f32.xlu1 %v5681_v16 }
 0xb4d   : > { %5676 = vadd.xlane.f32.xlu1 %v5675_v19 }
 0xb63   : > { %v5500_v29 = vpop.xlane.xlu0 %5499 }
 0xb64   : > { %v5574_v43 = vsub.f32 %v12239_v36, %v5500_v29 }
 0xb65   : > { %v5503_v39 = vpop.xlane.xlu1 %5502 }
 0xb66   : > { %v5616_v23 = vmul.f32 1.442695, %v5574_v43  ;;  %v5575_v11 = vsub.f32 %v12245_v55, %v5503_v39 }
 0xb68   : > { %9100 = vpow2.f32 %v5616_v23  ;;  %v5618_v8 = vmul.f32 1.442695, %v5575_v11 }
 0xb6f   : > { %v5524_v26 = vpop.xlane.xlu0 %5523 }
 0xb70   : > { %v5582_v37 = vsub.f32 %v12251_v46, %v5524_v26 }
 0xb71   : > { %v5527_v28 = vpop.xlane.xlu1 %5526 }
 0xb72   : > { %v12425_v62 = vpop.eup %9100  ;;  %v5632_v25 = vmul.f32 1.442695, %v5582_v37  ;;  %v5583_v24 = vsub.f32 %v12261_v56, %v5527_v28 }
 0xb73   : > { %v5494_v21 = vpop.xlane.xlu0 %5493  ;;  %v5690_v38 = vsel %vm1615_vm0, %v12425_v62, 0.0 }
 0xb74   : > { %9102 = vpow2.f32 %v5632_v25  ;;  %v5572_v31 = vsub.f32 %v12257_v14, %v5494_v21  ;;  %5691 = vadd.xlane.f32.xlu1 %v5690_v38  ;;  %v5634_v29 = vmul.f32 1.442695, %v5583_v24 }
 0xb75   : > { %v5497_v36 = vpop.xlane.xlu1 %5496 }
 0xb76   : > { %v5612_v41 = vmul.f32 1.442695, %v5572_v31  ;;  %v5573_v46 = vsub.f32 %v12267_v7, %v5497_v36 }
 0xb77   : > { %v5518_v16 = vpop.xlane.xlu0 %5517 }
 0xb78   : > { %9104 = vpow2.f32 %v5612_v41  ;;  %v5580_v19 = vsub.f32 %v12273_v63, %v5518_v16  ;;  %v5614_v23 = vmul.f32 1.442695, %v5573_v46 }
 0xb79   : > { %v5521_v55 = vpop.xlane.xlu1 %5520  ;;  %9106 = vpow2.f32 %v5618_v8 }
 0xb7a   : > { %v5628_v43 = vmul.f32 1.442695, %v5580_v19  ;;  %v5581_v39 = vsub.f32 %v12279_v12, %v5521_v55 }
 0xb7b   : > { %v5512_v14 = vpop.xlane.xlu0 %5511 }
 0xb7c   : > { %9108 = vpow2.f32 %v5628_v43  ;;  %v5578_v26 = vsub.f32 %v12285_v47, %v5512_v14  ;;  %v5630_v7 = vmul.f32 1.442695, %v5581_v39 }
 0xb7d   : > { %9110 = vpow2.f32 %v5634_v29  ;;  %v5515_v28 = vpop.xlane.xlu1 %5514 }
 0xb7e   : > { %v12436_v56 = vpop.eup %9102  ;;  %v5624_v37 = vmul.f32 1.442695, %v5578_v26  ;;  %9112 = vpow2.f32 %v5614_v23  ;;  %v5579_v12 = vsub.f32 %v12291_v61, %v5515_v28 }
 0xb7f   : > { %v5536_v25 = vpop.xlane.xlu0 %5535  ;;  %v5714_v63 = vsel %vm1615_vm0, %v12436_v56, 0.0 }
 0xb80   : > { %v5586_v11 = vsub.f32 %v12297_v48, %v5536_v25  ;;  %5715 = vadd.xlane.f32.xlu0 %v5714_v63  ;;  %9114 = vpow2.f32 %v5624_v37  ;;  %v5626_v48 = vmul.f32 1.442695, %v5579_v12 }
 0xb81   : > { %9116 = vpow2.f32 %v5630_v7 }
 0xb82   : > { %v12441_v21 = vpop.eup %9104  ;;  %v5640_v47 = vmul.f32 1.442695, %v5586_v11  ;;  %v5539_v11 = vpop.xlane.xlu1 %5538 }
 0xb83   : > { %v5506_v38 = vpop.xlane.xlu0 %5505  ;;  %v5684_v31 = vsel %vm1615_vm0, %v12441_v21, 0.0  ;;  %v12447_v24 = vpop.eup %9106 }
 0xb84   : > { %v5576_v36 = vsub.f32 %v12309_v42, %v5506_v38  ;;  %5685 = vadd.xlane.f32.xlu1 %v5684_v31  ;;  %9118 = vpow2.f32 %v5640_v47  ;;  %v5693_v42 = vsel %vm1615_vm0, %v12447_v24, 0.0  ;;  %v5587_v31 = vsub.f32 %v12303_v35, %v5539_v11 }
 0xb86   : > { %v12449_v41 = vpop.eup %9108  ;;  %v5620_v8 = vmul.f32 1.442695, %v5576_v36  ;;  %v5509_v12 = vpop.xlane.xlu1 %5508 }
 0xb87   : > { %v12451_v46 = vpop.permute.xlu0 %6026  ;;  %v5708_v61 = vsel %vm1615_vm0, %v12449_v41, 0.0  ;;  %v12455_v16 = vpop.eup %9110 }
 0xb88   : > { %9120 = vpow2.f32 %v5620_v8  ;;  %8144 = vmatprep.subr.bf16.mxu1 %v12451_v46  ;;  %5709 = vadd.xlane.f32.xlu0 %v5708_v61  ;;  %v12460_v19 = vpop.eup %9112  ;;  %v5717_v55 = vsel %vm1615_vm0, %v12455_v16, 0.0  ;;  %v5642_v8 = vmul.f32 1.442695, %v5587_v31  ;;  %v5577_v61 = vsub.f32 %v12315_v40, %v5509_v12 }
 0xb89   : > { %5694 = vadd.xlane.f32.xlu1 %v5693_v42  ;;  %9122 = vpow2.f32 %v5626_v48  ;;  %v5687_v43 = vsel %vm1615_vm0, %v12460_v19, 0.0 }
 0xb8a   : > { %v12464_v29 = vpop.eup %9114  ;;  %v12488_v47 = vpop.xlane.xlu1 %5532 }
 0xb8b   : > { %v12468_v23 = vpop.eup %9116  ;;  %v5702_v39 = vsel %vm1615_vm0, %v12464_v29, 0.0 }
 0xb8c   : > { %5718 = vadd.xlane.f32.xlu0 %v5717_v55  ;;  %v5711_v14 = vsel %vm1615_vm0, %v12468_v23, 0.0 }
 0xb8d   : > { %5688 = vadd.xlane.f32.xlu1 %v5687_v43  ;;  %v5622_v43 = vmul.f32 1.442695, %v5577_v61 }
 0xb8e   : > { %v12474_v26 = vpop.eup %9118  ;;  %v5551_v38 = vpop.xlane.xlu1 %5550 }
 0xb8f   : > { %v5726_v25 = vsel %vm1615_vm0, %v12474_v26, 0.0 }
 0xb90   : > { %5703 = vadd.xlane.f32.xlu0 %v5702_v39 }
 0xb91   : > { %5712 = vadd.xlane.f32.xlu1 %v5711_v14 }
 0xb92   : > { %v12476_v37 = vpop.eup %9120  ;;  %v12497_v55 = vpop.xlane.xlu1 %5544 }
 0xb93   : > { %v5696_v7 = vsel %vm1615_vm0, %v12476_v37, 0.0  ;;  %v12480_v28 = vpop.eup %9122 }
 0xb94   : > { %5697 = vadd.xlane.f32.xlu0 %v5696_v7  ;;  %v5705_v63 = vsel %vm1615_vm0, %v12480_v28, 0.0 }
 0xb95   : > { %5727 = vadd.xlane.f32.xlu1 %v5726_v25  ;;  %v5591_v25 = vsub.f32 %v12329_v30, %v5551_v38 }
 0xb96   : > { %v12500_v14 = vpop.xlane.xlu1 %5556 }
 0xb98   : > { %5706 = vadd.xlane.f32.xlu0 %v5705_v63 }
 0xbae   : > { %6030 = vrot.lane.b32.xlu0 %v13628_v33, %s9379_s21 }
 0xbb2   : > { %6032 = vrot.lane.b32.xlu0 %v13629_v9, %s9379_s21 }
 0xbb6   : > { %6119 = vrot.lane.b32.xlu0 %v13647_v3, %s9379_s21 }
 0xbb8   : > { %v5530_v36 = vpop.xlane.xlu0 %5529 }
 0xbb9   : > { %v5584_v48 = vsub.f32 %v12349_v44, %v5530_v36  ;;  %v5650_v36 = vmul.f32 1.442695, %v5591_v25 }
 0xbbb   : > { %v5636_v42 = vmul.f32 1.442695, %v5584_v48 }
 0xbbc   : > { %v5548_v33 = vpop.xlane.xlu0 %5547 }
 0xbbd   : > { %9124 = vpow2.f32 %v5636_v42  ;;  %v5590_v9 = vsub.f32 %v12357_v49, %v5548_v33 }
 0xbbe   : > { %9126 = vpow2.f32 %v5642_v8 }
 0xbbf   : > { %9128 = vpow2.f32 %v5622_v43  ;;  %v5648_v3 = vmul.f32 1.442695, %v5590_v9 }
 0xbc0   : > { %v5542_v39 = vpop.xlane.xlu0 %5541 }
 0xbc1   : > { %v5588_v35 = vsub.f32 %v12365_v50, %v5542_v39  ;;  %9130 = vpow2.f32 %v5648_v3 }
 0xbc3   : > { %v5644_v63 = vmul.f32 1.442695, %v5588_v35 }
 0xbc4   : > { %v12503_v44 = vpop.xlane.xlu0 %5559 }
 0xbc5   : > { %9132 = vpow2.f32 %v5644_v63 }
 0xbc6   : > { %v5671_v7 = vpop.xlane.xlu1 %5670  ;;  %9134 = vpow2.f32 %v5650_v36 }
 0xbc7   : > { %v12505_v40 = vpop.eup %9124 }
 0xbc8   : > { %v12508_v11 = vpop.xlane.xlu0 %5553  ;;  %v5720_v49 = vsel %vm1615_vm0, %v12505_v40, 0.0  ;;  %v12512_v12 = vpop.eup %9126 }
 0xbc9   : > { %5721 = vadd.xlane.f32.xlu1 %v5720_v49  ;;  %v5729_v48 = vsel %vm1615_vm0, %v12512_v12, 0.0  ;;  %v12518_v8 = vpop.eup %9128 }
 0xbca   : > { %v5665_v31 = vpop.xlane.xlu1 %5664  ;;  %v5699_v61 = vsel %vm1615_vm0, %v12518_v8, 0.0 }
 0xbcb   : > { %v12522_v42 = vpop.eup %9130 }
 0xbcc   : > { %v12514_v50 = vpop.xlane.xlu0 %5562  ;;  %v5738_v9 = vsel %vm1615_vm0, %v12522_v42, 0.0 }
 0xbcd   : > { %5730 = vadd.xlane.f32.xlu1 %v5729_v48 }
 0xbce   : > { %v5680_v30 = vpop.xlane.xlu1 %5679 }
 0xbcf   : > { %v12526_v39 = vpop.eup %9132 }
 0xbd0   : > { %v5668_v38 = vpop.xlane.xlu0 %5667  ;;  %v5732_v35 = vsel %vm1615_vm0, %v12526_v39, 0.0  ;;  %v12530_v25 = vpop.eup %9134 }
 0xbd1   : > { %5700 = vadd.xlane.f32.xlu1 %v5699_v61  ;;  %9136 = vrcp.f32 %v5668_v38  ;;  %v5741_v49 = vsel %vm1615_vm0, %v12530_v25, 0.0 }
 0xbd2   : > { %v5674_v33 = vpop.xlane.xlu1 %5673  ;;  %9138 = vrcp.f32 %v5665_v31 }
 0xbd3   : > { %9140 = vrcp.f32 %v5671_v7 }
 0xbd4   : > { %v5662_v43 = vpop.xlane.xlu0 %5661 }
 0xbd5   : > { %9142 = vrcp.f32 %v5662_v43  ;;  %5739 = vadd.xlane.f32.xlu0 %v5738_v9 }
 0xbd6   : > { %v5683_v3 = vpop.xlane.xlu1 %5682  ;;  %9144 = vrcp.f32 %v5674_v33 }
 0xbd7   : > { %9146 = vrcp.f32 %v5683_v3 }
 0xbd9   : > { %5733 = vadd.xlane.f32.xlu0 %v5732_v35 }
 0xbda   : > { %v5677_v63 = vpop.xlane.xlu1 %5676 }
 0xbdb   : > { %9148 = vrcp.f32 %v5677_v63  ;;  %v9137_v7 = vpop.eup %9136 }
 0xbdc   : > { %9150 = vrcp.f32 %v5680_v30  ;;  %v9139_v31 = vpop.eup %9138  ;;  %v5790_v38 = vmul.f32 %v9137_v7, %v12401_v53 }
 0xbdd   : > { %5742 = vadd.xlane.f32.xlu0 %v5741_v49  ;;  %v9141_v36 = vpop.eup %9140  ;;  %v5789_v43 = vmul.f32 %v9139_v31, %v12387_v27  ;;  %v5585_v31 = vsub.f32 %v12323_v51, %v12488_v47  ;;  %v5592_v51 = vsub.f32 %v12382_v6, %v12508_v11 }
 0xbde   : > { %v5791_v33 = vmul.f32 %v9141_v36, %v12378_v5 }
 0xbdf   : > { %v9143_v48 = vpop.eup %9142  ;;  %v5652_v47 = vmul.f32 1.442695, %v5592_v51 }
 0xbe0   : > { %v5788_v61 = vmul.f32 %v9143_v48, %v12409_v1  ;;  %v9145_v30 = vpop.eup %9144  ;;  %v5821_v3 = vpack.c.bf16 %v5791_v33, %v5790_v38 }
 0xbe1   : > { %v9147_v35 = vpop.eup %9146  ;;  %v5792_v53 = vmul.f32 %v9145_v30, %v12405_v4  ;;  %v5589_v4 = vsub.f32 %v12335_v13, %v12497_v55 }
 0xbe2   : > { %6028 = vrot.lane.b32.xlu1 %v13627_v32, %s9379_s21  ;;  %v5820_v9 = vpack.c.bf16 %v5789_v43, %v5788_v61  ;;  %v5795_v5 = vmul.f32 %v9147_v35, %v12413_v45  ;;  %v5594_v45 = vsub.f32 %v12373_v17, %v12503_v44 }
 0xbe4   : > { %8120 = vmatprep.mubr.msk.bf16.mxu1 %vm1615_vm0, %v5820_v9 }
 0xbe5   : > { %v9149_v63 = vpop.eup %9148  ;;  %8121 = vmatmul.mubr.msk.bf16.vlgmr.msra.gmra.mrb[152].mxu1 %vm1615_vm0, %v5821_v3 }
 0xbe6   : > { %v9151_v49 = vpop.eup %9150  ;;  %8145 = vmatpush3.bf16.msra.mxu1 %v12451_v46  ;;  %v5793_v27 = vmul.f32 %v9149_v63, %v12419_v52  ;;  %v5638_v46 = vmul.f32 1.442695, %v5585_v31  ;;  %v5656_v52 = vmul.f32 1.442695, %v5594_v45 }
 0xbe7   : > { %v5794_v32 = vmul.f32 %v9151_v49, %v12397_v10  ;;  %v5646_v10 = vmul.f32 1.442695, %v5589_v4 }
 0xbe8   : > { %v5822_v1 = vpack.c.bf16 %v5793_v27, %v5792_v53  ;;  %9152 = vpow2.f32 %v5638_v46 }
 0xbe9   : > { %v5823_v7 = vpack.c.bf16 %v5795_v5, %v5794_v32  ;;  %9154 = vpow2.f32 %v5646_v10 }
 0xbea   : > { %8124 = vmatprep.mubr.msk.bf16.mxu1 %vm1615_vm0, %v5822_v1  ;;  %9156 = vpow2.f32 %v5656_v52 }
 0xbeb   : > { %9158 = vpow2.f32 %v5652_v47 }
 0xbed   : > { %8125 = vmatmul.mubr.msk.bf16.gmra.mrb[156].mxu1 %vm1615_vm0, %v5823_v7 }
 0xbf2   : > { %v12563_v36 = vpop.eup %9152 }
 0xbf3   : > { %6123 = vrot.lane.b32.xlu0 %v13649_v60, %s9379_s21  ;;  %v5595_v60 = vsub.f32 %v12393_v18, %v12514_v50  ;;  %v5723_v17 = vsel %vm1615_vm0, %v12563_v36, 0.0  ;;  %v12569_v55 = vpop.eup %9154 }
 0xbf4   : > { %v5735_v6 = vsel %vm1615_vm0, %v12569_v55, 0.0  ;;  %v12573_v11 = vpop.eup %9156 }
 0xbf5   : > { %v5658_v13 = vmul.f32 1.442695, %v5595_v60 }
 0xbf7   : > { %6125 = vrot.lane.b32.xlu0 %v13651_v59, %s9379_s21  ;;  %v5593_v59 = vsub.f32 %v12341_v2, %v12500_v14  ;;  %9160 = vpow2.f32 %v5658_v13  ;;  %v5750_v2 = vsel %vm1615_vm0, %v12573_v11, 0.0  ;;  %v12577_v14 = vpop.eup %9158 }
 0xbf8   : > { %v5744_v38 = vsel %vm1615_vm0, %v12577_v14, 0.0 }
 0xbf9   : > { %v5654_v44 = vmul.f32 1.442695, %v5593_v59 }
 0xbfb   : > { %9162 = vpow2.f32 %v5654_v44 }
 0xc01   : > { %v5692_v18 = vpop.xlane.xlu1 %5691  ;;  %v12581_v61 = vpop.eup %9160 }
 0xc02   : > { %v5753_v33 = vsel %vm1615_vm0, %v12581_v61, 0.0  ;;  %9164 = vrcp.f32 %v5692_v18  ;;  %v13691_v18 = vld [vmem:[#allocation47_spill] sm:$0xff] }
 0xc05   : > { %v12585_v9 = vpop.eup %9162 }
 0xc06   : > { %5724 = vadd.xlane.f32.xlu1 %v5723_v17  ;;  %v5747_v35 = vsel %vm1615_vm0, %v12585_v9, 0.0 }
 0xc0a   : > { %5736 = vadd.xlane.f32.xlu1 %v5735_v6 }
 0xc0c   : > { %v9165_v27 = vpop.eup %9164 }
 0xc0d   : > { %v5716_v50 = vpop.xlane.xlu0 %5715  ;;  %v5798_v59 = vmul.f32 %v9165_v27, %v12425_v62  ;;  %v13705_v27 = vld [vmem:[#allocation29_spill] sm:$0xff] }
 0xc0e   : > { %5751 = vadd.xlane.f32.xlu1 %v5750_v2  ;;  %9166 = vrcp.f32 %v5716_v50 }
 0xc11   : > { %v5686_v48 = vpop.xlane.xlu1 %5685 }
 0xc12   : > { %5745 = vadd.xlane.f32.xlu1 %v5744_v38  ;;  %v13696_v38 = vld [vmem:[#allocation50_spill] sm:$0xff] }
 0xc15   : > { %v5710_v43 = vpop.xlane.xlu0 %5709 }
 0xc16   : > { %v5695_v30 = vpop.xlane.xlu1 %5694  ;;  %5754 = vadd.xlane.f32.xlu1 %v5753_v33  ;;  %v13699_v33 = vld [vmem:[#allocation48_spill] sm:$0xff] }
 0xc17   : > { %9168 = vrcp.f32 %v5695_v30  ;;  %v13700_v30 = vld [vmem:[#allocation51_spill] sm:$0xff] }
 0xc18   : > { %9170 = vrcp.f32 %v5686_v48  ;;  %v9167_v5 = vpop.eup %9166  ;;  %v13694_v48 = vld [vmem:[#allocation71_spill] sm:$0xff] }
 0xc19   : > { %v5719_v3 = vpop.xlane.xlu0 %5718  ;;  %v12590_v4 = vmul.f32 %v9167_v5, %v12436_v56  ;;  %v13706_v5 = vld [vmem:[#allocation19_spill] sm:$0xff] }
 0xc1a   : > { %9172 = vrcp.f32 %v5719_v3  ;;  %v5689_v63 = vpop.xlane.xlu1 %5688  ;;  %5748 = vadd.xlane.f32.xlu1 %v5747_v35  ;;  %v13701_v3 = vpack.i.bf16 %v13699_v33, %v13700_v30  ;;  %v13702_v35 = vld [vmem:[#allocation32_spill] sm:$0xff] }
 0xc1b   : > { %9174 = vrcp.f32 %v5689_v63  ;;  %v13703_v63 = vld [vmem:[#allocation26_spill] sm:$0xff] }
 0xc1c   : > { %9176 = vrcp.f32 %v5710_v43 }
 0xc1d   : > { %v5704_v49 = vpop.xlane.xlu0 %5703 }
 0xc1e   : > { %v5713_v53 = vpop.xlane.xlu1 %5712 }
 0xc1f   : > { %9178 = vrcp.f32 %v5713_v53  ;;  %v13704_v53 = vpack.i.bf16 %v13702_v35, %v13703_v63  ;;  %v13730_v35 = vld [vmem:[#allocation23_spill] sm:$0xff] }
 0xc21   : > { %v5698_v1 = vpop.xlane.xlu0 %5697  ;;  %v9169_v32 = vpop.eup %9168 }
 0xc22   : > { %v9171_v7 = vpop.eup %9170  ;;  %v5799_v10 = vmul.f32 %v9169_v32, %v12447_v24  ;;  %v13707_v32 = vpack.i.bf16 %v13705_v27, %v13706_v5 }
 0xc23   : > { %v5796_v51 = vmul.f32 %v9171_v7, %v12441_v21  ;;  %v13708_v7 = vld [vmem:[#allocation21_spill] sm:$0xff] }
 0xc24   : > { %v9173_v31 = vpop.eup %9172  ;;  %v5825_v56 = vpack.c.bf16 %v5799_v10, %v5798_v59  ;;  %v13711_v10 = vld [vmem:[#allocation20_spill] sm:$0xff]  ;;  %v13715_v59 = vld [vmem:[#allocation55_spill] sm:$0xff] }
 0xc25   : > { %v9175_v46 = vpop.eup %9174  ;;  %v12594_v45 = vmul.f32 %v9173_v31, %v12455_v16  ;;  %v5707_v52 = vpop.xlane.xlu0 %5706  ;;  %v13709_v31 = vld [vmem:[#allocation36_spill] sm:$0xff] }
 0xc26   : > { %v5797_v47 = vmul.f32 %v9175_v46, %v12460_v19  ;;  %v9177_v60 = vpop.eup %9176  ;;  %v13690_v19 = vld [vmem:[#allocation46_spill] sm:$0xff]  ;;  %v13710_v46 = vpack.i.bf16 %v13708_v7, %v13709_v31  ;;  %9180 = vrcp.f32 %v5707_v52 }
 0xc27   : > { %v5829_v13 = vpack.c.bf16 %v12594_v45, %v12590_v4  ;;  %v5804_v24 = vmul.f32 %v9177_v60, %v12449_v41  ;;  %v13692_v2 = vpack.i.bf16 %v13690_v19, %v13691_v18  ;;  %v13693_v41 = vld [vmem:[#allocation17_spill] sm:$0xff]  ;;  %v13714_v60 = vld [vmem:[#allocation56_spill] sm:$0xff]  ;;  %v13720_v19 = vld [vmem:[#allocation87_spill] sm:$0xff]  ;;  %9182 = vrcp.f32 %v5698_v1 }
 0xc28   : > { %v5824_v17 = vpack.c.bf16 %v5797_v47, %v5796_v51  ;;  %v13712_v51 = vld [vmem:[#allocation27_spill] sm:$0xff]  ;;  %v13721_v18 = vld [vmem:[#allocation54_spill] sm:$0xff]  ;;  %9184 = vrcp.f32 %v5704_v49  ;;  %v13733_v1 = vld [vmem:[#allocation105_spill] sm:$0xff] }
 0xc29   : > { %v9179_v44 = vpop.eup %9178  ;;  %v6031_v6 = vpop.permute.xlu0 %6030  ;;  %v13713_v47 = vpack.i.bf16 %v13711_v10, %v13712_v51  ;;  %v13732_v49 = vld [vmem:[#allocation107_spill] sm:$0xff]  ;;  %v13735_v51 = vld [vmem:[#allocation106_spill] sm:$0xff]  ;;  %v8672_v45 = vld [vmem:[#allocation7 + $0x64] ss:$8 sps:$4 sm:$0xff]  }
 0xc2a   : > { %8136 = vmatprep.mubr.msk.bf16.mxu0 %vm1615_vm0, %v5824_v17  ;;  %v5805_v16 = vmul.f32 %v9179_v44, %v12468_v23  ;;  %v13695_v23 = vpack.i.bf16 %v13693_v41, %v13694_v48  ;;  %v13716_v17 = vpack.i.bf16 %v13714_v60, %v13715_v59  ;;  %v12644_v44 = vpop.xlane.xlu1 %5727  ;;  %v13723_v41 = vld [vmem:[#allocation30_spill] sm:$0xff]  ;;  %v13724_v48 = vld [vmem:[#allocation53_spill] sm:$0xff]  ;;  %v13734_v27 = vpack.i.bf16 %v13732_v49, %v13733_v1 }
 0xc2b   : > { %8137 = vmatmul.mubr.msk.bf16.vlgmr.msra.gmra.mrb[8].mxu0 %vm1615_vm0, %v5825_v56  ;;  %6121 = vrot.lane.b32.xlu1 %v13648_v58, %s9379_s21  ;;  %v13697_v58 = vld [vmem:[#allocation52_spill] sm:$0xff]  ;;  %v13717_v56 = vld [vmem:[#allocation18_spill] sm:$0xff] }
 0xc2c   : > { %v5828_v21 = vpack.c.bf16 %v5805_v16, %v5804_v24  ;;  %v13698_v43 = vpack.i.bf16 %v13696_v38, %v13697_v58  ;;  %v13718_v24 = vld [vmem:[#allocation16_spill] sm:$0xff]  ;;  %v13726_v58 = vld [vmem:[#allocation103_spill] sm:$0xff] }
 0xc2d   : > { %v6033_v62 = vpop.permute.xlu0 %6032  ;;  %v13719_v16 = vpack.i.bf16 %v13717_v56, %v13718_v24  ;;  %v8654_v56 = vld [vmem:[#allocation7 + $0x4] ss:$8 sps:$4 sm:$0xff]   ;;  %v8657_v24 = vld [vmem:[#allocation7 + $0x14] ss:$8 sps:$4 sm:$0xff]   ;;  %v8667_v4 = vld [vmem:[#allocation7 + $0x50] ss:$8 sps:$4 sm:$0xff]  }
 0xc2e   : > { %8152 = vmatprep.mubr.msk.bf16.mxu1 %vm1615_vm0, %v5828_v21  ;;  %v8687_v1 = vld [vmem:[#allocation7 + $0xb4] ss:$8 sps:$4 sm:$0xff]  }
 0xc2f   : > { %8354 = vrot.lane.b32.xlu1 %v13692_v2, %s9379_s21  ;;  %v13722_v2 = vpack.i.bf16 %v13720_v19, %v13721_v18  ;;  %v8664_v19 = vld [vmem:[#allocation7 + $0x40] ss:$8 sps:$4 sm:$0xff]   ;;  %v8669_v18 = vld [vmem:[#allocation7 + $0x54] ss:$8 sps:$4 sm:$0xff]  }
 0xc31   : > { %v6120_v50 = vpop.permute.xlu0 %6119 }
 0xc32   : > { %8160 = vmatprep.subr.bf16.mxu0 %v6120_v50 }
 0xc33   : > { %8364 = vrot.lane.b32.xlu1 %v13695_v23, %s9379_s21  ;;  %8161 = vmatpush3.bf16.msra.mxu0 %v6120_v50  ;;  %v13725_v23 = vpack.i.bf16 %v13723_v41, %v13724_v48  ;;  %v8675_v41 = vld [vmem:[#allocation7 + $0x74] ss:$8 sps:$4 sm:$0xff]   ;;  %v8673_v48 = vld [vmem:[#allocation7 + $0x70] ss:$8 sps:$4 sm:$0xff]  }
 0xc37   : > { %8374 = vrot.lane.b32.xlu1 %v13698_v43, %s9379_s21  ;;  %v13727_v43 = vld [vmem:[#allocation25_spill] sm:$0xff] }
 0xc38   : > { %v13728_v33 = vpack.i.bf16 %v13726_v58, %v13727_v43  ;;  %v8676_v43 = vld [vmem:[#allocation7 + $0x80] ss:$8 sps:$4 sm:$0xff]  }
 0xc3b   : > { %8384 = vrot.lane.b32.xlu1 %v13701_v3, %s9379_s21  ;;  %v13729_v3 = vld [vmem:[#allocation102_spill] sm:$0xff] }
 0xc3c   : > { %v13731_v63 = vpack.i.bf16 %v13729_v3, %v13730_v35  ;;  %v8684_v3 = vld [vmem:[#allocation7 + $0xa4] ss:$8 sps:$4 sm:$0xff]  }
 0xc3f   : > { %8394 = vrot.lane.b32.xlu1 %v13704_v53, %s9379_s21  ;;  %v9181_v53 = vpop.eup %9180 }
 0xc40   : > { %v9183_v52 = vpop.eup %9182  ;;  %v5803_v7 = vmul.f32 %v9181_v53, %v12480_v28  ;;  %v8658_v28 = vld [vmem:[#allocation7 + $0x20] ss:$8 sps:$4 sm:$0xff]  }
 0xc41   : > { %v9185_v5 = vpop.eup %9184  ;;  %v5800_v31 = vmul.f32 %v9183_v52, %v12476_v37  ;;  %v8660_v37 = vld [vmem:[#allocation7 + $0x24] ss:$8 sps:$4 sm:$0xff]  }
 0xc42   : > { %v5802_v10 = vmul.f32 %v9185_v5, %v12464_v29  ;;  %v8655_v29 = vld [vmem:[#allocation7 + $0x10] ss:$8 sps:$4 sm:$0xff]  }
 0xc43   : > { %8404 = vrot.lane.b32.xlu1 %v13707_v32, %s9379_s21 }
 0xc47   : > { %8414 = vrot.lane.b32.xlu1 %v13710_v46, %s9379_s21 }
 0xc4b   : > { %8424 = vrot.lane.b32.xlu1 %v13713_v47, %s9379_s21  ;;  %v13736_v47 = vld [vmem:[#allocation104_spill] sm:$0xff] }
 0xc4c   : > { %v13737_v60 = vpack.i.bf16 %v13735_v51, %v13736_v47 }
 0xc4f   : > { %8434 = vrot.lane.b32.xlu1 %v13716_v17, %s9379_s21  ;;  %v8652_v17 = vld [vmem:[#allocation7] ss:$8 sps:$4 sm:$0xff]  }
 0xc53   : > { %8444 = vrot.lane.b32.xlu1 %v13719_v16, %s9379_s21  ;;  %v8666_v16 = vld [vmem:[#allocation7 + $0x44] ss:$8 sps:$4 sm:$0xff]  }
 0xc56   : > { %v12650_v21 = vpop.xlane.xlu1 %5721 }
 0xc57   : > { %8454 = vrot.lane.b32.xlu1 %v13722_v2, %s9379_s21  ;;  %v8670_v2 = vld [vmem:[#allocation7 + $0x60] ss:$8 sps:$4 sm:$0xff]  }
 0xc5a   : > { %v5731_v50 = vpop.xlane.xlu1 %5730 }
 0xc5b   : > { %8464 = vrot.lane.b32.xlu1 %v13725_v23, %s9379_s21  ;;  %v8678_v23 = vld [vmem:[#allocation7 + $0x84] ss:$8 sps:$4 sm:$0xff]  }
 0xc5e   : > { %v5701_v38 = vpop.xlane.xlu1 %5700 }
 0xc5f   : > { %9186 = vrcp.f32 %v5701_v38  ;;  %8474 = vrot.lane.b32.xlu1 %v13728_v33, %s9379_s21  ;;  %v8681_v33 = vld [vmem:[#allocation7 + $0x94] ss:$8 sps:$4 sm:$0xff]  }
 0xc60   : > { %9188 = vrcp.f32 %v5731_v50  ;;  %v8679_v50 = vld [vmem:[#allocation7 + $0x90] ss:$8 sps:$4 sm:$0xff]  }
 0xc61   : > { %9190 = vrcp.f32 %v12650_v21 }
 0xc62   : > { %v6029_v30 = vpop.permute.xlu1 %6028  ;;  %9192 = vrcp.f32 %v12644_v44  ;;  %v8682_v44 = vld [vmem:[#allocation7 + $0xa0] ss:$8 sps:$4 sm:$0xff]  }
 0xc63   : > { %8484 = vrot.lane.b32.xlu1 %v13731_v63, %s9379_s21  ;;  %8146 = vmatprep.subr.bf16.mxu1 %v6029_v30 }
 0xc64   : > { %8147 = vmatpush3.bf16.msra.mxu1 %v6029_v30 }
 0xc65   : > { %8148 = vmatprep.subr.bf16.mxu1 %v6031_v6 }
 0xc67   : > { %8494 = vrot.lane.b32.xlu1 %v13734_v27, %s9379_s21 }
 0xc68   : > { %8149 = vmatpush3.bf16.msra.mxu1 %v6031_v6  ;;  %v5827_v6 = vpack.c.bf16 %v5803_v7, %v5802_v10  ;;  %v8685_v10 = vld [vmem:[#allocation7 + $0xb0] ss:$8 sps:$4 sm:$0xff]  }
 0xc69   : > { %v9187_v32 = vpop.eup %9186  ;;  %8150 = vmatprep.subr.bf16.mxu1 %v6033_v62 }
 0xc6a   : > { %v5801_v46 = vmul.f32 %v9187_v32, %v12518_v8  ;;  %v8663_v8 = vld [vmem:[#allocation7 + $0x34] ss:$8 sps:$4 sm:$0xff]   ;;  %v9189_v35 = vpop.eup %9188 }
 0xc6b   : > { %8504 = vrot.lane.b32.xlu1 %v13737_v60, %s9379_s21  ;;  %v9191_v63 = vpop.eup %9190  ;;  %v5811_v49 = vmul.f32 %v9189_v35, %v12512_v12 }
 0xc6c   : > { %8151 = vmatpush3.bf16.msra.mxu1 %v6033_v62  ;;  %v5826_v59 = vpack.c.bf16 %v5801_v46, %v5800_v31  ;;  %v8661_v62 = vld [vmem:[#allocation7 + $0x30] ss:$8 sps:$4 sm:$0xff]   ;;  %v9193_v53 = vpop.eup %9192  ;;  %v5808_v5 = vmul.f32 %v9191_v63, %v12505_v40 }
 0xc6d   : > { %6764 = vmatprep.subr.bf16.mxu1 %v8654_v56  ;;  %v5810_v31 = vmul.f32 %v9193_v53, %v12474_v26  ;;  %v8688_v26 = vld [vmem:[#allocation7 + $0xc0] ss:$8 sps:$4 sm:$0xff]   ;;  %v8693_v56 = vld [vmem:[#allocation7 + $0xd4] ss:$8 sps:$4 sm:$0xff]  }
 0xc6e   : > { %8140 = vmatprep.mubr.msk.bf16.mxu0 %vm1615_vm0, %v5826_v59  ;;  %v8690_v59 = vld [vmem:[#allocation7 + $0xc4] ss:$8 sps:$4 sm:$0xff]   ;;  %v13740_v63 = vld [vmem:[#allocation22_spill] sm:$0xff] }
 0xc6f   : > { %8141 = vmatmul.mubr.msk.bf16.gmra.mrb[12].mxu0 %vm1615_vm0, %v5827_v6  ;;  %8153 = vmatmul.mubr.msk.bf16.vlgmr.msra.gmra.mrb[160].mxu1 %vm1615_vm0, %v5829_v13  ;;  %v5740_v13 = vpop.xlane.xlu0 %5739  ;;  %v5831_v60 = vpack.c.bf16 %v5811_v49, %v5810_v31 }
 0xc70   : > { %6765 = vmatpush1.bf16.msra.mxu1 %v8652_v17 }
 0xc71   : > { %6766 = vmatprep.subr.bf16.mxu1 %v8657_v24  ;;  %v8691_v24 = vld [vmem:[#allocation7 + $0xd0] ss:$8 sps:$4 sm:$0xff]  }
 0xc73   : > { %v5734_v38 = vpop.xlane.xlu0 %5733 }
 0xc74   : > { %6767 = vmatpush1.bf16.msra.mxu1 %v8655_v29 }
 0xc75   : > { %6768 = vmatprep.subr.bf16.mxu1 %v8660_v37  ;;  %v8694_v37 = vld [vmem:[#allocation7 + $0xe0] ss:$8 sps:$4 sm:$0xff]  }
 0xc77   : > { %v5743_v47 = vpop.xlane.xlu0 %5742 }
 0xc78   : > { %6769 = vmatpush1.bf16.msra.mxu1 %v8658_v28 }
 0xc79   : > { %6770 = vmatprep.subr.bf16.mxu1 %v8663_v8 }
 0xc7b   : > { %v6124_v29 = vpop.permute.xlu0 %6123 }
 0xc7c   : > { %6771 = vmatpush1.bf16.msra.mxu1 %v8661_v62 }
 0xc7d   : > { %6772 = vmatprep.subr.bf16.mxu1 %v8666_v16 }
 0xc80   : > { %6773 = vmatpush1.bf16.msra.mxu1 %v8664_v19 }
 0xc81   : > { %6774 = vmatprep.subr.bf16.mxu1 %v8669_v18 }
 0xc84   : > { %6775 = vmatpush1.bf16.msra.mxu1 %v8667_v4  ;;  %v6126_v4 = vpop.permute.xlu0 %6125 }
 0xc85   : > { %6776 = vmatprep.subr.bf16.mxu1 %v8672_v45  ;;  %v8697_v45 = vld [vmem:[#allocation7 + $0xf0] ss:$8 sps:$4 sm:$0xff]  }
 0xc88   : > { %6777 = vmatpush1.bf16.msra.mxu1 %v8670_v2 }
 0xc89   : > { %6778 = vmatprep.subr.bf16.mxu1 %v8675_v41 }
 0xc8c   : > { %6779 = vmatpush1.bf16.msra.mxu1 %v8673_v48  ;;  %v13738_v48 = vld [vmem:[#allocation31_spill] sm:$0xff] }
 0xc8d   : > { %6780 = vmatprep.subr.bf16.mxu1 %v8678_v23 }
 0xc90   : > { %6781 = vmatpush1.bf16.msra.mxu1 %v8676_v43 }
 0xc91   : > { %6782 = vmatprep.subr.bf16.mxu1 %v8681_v33 }
 0xc93   : > { %v5725_v58 = vpop.xlane.xlu1 %5724 }
 0xc94   : > { %9194 = vrcp.f32 %v5725_v58  ;;  %6783 = vmatpush1.bf16.msra.mxu1 %v8679_v50 }
 0xc95   : > { %9196 = vrcp.f32 %v5734_v38  ;;  %6784 = vmatprep.subr.bf16.mxu1 %v8684_v3  ;;  %v13739_v38 = vld [vmem:[#allocation28_spill] sm:$0xff] }
 0xc97   : > { %v5737_v30 = vpop.xlane.xlu1 %5736 }
 0xc98   : > { %9198 = vrcp.f32 %v5737_v30  ;;  %6785 = vmatpush1.bf16.msra.mxu1 %v8682_v44  ;;  %v13741_v44 = vld [vmem:[#allocation24_spill] sm:$0xff] }
 0xc99   : > { %6786 = vmatprep.subr.bf16.mxu1 %v8687_v1  ;;  %9200 = vrcp.f32 %v5743_v47  ;;  %v13743_v47 = vld [vmem:[#allocation40_spill] sm:$0xff] }
 0xc9a   : > { %9202 = vrcp.f32 %v5740_v13  ;;  %v8699_v13 = vld [vmem:[#allocation7 + $0xf4] ss:$8 sps:$4 sm:$0xff]  }
 0xc9b   : > { %v5752_v21 = vpop.xlane.xlu1 %5751 }
 0xc9c   : > { %6787 = vmatpush1.bf16.msra.mxu1 %v8685_v10  ;;  %v13742_v10 = vld [vmem:[#allocation34_spill] sm:$0xff] }
 0xc9d   : > { %6788 = vmatprep.subr.bf16.mxu1 %v8690_v59 }
 0xc9e   : > { %v9195_v52 = vpop.eup %9194 }
 0xc9f   : > { %v5746_v27 = vpop.xlane.xlu1 %5745  ;;  %v5809_v32 = vmul.f32 %v9195_v52, %v12563_v36  ;;  %v9197_v7 = vpop.eup %9196 }
 0xca0   : > { %v5812_v17 = vmul.f32 %v9197_v7, %v12526_v39  ;;  %9204 = vrcp.f32 %v5746_v27  ;;  %6789 = vmatpush1.bf16.msra.mxu1 %v8688_v26  ;;  %v8696_v39 = vld [vmem:[#allocation7 + $0xe4] ss:$8 sps:$4 sm:$0xff]  }
 0xca1   : > { %v5830_v46 = vpack.c.bf16 %v5809_v32, %v5808_v5  ;;  %6790 = vmatprep.subr.bf16.mxu1 %v8693_v56 }
 0xca2   : > { %v9199_v51 = vpop.eup %9198 }
 0xca3   : > { %8156 = vmatprep.mubr.msk.bf16.mxu1 %vm1615_vm0, %v5830_v46  ;;  %v5755_v12 = vpop.xlane.xlu1 %5754  ;;  %v5813_v40 = vmul.f32 %v9199_v51, %v12569_v55  ;;  %v9201_v28 = vpop.eup %9200 }
 0xca4   : > { %8157 = vmatmul.mubr.msk.bf16.gmra.mrb[164].mxu1 %vm1615_vm0, %v5831_v60  ;;  %v9203_v62 = vpop.eup %9202  ;;  %v5815_v41 = vmul.f32 %v9201_v28, %v12530_v25 }
 0xca5   : > { %v5832_v36 = vpack.c.bf16 %v5813_v40, %v5812_v17  ;;  %6791 = vmatpush1.bf16.msra.mxu1 %v8691_v24  ;;  %v5814_v50 = vmul.f32 %v9203_v62, %v12522_v42  ;;  %v13744_v24 = vld [vmem:[#allocation43_spill] sm:$0xff] }
 0xca6   : > { %6792 = vmatprep.subr.bf16.mxu1 %v8696_v39 }
 0xca7   : > { %8168 = vmatprep.mubr.msk.bf16.mxu0 %vm1615_vm0, %v5832_v36  ;;  %v5749_v6 = vpop.xlane.xlu1 %5748 }
 0xca8   : > { %9206 = vrcp.f32 %v5749_v6 }
 0xca9   : > { %9208 = vrcp.f32 %v5755_v12  ;;  %6793 = vmatpush1.bf16.msra.mxu1 %v8694_v37 }
 0xcaa   : > { %9210 = vrcp.f32 %v5752_v21  ;;  %v9205_v18 = vpop.eup %9204  ;;  %6794 = vmatprep.subr.bf16.mxu1 %v8699_v13  ;;  %v5833_v21 = vpack.c.bf16 %v5815_v41, %v5814_v50 }
 0xcab   : > { %v6122_v55 = vpop.permute.xlu1 %6121  ;;  %v5816_v35 = vmul.f32 %v9205_v18, %v12577_v14  ;;  %v13746_v18 = vld [vmem:[#allocation72_spill] sm:$0xff] }
 0xcac   : > { %8162 = vmatprep.subr.bf16.mxu0 %v6122_v55 }
 0xcad   : > { %8163 = vmatpush3.bf16.msra.mxu0 %v6122_v55  ;;  %6795 = vmatpush1.bf16.msra.mxu1 %v8697_v45  ;;  %v13747_v45 = vld [vmem:[#allocation76_spill] sm:$0xff] }
 0xcae   : > { %8164 = vmatprep.subr.bf16.mxu0 %v6124_v29 }
 0xcaf   : > { %v8355_v8 = vpop.permute.xlu1 %8354 }
 0xcb0   : > { %v8357_v16 = vunpack.i.h.bf16 %v8355_v8  ;;  %v8356_v19 = vunpack.i.l.bf16 %v8355_v8 }
 0xcb1   : > { %8165 = vmatpush3.bf16.msra.mxu0 %v6124_v29  ;;  %v13745_v29 = vld [vmem:[#allocation37_spill] sm:$0xff] }
 0xcb2   : > { %v9207_v2 = vpop.eup %9206  ;;  %v12700_v23 = vsel %vm1615_vm0, %v13738_v48, %v8357_v16  ;;  %v12704_v58 = vsel %vm1615_vm0, %v13739_v38, %v8356_v19  ;;  %8166 = vmatprep.subr.bf16.mxu0 %v6126_v4 }
 0xcb3   : > { %v6528_v43 = vpack.c.bf16 %v12700_v23, %v12704_v58  ;;  %v8365_v33 = vpop.permute.xlu1 %8364  ;;  %v5817_v30 = vmul.f32 %v9207_v2, %v12585_v9  ;;  %v9209_v49 = vpop.eup %9208 }
 0xcb4   : > { %v8367_v3 = vunpack.i.h.bf16 %v8365_v33  ;;  %v8366_v25 = vunpack.i.l.bf16 %v8365_v33  ;;  %v9211_v14 = vpop.eup %9210  ;;  %v5819_v31 = vmul.f32 %v9209_v49, %v12581_v61 }
 0xcb5   : > { %8167 = vmatpush3.bf16.msra.mxu0 %v6126_v4  ;;  %v5834_v1 = vpack.c.bf16 %v5817_v30, %v5816_v35  ;;  %v5818_v36 = vmul.f32 %v9211_v14, %v12573_v11  ;;  %v13749_v35 = vld [vmem:[#allocation74_spill] sm:$0xff] }
 0xcb6   : > { %v12713_v53 = vsel %vm1615_vm0, %v13740_v63, %v8366_v25  ;;  %v12717_v52 = vsel %vm1615_vm0, %v13741_v44, %v8367_v3  ;;  %v13748_v3 = vld [vmem:[#allocation44_spill] sm:$0xff] }
 0xcb7   : > { %v8375_v9 = vpop.permute.xlu1 %8374  ;;  %v6530_v42 = vpack.c.bf16 %v12717_v52, %v12713_v53  ;;  %v5835_v6 = vpack.c.bf16 %v5819_v31, %v5818_v36 }
 0xcb8   : > { %v8377_v27 = vunpack.i.h.bf16 %v8375_v9  ;;  %v8376_v5 = vunpack.i.l.bf16 %v8375_v9  ;;  %v8122_v32 = vpop.f32.mrb[152].mxu1  ;;  %8169 = vmatmul.mubr.msk.bf16.vlgmr.msra.gmra.mrb[16].mxu0 %vm1615_vm0, %v5833_v21 }
 0xcb9   : > { %v5898_v7 = vpop.f32.mrb[153].mxu1  ;;  %8172 = vmatprep.mubr.msk.bf16.mxu0 %vm1615_vm0, %v5834_v1  ;;  %v13750_v1 = vld [vmem:[#allocation92_spill] sm:$0xff] }
 0xcba   : > { %v8123_v46 = vpop.f32.mrb[154].mxu1  ;;  %v12726_v51 = vsel %vm1615_vm0, %v13742_v10, %v8376_v5  ;;  %v12730_v60 = vsel %vm1615_vm0, %v13743_v47, %v8377_v27  ;;  %v13751_v5 = vld [vmem:[#allocation81_spill] sm:$0xff]  ;;  %v13752_v10 = vld [vmem:[#allocation78_spill] sm:$0xff] }
 0xcbb   : > { %v8358_v59 = vpack.i.bf16 %v8123_v46, %v8122_v32  ;;  %v5901_v12 = vpop.f32.mrb[155].mxu1  ;;  %v8385_v17 = vpop.permute.xlu1 %8384  ;;  %v6532_v40 = vpack.c.bf16 %v12730_v60, %v12726_v51  ;;  %v13771_v60 = vld [vmem:[#allocation35_spill] sm:$0xff] }
 0xcbc   : > { %v8348_v26 = vpack.i.bf16 %v5901_v12, %v5898_v7  ;;  %v8387_v56 = vunpack.i.h.bf16 %v8385_v17  ;;  %v8386_v61 = vunpack.i.l.bf16 %v8385_v17 }
 0xcbe   : > { %8349 = vrot.lane.b32.xlu0 %v8348_v26, %s9379_s21  ;;  %v12738_v39 = vsel %vm1615_vm0, %v13744_v24, %v8386_v61  ;;  %v12742_v55 = vsel %vm1615_vm0, %v13745_v29, %v8387_v56  ;;  %v13754_v61 = vld [vmem:[#allocation15_spill] sm:$0xff]  ;;  %v13755_v24 = vld [vmem:[#allocation66_spill] sm:$0xff] }
 0xcbf   : > { %v8395_v37 = vpop.permute.xlu1 %8394  ;;  %v6534_v28 = vpack.c.bf16 %v12742_v55, %v12738_v39 }
 0xcc0   : > { %v8397_v8 = vunpack.i.h.bf16 %v8395_v37  ;;  %v8396_v11 = vunpack.i.l.bf16 %v8395_v37  ;;  %v8126_v62 = vpop.f32.mrb[156].mxu1  ;;  %8173 = vmatmul.mubr.msk.bf16.gmra.mrb[20].mxu0 %vm1615_vm0, %v5835_v6 }
 0xcc1   : > { %v5914_v16 = vpop.f32.mrb[157].mxu1 }
 0xcc2   : > { %8359 = vrot.lane.b32.xlu0 %v8358_v59, %s9379_s21  ;;  %v8127_v19 = vpop.f32.mrb[158].mxu1  ;;  %v12750_v4 = vsel %vm1615_vm0, %v13746_v18, %v8396_v11  ;;  %v12754_v13 = vsel %vm1615_vm0, %v13747_v45, %v8397_v8  ;;  %v13753_v59 = vld [vmem:[#allocation90_spill] sm:$0xff]  ;;  %v13757_v18 = vld [vmem:[#allocation85_spill] sm:$0xff] }
 0xcc3   : > { %v8378_v2 = vpack.i.bf16 %v8127_v19, %v8126_v62  ;;  %v5917_v41 = vpop.f32.mrb[159].mxu1  ;;  %v8405_v48 = vpop.permute.xlu1 %8404  ;;  %v6536_v38 = vpack.c.bf16 %v12754_v13, %v12750_v4 }
 0xcc4   : > { %v8368_v33 = vpack.i.bf16 %v5917_v41, %v5914_v16  ;;  %v8407_v30 = vunpack.i.h.bf16 %v8405_v48  ;;  %v8406_v50 = vunpack.i.l.bf16 %v8405_v48  ;;  %v13756_v16 = vld [vmem:[#allocation83_spill] sm:$0xff] }
 0xcc6   : > { %8369 = vrot.lane.b32.xlu0 %v8368_v33, %s9379_s21  ;;  %v12761_v25 = vsel %vm1615_vm0, %v13748_v3, %v8406_v50  ;;  %v12765_v21 = vsel %vm1615_vm0, %v13749_v35, %v8407_v30  ;;  %v13758_v30 = vld [vmem:[#allocation13_spill] sm:$0xff]  ;;  %v13759_v3 = vld [vmem:[#allocation14_spill] sm:$0xff] }
 0xcc7   : > { %v8415_v63 = vpop.permute.xlu1 %8414  ;;  %v6538_v44 = vpack.c.bf16 %v12765_v21, %v12761_v25 }
 0xcc8   : > { %v8417_v49 = vunpack.i.h.bf16 %v8415_v63  ;;  %v8416_v9 = vunpack.i.l.bf16 %v8415_v63 }
 0xcca   : > { %8379 = vrot.lane.b32.xlu0 %v8378_v2, %s9379_s21  ;;  %v12772_v27 = vsel %vm1615_vm0, %v13750_v1, %v8416_v9  ;;  %v12776_v32 = vsel %vm1615_vm0, %v13751_v5, %v8417_v49  ;;  %v13760_v5 = vld [vmem:[#allocation67_spill] sm:$0xff] }
 0xccb   : > { %v8425_v14 = vpop.permute.xlu1 %8424  ;;  %v6540_v7 = vpack.c.bf16 %v12776_v32, %v12772_v27 }
 0xccc   : > { %v8427_v31 = vunpack.i.h.bf16 %v8425_v14  ;;  %v8426_v46 = vunpack.i.l.bf16 %v8425_v14 }
 0xcce   : > { %v12782_v47 = vsel %vm1615_vm0, %v13752_v10, %v8426_v46  ;;  %v12786_v12 = vsel %vm1615_vm0, %v13753_v59, %v8427_v31  ;;  %v13761_v31 = vld [vmem:[#allocation68_spill] sm:$0xff] }
 0xccf   : > { %v8435_v17 = vpop.permute.xlu1 %8434  ;;  %v6542_v36 = vpack.c.bf16 %v12786_v12, %v12782_v47 }
 0xcd0   : > { %v8437_v26 = vunpack.i.h.bf16 %v8435_v17  ;;  %v8436_v56 = vunpack.i.l.bf16 %v8435_v17 }
 0xcd2   : > { %v12792_v6 = vsel %vm1615_vm0, %v13754_v61, %v8436_v56  ;;  %v12796_v29 = vsel %vm1615_vm0, %v13755_v24, %v8437_v26  ;;  %v13762_v56 = vld [vmem:[#allocation99_spill] sm:$0xff]  ;;  %v13763_v24 = vld [vmem:[#allocation98_spill] sm:$0xff] }
 0xcd3   : > { %v8445_v37 = vpop.permute.xlu1 %8444  ;;  %v6544_v8 = vpack.c.bf16 %v12796_v29, %v12792_v6  ;;  %v13786_v29 = vld [vmem:[#allocation38_spill] sm:$0xff] }
 0xcd4   : > { %v8447_v11 = vunpack.i.h.bf16 %v8445_v37  ;;  %v8446_v62 = vunpack.i.l.bf16 %v8445_v37 }
 0xcd6   : > { %v12802_v19 = vsel %vm1615_vm0, %v13756_v16, %v8446_v62  ;;  %v12806_v45 = vsel %vm1615_vm0, %v13757_v18, %v8447_v11 }
 0xcd7   : > { %v8455_v2 = vpop.permute.xlu1 %8454  ;;  %v6546_v41 = vpack.c.bf16 %v12806_v45, %v12802_v19  ;;  %v13787_v19 = vld [vmem:[#allocation45_spill] sm:$0xff] }
 0xcd8   : > { %v8457_v48 = vunpack.i.h.bf16 %v8455_v2  ;;  %v8456_v33 = vunpack.i.l.bf16 %v8455_v2  ;;  %v13764_v2 = vld [vmem:[#allocation97_spill] sm:$0xff] }
 0xcda   : > { %v12812_v50 = vsel %vm1615_vm0, %v13758_v30, %v8456_v33  ;;  %v12816_v35 = vsel %vm1615_vm0, %v13759_v3, %v8457_v48  ;;  %v13765_v33 = vld [vmem:[#allocation100_spill] sm:$0xff] }
 0xcdb   : > { %v8465_v63 = vpop.permute.xlu1 %8464  ;;  %v13785_v6 = vpack.c.bf16 %v12816_v35, %v12812_v50  ;;  %v6592_v50 = vld [vmem:[%s13189_s3] sm:$0x3] }
 0xcdc   : > { %v8467_v9 = vunpack.i.h.bf16 %v8465_v63  ;;  %v8466_v1 = vunpack.i.l.bf16 %v8465_v63 }
 0xcde   : > { %v12822_v14 = vsel %vm1615_vm0, %v13760_v5, %v8466_v1  ;;  %v12826_v46 = vsel %vm1615_vm0, %v13761_v31, %v8467_v9  ;;  %v13766_v5 = vld [vmem:[#allocation96_spill] sm:$0xff] }
 0xcdf   : > { %v8475_v10 = vpop.permute.xlu1 %8474 }
 0xce0   : > { %v8477_v17 = vunpack.i.h.bf16 %v8475_v10  ;;  %v8476_v26 = vunpack.i.l.bf16 %v8475_v10  ;;  %v13767_v10 = vld [vmem:[#allocation12_spill] sm:$0xff] }
 0xce2   : > { %v12832_v61 = vsel %vm1615_vm0, %v13762_v56, %v8476_v26  ;;  %v12836_v37 = vsel %vm1615_vm0, %v13763_v24, %v8477_v17 }
 0xce3   : > { %v8485_v11 = vpop.permute.xlu1 %8484 }
 0xce4   : > { %v8487_v16 = vunpack.i.h.bf16 %v8485_v11  ;;  %v8486_v18 = vunpack.i.l.bf16 %v8485_v11 }
 0xce6   : > { %v12842_v48 = vsel %vm1615_vm0, %v13764_v2, %v8486_v18  ;;  %v12846_v30 = vsel %vm1615_vm0, %v13765_v33, %v8487_v16  ;;  %v13768_v16 = vld [vmem:[#allocation70_spill] sm:$0xff]  ;;  %v13769_v2 = vld [vmem:[#allocation69_spill] sm:$0xff] }
 0xce7   : > { %v8495_v3 = vpop.permute.xlu1 %8494 }
 0xce8   : > { %v8497_v9 = vunpack.i.h.bf16 %v8495_v3  ;;  %v8496_v1 = vunpack.i.l.bf16 %v8495_v3 }
 0xcea   : > { %v12852_v31 = vsel %vm1615_vm0, %v13766_v5, %v8496_v1  ;;  %v12856_v17 = vsel %vm1615_vm0, %v13767_v10, %v8497_v9 }
 0xceb   : > { %v8505_v26 = vpop.permute.xlu1 %8504 }
 0xcec   : > { %v8507_v24 = vunpack.i.h.bf16 %v8505_v26  ;;  %v8506_v11 = vunpack.i.l.bf16 %v8505_v26 }
 0xcee   : > { %v12862_v18 = vsel %vm1615_vm0, %v13768_v16, %v8506_v11  ;;  %v12866_v33 = vsel %vm1615_vm0, %v13769_v2, %v8507_v24 }
 0xcfe   : > { %v8138_v1 = vpop.f32.mrb[8].mxu0 }
 0xcff   : > { %v5991_v9 = vpop.f32.mrb[9].mxu0 }
 0xd00   : > { %v8139_v5 = vpop.f32.mrb[10].mxu0 }
 0xd01   : > { %v8398_v10 = vpack.i.bf16 %v8139_v5, %v8138_v1  ;;  %v5994_v63 = vpop.f32.mrb[11].mxu0 }
 0xd02   : > { %v8388_v62 = vpack.i.bf16 %v5994_v63, %v5991_v9 }
 0xd04   : > { %8389 = vrot.lane.b32.xlu0 %v8388_v62, %s9379_s21 }
 0xd08   : > { %8399 = vrot.lane.b32.xlu0 %v8398_v10, %s9379_s21 }
 0xd30   : > { %v8350_v26 = vpop.permute.xlu0 %8349 }
 0xd31   : > { %v8352_v11 = vunpack.i.h.bf16 %v8350_v26  ;;  %v8351_v16 = vunpack.i.l.bf16 %v8350_v26 }
 0xd33   : > { %v6496_v24 = vsel %vm1615_vm0, %v12126_v0, %v8351_v16  ;;  %v6497_v2 = vsel %vm1615_vm0, %v12131_v20, %v8352_v11 }
 0xd34   : > { %v8360_v3 = vpop.permute.xlu0 %8359  ;;  %v6529_v56 = vpack.c.bf16 %v6497_v2, %v6496_v24 }
 0xd35   : > { %v8362_v59 = vunpack.i.h.bf16 %v8360_v3  ;;  %v8361_v49 = vunpack.i.l.bf16 %v8360_v3 }
 0xd36   : > { %6796 = vmatprep.mubr.bf16.mxu1 %v6529_v56 }
 0xd37   : > { %6797 = vmatmul.mubr.bf16.vlgmr.msra.gmra.mrb[168].mxu1 %v6528_v43  ;;  %v6498_v62 = vsel %vm1615_vm0, %v12124_v34, %v8361_v49  ;;  %v6499_v63 = vsel %vm1615_vm0, %v12129_v22, %v8362_v59  ;;  %v13770_v22 = vld [vmem:[#allocation88_spill] sm:$0xff] }
 0xd38   : > { %v8370_v1 = vpop.permute.xlu0 %8369  ;;  %v6531_v0 = vpack.c.bf16 %v6499_v63, %v6498_v62 }
 0xd39   : > { %v8372_v9 = vunpack.i.h.bf16 %v8370_v1  ;;  %v8371_v5 = vunpack.i.l.bf16 %v8370_v1 }
 0xd3a   : > { %6806 = vmatprep.mubr.bf16.mxu1 %v6531_v0 }
 0xd3b   : > { %v6500_v20 = vsel %vm1615_vm0, %v12135_v54, %v8371_v5  ;;  %v6501_v56 = vsel %vm1615_vm0, %v12139_v57, %v8372_v9  ;;  %v13772_v5 = vld [vmem:[#allocation41_spill] sm:$0xff] }
 0xd3c   : > { %v8380_v3 = vpop.permute.xlu0 %8379  ;;  %v6533_v23 = vpack.c.bf16 %v6501_v56, %v6500_v20 }
 0xd3d   : > { %v8382_v58 = vunpack.i.h.bf16 %v8380_v3  ;;  %v8381_v43 = vunpack.i.l.bf16 %v8380_v3 }
 0xd3f   : > { %6807 = vmatmul.mubr.bf16.gmra.mrb[172].mxu1 %v6530_v42  ;;  %v6502_v34 = vsel %vm1615_vm0, %v12133_v15, %v8381_v43  ;;  %v6503_v49 = vsel %vm1615_vm0, %v13770_v22, %v8382_v58  ;;  %v13773_v43 = vld [vmem:[#allocation33_spill] sm:$0xff] }
 0xd40   : > { %6816 = vmatprep.mubr.bf16.mxu1 %v6533_v23  ;;  %v6535_v59 = vpack.c.bf16 %v6503_v49, %v6502_v34  ;;  %v13774_v22 = vld [vmem:[#allocation49_spill] sm:$0xff] }
 0xd42   : > { %v8142_v54 = vpop.f32.mrb[12].mxu0  ;;  %v8154_v10 = vpop.f32.mrb[160].mxu1 }
 0xd43   : > { %v6007_v26 = vpop.f32.mrb[13].mxu0  ;;  %v6084_v57 = vpop.f32.mrb[161].mxu1 }
 0xd44   : > { %v8143_v11 = vpop.f32.mrb[14].mxu0  ;;  %v8155_v16 = vpop.f32.mrb[162].mxu1 }
 0xd45   : > { %v8418_v24 = vpack.i.bf16 %v8143_v11, %v8142_v54  ;;  %v8438_v2 = vpack.i.bf16 %v8155_v16, %v8154_v10  ;;  %v6010_v62 = vpop.f32.mrb[15].mxu0  ;;  %v6087_v63 = vpop.f32.mrb[163].mxu1 }
 0xd46   : > { %v8408_v53 = vpack.i.bf16 %v6010_v62, %v6007_v26  ;;  %v8428_v52 = vpack.i.bf16 %v6087_v63, %v6084_v57  ;;  %v13775_v63 = vld [vmem:[#allocation79_spill] sm:$0xff] }
 0xd47   : > { %6817 = vmatmul.mubr.bf16.gmra.mrb[176].mxu1 %v6532_v40 }
 0xd48   : > { %8409 = vrot.lane.b32.xlu0 %v8408_v53, %s9379_s21  ;;  %6826 = vmatprep.mubr.bf16.mxu1 %v6535_v59 }
 0xd4c   : > { %8419 = vrot.lane.b32.xlu0 %v8418_v24, %s9379_s21 }
 0xd4f   : > { %6827 = vmatmul.mubr.bf16.gmra.mrb[180].mxu1 %v6534_v28 }
 0xd50   : > { %8429 = vrot.lane.b32.xlu0 %v8428_v52, %s9379_s21  ;;  %v13776_v52 = vld [vmem:[#allocation82_spill] sm:$0xff] }
 0xd54   : > { %8439 = vrot.lane.b32.xlu0 %v8438_v2, %s9379_s21 }
 0xd76   : > { %v8390_v15 = vpop.permute.xlu0 %8389 }
 0xd77   : > { %v8392_v42 = vunpack.i.h.bf16 %v8390_v15  ;;  %v8391_v1 = vunpack.i.l.bf16 %v8390_v15  ;;  %v8158_v0 = vpop.f32.mrb[164].mxu1 }
 0xd78   : > { %v6100_v9 = vpop.f32.mrb[165].mxu1 }
 0xd79   : > { %v8159_v51 = vpop.f32.mrb[166].mxu1  ;;  %v6504_v40 = vsel %vm1615_vm0, %v13771_v60, %v8391_v1  ;;  %v6505_v20 = vsel %vm1615_vm0, %v13772_v5, %v8392_v42 }
 0xd7a   : > { %v8400_v56 = vpop.permute.xlu0 %8399  ;;  %v8458_v3 = vpack.i.bf16 %v8159_v51, %v8158_v0  ;;  %v6103_v39 = vpop.f32.mrb[167].mxu1  ;;  %v6537_v55 = vpack.c.bf16 %v6505_v20, %v6504_v40  ;;  %v13777_v51 = vld [vmem:[#allocation75_spill] sm:$0xff]  ;;  %v13778_v40 = vld [vmem:[#allocation80_spill] sm:$0xff] }
 0xd7b   : > { %v8402_v28 = vunpack.i.h.bf16 %v8400_v56  ;;  %v8401_v23 = vunpack.i.l.bf16 %v8400_v56  ;;  %v8448_v58 = vpack.i.bf16 %v6103_v39, %v6100_v9 }
 0xd7c   : > { %6836 = vmatprep.mubr.bf16.mxu1 %v6537_v55  ;;  %v13779_v55 = vld [vmem:[#allocation91_spill] sm:$0xff] }
 0xd7d   : > { %6837 = vmatmul.mubr.bf16.gmra.mrb[184].mxu1 %v6536_v38  ;;  %8449 = vrot.lane.b32.xlu0 %v8448_v58, %s9379_s21  ;;  %v6506_v34 = vsel %vm1615_vm0, %v13773_v43, %v8401_v23  ;;  %v6507_v49 = vsel %vm1615_vm0, %v13774_v22, %v8402_v28  ;;  %v13780_v23 = vld [vmem:[#allocation42_spill] sm:$0xff] }
 0xd7e   : > { %v6539_v59 = vpack.c.bf16 %v6507_v49, %v6506_v34  ;;  %v13781_v34 = vld [vmem:[#allocation89_spill] sm:$0xff]  ;;  %v13782_v49 = vld [vmem:[#allocation39_spill] sm:$0xff] }
 0xd80   : > { %6846 = vmatprep.mubr.bf16.mxu1 %v6539_v59 }
 0xd81   : > { %8459 = vrot.lane.b32.xlu0 %v8458_v3, %s9379_s21 }
 0xd85   : > { %6847 = vmatmul.mubr.bf16.gmra.mrb[188].mxu1 %v6538_v44 }
 0xd8b   : > { %v8170_v54 = vpop.f32.mrb[16].mxu0 }
 0xd8c   : > { %v6177_v10 = vpop.f32.mrb[17].mxu0 }
 0xd8d   : > { %v8171_v4 = vpop.f32.mrb[18].mxu0 }
 0xd8e   : > { %v8478_v13 = vpack.i.bf16 %v8171_v4, %v8170_v54  ;;  %v6180_v38 = vpop.f32.mrb[19].mxu0 }
 0xd8f   : > { %v8468_v26 = vpack.i.bf16 %v6180_v38, %v6177_v10 }
 0xd91   : > { %8469 = vrot.lane.b32.xlu0 %v8468_v26, %s9379_s21 }
 0xd93   : > { %v8174_v57 = vpop.f32.mrb[20].mxu0 }
 0xd94   : > { %v6193_v11 = vpop.f32.mrb[21].mxu0 }
 0xd95   : > { %8479 = vrot.lane.b32.xlu0 %v8478_v13, %s9379_s21  ;;  %v8175_v16 = vpop.f32.mrb[22].mxu0  ;;  %v13784_v13 = vld [vmem:[#allocation77_spill] sm:$0xff] }
 0xd96   : > { %v8498_v24 = vpack.i.bf16 %v8175_v16, %v8174_v57  ;;  %v6196_v2 = vpop.f32.mrb[23].mxu0 }
 0xd97   : > { %v8488_v62 = vpack.i.bf16 %v6196_v2, %v6193_v11  ;;  %v13789_v2 = vld [vmem:[#allocation57_spill] sm:$0xff] }
 0xd98   : > { %v6600_v35 = vsub.s32 1, %v13789_v2 }
 0xd99   : > { %8489 = vrot.lane.b32.xlu0 %v8488_v62, %s9379_s21  ;;  %v6596_v62 = vsub.s32 0, %v13789_v2 }
 0xd9d   : > { %8499 = vrot.lane.b32.xlu0 %v8498_v24, %s9379_s21  ;;  %v13788_v24 = vpack.c.bf16 %v12826_v46, %v12822_v14 }
 0xdba   : > { %v8410_v25 = vpop.permute.xlu0 %8409 }
 0xdbb   : > { %v8412_v21 = vunpack.i.h.bf16 %v8410_v25  ;;  %v8411_v44 = vunpack.i.l.bf16 %v8410_v25 }
 0xdbd   : > { %v6508_v53 = vsel %vm1615_vm0, %v13775_v63, %v8411_v44  ;;  %v6509_v15 = vsel %vm1615_vm0, %v13776_v52, %v8412_v21  ;;  %v13790_v63 = vld [vmem:[#allocation108_spill] sm:$0xff]  ;;  %v13791_v52 = vld [vmem:[#allocation93_spill] sm:$0xff] }
 0xdbe   : > { %v8420_v42 = vpop.permute.xlu0 %8419  ;;  %v6541_v1 = vpack.c.bf16 %v6509_v15, %v6508_v53 }
 0xdbf   : > { %v8422_v0 = vunpack.i.h.bf16 %v8420_v42  ;;  %v8421_v9 = vunpack.i.l.bf16 %v8420_v42  ;;  %v12975_v42 = vrot.slane %v6592_v50, %v6596_v62 }
 0xdc0   : > { %6856 = vmatprep.mubr.bf16.mxu1 %v6541_v1  ;;  %v12977_v1 = vrot.slane %v6592_v50, %v6600_v35 }
 0xdc1   : > { %6857 = vmatmul.mubr.bf16.gmra.mrb[192].mxu1 %v6540_v7  ;;  %v6510_v60 = vsel %vm1615_vm0, %v13777_v51, %v8421_v9  ;;  %v6511_v5 = vsel %vm1615_vm0, %v13778_v40, %v8422_v0  ;;  %v13793_v40 = vld [vmem:[#allocation84_spill] sm:$0xff] }
 0xdc2   : > { %v8430_v20 = vpop.permute.xlu0 %8429  ;;  %v6543_v56 = vpack.c.bf16 %v6511_v5, %v6510_v60  ;;  %v13792_v60 = vpack.c.bf16 %v12836_v37, %v12832_v61 }
 0xdc3   : > { %v8432_v3 = vunpack.i.h.bf16 %v8430_v20  ;;  %v8431_v39 = vunpack.i.l.bf16 %v8430_v20  ;;  %v13794_v20 = vld [vmem:[#allocation86_spill] sm:$0xff] }
 0xdc4   : > { %6866 = vmatprep.mubr.bf16.mxu1 %v6543_v56 }
 0xdc5   : > { %v6512_v28 = vsel %vm1615_vm0, %v13779_v55, %v8431_v39  ;;  %v6513_v58 = vsel %vm1615_vm0, %v13780_v23, %v8432_v3 }
 0xdc6   : > { %v8440_v43 = vpop.permute.xlu0 %8439  ;;  %v6545_v27 = vpack.c.bf16 %v6513_v58, %v6512_v28 }
 0xdc7   : > { %v8442_v32 = vunpack.i.h.bf16 %v8440_v43  ;;  %v8441_v7 = vunpack.i.l.bf16 %v8440_v43 }
 0xdc9   : > { %6867 = vmatmul.mubr.bf16.gmra.mrb[196].mxu1 %v6542_v36  ;;  %v6514_v22 = vsel %vm1615_vm0, %v13781_v34, %v8441_v7  ;;  %v6515_v59 = vsel %vm1615_vm0, %v13782_v49, %v8442_v32  ;;  %v13783_v36 = vld [vmem:[#allocation73_spill] sm:$0xff]  ;;  %v13795_v7 = vld [vmem:[#allocation95_spill] sm:$0xff] }
 0xdca   : > { %6876 = vmatprep.mubr.bf16.mxu1 %v6545_v27  ;;  %v6547_v54 = vpack.c.bf16 %v6515_v59, %v6514_v22  ;;  %v13796_v22 = vld [vmem:[#allocation101_spill] sm:$0xff] }
 0xdd1   : > { %6877 = vmatmul.mubr.bf16.gmra.mrb[200].mxu1 %v6544_v8 }
 0xdd2   : > { %6886 = vmatprep.mubr.bf16.mxu1 %v6547_v54 }
 0xdd9   : > { %6887 = vmatmul.mubr.bf16.gmra.mrb[204].mxu1 %v6546_v41 }
 0xdef   : > { %v8450_v10 = vpop.permute.xlu0 %8449 }
 0xdf0   : > { %v8452_v47 = vunpack.i.h.bf16 %v8450_v10  ;;  %v8451_v12 = vunpack.i.l.bf16 %v8450_v10 }
 0xdf2   : > { %v6516_v4 = vsel %vm1615_vm0, %v13783_v36, %v8451_v12  ;;  %v6517_v38 = vsel %vm1615_vm0, %v13784_v13, %v8452_v47  ;;  %v13797_v36 = vpack.c.bf16 %v12846_v30, %v12842_v48 }
 0xdf3   : > { %v8460_v26 = vpop.permute.xlu0 %8459  ;;  %v6549_v57 = vpack.c.bf16 %v6517_v38, %v6516_v4  ;;  %v13798_v4 = vld [vmem:[#allocation94_spill] sm:$0xff]  ;;  %v13799_v38 = vld [vmem:[#allocation109_spill] sm:$0xff] }
 0xdf4   : > { %v8462_v11 = vunpack.i.h.bf16 %v8460_v26  ;;  %v8461_v16 = vunpack.i.l.bf16 %v8460_v26 }
 0xdf5   : > { %6896 = vmatprep.mubr.bf16.mxu1 %v6549_v57 }
 0xdf6   : > { %6897 = vmatmul.mubr.bf16.gmra.mrb[208].mxu1 %v13785_v6  ;;  %v6518_v8 = vsel %vm1615_vm0, %v13786_v29, %v8461_v16  ;;  %v6519_v45 = vsel %vm1615_vm0, %v13787_v19, %v8462_v11 }
 0xdf7   : > { %v6551_v41 = vpack.c.bf16 %v6519_v45, %v6518_v8  ;;  %v13800_v45 = vpack.c.bf16 %v12856_v17, %v12852_v31  ;;  %v13801_v17 = vpack.c.bf16 %v12866_v33, %v12862_v18 }
 0xdf9   : > { %6906 = vmatprep.mubr.bf16.mxu1 %v6551_v41 }
 0xdfe   : > { %6907 = vmatmul.mubr.bf16.gmra.mrb[212].mxu1 %v13788_v24 }
 0xe03   : > { %v8470_v25 = vpop.permute.xlu0 %8469 }
 0xe04   : > { %v8472_v21 = vunpack.i.h.bf16 %v8470_v25  ;;  %v8471_v44 = vunpack.i.l.bf16 %v8470_v25 }
 0xe06   : > { %v6520_v53 = vsel %vm1615_vm0, %v13790_v63, %v8471_v44  ;;  %v6521_v15 = vsel %vm1615_vm0, %v13791_v52, %v8472_v21 }
 0xe07   : > { %v8480_v14 = vpop.permute.xlu0 %8479  ;;  %v6553_v46 = vpack.c.bf16 %v6521_v15, %v6520_v53 }
 0xe08   : > { %v8482_v0 = vunpack.i.h.bf16 %v8480_v14  ;;  %v8481_v9 = vunpack.i.l.bf16 %v8480_v14 }
 0xe09   : > { %6916 = vmatprep.mubr.bf16.mxu1 %v6553_v46 }
 0xe0a   : > { %v6798_v51 = vpop.f32.mrb[168].mxu1  ;;  %6917 = vmatmul.mubr.bf16.gmra.mrb[216].mxu1 %v13792_v60  ;;  %v6522_v5 = vsel %vm1615_vm0, %v13793_v40, %v8481_v9  ;;  %v6523_v56 = vsel %vm1615_vm0, %v13794_v20, %v8482_v0 }
 0xe0b   : > { %v6799_v3 = vadd.f32 %v6798_v51, %v12975_v42  ;;  %v8490_v39 = vpop.permute.xlu0 %8489  ;;  %v6800_v55 = vpop.f32.mrb[169].mxu1  ;;  %v6555_v28 = vpack.c.bf16 %v6523_v56, %v6522_v5 }
 0xe0c   : > { %v8492_v23 = vunpack.i.h.bf16 %v8490_v39  ;;  %v8491_v58 = vunpack.i.l.bf16 %v8490_v39  ;;  %v6801_v43 = vadd.f32 %v6800_v55, %v12977_v1  ;;  %v6802_v27 = vpop.f32.mrb[170].mxu1 }
 0xe0d   : > { %6957 = vst [vmem:[%s12990_s6] sm:$0xff] %v6799_v3  ;;  %v6803_v61 = vadd.f32 %v6802_v27, %v12975_v42  ;;  %v6804_v37 = vpop.f32.mrb[171].mxu1  ;;  %6926 = vmatprep.mubr.bf16.mxu1 %v6555_v28 }
 0xe0e   : > { %6958 = vst [vmem:[%s12990_s6 + $0x8] sm:$0xff] %v6801_v43  ;;  %v6805_v32 = vadd.f32 %v6804_v37, %v12977_v1  ;;  %v6524_v34 = vsel %vm1615_vm0, %v13795_v7, %v8491_v58  ;;  %v6525_v49 = vsel %vm1615_vm0, %v13796_v22, %v8492_v23 }
 0xe0f   : > { %6959 = vst [vmem:[%s12990_s6 + $0x10] sm:$0xff] %v6803_v61  ;;  %v8500_v59 = vpop.permute.xlu0 %8499  ;;  %v6557_v54 = vpack.c.bf16 %v6525_v49, %v6524_v34 }
 0xe10   : > { %6960 = vst [vmem:[%s12990_s6 + $0x18] sm:$0xff] %v6805_v32  ;;  %v8502_v10 = vunpack.i.h.bf16 %v8500_v59  ;;  %v8501_v47 = vunpack.i.l.bf16 %v8500_v59 }
 0xe12   : > { %v6808_v12 = vpop.f32.mrb[172].mxu1  ;;  %6927 = vmatmul.mubr.bf16.gmra.mrb[220].mxu1 %v13797_v36  ;;  %v6526_v13 = vsel %vm1615_vm0, %v13798_v4, %v8501_v47  ;;  %v6527_v26 = vsel %vm1615_vm0, %v13799_v38, %v8502_v10 }
 0xe13   : > { %v6809_v57 = vadd.f32 %v6808_v12, %v12975_v42  ;;  %v6810_v11 = vpop.f32.mrb[173].mxu1  ;;  %6936 = vmatprep.mubr.bf16.mxu1 %v6557_v54  ;;  %v6559_v16 = vpack.c.bf16 %v6527_v26, %v6526_v13 }
 0xe14   : > { %v6811_v6 = vadd.f32 %v6810_v11, %v12977_v1  ;;  %v6812_v29 = vpop.f32.mrb[174].mxu1 }
 0xe15   : > { %6961 = vst [vmem:[%s12990_s6 + $0x20] sm:$0xff] %v6809_v57  ;;  %v6813_v48 = vadd.f32 %v6812_v29, %v12975_v42  ;;  %v6814_v30 = vpop.f32.mrb[175].mxu1 }
 0xe16   : > { %6962 = vst [vmem:[%s12990_s6 + $0x28] sm:$0xff] %v6811_v6  ;;  %v6815_v8 = vadd.f32 %v6814_v30, %v12977_v1 }
 0xe17   : > { %6963 = vst [vmem:[%s12990_s6 + $0x30] sm:$0xff] %v6813_v48 }
 0xe18   : > { %6964 = vst [vmem:[%s12990_s6 + $0x38] sm:$0xff] %v6815_v8 }
 0xe1a   : > { %v6818_v19 = vpop.f32.mrb[176].mxu1  ;;  %6937 = vmatmul.mubr.bf16.gmra.mrb[224].mxu1 %v13800_v45 }
 0xe1b   : > { %v6819_v41 = vadd.f32 %v6818_v19, %v12975_v42  ;;  %v6820_v24 = vpop.f32.mrb[177].mxu1  ;;  %6946 = vmatprep.mubr.bf16.mxu1 %v6559_v16 }
 0xe1c   : > { %v6821_v2 = vadd.f32 %v6820_v24, %v12977_v1  ;;  %v6822_v62 = vpop.f32.mrb[178].mxu1 }
 0xe1d   : > { %6965 = vst [vmem:[%s12990_s6 + $0x40] sm:$0xff] %v6819_v41  ;;  %v6823_v25 = vadd.f32 %v6822_v62, %v12975_v42  ;;  %v6824_v50 = vpop.f32.mrb[179].mxu1 }
 0xe1e   : > { %6966 = vst [vmem:[%s12990_s6 + $0x48] sm:$0xff] %v6821_v2  ;;  %v6825_v35 = vadd.f32 %v6824_v50, %v12977_v1 }
 0xe1f   : > { %6967 = vst [vmem:[%s12990_s6 + $0x50] sm:$0xff] %v6823_v25 }
 0xe20   : > { %6968 = vst [vmem:[%s12990_s6 + $0x58] sm:$0xff] %v6825_v35 }
 0xe22   : > { %v6828_v31 = vpop.f32.mrb[180].mxu1  ;;  %6947 = vmatmul.mubr.bf16.gmra.mrb[228].mxu1 %v13801_v17 }
 0xe23   : > { %v6829_v21 = vadd.f32 %v6828_v31, %v12975_v42  ;;  %v6830_v44 = vpop.f32.mrb[181].mxu1 }
 0xe24   : > { %v6831_v63 = vadd.f32 %v6830_v44, %v12977_v1  ;;  %v6832_v53 = vpop.f32.mrb[182].mxu1 }
 0xe25   : > { %6969 = vst [vmem:[%s12990_s6 + $0x60] sm:$0xff] %v6829_v21  ;;  %v6833_v52 = vadd.f32 %v6832_v53, %v12975_v42  ;;  %v6834_v15 = vpop.f32.mrb[183].mxu1 }
 0xe26   : > { %6970 = vst [vmem:[%s12990_s6 + $0x68] sm:$0xff] %v6831_v63  ;;  %v6835_v14 = vadd.f32 %v6834_v15, %v12977_v1 }
 0xe27   : > { %6971 = vst [vmem:[%s12990_s6 + $0x70] sm:$0xff] %v6833_v52 }
 0xe28   : > { %6972 = vst [vmem:[%s12990_s6 + $0x78] sm:$0xff] %v6835_v14 }
 0xe50   : > { %v6838_v18 = vpop.f32.mrb[184].mxu1 }
 0xe51   : > { %v6839_v33 = vadd.f32 %v6838_v18, %v12975_v42  ;;  %v6840_v46 = vpop.f32.mrb[185].mxu1 }
 0xe52   : > { %v6841_v0 = vadd.f32 %v6840_v46, %v12977_v1  ;;  %v6842_v9 = vpop.f32.mrb[186].mxu1 }
 0xe53   : > { %6973 = vst [vmem:[%s12990_s6 + $0x80] sm:$0xff] %v6839_v33  ;;  %v6843_v51 = vadd.f32 %v6842_v9, %v12975_v42  ;;  %v6844_v60 = vpop.f32.mrb[187].mxu1 }
 0xe54   : > { %6974 = vst [vmem:[%s12990_s6 + $0x88] sm:$0xff] %v6841_v0  ;;  %v6845_v40 = vadd.f32 %v6844_v60, %v12977_v1 }
 0xe55   : > { %6975 = vst [vmem:[%s12990_s6 + $0x90] sm:$0xff] %v6843_v51 }
 0xe56   : > { %6976 = vst [vmem:[%s12990_s6 + $0x98] sm:$0xff] %v6845_v40 }
 0xe58   : > { %v6848_v5 = vpop.f32.mrb[188].mxu1 }
 0xe59   : > { %v6849_v20 = vadd.f32 %v6848_v5, %v12975_v42  ;;  %v6850_v56 = vpop.f32.mrb[189].mxu1 }
 0xe5a   : > { %v6851_v3 = vadd.f32 %v6850_v56, %v12977_v1  ;;  %v6852_v39 = vpop.f32.mrb[190].mxu1 }
 0xe5b   : > { %6977 = vst [vmem:[%s12990_s6 + $0xa0] sm:$0xff] %v6849_v20  ;;  %v6853_v55 = vadd.f32 %v6852_v39, %v12975_v42  ;;  %v6854_v28 = vpop.f32.mrb[191].mxu1 }
 0xe5c   : > { %6978 = vst [vmem:[%s12990_s6 + $0xa8] sm:$0xff] %v6851_v3  ;;  %v6855_v23 = vadd.f32 %v6854_v28, %v12977_v1 }
 0xe5d   : > { %6979 = vst [vmem:[%s12990_s6 + $0xb0] sm:$0xff] %v6853_v55 }
 0xe5e   : > { %6980 = vst [vmem:[%s12990_s6 + $0xb8] sm:$0xff] %v6855_v23 }
 0xe94   : > { %v6858_v58 = vpop.f32.mrb[192].mxu1 }
 0xe95   : > { %v6859_v43 = vadd.f32 %v6858_v58, %v12975_v42  ;;  %v6860_v27 = vpop.f32.mrb[193].mxu1 }
 0xe96   : > { %v6861_v61 = vadd.f32 %v6860_v27, %v12977_v1  ;;  %v6862_v37 = vpop.f32.mrb[194].mxu1 }
 0xe97   : > { %6981 = vst [vmem:[%s12990_s6 + $0xc0] sm:$0xff] %v6859_v43  ;;  %v6863_v32 = vadd.f32 %v6862_v37, %v12975_v42  ;;  %v6864_v7 = vpop.f32.mrb[195].mxu1 }
 0xe98   : > { %6982 = vst [vmem:[%s12990_s6 + $0xc8] sm:$0xff] %v6861_v61  ;;  %v6865_v34 = vadd.f32 %v6864_v7, %v12977_v1 }
 0xe99   : > { %6983 = vst [vmem:[%s12990_s6 + $0xd0] sm:$0xff] %v6863_v32 }
 0xe9a   : > { %6984 = vst [vmem:[%s12990_s6 + $0xd8] sm:$0xff] %v6865_v34 }
 0xe9c   : > { %v6868_v22 = vpop.f32.mrb[196].mxu1 }
 0xe9d   : > { %v6869_v49 = vadd.f32 %v6868_v22, %v12975_v42  ;;  %v6870_v59 = vpop.f32.mrb[197].mxu1 }
 0xe9e   : > { %v6871_v54 = vadd.f32 %v6870_v59, %v12977_v1  ;;  %v6872_v10 = vpop.f32.mrb[198].mxu1 }
 0xe9f   : > { %6985 = vst [vmem:[%s12990_s6 + $0xe0] sm:$0xff] %v6869_v49  ;;  %v6873_v47 = vadd.f32 %v6872_v10, %v12975_v42  ;;  %v6874_v12 = vpop.f32.mrb[199].mxu1 }
 0xea0   : > { %6986 = vst [vmem:[%s12990_s6 + $0xe8] sm:$0xff] %v6871_v54  ;;  %v6875_v36 = vadd.f32 %v6874_v12, %v12977_v1 }
 0xea1   : > { %6987 = vst [vmem:[%s12990_s6 + $0xf0] sm:$0xff] %v6873_v47 }
 0xea2   : > { %6988 = vst [vmem:[%s12990_s6 + $0xf8] sm:$0xff] %v6875_v36 }
 0xea4   : > { %v6878_v4 = vpop.f32.mrb[200].mxu1 }
 0xea5   : > { %v6879_v13 = vadd.f32 %v6878_v4, %v12975_v42  ;;  %v6880_v38 = vpop.f32.mrb[201].mxu1 }
 0xea6   : > { %v6881_v26 = vadd.f32 %v6880_v38, %v12977_v1  ;;  %v6882_v57 = vpop.f32.mrb[202].mxu1 }
 0xea7   : > { %6989 = vst [vmem:[%s12990_s6 + $0x100] sm:$0xff] %v6879_v13  ;;  %v6883_v11 = vadd.f32 %v6882_v57, %v12975_v42  ;;  %v6884_v16 = vpop.f32.mrb[203].mxu1 }
 0xea8   : > { %6990 = vst [vmem:[%s12990_s6 + $0x108] sm:$0xff] %v6881_v26  ;;  %v6885_v6 = vadd.f32 %v6884_v16, %v12977_v1 }
 0xea9   : > { %6991 = vst [vmem:[%s12990_s6 + $0x110] sm:$0xff] %v6883_v11 }
 0xeaa   : > { %6992 = vst [vmem:[%s12990_s6 + $0x118] sm:$0xff] %v6885_v6 }
 0xeac   : > { %v6888_v29 = vpop.f32.mrb[204].mxu1 }
 0xead   : > { %v6889_v48 = vadd.f32 %v6888_v29, %v12975_v42  ;;  %v6890_v30 = vpop.f32.mrb[205].mxu1 }
 0xeae   : > { %v6891_v8 = vadd.f32 %v6890_v30, %v12977_v1  ;;  %v6892_v19 = vpop.f32.mrb[206].mxu1 }
 0xeaf   : > { %6993 = vst [vmem:[%s12990_s6 + $0x120] sm:$0xff] %v6889_v48  ;;  %v6893_v45 = vadd.f32 %v6892_v19, %v12975_v42  ;;  %v6894_v41 = vpop.f32.mrb[207].mxu1 }
 0xeb0   : > { %6994 = vst [vmem:[%s12990_s6 + $0x128] sm:$0xff] %v6891_v8  ;;  %v6895_v24 = vadd.f32 %v6894_v41, %v12977_v1 }
 0xeb1   : > { %6995 = vst [vmem:[%s12990_s6 + $0x130] sm:$0xff] %v6893_v45 }
 0xeb2   : > { %6996 = vst [vmem:[%s12990_s6 + $0x138] sm:$0xff] %v6895_v24 }
 0xec9   : > { %v6898_v2 = vpop.f32.mrb[208].mxu1 }
 0xeca   : > { %v6899_v62 = vadd.f32 %v6898_v2, %v12975_v42  ;;  %v6900_v25 = vpop.f32.mrb[209].mxu1 }
 0xecb   : > { %v6901_v50 = vadd.f32 %v6900_v25, %v12977_v1  ;;  %v6902_v35 = vpop.f32.mrb[210].mxu1 }
 0xecc   : > { %6997 = vst [vmem:[%s12990_s6 + $0x140] sm:$0xff] %v6899_v62  ;;  %v6903_v31 = vadd.f32 %v6902_v35, %v12975_v42  ;;  %v6904_v17 = vpop.f32.mrb[211].mxu1 }
 0xecd   : > { %6998 = vst [vmem:[%s12990_s6 + $0x148] sm:$0xff] %v6901_v50  ;;  %v6905_v21 = vadd.f32 %v6904_v17, %v12977_v1 }
 0xece   : > { %6999 = vst [vmem:[%s12990_s6 + $0x150] sm:$0xff] %v6903_v31 }
 0xecf   : > { %7000 = vst [vmem:[%s12990_s6 + $0x158] sm:$0xff] %v6905_v21 }
 0xed1   : > { %v6908_v44 = vpop.f32.mrb[212].mxu1 }
 0xed2   : > { %v6909_v63 = vadd.f32 %v6908_v44, %v12975_v42  ;;  %v6910_v53 = vpop.f32.mrb[213].mxu1 }
 0xed3   : > { %v6911_v52 = vadd.f32 %v6910_v53, %v12977_v1  ;;  %v6912_v15 = vpop.f32.mrb[214].mxu1 }
 0xed4   : > { %7001 = vst [vmem:[%s12990_s6 + $0x160] sm:$0xff] %v6909_v63  ;;  %v6913_v14 = vadd.f32 %v6912_v15, %v12975_v42  ;;  %v6914_v18 = vpop.f32.mrb[215].mxu1 }
 0xed5   : > { %7002 = vst [vmem:[%s12990_s6 + $0x168] sm:$0xff] %v6911_v52  ;;  %v6915_v33 = vadd.f32 %v6914_v18, %v12977_v1 }
 0xed6   : > { %7003 = vst [vmem:[%s12990_s6 + $0x170] sm:$0xff] %v6913_v14 }
 0xed7   : > { %7004 = vst [vmem:[%s12990_s6 + $0x178] sm:$0xff] %v6915_v33 }
 0xedd   : > { %v6918_v46 = vpop.f32.mrb[216].mxu1 }
 0xede   : > { %v6919_v0 = vadd.f32 %v6918_v46, %v12975_v42  ;;  %v6920_v9 = vpop.f32.mrb[217].mxu1 }
 0xedf   : > { %v6921_v51 = vadd.f32 %v6920_v9, %v12977_v1  ;;  %v6922_v60 = vpop.f32.mrb[218].mxu1 }
 0xee0   : > { %7005 = vst [vmem:[%s12990_s6 + $0x180] sm:$0xff] %v6919_v0  ;;  %v6923_v40 = vadd.f32 %v6922_v60, %v12975_v42  ;;  %v6924_v5 = vpop.f32.mrb[219].mxu1 }
 0xee1   : > { %7006 = vst [vmem:[%s12990_s6 + $0x188] sm:$0xff] %v6921_v51  ;;  %v6925_v20 = vadd.f32 %v6924_v5, %v12977_v1 }
 0xee2   : > { %7007 = vst [vmem:[%s12990_s6 + $0x190] sm:$0xff] %v6923_v40 }
 0xee3   : > { %7008 = vst [vmem:[%s12990_s6 + $0x198] sm:$0xff] %v6925_v20 }
 0xee5   : > { %v6928_v56 = vpop.f32.mrb[220].mxu1 }
 0xee6   : > { %v6929_v3 = vadd.f32 %v6928_v56, %v12975_v42  ;;  %v6930_v39 = vpop.f32.mrb[221].mxu1 }
 0xee7   : > { %v6931_v55 = vadd.f32 %v6930_v39, %v12977_v1  ;;  %v6932_v28 = vpop.f32.mrb[222].mxu1 }
 0xee8   : > { %7009 = vst [vmem:[%s12990_s6 + $0x1a0] sm:$0xff] %v6929_v3  ;;  %v6933_v23 = vadd.f32 %v6932_v28, %v12975_v42  ;;  %v6934_v58 = vpop.f32.mrb[223].mxu1 }
 0xee9   : > { %7010 = vst [vmem:[%s12990_s6 + $0x1a8] sm:$0xff] %v6931_v55  ;;  %v6935_v43 = vadd.f32 %v6934_v58, %v12977_v1 }
 0xeea   : > { %7011 = vst [vmem:[%s12990_s6 + $0x1b0] sm:$0xff] %v6933_v23 }
 0xeeb   : > { %7012 = vst [vmem:[%s12990_s6 + $0x1b8] sm:$0xff] %v6935_v43 }
 0xeed   : > { %v6938_v27 = vpop.f32.mrb[224].mxu1 }
 0xeee   : > { %v6939_v61 = vadd.f32 %v6938_v27, %v12975_v42  ;;  %v6940_v37 = vpop.f32.mrb[225].mxu1 }
 0xeef   : > { %v6941_v32 = vadd.f32 %v6940_v37, %v12977_v1  ;;  %v6942_v7 = vpop.f32.mrb[226].mxu1 }
 0xef0   : > { %7013 = vst [vmem:[%s12990_s6 + $0x1c0] sm:$0xff] %v6939_v61  ;;  %v6943_v34 = vadd.f32 %v6942_v7, %v12975_v42  ;;  %v6944_v22 = vpop.f32.mrb[227].mxu1 }
 0xef1   : > { %7014 = vst [vmem:[%s12990_s6 + $0x1c8] sm:$0xff] %v6941_v32  ;;  %v6945_v49 = vadd.f32 %v6944_v22, %v12977_v1 }
 0xef2   : > { %7015 = vst [vmem:[%s12990_s6 + $0x1d0] sm:$0xff] %v6943_v34 }
 0xef3   : > { %7016 = vst [vmem:[%s12990_s6 + $0x1d8] sm:$0xff] %v6945_v49 }
 0xef5   : > { %v6948_v59 = vpop.f32.mrb[228].mxu1 }
 0xef6   : > { %v6949_v54 = vadd.f32 %v6948_v59, %v12975_v42  ;;  %v6950_v10 = vpop.f32.mrb[229].mxu1 }
 0xef7   : > { %v6951_v47 = vadd.f32 %v6950_v10, %v12977_v1  ;;  %v6952_v12 = vpop.f32.mrb[230].mxu1 }
 0xef8   : > { %7017 = vst [vmem:[%s12990_s6 + $0x1e0] sm:$0xff] %v6949_v54  ;;  %v6953_v36 = vadd.f32 %v6952_v12, %v12975_v42  ;;  %v6954_v4 = vpop.f32.mrb[231].mxu1 }
 0xef9   : > { %7018 = vst [vmem:[%s12990_s6 + $0x1e8] sm:$0xff] %v6951_v47  ;;  %v6955_v13 = vadd.f32 %v6954_v4, %v12977_v1 }
 0xefa   : > { %7019 = vst [vmem:[%s12990_s6 + $0x1f0] sm:$0xff] %v6953_v36 }
 0xefb   : > { %7020 = vst [vmem:[%s12990_s6 + $0x1f8] sm:$0xff] %v6955_v13 }
 0xefc   : > { %9311 = shalt.err (!%p9308_p2)
}
 0xefd   : > { %s9312_s10 = scalar_lea.hbm %s13136_s28, 8192  ;;  %s9316_s21 = scalar_lea.hbm %s13190_s4, 16384 }
 0xefe   : > { %p9313_p13 = scmp.ne.s32.totalorder %s13136_s28, %s9312_s10  ;;  %p9317_p4 = scmp.lt.u32.totalorder %s13136_s28, %s13190_s4 }
 0xeff   : > { %p9318_p7 = scmp.lt.u32.totalorder %s9316_s21, %s9312_s10  ;;  %p9320_p11 = scmp.lt.u32.totalorder %s9312_s10, %s13136_s28 }
 0xf00   : > { %p9314_p6 = pnand %p9313_p13, %p13802_p0 }
 0xf01   : > { %p9319_p8 = por %p9318_p7, %p9317_p4 }
 0xf02   : > { %p9315_p10 = pneg %p9314_p6 }
 0xf03   : > { %p9321_p1 = por %p9320_p11, %p9319_p8 }
 0xf05   : > { %p9322_p3 = pnand %p9321_p1, %p9315_p10 }
 0xf07   : > { %9325 = shalt.err (!%p9322_p3)
}
 0xf08   : > { %s9381_s6 = smov 256   ;;  %s9382_s25 = smov 16  }
 0xf09   : > { %8282 = dma.vmem_to_hbm [thread:$0]  (%p13802_p0), %s13138_s7, 8192, %s13136_s28, %s7022_s19, %s9381_s6, %s9381_s6, %s9382_s25  }
 0xf0a PF: > { %s7051_s24 = sand.u32 1, %s9356_s15   ;;  %p13803_p5 = scmp.ne.s32.totalorder %s13350_s22, 0 }
 0xf0b   : > { %p13804_p9 = scmp.ge.s32.totalorder %s9368_s18, 2  ;;  %s7052_s26 = scalar_lea.sflag [#allocation4], %s7051_s24 }
 0xf0d   : > { %p8296_p12 = pnand %p13804_p9, %p13803_p5 }
 0xf0f   : > { %9351 = dma.done.wait (!%p8296_p12), %s7052_s26, 8192  }
 0xf10   : > { %9353 = vsyncadd (!%p8296_p12), %s7052_s26, 4294959104  ;;  %p18_p2 = scmp.ge.s32.totalorder %s9518_s11, 4   ;;  %s13805_s15 = smov %s9360_s16 }
 0xf11   : > { %s13806_s16 = smov %s9364_s17  ;;  %s13807_s17 = smov %s9527_s14 }
 0xf12   : > { %s13808_s18 = smov %s9518_s11  ;;  %20 = sbr.rel (!%p18_p2) target bundleno = 6 (0x6), region = 89 }
 0xf19   :  { %7057 = vsyncpa [#allocation3], 1 }
 0xf1a   :  { %7059 = vsyncpa [#allocation3 + $0x1], 1 }
 0xf1b   :  { %7060 = vsyncpa [#allocation6], 1 }
 0xf1c   :  { %7061 = vsyncpa [#allocation4], 1 }
 0xf1d   :  { %7063 = vsyncpa [#allocation4 + $0x1], 1 }

</bundles_post_ra>
